<compile_context>
chip_gen: v7x
topology: tpu7x:2x2x1
jax: 0.10.0
libtpu: 0.0.40
codegen_flags: <defaults>
</compile_context>

<pallas_src>
import functools
import math

import numpy as np
import jax
import jax.numpy as jnp
from jax.experimental import pallas as pl
from jax.experimental.pallas import tpu as pltpu


# ----------------------------- static architecture description -----------------------------

def build_arch(*, embedding_dim, dim_mults, channels, groups, B, L):
    init_dim = 2 * embedding_dim // 3
    init_dim -= init_dim % groups
    dims = [init_dim] + [embedding_dim * m for m in dim_mults]
    in_out = list(zip(dims[:-1], dims[1:]))
    num_res = len(in_out)
    time_dim = embedding_dim
    init_k = 7
    assert L % (2 ** (num_res - 1)) == 0

    blocks = []          # (name, cin, cout, length, has_time)
    downs, ups = [], []  # (name, channels, length)
    l = L
    for i, (din, dout) in enumerate(in_out):
        blocks.append((f"d{i}_rb1", din, dout, l, True))
        blocks.append((f"d{i}_rb2", dout, dout, l, True))
        if i < num_res - 1:
            downs.append((f"down{i}", dout, l))
            l //= 2
    mid = dims[-1]
    blocks.append(("mid1", mid, mid, l, True))
    blocks.append(("mid2", mid, mid, l, True))
    for i, (din, dout) in enumerate(list(reversed(in_out[1:]))):
        blocks.append((f"u{i}_rb1", dout * 2, din, l, True))
        blocks.append((f"u{i}_rb2", din, din, l, True))
        ups.append((f"up{i}", din, l))
        l *= 2
    # TODO(synk): the PyTorch module declares the final ResnetBlock(dims[0], dims[0]) but the
    # tensor reaching it has dims[1] channels for every valid config (init_dim < embedding_dim);
    # we use the actual incoming channel count so the forward is well-defined.
    final_in = dims[1] if len(dims) > 1 else dims[0]
    blocks.append(("final_rb", final_in, dims[0], L, False))

    levels = sorted({b[3] for b in blocks} | {d[2] for d in downs} | {u[2] for u in ups})
    shifts = {lv: {-1, 1} for lv in levels}
    shifts[L] |= {s for s in range(-(init_k // 2), init_k // 2 + 1) if s != 0}
    gn_channels = sorted({b[2] for b in blocks})
    time_blocks = [(name, cout) for (name, _, cout, _, ht) in blocks if ht]

    return dict(embedding_dim=embedding_dim, channels=channels, groups=groups,
                B=B, L=L, init_k=init_k, init_dim=init_dim, dims=dims,
                num_res=num_res, time_dim=time_dim,
                blocks=blocks, downs=downs, ups=ups,
                levels=levels, shifts={k: sorted(v) for k, v in shifts.items()},
                gn_channels=gn_channels, time_blocks=time_blocks)


# ----------------------------- deterministic parameter init -----------------------------

def init_unet_params(key, arch):
    f32 = jnp.float32

    def nrm(k, shape):
        return 0.05 * jax.random.normal(k, shape, f32)

    keys = iter(jax.random.split(key, 256))
    p = {}
    ch, idim, K = arch["channels"], arch["init_dim"], arch["init_k"]
    p["init_w"] = nrm(next(keys), (K, ch, idim))        # [k, cin, cout] == torch w[cout, cin, k]
    p["init_b"] = nrm(next(keys), (idim,))

    tdim = arch["time_dim"]
    p["t_w1"] = nrm(next(keys), (arch["embedding_dim"], tdim))
    p["t_b1"] = jnp.zeros((tdim,), f32)
    p["t_w2"] = nrm(next(keys), (tdim, tdim))
    p["t_b2"] = jnp.zeros((tdim,), f32)

    for name, cin, cout, _, has_time in arch["blocks"]:
        p[f"{name}_w1"] = nrm(next(keys), (3, cin, cout))
        p[f"{name}_b1"] = nrm(next(keys), (cout,))
        p[f"{name}_g1"] = jnp.ones((cout,), f32)
        p[f"{name}_be1"] = jnp.zeros((cout,), f32)
        p[f"{name}_w2"] = nrm(next(keys), (3, cout, cout))
        p[f"{name}_b2"] = nrm(next(keys), (cout,))
        p[f"{name}_g2"] = jnp.ones((cout,), f32)
        p[f"{name}_be2"] = jnp.zeros((cout,), f32)
        if has_time:
            p[f"{name}_mlp_w"] = nrm(next(keys), (tdim, cout))
            p[f"{name}_mlp_b"] = jnp.zeros((cout,), f32)
        if cin != cout:
            p[f"{name}_rw"] = nrm(next(keys), (1, cin, cout))
            p[f"{name}_rb"] = nrm(next(keys), (cout,))

    for name, c, _ in arch["downs"]:
        p[f"{name}_w"] = nrm(next(keys), (3, c, c))
        p[f"{name}_b"] = nrm(next(keys), (c,))
    for name, c, _ in arch["ups"]:
        # ConvTranspose1d weight, stored as [k, cin, cout] == torch w[cin, cout, k]
        p[f"{name}_w"] = nrm(next(keys), (3, c, c))
        p[f"{name}_b"] = nrm(next(keys), (c,))

    p["final_w"] = nrm(next(keys), (arch["channels"], arch["dims"][0]))   # [cout, cin]
    p["final_b"] = nrm(next(keys), (arch["channels"],))
    return p


# ----------------------------- one-time weight / constant packing -----------------------------

def _round8(n):
    return -(-n // 8) * 8


def pack_unet(params, arch):
    """Pack all kernel-side weights + constant matrices into ONE f32 slab (done once)."""
    B, groups = arch["B"], arch["groups"]
    items, seen = [], set()

    def add(name, a):
        assert name not in seen, name
        seen.add(name)
        a = jnp.asarray(a, jnp.float32)
        if a.ndim == 1:
            a = a.reshape(1, -1)
        assert a.ndim == 2
        items.append((name, a))

    def conv_w2d(w):  # (K, Cin, Cout) -> (K*Cin, Cout), im2col row order = k*Cin + ci
        K, ci, co = w.shape
        return jnp.asarray(w, jnp.float32).reshape(K * ci, co)

    # ---- weights ----
    add("init_w", conv_w2d(params["init_w"]))
    add("init_b", params["init_b"])
    for name, cin, cout, _, _ in arch["blocks"]:
        add(f"{name}_w1", conv_w2d(params[f"{name}_w1"]))
        add(f"{name}_b1", params[f"{name}_b1"])
        add(f"{name}_g1", params[f"{name}_g1"])
        add(f"{name}_be1", params[f"{name}_be1"])
        add(f"{name}_w2", conv_w2d(params[f"{name}_w2"]))
        add(f"{name}_b2", params[f"{name}_b2"])
        add(f"{name}_g2", params[f"{name}_g2"])
        add(f"{name}_be2", params[f"{name}_be2"])
        if cin != cout:
            add(f"{name}_rw", conv_w2d(params[f"{name}_rw"]))
            add(f"{name}_rb", params[f"{name}_rb"])
    for name, c, _ in arch["downs"]:
        add(f"{name}_w", conv_w2d(params[f"{name}_w"]))
        add(f"{name}_b", params[f"{name}_b"])
    for name, c, _ in arch["ups"]:
        # ConvTranspose1d two-phase fused weight: [x | x_next] @ [[W1, W2], [0, W0]] = [even | odd]
        w = jnp.asarray(params[f"{name}_w"], jnp.float32)       # (3, c, c) = torch W[ci, co, k]
        wf = jnp.zeros((2 * c, 2 * c), jnp.float32)
        wf = wf.at[:c, :c].set(w[1])        # even phase:   x      @ W[..., 1]
        wf = wf.at[:c, c:].set(w[2])        # odd  phase:   x      @ W[..., 2]
        wf = wf.at[c:, c:].set(w[0])        # odd  phase:   x_next @ W[..., 0]
        add(f"{name}_w", wf)
        add(f"{name}_b", params[f"{name}_b"])
    add("final_w", params["final_w"])                            # (channels, dims[0])
    add("final_bT", jnp.asarray(params["final_b"]).reshape(-1, 1))

    # ---- constant selection / reduction matrices (XLA folds them into the slab once) ----
    for lv in arch["levels"]:
        bl = B * lv
        rows = np.arange(bl)
        batch = rows // lv
        bsum = (batch[None, :] == np.arange(B)[:, None]).astype(np.float32)   # (B, bl)
        add(f"bsum_{lv}", bsum)
        add(f"bmask_{lv}", bsum.T)                                             # (bl, B)
        for s in arch["shifts"][lv]:
            loc = rows % lv
            m = ((loc + s >= 0) & (loc + s < lv)).astype(np.float32)
            add(f"padmask_{lv}_{s}", m.reshape(bl, 1))
    for c in arch["gn_channels"]:
        g = c // groups
        same = (np.arange(c)[:, None] // g == np.arange(c)[None, :] // g).astype(np.float32)
        g2 = np.zeros((2 * c, 2 * c), np.float32)
        g2[:c, :c] = same
        g2[c:, c:] = same
        add(f"gmat2_{c}", g2)
    for _, _, lv in arch["downs"]:
        bl, half = B * lv, lv // 2
        take = np.zeros((B * half, bl), np.float32)
        r = np.arange(B * half)
        take[r, (r // half) * lv + 2 * (r % half)] = 1.0
        add(f"take_{lv}", take)
    for _, _, lv in arch["ups"]:
        bl = B * lv
        s = np.zeros((2 * bl, 2 * bl), np.float32)   # (B*2l, [even rows ; odd rows])
        for b in range(B):
            for m in range(lv):
                s[b * 2 * lv + 2 * m + 0, 0 * bl + b * lv + m] = 1.0
                s[b * 2 * lv + 2 * m + 1, 1 * bl + b * lv + m] = 1.0
        add(f"interleave_{lv}", s)

    # ---- concatenate into one (rows, lane) slab with 8-row-aligned static offsets ----
    max_c = max(a.shape[1] for _, a in items)
    lane = max(128, ((max_c + 127) // 128) * 128)
    layout, chunks, off = {}, [], 0
    for name, a in items:
        r, c = a.shape
        rp = _round8(r)
        layout[name] = (off, r, c)
        chunks.append(jnp.pad(a, ((0, rp - r), (0, lane - c))))
        off += rp
    slab = jnp.concatenate(chunks, axis=0)
    return slab, layout


def extract_time_params(params, arch):
    return {
        "t_w1": params["t_w1"], "t_b1": params["t_b1"],
        "t_w2": params["t_w2"], "t_b2": params["t_b2"],
        "mlp_ws": [params[f"{name}_mlp_w"] for name, _ in arch["time_blocks"]],
        "mlp_bs": [params[f"{name}_mlp_b"] for name, _ in arch["time_blocks"]],
    }


# ----------------------------- the fused whole-network kernel -----------------------------

def make_unet_kernel(arch, layout):
    f32 = jnp.float32
    B, groups = arch["B"], arch["groups"]
    eps = 1e-5
    trow = {name: 8 * i for i, (name, _) in enumerate(arch["time_blocks"])}
    tcol = {name: c for name, c in arch["time_blocks"]}

    def kernel(x_ref, t_ref, slab_ref, out_ref):

        def W(name):                                  # static-offset slice of the weight slab
            off, r, c = layout[name]
            return slab_ref[off:off + r, 0:c]

        def mm(a, b):
            return jnp.dot(a, b, preferred_element_type=f32)

        def rollmask(x, s, lv):
            # value shifted so row r holds input row r+s of the SAME batch (zero "same" pad);
            # the shift is an XLU roll, the pad/boundary fix is a VPU mask multiply.
            if s == 0:
                return x
            sh = (-s) % x.shape[0]
            return pltpu.roll(x, shift=sh, axis=0) * W(f"padmask_{lv}_{s}")

        def conv(xs, wname, bname, K, pad, lv):
            """Stride-1 Conv1d over the channel-concat of `xs` as ONE im2col matmul."""
            w, b = W(wname), W(bname)
            if sum(x.shape[1] for x in xs) == 1:
                # Cin == 1 (init conv): per-tap VPU outer products, no skinny matmul at all.
                x, acc = xs[0], None
                for k in range(K):
                    term = rollmask(x * w[k:k + 1, :], k - pad, lv)
                    acc = term if acc is None else acc + term
                return acc + b
            cols = []
            for k in range(K):
                for x in xs:
                    cols.append(rollmask(x, k - pad, lv))
            op = cols[0] if len(cols) == 1 else jnp.concatenate(cols, axis=1)
            return mm(op, w) + b

        def bcast_rows(vals, lv):
            # (B, C) per-batch rows -> (B*lv, C), VPU only (off the MXU chain).
            bm = W(f"bmask_{lv}")                         # (B*lv, B)
            out = bm[:, 0:1] * vals[0:1, :]
            for b in range(1, B):
                out = out + bm[:, b:b + 1] * vals[b:b + 1, :]
            return out

        def gn_silu(x, gname, bname, lv):
            # GroupNorm (PyTorch semantics, eps=1e-5, biased var) + SiLU, 2 fused MXU ops.
            c = x.shape[1]
            inv_n = 1.0 / float(lv * (c // groups))
            stats = mm(W(f"bsum_{lv}"), jnp.concatenate([x, x * x], axis=1))   # (B, 2c)
            spread = mm(stats, W(f"gmat2_{c}")) * inv_n                         # (B, 2c)
            mean, msq = spread[:, 0:c], spread[:, c:2 * c]
            var = jnp.maximum(msq - mean * mean, 0.0)
            rstd = jax.lax.rsqrt(var + eps)
            scale = rstd * W(gname)                                             # (B, c)
            shift = W(bname) - mean * scale
            y = x * bcast_rows(scale, lv) + bcast_rows(shift, lv)
            return y * jax.nn.sigmoid(y)                                        # SiLU

        def resnet(xs, nm, lv):
            h = conv(xs, f"{nm}_w1", f"{nm}_b1", 3, 1, lv)
            h = gn_silu(h, f"{nm}_g1", f"{nm}_be1", lv)
            if nm in trow:                               # hoisted per-block time projection
                r0, c = trow[nm], tcol[nm]
                h = h + bcast_rows(t_ref[r0:r0 + B, 0:c], lv)
            h = conv([h], f"{nm}_w2", f"{nm}_b2", 3, 1, lv)
            h = gn_silu(h, f"{nm}_g2", f"{nm}_be2", lv)
            if f"{nm}_rw" in layout:
                res = conv(xs, f"{nm}_rw", f"{nm}_rb", 1, 0, lv)   # 1x1 residual conv
            else:
                res = xs[0]
            return h + res

        def downsample(x, nm, lv):
            # Conv1d(k=3, stride=2, pad=1): full stride-1 im2col conv + one even-row take.
            # TODO(synk): the even-row take is still one tiny selection matmul (a strided
            # sublane gather of a live value has no simple Mosaic-safe expression here).
            h = conv([x], f"{nm}_w", f"{nm}_b", 3, 1, lv)
            return mm(W(f"take_{lv}"), h)

        def upsample(x, nm, lv):
            # ConvTranspose1d(k=3, stride=2, pad=1, out_pad=1) via its two output phases,
            # fused into one matmul, then one interleave matmul to scatter even/odd rows.
            c = x.shape[1]
            op = jnp.concatenate([x, rollmask(x, 1, lv)], axis=1)        # [x | x_next]
            y = mm(op, W(f"{nm}_w"))                                      # (B*lv, 2c) = [even|odd]
            stacked = jnp.concatenate([y[:, 0:c], y[:, c:2 * c]], axis=0)
            return mm(W(f"interleave_{lv}"), stacked) + W(f"{nm}_b")

        # ------------------------------- forward -------------------------------
        x = x_ref[...]                                   # (B*L, channels), channels-last
        lv = arch["L"]
        x = conv([x], "init_w", "init_b", arch["init_k"], arch["init_k"] // 2, lv)

        skips = []
        for i in range(arch["num_res"]):
            x = resnet([x], f"d{i}_rb1", lv)
            x = resnet([x], f"d{i}_rb2", lv)
            skips.append((x, lv))
            if i < arch["num_res"] - 1:
                x = downsample(x, f"down{i}", lv)
                lv //= 2

        x = resnet([x], "mid1", lv)
        x = resnet([x], "mid2", lv)

        for i in range(arch["num_res"] - 1):
            skip, ls = skips.pop()
            assert ls == lv
            # torch.cat((x, skip), dim=1): never materialized outside the im2col operand;
            # the up-block conv / residual-conv weights already cover both channel groups.
            x = resnet([x, skip], f"u{i}_rb1", lv)
            x = resnet([x], f"u{i}_rb2", lv)
            x = upsample(x, f"up{i}", lv)
            lv *= 2

        x = resnet([x], "final_rb", lv)

        # final 1x1 conv (Cout = channels) on the VPU: multiply + lane reduction, no matmul.
        fw, fb = W("final_w"), W("final_bT")             # (channels, dims0), (channels, 1)
        outs = []
        for co in range(arch["channels"]):
            outs.append(jnp.sum(x * fw[co:co + 1, :], axis=1, keepdims=True) + fb[co:co + 1, :])
        out_ref[...] = outs[0] if len(outs) == 1 else jnp.concatenate(outs, axis=1)

    return kernel


# ----------------------------- plain-JAX glue (tiny, outside the kernel) -----------------------------

def sinusoidal_embedding(time, dim):
    """Matches SinusoidalPositionalEmbeddings.forward: cat([cos, sin])."""
    if time.ndim == 2 and time.shape[1] == 1:
        time = time.reshape(-1)
    half = dim // 2
    e = math.log(10000.0) / (half - 1)
    inv_freq = jnp.exp(-e * jnp.arange(half, dtype=jnp.float32))
    emb = time.astype(jnp.float32)[:, None] * inv_freq[None, :]
    emb = jnp.concatenate([jnp.cos(emb), jnp.sin(emb)], axis=-1)
    if dim % 2 == 1:
        emb = jnp.pad(emb, ((0, 0), (0, 1)))
    return emb


def unet_forward(arch, layout, slab, tparams, x, time):
    """x: (B, channels, L) NCL like PyTorch (or (B, L)); time: (B,). Returns (B, channels, L)."""
    B, L, channels = arch["B"], arch["L"], arch["channels"]
    if x.ndim == 2:
        x = x[:, None, :]
    assert x.shape == (B, channels, L)
    x2d = jnp.transpose(x, (0, 2, 1)).reshape(B * L, channels).astype(jnp.float32)

    # Time MLP (sinusoidal -> Linear -> exact GELU -> Linear) plus every block's per-block
    # SiLU+Linear projection is hoisted here; XLA overlaps it with the kernel's input DMA.
    t = sinusoidal_embedding(time, arch["embedding_dim"])
    t = t @ tparams["t_w1"] + tparams["t_b1"]
    t = jax.nn.gelu(t, approximate=False)
    t = t @ tparams["t_w2"] + tparams["t_b2"]
    ts = jax.nn.silu(t)                                          # (B, time_dim)

    lane = slab.shape[1]
    assert B <= 8
    rows = []
    for (name, cout), w, b in zip(arch["time_blocks"], tparams["mlp_ws"], tparams["mlp_bs"]):
        proj = (ts @ w + b).astype(jnp.float32)                  # (B, cout)
        rows.append(jnp.pad(proj, ((0, 8 - B), (0, lane - cout))))
    tslab = jnp.concatenate(rows, axis=0)

    kernel = make_unet_kernel(arch, layout)
    weight_elems = sum(r * c for (_, r, c) in layout.values())
    cost = pl.CostEstimate(
        flops=int(2 * B * L * weight_elems),
        transcendentals=int(B * L * 64 * 24),
        bytes_accessed=int(4 * (slab.size + tslab.size + x2d.size + B * L * channels)),
    )
    out2d = pl.pallas_call(
        kernel,
        out_shape=jax.ShapeDtypeStruct((B * L, channels), jnp.float32),
        compiler_params=pltpu.CompilerParams(vmem_limit_bytes=32 * 1024 * 1024),
        cost_estimate=cost,
    )(x2d, tslab, slab)
    # TODO(synk): single gridless call uses one TensorCore; at B=2, L=16 sharding across a
    # second core (v7x) or casting matmul operands to bf16 is not worth the numerics risk.
    return jnp.transpose(out2d.reshape(B, L, channels), (0, 2, 1))


# ----------------------------- main -----------------------------

if __name__ == "__main__":
    EMBEDDING_DIM = 32
    DIM_MULTS = (1, 2)
    CHANNELS = 1
    GROUPS = 8
    B, L = 2, 16

    arch = build_arch(embedding_dim=EMBEDDING_DIM, dim_mults=DIM_MULTS,
                      channels=CHANNELS, groups=GROUPS, B=B, L=L)

    root = jax.random.PRNGKey(0)
    kp, kx = jax.random.split(root)
    params = init_unet_params(kp, arch)

    slab, layout = pack_unet(params, arch)      # one-time weight / constant packing
    tparams = extract_time_params(params, arch)

    x = jax.random.normal(kx, (B, CHANNELS, L), jnp.float32)   # NCL, like the PyTorch input
    time = jnp.array([3.0, 17.0], jnp.float32)                 # (B,) diffusion timesteps

    fwd = jax.jit(functools.partial(unet_forward, arch, layout))
    out = jax.block_until_ready(fwd(slab, tparams, x, time))
    assert out.shape == (B, CHANNELS, L), out.shape
    assert bool(jnp.all(jnp.isfinite(out)))
    print("KERNEL_OK")
</pallas_src>

<mosaic_0001>
module attributes {stable_mosaic.version = 11 : i64} {
  func.func @kernel(%arg0: memref<32x1xf32, #tpu.memory_space<vmem>>, %arg1: memref<64x128xf32, #tpu.memory_space<vmem>>, %arg2: memref<4032x128xf32, #tpu.memory_space<vmem>>, %arg3: memref<32x1xf32, #tpu.memory_space<vmem>>) attributes {dimension_semantics = [], scalar_prefetch = 0 : i64, scratch_operands = 0 : i64, tpu.core_type = #tpu.core_type<tc>} {
    %c0 = arith.constant 0 : index
    %c0_0 = arith.constant 0 : index
    %0 = vector.load %arg0[%c0, %c0_0] : memref<32x1xf32, #tpu.memory_space<vmem>>, vector<32x1xf32>
    %c0_1 = arith.constant 0 : index
    %c0_2 = arith.constant 0 : index
    %1 = vector.load %arg2[%c0_1, %c0_2] : memref<4032x128xf32, #tpu.memory_space<vmem>>, vector<7x16xf32>
    %c8 = arith.constant 8 : index
    %c0_3 = arith.constant 0 : index
    %2 = vector.load %arg2[%c8, %c0_3] : memref<4032x128xf32, #tpu.memory_space<vmem>>, vector<1x16xf32>
    %3 = vector.extract_strided_slice %1 {offsets = [0, 0], sizes = [1, 16], strides = [1, 1]} : vector<7x16xf32> to vector<1x16xf32>
    %4 = vector.broadcast %0 : vector<32x1xf32> to vector<32x16xf32>
    %5 = vector.broadcast %3 : vector<1x16xf32> to vector<32x16xf32>
    %6 = arith.mulf %4, %5 : vector<32x16xf32>
    %c3_i32 = arith.constant 3 : i32
    %7 = tpu.dynamic_rotate %6 by %c3_i32 dim 0 : vector<32x16xf32>, i32 -> vector<32x16xf32>
    %c3568 = arith.constant 3568 : index
    %c0_4 = arith.constant 0 : index
    %8 = vector.load %arg2[%c3568, %c0_4] : memref<4032x128xf32, #tpu.memory_space<vmem>>, vector<32x1xf32>
    %9 = vector.broadcast %8 : vector<32x1xf32> to vector<32x16xf32>
    %10 = arith.mulf %7, %9 : vector<32x16xf32>
    %11 = vector.extract_strided_slice %1 {offsets = [1, 0], sizes = [1, 16], strides = [1, 1]} : vector<7x16xf32> to vector<1x16xf32>
    %12 = vector.broadcast %0 : vector<32x1xf32> to vector<32x16xf32>
    %13 = vector.broadcast %11 : vector<1x16xf32> to vector<32x16xf32>
    %14 = arith.mulf %12, %13 : vector<32x16xf32>
    %c2_i32 = arith.constant 2 : i32
    %15 = tpu.dynamic_rotate %14 by %c2_i32 dim 0 : vector<32x16xf32>, i32 -> vector<32x16xf32>
    %c3600 = arith.constant 3600 : index
    %c0_5 = arith.constant 0 : index
    %16 = vector.load %arg2[%c3600, %c0_5] : memref<4032x128xf32, #tpu.memory_space<vmem>>, vector<32x1xf32>
    %17 = vector.broadcast %16 : vector<32x1xf32> to vector<32x16xf32>
    %18 = arith.mulf %15, %17 : vector<32x16xf32>
    %19 = arith.addf %10, %18 : vector<32x16xf32>
    %20 = vector.extract_strided_slice %1 {offsets = [2, 0], sizes = [1, 16], strides = [1, 1]} : vector<7x16xf32> to vector<1x16xf32>
    %21 = vector.broadcast %0 : vector<32x1xf32> to vector<32x16xf32>
    %22 = vector.broadcast %20 : vector<1x16xf32> to vector<32x16xf32>
    %23 = arith.mulf %21, %22 : vector<32x16xf32>
    %c1_i32 = arith.constant 1 : i32
    %24 = tpu.dynamic_rotate %23 by %c1_i32 dim 0 : vector<32x16xf32>, i32 -> vector<32x16xf32>
    %c3632 = arith.constant 3632 : index
    %c0_6 = arith.constant 0 : index
    %25 = vector.load %arg2[%c3632, %c0_6] : memref<4032x128xf32, #tpu.memory_space<vmem>>, vector<32x1xf32>
    %26 = vector.broadcast %25 : vector<32x1xf32> to vector<32x16xf32>
    %27 = arith.mulf %24, %26 : vector<32x16xf32>
    %28 = arith.addf %19, %27 : vector<32x16xf32>
    %29 = vector.extract_strided_slice %1 {offsets = [3, 0], sizes = [1, 16], strides = [1, 1]} : vector<7x16xf32> to vector<1x16xf32>
    %30 = vector.broadcast %0 : vector<32x1xf32> to vector<32x16xf32>
    %31 = vector.broadcast %29 : vector<1x16xf32> to vector<32x16xf32>
    %32 = arith.mulf %30, %31 : vector<32x16xf32>
    %33 = arith.addf %28, %32 : vector<32x16xf32>
    %34 = vector.extract_strided_slice %1 {offsets = [4, 0], sizes = [1, 16], strides = [1, 1]} : vector<7x16xf32> to vector<1x16xf32>
    %35 = vector.broadcast %0 : vector<32x1xf32> to vector<32x16xf32>
    %36 = vector.broadcast %34 : vector<1x16xf32> to vector<32x16xf32>
    %37 = arith.mulf %35, %36 : vector<32x16xf32>
    %c31_i32 = arith.constant 31 : i32
    %38 = tpu.dynamic_rotate %37 by %c31_i32 dim 0 : vector<32x16xf32>, i32 -> vector<32x16xf32>
    %c3664 = arith.constant 3664 : index
    %c0_7 = arith.constant 0 : index
    %39 = vector.load %arg2[%c3664, %c0_7] : memref<4032x128xf32, #tpu.memory_space<vmem>>, vector<32x1xf32>
    %40 = vector.broadcast %39 : vector<32x1xf32> to vector<32x16xf32>
    %41 = arith.mulf %38, %40 : vector<32x16xf32>
    %42 = arith.addf %33, %41 : vector<32x16xf32>
    %43 = vector.extract_strided_slice %1 {offsets = [5, 0], sizes = [1, 16], strides = [1, 1]} : vector<7x16xf32> to vector<1x16xf32>
    %44 = vector.broadcast %0 : vector<32x1xf32> to vector<32x16xf32>
    %45 = vector.broadcast %43 : vector<1x16xf32> to vector<32x16xf32>
    %46 = arith.mulf %44, %45 : vector<32x16xf32>
    %c30_i32 = arith.constant 30 : i32
    %47 = tpu.dynamic_rotate %46 by %c30_i32 dim 0 : vector<32x16xf32>, i32 -> vector<32x16xf32>
    %c3696 = arith.constant 3696 : index
    %c0_8 = arith.constant 0 : index
    %48 = vector.load %arg2[%c3696, %c0_8] : memref<4032x128xf32, #tpu.memory_space<vmem>>, vector<32x1xf32>
    %49 = vector.broadcast %48 : vector<32x1xf32> to vector<32x16xf32>
    %50 = arith.mulf %47, %49 : vector<32x16xf32>
    %51 = arith.addf %42, %50 : vector<32x16xf32>
    %52 = vector.extract_strided_slice %1 {offsets = [6, 0], sizes = [1, 16], strides = [1, 1]} : vector<7x16xf32> to vector<1x16xf32>
    %53 = vector.broadcast %0 : vector<32x1xf32> to vector<32x16xf32>
    %54 = vector.broadcast %52 : vector<1x16xf32> to vector<32x16xf32>
    %55 = arith.mulf %53, %54 : vector<32x16xf32>
    %c29_i32 = arith.constant 29 : i32
    %56 = tpu.dynamic_rotate %55 by %c29_i32 dim 0 : vector<32x16xf32>, i32 -> vector<32x16xf32>
    %c3728 = arith.constant 3728 : index
    %c0_9 = arith.constant 0 : index
    %57 = vector.load %arg2[%c3728, %c0_9] : memref<4032x128xf32, #tpu.memory_space<vmem>>, vector<32x1xf32>
    %58 = vector.broadcast %57 : vector<32x1xf32> to vector<32x16xf32>
    %59 = arith.mulf %56, %58 : vector<32x16xf32>
    %60 = arith.addf %51, %59 : vector<32x16xf32>
    %61 = vector.broadcast %2 : vector<1x16xf32> to vector<32x16xf32>
    %62 = arith.addf %60, %61 : vector<32x16xf32>
    %c16 = arith.constant 16 : index
    %c0_10 = arith.constant 0 : index
    %63 = vector.load %arg2[%c16, %c0_10] : memref<4032x128xf32, #tpu.memory_space<vmem>>, vector<48x32xf32>
    %c64 = arith.constant 64 : index
    %c0_11 = arith.constant 0 : index
    %64 = vector.load %arg2[%c64, %c0_11] : memref<4032x128xf32, #tpu.memory_space<vmem>>, vector<1x32xf32>
    %c1_i32_12 = arith.constant 1 : i32
    %65 = tpu.dynamic_rotate %62 by %c1_i32_12 dim 0 : vector<32x16xf32>, i32 -> vector<32x16xf32>
    %c3632_13 = arith.constant 3632 : index
    %c0_14 = arith.constant 0 : index
    %66 = vector.load %arg2[%c3632_13, %c0_14] : memref<4032x128xf32, #tpu.memory_space<vmem>>, vector<32x1xf32>
    %67 = vector.broadcast %66 : vector<32x1xf32> to vector<32x16xf32>
    %68 = arith.mulf %65, %67 : vector<32x16xf32>
    %c31_i32_15 = arith.constant 31 : i32
    %69 = tpu.dynamic_rotate %62 by %c31_i32_15 dim 0 : vector<32x16xf32>, i32 -> vector<32x16xf32>
    %c3664_16 = arith.constant 3664 : index
    %c0_17 = arith.constant 0 : index
    %70 = vector.load %arg2[%c3664_16, %c0_17] : memref<4032x128xf32, #tpu.memory_space<vmem>>, vector<32x1xf32>
    %71 = vector.broadcast %70 : vector<32x1xf32> to vector<32x16xf32>
    %72 = arith.mulf %69, %71 : vector<32x16xf32>
    %73 = tpu.concatenate %68, %62, %72 in 1 : vector<32x16xf32>, vector<32x16xf32>, vector<32x16xf32> -> vector<32x48xf32>
    %cst = arith.constant dense<0.000000e+00> : vector<32x32xf32>
    %74 = tpu.matmul %73, %63, %cst {dimension_numbers = #tpu.dot_dimension_numbers<[1], [0], [0], [1], [0, 0, 1, 1], [], []>} : vector<32x48xf32>, vector<48x32xf32>, vector<32x32xf32> -> vector<32x32xf32>
    %75 = vector.broadcast %64 : vector<1x32xf32> to vector<32x32xf32>
    %76 = arith.addf %74, %75 : vector<32x32xf32>
    %c3528 = arith.constant 3528 : index
    %c0_18 = arith.constant 0 : index
    %77 = vector.load %arg2[%c3528, %c0_18] : memref<4032x128xf32, #tpu.memory_space<vmem>>, vector<2x32xf32>
    %78 = arith.mulf %76, %76 : vector<32x32xf32>
    %79 = tpu.concatenate %76, %78 in 1 : vector<32x32xf32>, vector<32x32xf32> -> vector<32x64xf32>
    %cst_19 = arith.constant dense<0.000000e+00> : vector<2x64xf32>
    %80 = tpu.matmul %77, %79, %cst_19 {dimension_numbers = #tpu.dot_dimension_numbers<[1], [0], [0], [1], [0, 0, 1, 1], [], []>} : vector<2x32xf32>, vector<32x64xf32>, vector<2x64xf32> -> vector<2x64xf32>
    %c3792 = arith.constant 3792 : index
    %c0_20 = arith.constant 0 : index
    %81 = vector.load %arg2[%c3792, %c0_20] : memref<4032x128xf32, #tpu.memory_space<vmem>>, vector<64x64xf32>
    %cst_21 = arith.constant dense<0.000000e+00> : vector<2x64xf32>
    %82 = tpu.matmul %80, %81, %cst_21 {dimension_numbers = #tpu.dot_dimension_numbers<[1], [0], [0], [1], [0, 0, 1, 1], [], []>} : vector<2x64xf32>, vector<64x64xf32>, vector<2x64xf32> -> vector<2x64xf32>
    %cst_22 = arith.constant 1.562500e-02 : f32
    %83 = vector.broadcast %cst_22 : f32 to vector<2x64xf32>
    %84 = arith.mulf %82, %83 : vector<2x64xf32>
    %85 = vector.extract_strided_slice %84 {offsets = [0, 0], sizes = [2, 32], strides = [1, 1]} : vector<2x64xf32> to vector<2x32xf32>
    %86 = vector.extract_strided_slice %84 {offsets = [0, 32], sizes = [2, 32], strides = [1, 1]} : vector<2x64xf32> to vector<2x32xf32>
    %87 = arith.mulf %85, %85 : vector<2x32xf32>
    %88 = arith.subf %86, %87 : vector<2x32xf32>
    %cst_23 = arith.constant 0.000000e+00 : f32
    %89 = vector.broadcast %cst_23 : f32 to vector<2x32xf32>
    %90 = arith.maximumf %88, %89 : vector<2x32xf32>
    %cst_24 = arith.constant 9.99999974E-6 : f32
    %91 = vector.broadcast %cst_24 : f32 to vector<2x32xf32>
    %92 = arith.addf %90, %91 : vector<2x32xf32>
    %93 = math.rsqrt %92 : vector<2x32xf32>
    %c72 = arith.constant 72 : index
    %c0_25 = arith.constant 0 : index
    %94 = vector.load %arg2[%c72, %c0_25] : memref<4032x128xf32, #tpu.memory_space<vmem>>, vector<1x32xf32>
    %95 = vector.broadcast %94 : vector<1x32xf32> to vector<2x32xf32>
    %96 = arith.mulf %93, %95 : vector<2x32xf32>
    %c80 = arith.constant 80 : index
    %c0_26 = arith.constant 0 : index
    %97 = vector.load %arg2[%c80, %c0_26] : memref<4032x128xf32, #tpu.memory_space<vmem>>, vector<1x32xf32>
    %98 = arith.mulf %85, %96 : vector<2x32xf32>
    %99 = vector.broadcast %97 : vector<1x32xf32> to vector<2x32xf32>
    %100 = arith.subf %99, %98 : vector<2x32xf32>
    %c3536 = arith.constant 3536 : index
    %c0_27 = arith.constant 0 : index
    %101 = vector.load %arg2[%c3536, %c0_27] : memref<4032x128xf32, #tpu.memory_space<vmem>>, vector<32x2xf32>
    %102 = vector.extract_strided_slice %101 {offsets = [0, 0], sizes = [32, 1], strides = [1, 1]} : vector<32x2xf32> to vector<32x1xf32>
    %103 = vector.extract_strided_slice %96 {offsets = [0, 0], sizes = [1, 32], strides = [1, 1]} : vector<2x32xf32> to vector<1x32xf32>
    %104 = vector.broadcast %102 : vector<32x1xf32> to vector<32x32xf32>
    %105 = vector.broadcast %103 : vector<1x32xf32> to vector<32x32xf32>
    %106 = arith.mulf %104, %105 : vector<32x32xf32>
    %107 = vector.extract_strided_slice %101 {offsets = [0, 1], sizes = [32, 1], strides = [1, 1]} : vector<32x2xf32> to vector<32x1xf32>
    %108 = vector.extract_strided_slice %96 {offsets = [1, 0], sizes = [1, 32], strides = [1, 1]} : vector<2x32xf32> to vector<1x32xf32>
    %109 = vector.broadcast %107 : vector<32x1xf32> to vector<32x32xf32>
    %110 = vector.broadcast %108 : vector<1x32xf32> to vector<32x32xf32>
    %111 = arith.mulf %109, %110 : vector<32x32xf32>
    %112 = arith.addf %106, %111 : vector<32x32xf32>
    %113 = arith.mulf %76, %112 : vector<32x32xf32>
    %c3536_28 = arith.constant 3536 : index
    %c0_29 = arith.constant 0 : index
    %114 = vector.load %arg2[%c3536_28, %c0_29] : memref<4032x128xf32, #tpu.memory_space<vmem>>, vector<32x2xf32>
    %115 = vector.extract_strided_slice %114 {offsets = [0, 0], sizes = [32, 1], strides = [1, 1]} : vector<32x2xf32> to vector<32x1xf32>
    %116 = vector.extract_strided_slice %100 {offsets = [0, 0], sizes = [1, 32], strides = [1, 1]} : vector<2x32xf32> to vector<1x32xf32>
    %117 = vector.broadcast %115 : vector<32x1xf32> to vector<32x32xf32>
    %118 = vector.broadcast %116 : vector<1x32xf32> to vector<32x32xf32>
    %119 = arith.mulf %117, %118 : vector<32x32xf32>
    %120 = vector.extract_strided_slice %114 {offsets = [0, 1], sizes = [32, 1], strides = [1, 1]} : vector<32x2xf32> to vector<32x1xf32>
    %121 = vector.extract_strided_slice %100 {offsets = [1, 0], sizes = [1, 32], strides = [1, 1]} : vector<2x32xf32> to vector<1x32xf32>
    %122 = vector.broadcast %120 : vector<32x1xf32> to vector<32x32xf32>
    %123 = vector.broadcast %121 : vector<1x32xf32> to vector<32x32xf32>
    %124 = arith.mulf %122, %123 : vector<32x32xf32>
    %125 = arith.addf %119, %124 : vector<32x32xf32>
    %126 = arith.addf %113, %125 : vector<32x32xf32>
    %127 = arith.negf %126 : vector<32x32xf32>
    %128 = math.exp %127 : vector<32x32xf32>
    %cst_30 = arith.constant 1.000000e+00 : f32
    %129 = vector.broadcast %cst_30 : f32 to vector<32x32xf32>
    %130 = arith.addf %129, %128 : vector<32x32xf32>
    %131 = arith.divf %129, %130 : vector<32x32xf32>
    %132 = arith.mulf %126, %131 : vector<32x32xf32>
    %c0_31 = arith.constant 0 : index
    %c0_32 = arith.constant 0 : index
    %133 = vector.load %arg1[%c0_31, %c0_32] : memref<64x128xf32, #tpu.memory_space<vmem>>, vector<2x32xf32>
    %c3536_33 = arith.constant 3536 : index
    %c0_34 = arith.constant 0 : index
    %134 = vector.load %arg2[%c3536_33, %c0_34] : memref<4032x128xf32, #tpu.memory_space<vmem>>, vector<32x2xf32>
    %135 = vector.extract_strided_slice %134 {offsets = [0, 0], sizes = [32, 1], strides = [1, 1]} : vector<32x2xf32> to vector<32x1xf32>
    %136 = vector.extract_strided_slice %133 {offsets = [0, 0], sizes = [1, 32], strides = [1, 1]} : vector<2x32xf32> to vector<1x32xf32>
    %137 = vector.broadcast %135 : vector<32x1xf32> to vector<32x32xf32>
    %138 = vector.broadcast %136 : vector<1x32xf32> to vector<32x32xf32>
    %139 = arith.mulf %137, %138 : vector<32x32xf32>
    %140 = vector.extract_strided_slice %134 {offsets = [0, 1], sizes = [32, 1], strides = [1, 1]} : vector<32x2xf32> to vector<32x1xf32>
    %141 = vector.extract_strided_slice %133 {offsets = [1, 0], sizes = [1, 32], strides = [1, 1]} : vector<2x32xf32> to vector<1x32xf32>
    %142 = vector.broadcast %140 : vector<32x1xf32> to vector<32x32xf32>
    %143 = vector.broadcast %141 : vector<1x32xf32> to vector<32x32xf32>
    %144 = arith.mulf %142, %143 : vector<32x32xf32>
    %145 = arith.addf %139, %144 : vector<32x32xf32>
    %146 = arith.addf %132, %145 : vector<32x32xf32>
    %c88 = arith.constant 88 : index
    %c0_35 = arith.constant 0 : index
    %147 = vector.load %arg2[%c88, %c0_35] : memref<4032x128xf32, #tpu.memory_space<vmem>>, vector<96x32xf32>
    %c184 = arith.constant 184 : index
    %c0_36 = arith.constant 0 : index
    %148 = vector.load %arg2[%c184, %c0_36] : memref<4032x128xf32, #tpu.memory_space<vmem>>, vector<1x32xf32>
    %c1_i32_37 = arith.constant 1 : i32
    %149 = tpu.dynamic_rotate %146 by %c1_i32_37 dim 0 : vector<32x32xf32>, i32 -> vector<32x32xf32>
    %c3632_38 = arith.constant 3632 : index
    %c0_39 = arith.constant 0 : index
    %150 = vector.load %arg2[%c3632_38, %c0_39] : memref<4032x128xf32, #tpu.memory_space<vmem>>, vector<32x1xf32>
    %151 = vector.broadcast %150 : vector<32x1xf32> to vector<32x32xf32>
    %152 = arith.mulf %149, %151 : vector<32x32xf32>
    %c31_i32_40 = arith.constant 31 : i32
    %153 = tpu.dynamic_rotate %146 by %c31_i32_40 dim 0 : vector<32x32xf32>, i32 -> vector<32x32xf32>
    %c3664_41 = arith.constant 3664 : index
    %c0_42 = arith.constant 0 : index
    %154 = vector.load %arg2[%c3664_41, %c0_42] : memref<4032x128xf32, #tpu.memory_space<vmem>>, vector<32x1xf32>
    %155 = vector.broadcast %154 : vector<32x1xf32> to vector<32x32xf32>
    %156 = arith.mulf %153, %155 : vector<32x32xf32>
    %157 = tpu.concatenate %152, %146, %156 in 1 : vector<32x32xf32>, vector<32x32xf32>, vector<32x32xf32> -> vector<32x96xf32>
    %cst_43 = arith.constant dense<0.000000e+00> : vector<32x32xf32>
    %158 = tpu.matmul %157, %147, %cst_43 {dimension_numbers = #tpu.dot_dimension_numbers<[1], [0], [0], [1], [0, 0, 1, 1], [], []>} : vector<32x96xf32>, vector<96x32xf32>, vector<32x32xf32> -> vector<32x32xf32>
    %159 = vector.broadcast %148 : vector<1x32xf32> to vector<32x32xf32>
    %160 = arith.addf %158, %159 : vector<32x32xf32>
    %c3528_44 = arith.constant 3528 : index
    %c0_45 = arith.constant 0 : index
    %161 = vector.load %arg2[%c3528_44, %c0_45] : memref<4032x128xf32, #tpu.memory_space<vmem>>, vector<2x32xf32>
    %162 = arith.mulf %160, %160 : vector<32x32xf32>
    %163 = tpu.concatenate %160, %162 in 1 : vector<32x32xf32>, vector<32x32xf32> -> vector<32x64xf32>
    %cst_46 = arith.constant dense<0.000000e+00> : vector<2x64xf32>
    %164 = tpu.matmul %161, %163, %cst_46 {dimension_numbers = #tpu.dot_dimension_numbers<[1], [0], [0], [1], [0, 0, 1, 1], [], []>} : vector<2x32xf32>, vector<32x64xf32>, vector<2x64xf32> -> vector<2x64xf32>
    %c3792_47 = arith.constant 3792 : index
    %c0_48 = arith.constant 0 : index
    %165 = vector.load %arg2[%c3792_47, %c0_48] : memref<4032x128xf32, #tpu.memory_space<vmem>>, vector<64x64xf32>
    %cst_49 = arith.constant dense<0.000000e+00> : vector<2x64xf32>
    %166 = tpu.matmul %164, %165, %cst_49 {dimension_numbers = #tpu.dot_dimension_numbers<[1], [0], [0], [1], [0, 0, 1, 1], [], []>} : vector<2x64xf32>, vector<64x64xf32>, vector<2x64xf32> -> vector<2x64xf32>
    %cst_50 = arith.constant 1.562500e-02 : f32
    %167 = vector.broadcast %cst_50 : f32 to vector<2x64xf32>
    %168 = arith.mulf %166, %167 : vector<2x64xf32>
    %169 = vector.extract_strided_slice %168 {offsets = [0, 0], sizes = [2, 32], strides = [1, 1]} : vector<2x64xf32> to vector<2x32xf32>
    %170 = vector.extract_strided_slice %168 {offsets = [0, 32], sizes = [2, 32], strides = [1, 1]} : vector<2x64xf32> to vector<2x32xf32>
    %171 = arith.mulf %169, %169 : vector<2x32xf32>
    %172 = arith.subf %170, %171 : vector<2x32xf32>
    %cst_51 = arith.constant 0.000000e+00 : f32
    %173 = vector.broadcast %cst_51 : f32 to vector<2x32xf32>
    %174 = arith.maximumf %172, %173 : vector<2x32xf32>
    %cst_52 = arith.constant 9.99999974E-6 : f32
    %175 = vector.broadcast %cst_52 : f32 to vector<2x32xf32>
    %176 = arith.addf %174, %175 : vector<2x32xf32>
    %177 = math.rsqrt %176 : vector<2x32xf32>
    %c192 = arith.constant 192 : index
    %c0_53 = arith.constant 0 : index
    %178 = vector.load %arg2[%c192, %c0_53] : memref<4032x128xf32, #tpu.memory_space<vmem>>, vector<1x32xf32>
    %179 = vector.broadcast %178 : vector<1x32xf32> to vector<2x32xf32>
    %180 = arith.mulf %177, %179 : vector<2x32xf32>
    %c200 = arith.constant 200 : index
    %c0_54 = arith.constant 0 : index
    %181 = vector.load %arg2[%c200, %c0_54] : memref<4032x128xf32, #tpu.memory_space<vmem>>, vector<1x32xf32>
    %182 = arith.mulf %169, %180 : vector<2x32xf32>
    %183 = vector.broadcast %181 : vector<1x32xf32> to vector<2x32xf32>
    %184 = arith.subf %183, %182 : vector<2x32xf32>
    %c3536_55 = arith.constant 3536 : index
    %c0_56 = arith.constant 0 : index
    %185 = vector.load %arg2[%c3536_55, %c0_56] : memref<4032x128xf32, #tpu.memory_space<vmem>>, vector<32x2xf32>
    %186 = vector.extract_strided_slice %185 {offsets = [0, 0], sizes = [32, 1], strides = [1, 1]} : vector<32x2xf32> to vector<32x1xf32>
    %187 = vector.extract_strided_slice %180 {offsets = [0, 0], sizes = [1, 32], strides = [1, 1]} : vector<2x32xf32> to vector<1x32xf32>
    %188 = vector.broadcast %186 : vector<32x1xf32> to vector<32x32xf32>
    %189 = vector.broadcast %187 : vector<1x32xf32> to vector<32x32xf32>
    %190 = arith.mulf %188, %189 : vector<32x32xf32>
    %191 = vector.extract_strided_slice %185 {offsets = [0, 1], sizes = [32, 1], strides = [1, 1]} : vector<32x2xf32> to vector<32x1xf32>
    %192 = vector.extract_strided_slice %180 {offsets = [1, 0], sizes = [1, 32], strides = [1, 1]} : vector<2x32xf32> to vector<1x32xf32>
    %193 = vector.broadcast %191 : vector<32x1xf32> to vector<32x32xf32>
    %194 = vector.broadcast %192 : vector<1x32xf32> to vector<32x32xf32>
    %195 = arith.mulf %193, %194 : vector<32x32xf32>
    %196 = arith.addf %190, %195 : vector<32x32xf32>
    %197 = arith.mulf %160, %196 : vector<32x32xf32>
    %c3536_57 = arith.constant 3536 : index
    %c0_58 = arith.constant 0 : index
    %198 = vector.load %arg2[%c3536_57, %c0_58] : memref<4032x128xf32, #tpu.memory_space<vmem>>, vector<32x2xf32>
    %199 = vector.extract_strided_slice %198 {offsets = [0, 0], sizes = [32, 1], strides = [1, 1]} : vector<32x2xf32> to vector<32x1xf32>
    %200 = vector.extract_strided_slice %184 {offsets = [0, 0], sizes = [1, 32], strides = [1, 1]} : vector<2x32xf32> to vector<1x32xf32>
    %201 = vector.broadcast %199 : vector<32x1xf32> to vector<32x32xf32>
    %202 = vector.broadcast %200 : vector<1x32xf32> to vector<32x32xf32>
    %203 = arith.mulf %201, %202 : vector<32x32xf32>
    %204 = vector.extract_strided_slice %198 {offsets = [0, 1], sizes = [32, 1], strides = [1, 1]} : vector<32x2xf32> to vector<32x1xf32>
    %205 = vector.extract_strided_slice %184 {offsets = [1, 0], sizes = [1, 32], strides = [1, 1]} : vector<2x32xf32> to vector<1x32xf32>
    %206 = vector.broadcast %204 : vector<32x1xf32> to vector<32x32xf32>
    %207 = vector.broadcast %205 : vector<1x32xf32> to vector<32x32xf32>
    %208 = arith.mulf %206, %207 : vector<32x32xf32>
    %209 = arith.addf %203, %208 : vector<32x32xf32>
    %210 = arith.addf %197, %209 : vector<32x32xf32>
    %211 = arith.negf %210 : vector<32x32xf32>
    %212 = math.exp %211 : vector<32x32xf32>
    %cst_59 = arith.constant 1.000000e+00 : f32
    %213 = vector.broadcast %cst_59 : f32 to vector<32x32xf32>
    %214 = arith.addf %213, %212 : vector<32x32xf32>
    %215 = arith.divf %213, %214 : vector<32x32xf32>
    %216 = arith.mulf %210, %215 : vector<32x32xf32>
    %c208 = arith.constant 208 : index
    %c0_60 = arith.constant 0 : index
    %217 = vector.load %arg2[%c208, %c0_60] : memref<4032x128xf32, #tpu.memory_space<vmem>>, vector<16x32xf32>
    %c224 = arith.constant 224 : index
    %c0_61 = arith.constant 0 : index
    %218 = vector.load %arg2[%c224, %c0_61] : memref<4032x128xf32, #tpu.memory_space<vmem>>, vector<1x32xf32>
    %cst_62 = arith.constant dense<0.000000e+00> : vector<32x32xf32>
    %219 = tpu.matmul %62, %217, %cst_62 {dimension_numbers = #tpu.dot_dimension_numbers<[1], [0], [0], [1], [0, 0, 1, 1], [], []>} : vector<32x16xf32>, vector<16x32xf32>, vector<32x32xf32> -> vector<32x32xf32>
    %220 = vector.broadcast %218 : vector<1x32xf32> to vector<32x32xf32>
    %221 = arith.addf %219, %220 : vector<32x32xf32>
    %222 = arith.addf %216, %221 : vector<32x32xf32>
    %c232 = arith.constant 232 : index
    %c0_63 = arith.constant 0 : index
    %223 = vector.load %arg2[%c232, %c0_63] : memref<4032x128xf32, #tpu.memory_space<vmem>>, vector<96x32xf32>
    %c328 = arith.constant 328 : index
    %c0_64 = arith.constant 0 : index
    %224 = vector.load %arg2[%c328, %c0_64] : memref<4032x128xf32, #tpu.memory_space<vmem>>, vector<1x32xf32>
    %c1_i32_65 = arith.constant 1 : i32
    %225 = tpu.dynamic_rotate %222 by %c1_i32_65 dim 0 : vector<32x32xf32>, i32 -> vector<32x32xf32>
    %c3632_66 = arith.constant 3632 : index
    %c0_67 = arith.constant 0 : index
    %226 = vector.load %arg2[%c3632_66, %c0_67] : memref<4032x128xf32, #tpu.memory_space<vmem>>, vector<32x1xf32>
    %227 = vector.broadcast %226 : vector<32x1xf32> to vector<32x32xf32>
    %228 = arith.mulf %225, %227 : vector<32x32xf32>
    %c31_i32_68 = arith.constant 31 : i32
    %229 = tpu.dynamic_rotate %222 by %c31_i32_68 dim 0 : vector<32x32xf32>, i32 -> vector<32x32xf32>
    %c3664_69 = arith.constant 3664 : index
    %c0_70 = arith.constant 0 : index
    %230 = vector.load %arg2[%c3664_69, %c0_70] : memref<4032x128xf32, #tpu.memory_space<vmem>>, vector<32x1xf32>
    %231 = vector.broadcast %230 : vector<32x1xf32> to vector<32x32xf32>
    %232 = arith.mulf %229, %231 : vector<32x32xf32>
    %233 = tpu.concatenate %228, %222, %232 in 1 : vector<32x32xf32>, vector<32x32xf32>, vector<32x32xf32> -> vector<32x96xf32>
    %cst_71 = arith.constant dense<0.000000e+00> : vector<32x32xf32>
    %234 = tpu.matmul %233, %223, %cst_71 {dimension_numbers = #tpu.dot_dimension_numbers<[1], [0], [0], [1], [0, 0, 1, 1], [], []>} : vector<32x96xf32>, vector<96x32xf32>, vector<32x32xf32> -> vector<32x32xf32>
    %235 = vector.broadcast %224 : vector<1x32xf32> to vector<32x32xf32>
    %236 = arith.addf %234, %235 : vector<32x32xf32>
    %c3528_72 = arith.constant 3528 : index
    %c0_73 = arith.constant 0 : index
    %237 = vector.load %arg2[%c3528_72, %c0_73] : memref<4032x128xf32, #tpu.memory_space<vmem>>, vector<2x32xf32>
    %238 = arith.mulf %236, %236 : vector<32x32xf32>
    %239 = tpu.concatenate %236, %238 in 1 : vector<32x32xf32>, vector<32x32xf32> -> vector<32x64xf32>
    %cst_74 = arith.constant dense<0.000000e+00> : vector<2x64xf32>
    %240 = tpu.matmul %237, %239, %cst_74 {dimension_numbers = #tpu.dot_dimension_numbers<[1], [0], [0], [1], [0, 0, 1, 1], [], []>} : vector<2x32xf32>, vector<32x64xf32>, vector<2x64xf32> -> vector<2x64xf32>
    %c3792_75 = arith.constant 3792 : index
    %c0_76 = arith.constant 0 : index
    %241 = vector.load %arg2[%c3792_75, %c0_76] : memref<4032x128xf32, #tpu.memory_space<vmem>>, vector<64x64xf32>
    %cst_77 = arith.constant dense<0.000000e+00> : vector<2x64xf32>
    %242 = tpu.matmul %240, %241, %cst_77 {dimension_numbers = #tpu.dot_dimension_numbers<[1], [0], [0], [1], [0, 0, 1, 1], [], []>} : vector<2x64xf32>, vector<64x64xf32>, vector<2x64xf32> -> vector<2x64xf32>
    %cst_78 = arith.constant 1.562500e-02 : f32
    %243 = vector.broadcast %cst_78 : f32 to vector<2x64xf32>
    %244 = arith.mulf %242, %243 : vector<2x64xf32>
    %245 = vector.extract_strided_slice %244 {offsets = [0, 0], sizes = [2, 32], strides = [1, 1]} : vector<2x64xf32> to vector<2x32xf32>
    %246 = vector.extract_strided_slice %244 {offsets = [0, 32], sizes = [2, 32], strides = [1, 1]} : vector<2x64xf32> to vector<2x32xf32>
    %247 = arith.mulf %245, %245 : vector<2x32xf32>
    %248 = arith.subf %246, %247 : vector<2x32xf32>
    %cst_79 = arith.constant 0.000000e+00 : f32
    %249 = vector.broadcast %cst_79 : f32 to vector<2x32xf32>
    %250 = arith.maximumf %248, %249 : vector<2x32xf32>
    %cst_80 = arith.constant 9.99999974E-6 : f32
    %251 = vector.broadcast %cst_80 : f32 to vector<2x32xf32>
    %252 = arith.addf %250, %251 : vector<2x32xf32>
    %253 = math.rsqrt %252 : vector<2x32xf32>
    %c336 = arith.constant 336 : index
    %c0_81 = arith.constant 0 : index
    %254 = vector.load %arg2[%c336, %c0_81] : memref<4032x128xf32, #tpu.memory_space<vmem>>, vector<1x32xf32>
    %255 = vector.broadcast %254 : vector<1x32xf32> to vector<2x32xf32>
    %256 = arith.mulf %253, %255 : vector<2x32xf32>
    %c344 = arith.constant 344 : index
    %c0_82 = arith.constant 0 : index
    %257 = vector.load %arg2[%c344, %c0_82] : memref<4032x128xf32, #tpu.memory_space<vmem>>, vector<1x32xf32>
    %258 = arith.mulf %245, %256 : vector<2x32xf32>
    %259 = vector.broadcast %257 : vector<1x32xf32> to vector<2x32xf32>
    %260 = arith.subf %259, %258 : vector<2x32xf32>
    %c3536_83 = arith.constant 3536 : index
    %c0_84 = arith.constant 0 : index
    %261 = vector.load %arg2[%c3536_83, %c0_84] : memref<4032x128xf32, #tpu.memory_space<vmem>>, vector<32x2xf32>
    %262 = vector.extract_strided_slice %261 {offsets = [0, 0], sizes = [32, 1], strides = [1, 1]} : vector<32x2xf32> to vector<32x1xf32>
    %263 = vector.extract_strided_slice %256 {offsets = [0, 0], sizes = [1, 32], strides = [1, 1]} : vector<2x32xf32> to vector<1x32xf32>
    %264 = vector.broadcast %262 : vector<32x1xf32> to vector<32x32xf32>
    %265 = vector.broadcast %263 : vector<1x32xf32> to vector<32x32xf32>
    %266 = arith.mulf %264, %265 : vector<32x32xf32>
    %267 = vector.extract_strided_slice %261 {offsets = [0, 1], sizes = [32, 1], strides = [1, 1]} : vector<32x2xf32> to vector<32x1xf32>
    %268 = vector.extract_strided_slice %256 {offsets = [1, 0], sizes = [1, 32], strides = [1, 1]} : vector<2x32xf32> to vector<1x32xf32>
    %269 = vector.broadcast %267 : vector<32x1xf32> to vector<32x32xf32>
    %270 = vector.broadcast %268 : vector<1x32xf32> to vector<32x32xf32>
    %271 = arith.mulf %269, %270 : vector<32x32xf32>
    %272 = arith.addf %266, %271 : vector<32x32xf32>
    %273 = arith.mulf %236, %272 : vector<32x32xf32>
    %c3536_85 = arith.constant 3536 : index
    %c0_86 = arith.constant 0 : index
    %274 = vector.load %arg2[%c3536_85, %c0_86] : memref<4032x128xf32, #tpu.memory_space<vmem>>, vector<32x2xf32>
    %275 = vector.extract_strided_slice %274 {offsets = [0, 0], sizes = [32, 1], strides = [1, 1]} : vector<32x2xf32> to vector<32x1xf32>
    %276 = vector.extract_strided_slice %260 {offsets = [0, 0], sizes = [1, 32], strides = [1, 1]} : vector<2x32xf32> to vector<1x32xf32>
    %277 = vector.broadcast %275 : vector<32x1xf32> to vector<32x32xf32>
    %278 = vector.broadcast %276 : vector<1x32xf32> to vector<32x32xf32>
    %279 = arith.mulf %277, %278 : vector<32x32xf32>
    %280 = vector.extract_strided_slice %274 {offsets = [0, 1], sizes = [32, 1], strides = [1, 1]} : vector<32x2xf32> to vector<32x1xf32>
    %281 = vector.extract_strided_slice %260 {offsets = [1, 0], sizes = [1, 32], strides = [1, 1]} : vector<2x32xf32> to vector<1x32xf32>
    %282 = vector.broadcast %280 : vector<32x1xf32> to vector<32x32xf32>
    %283 = vector.broadcast %281 : vector<1x32xf32> to vector<32x32xf32>
    %284 = arith.mulf %282, %283 : vector<32x32xf32>
    %285 = arith.addf %279, %284 : vector<32x32xf32>
    %286 = arith.addf %273, %285 : vector<32x32xf32>
    %287 = arith.negf %286 : vector<32x32xf32>
    %288 = math.exp %287 : vector<32x32xf32>
    %cst_87 = arith.constant 1.000000e+00 : f32
    %289 = vector.broadcast %cst_87 : f32 to vector<32x32xf32>
    %290 = arith.addf %289, %288 : vector<32x32xf32>
    %291 = arith.divf %289, %290 : vector<32x32xf32>
    %292 = arith.mulf %286, %291 : vector<32x32xf32>
    %c8_88 = arith.constant 8 : index
    %c0_89 = arith.constant 0 : index
    %293 = vector.load %arg1[%c8_88, %c0_89] : memref<64x128xf32, #tpu.memory_space<vmem>>, vector<2x32xf32>
    %c3536_90 = arith.constant 3536 : index
    %c0_91 = arith.constant 0 : index
    %294 = vector.load %arg2[%c3536_90, %c0_91] : memref<4032x128xf32, #tpu.memory_space<vmem>>, vector<32x2xf32>
    %295 = vector.extract_strided_slice %294 {offsets = [0, 0], sizes = [32, 1], strides = [1, 1]} : vector<32x2xf32> to vector<32x1xf32>
    %296 = vector.extract_strided_slice %293 {offsets = [0, 0], sizes = [1, 32], strides = [1, 1]} : vector<2x32xf32> to vector<1x32xf32>
    %297 = vector.broadcast %295 : vector<32x1xf32> to vector<32x32xf32>
    %298 = vector.broadcast %296 : vector<1x32xf32> to vector<32x32xf32>
    %299 = arith.mulf %297, %298 : vector<32x32xf32>
    %300 = vector.extract_strided_slice %294 {offsets = [0, 1], sizes = [32, 1], strides = [1, 1]} : vector<32x2xf32> to vector<32x1xf32>
    %301 = vector.extract_strided_slice %293 {offsets = [1, 0], sizes = [1, 32], strides = [1, 1]} : vector<2x32xf32> to vector<1x32xf32>
    %302 = vector.broadcast %300 : vector<32x1xf32> to vector<32x32xf32>
    %303 = vector.broadcast %301 : vector<1x32xf32> to vector<32x32xf32>
    %304 = arith.mulf %302, %303 : vector<32x32xf32>
    %305 = arith.addf %299, %304 : vector<32x32xf32>
    %306 = arith.addf %292, %305 : vector<32x32xf32>
    %c352 = arith.constant 352 : index
    %c0_92 = arith.constant 0 : index
    %307 = vector.load %arg2[%c352, %c0_92] : memref<4032x128xf32, #tpu.memory_space<vmem>>, vector<96x32xf32>
    %c448 = arith.constant 448 : index
    %c0_93 = arith.constant 0 : index
    %308 = vector.load %arg2[%c448, %c0_93] : memref<4032x128xf32, #tpu.memory_space<vmem>>, vector<1x32xf32>
    %c1_i32_94 = arith.constant 1 : i32
    %309 = tpu.dynamic_rotate %306 by %c1_i32_94 dim 0 : vector<32x32xf32>, i32 -> vector<32x32xf32>
    %c3632_95 = arith.constant 3632 : index
    %c0_96 = arith.constant 0 : index
    %310 = vector.load %arg2[%c3632_95, %c0_96] : memref<4032x128xf32, #tpu.memory_space<vmem>>, vector<32x1xf32>
    %311 = vector.broadcast %310 : vector<32x1xf32> to vector<32x32xf32>
    %312 = arith.mulf %309, %311 : vector<32x32xf32>
    %c31_i32_97 = arith.constant 31 : i32
    %313 = tpu.dynamic_rotate %306 by %c31_i32_97 dim 0 : vector<32x32xf32>, i32 -> vector<32x32xf32>
    %c3664_98 = arith.constant 3664 : index
    %c0_99 = arith.constant 0 : index
    %314 = vector.load %arg2[%c3664_98, %c0_99] : memref<4032x128xf32, #tpu.memory_space<vmem>>, vector<32x1xf32>
    %315 = vector.broadcast %314 : vector<32x1xf32> to vector<32x32xf32>
    %316 = arith.mulf %313, %315 : vector<32x32xf32>
    %317 = tpu.concatenate %312, %306, %316 in 1 : vector<32x32xf32>, vector<32x32xf32>, vector<32x32xf32> -> vector<32x96xf32>
    %cst_100 = arith.constant dense<0.000000e+00> : vector<32x32xf32>
    %318 = tpu.matmul %317, %307, %cst_100 {dimension_numbers = #tpu.dot_dimension_numbers<[1], [0], [0], [1], [0, 0, 1, 1], [], []>} : vector<32x96xf32>, vector<96x32xf32>, vector<32x32xf32> -> vector<32x32xf32>
    %319 = vector.broadcast %308 : vector<1x32xf32> to vector<32x32xf32>
    %320 = arith.addf %318, %319 : vector<32x32xf32>
    %c3528_101 = arith.constant 3528 : index
    %c0_102 = arith.constant 0 : index
    %321 = vector.load %arg2[%c3528_101, %c0_102] : memref<4032x128xf32, #tpu.memory_space<vmem>>, vector<2x32xf32>
    %322 = arith.mulf %320, %320 : vector<32x32xf32>
    %323 = tpu.concatenate %320, %322 in 1 : vector<32x32xf32>, vector<32x32xf32> -> vector<32x64xf32>
    %cst_103 = arith.constant dense<0.000000e+00> : vector<2x64xf32>
    %324 = tpu.matmul %321, %323, %cst_103 {dimension_numbers = #tpu.dot_dimension_numbers<[1], [0], [0], [1], [0, 0, 1, 1], [], []>} : vector<2x32xf32>, vector<32x64xf32>, vector<2x64xf32> -> vector<2x64xf32>
    %c3792_104 = arith.constant 3792 : index
    %c0_105 = arith.constant 0 : index
    %325 = vector.load %arg2[%c3792_104, %c0_105] : memref<4032x128xf32, #tpu.memory_space<vmem>>, vector<64x64xf32>
    %cst_106 = arith.constant dense<0.000000e+00> : vector<2x64xf32>
    %326 = tpu.matmul %324, %325, %cst_106 {dimension_numbers = #tpu.dot_dimension_numbers<[1], [0], [0], [1], [0, 0, 1, 1], [], []>} : vector<2x64xf32>, vector<64x64xf32>, vector<2x64xf32> -> vector<2x64xf32>
    %cst_107 = arith.constant 1.562500e-02 : f32
    %327 = vector.broadcast %cst_107 : f32 to vector<2x64xf32>
    %328 = arith.mulf %326, %327 : vector<2x64xf32>
    %329 = vector.extract_strided_slice %328 {offsets = [0, 0], sizes = [2, 32], strides = [1, 1]} : vector<2x64xf32> to vector<2x32xf32>
    %330 = vector.extract_strided_slice %328 {offsets = [0, 32], sizes = [2, 32], strides = [1, 1]} : vector<2x64xf32> to vector<2x32xf32>
    %331 = arith.mulf %329, %329 : vector<2x32xf32>
    %332 = arith.subf %330, %331 : vector<2x32xf32>
    %cst_108 = arith.constant 0.000000e+00 : f32
    %333 = vector.broadcast %cst_108 : f32 to vector<2x32xf32>
    %334 = arith.maximumf %332, %333 : vector<2x32xf32>
    %cst_109 = arith.constant 9.99999974E-6 : f32
    %335 = vector.broadcast %cst_109 : f32 to vector<2x32xf32>
    %336 = arith.addf %334, %335 : vector<2x32xf32>
    %337 = math.rsqrt %336 : vector<2x32xf32>
    %c456 = arith.constant 456 : index
    %c0_110 = arith.constant 0 : index
    %338 = vector.load %arg2[%c456, %c0_110] : memref<4032x128xf32, #tpu.memory_space<vmem>>, vector<1x32xf32>
    %339 = vector.broadcast %338 : vector<1x32xf32> to vector<2x32xf32>
    %340 = arith.mulf %337, %339 : vector<2x32xf32>
    %c464 = arith.constant 464 : index
    %c0_111 = arith.constant 0 : index
    %341 = vector.load %arg2[%c464, %c0_111] : memref<4032x128xf32, #tpu.memory_space<vmem>>, vector<1x32xf32>
    %342 = arith.mulf %329, %340 : vector<2x32xf32>
    %343 = vector.broadcast %341 : vector<1x32xf32> to vector<2x32xf32>
    %344 = arith.subf %343, %342 : vector<2x32xf32>
    %c3536_112 = arith.constant 3536 : index
    %c0_113 = arith.constant 0 : index
    %345 = vector.load %arg2[%c3536_112, %c0_113] : memref<4032x128xf32, #tpu.memory_space<vmem>>, vector<32x2xf32>
    %346 = vector.extract_strided_slice %345 {offsets = [0, 0], sizes = [32, 1], strides = [1, 1]} : vector<32x2xf32> to vector<32x1xf32>
    %347 = vector.extract_strided_slice %340 {offsets = [0, 0], sizes = [1, 32], strides = [1, 1]} : vector<2x32xf32> to vector<1x32xf32>
    %348 = vector.broadcast %346 : vector<32x1xf32> to vector<32x32xf32>
    %349 = vector.broadcast %347 : vector<1x32xf32> to vector<32x32xf32>
    %350 = arith.mulf %348, %349 : vector<32x32xf32>
    %351 = vector.extract_strided_slice %345 {offsets = [0, 1], sizes = [32, 1], strides = [1, 1]} : vector<32x2xf32> to vector<32x1xf32>
    %352 = vector.extract_strided_slice %340 {offsets = [1, 0], sizes = [1, 32], strides = [1, 1]} : vector<2x32xf32> to vector<1x32xf32>
    %353 = vector.broadcast %351 : vector<32x1xf32> to vector<32x32xf32>
    %354 = vector.broadcast %352 : vector<1x32xf32> to vector<32x32xf32>
    %355 = arith.mulf %353, %354 : vector<32x32xf32>
    %356 = arith.addf %350, %355 : vector<32x32xf32>
    %357 = arith.mulf %320, %356 : vector<32x32xf32>
    %c3536_114 = arith.constant 3536 : index
    %c0_115 = arith.constant 0 : index
    %358 = vector.load %arg2[%c3536_114, %c0_115] : memref<4032x128xf32, #tpu.memory_space<vmem>>, vector<32x2xf32>
    %359 = vector.extract_strided_slice %358 {offsets = [0, 0], sizes = [32, 1], strides = [1, 1]} : vector<32x2xf32> to vector<32x1xf32>
    %360 = vector.extract_strided_slice %344 {offsets = [0, 0], sizes = [1, 32], strides = [1, 1]} : vector<2x32xf32> to vector<1x32xf32>
    %361 = vector.broadcast %359 : vector<32x1xf32> to vector<32x32xf32>
    %362 = vector.broadcast %360 : vector<1x32xf32> to vector<32x32xf32>
    %363 = arith.mulf %361, %362 : vector<32x32xf32>
    %364 = vector.extract_strided_slice %358 {offsets = [0, 1], sizes = [32, 1], strides = [1, 1]} : vector<32x2xf32> to vector<32x1xf32>
    %365 = vector.extract_strided_slice %344 {offsets = [1, 0], sizes = [1, 32], strides = [1, 1]} : vector<2x32xf32> to vector<1x32xf32>
    %366 = vector.broadcast %364 : vector<32x1xf32> to vector<32x32xf32>
    %367 = vector.broadcast %365 : vector<1x32xf32> to vector<32x32xf32>
    %368 = arith.mulf %366, %367 : vector<32x32xf32>
    %369 = arith.addf %363, %368 : vector<32x32xf32>
    %370 = arith.addf %357, %369 : vector<32x32xf32>
    %371 = arith.negf %370 : vector<32x32xf32>
    %372 = math.exp %371 : vector<32x32xf32>
    %cst_116 = arith.constant 1.000000e+00 : f32
    %373 = vector.broadcast %cst_116 : f32 to vector<32x32xf32>
    %374 = arith.addf %373, %372 : vector<32x32xf32>
    %375 = arith.divf %373, %374 : vector<32x32xf32>
    %376 = arith.mulf %370, %375 : vector<32x32xf32>
    %377 = arith.addf %376, %222 : vector<32x32xf32>
    %c3280 = arith.constant 3280 : index
    %c0_117 = arith.constant 0 : index
    %378 = vector.load %arg2[%c3280, %c0_117] : memref<4032x128xf32, #tpu.memory_space<vmem>>, vector<96x32xf32>
    %c3376 = arith.constant 3376 : index
    %c0_118 = arith.constant 0 : index
    %379 = vector.load %arg2[%c3376, %c0_118] : memref<4032x128xf32, #tpu.memory_space<vmem>>, vector<1x32xf32>
    %c1_i32_119 = arith.constant 1 : i32
    %380 = tpu.dynamic_rotate %377 by %c1_i32_119 dim 0 : vector<32x32xf32>, i32 -> vector<32x32xf32>
    %c3632_120 = arith.constant 3632 : index
    %c0_121 = arith.constant 0 : index
    %381 = vector.load %arg2[%c3632_120, %c0_121] : memref<4032x128xf32, #tpu.memory_space<vmem>>, vector<32x1xf32>
    %382 = vector.broadcast %381 : vector<32x1xf32> to vector<32x32xf32>
    %383 = arith.mulf %380, %382 : vector<32x32xf32>
    %c31_i32_122 = arith.constant 31 : i32
    %384 = tpu.dynamic_rotate %377 by %c31_i32_122 dim 0 : vector<32x32xf32>, i32 -> vector<32x32xf32>
    %c3664_123 = arith.constant 3664 : index
    %c0_124 = arith.constant 0 : index
    %385 = vector.load %arg2[%c3664_123, %c0_124] : memref<4032x128xf32, #tpu.memory_space<vmem>>, vector<32x1xf32>
    %386 = vector.broadcast %385 : vector<32x1xf32> to vector<32x32xf32>
    %387 = arith.mulf %384, %386 : vector<32x32xf32>
    %388 = tpu.concatenate %383, %377, %387 in 1 : vector<32x32xf32>, vector<32x32xf32>, vector<32x32xf32> -> vector<32x96xf32>
    %cst_125 = arith.constant dense<0.000000e+00> : vector<32x32xf32>
    %389 = tpu.matmul %388, %378, %cst_125 {dimension_numbers = #tpu.dot_dimension_numbers<[1], [0], [0], [1], [0, 0, 1, 1], [], []>} : vector<32x96xf32>, vector<96x32xf32>, vector<32x32xf32> -> vector<32x32xf32>
    %390 = vector.broadcast %379 : vector<1x32xf32> to vector<32x32xf32>
    %391 = arith.addf %389, %390 : vector<32x32xf32>
    %c3984 = arith.constant 3984 : index
    %c0_126 = arith.constant 0 : index
    %392 = vector.load %arg2[%c3984, %c0_126] : memref<4032x128xf32, #tpu.memory_space<vmem>>, vector<16x32xf32>
    %cst_127 = arith.constant dense<0.000000e+00> : vector<16x32xf32>
    %393 = tpu.matmul %392, %391, %cst_127 {dimension_numbers = #tpu.dot_dimension_numbers<[1], [0], [0], [1], [0, 0, 1, 1], [], []>} : vector<16x32xf32>, vector<32x32xf32>, vector<16x32xf32> -> vector<16x32xf32>
    %c472 = arith.constant 472 : index
    %c0_128 = arith.constant 0 : index
    %394 = vector.load %arg2[%c472, %c0_128] : memref<4032x128xf32, #tpu.memory_space<vmem>>, vector<96x64xf32>
    %c568 = arith.constant 568 : index
    %c0_129 = arith.constant 0 : index
    %395 = vector.load %arg2[%c568, %c0_129] : memref<4032x128xf32, #tpu.memory_space<vmem>>, vector<1x64xf32>
    %c1_i32_130 = arith.constant 1 : i32
    %396 = tpu.dynamic_rotate %393 by %c1_i32_130 dim 0 : vector<16x32xf32>, i32 -> vector<16x32xf32>
    %c3496 = arith.constant 3496 : index
    %c0_131 = arith.constant 0 : index
    %397 = vector.load %arg2[%c3496, %c0_131] : memref<4032x128xf32, #tpu.memory_space<vmem>>, vector<16x1xf32>
    %398 = vector.broadcast %397 : vector<16x1xf32> to vector<16x32xf32>
    %399 = arith.mulf %396, %398 : vector<16x32xf32>
    %c15_i32 = arith.constant 15 : i32
    %400 = tpu.dynamic_rotate %393 by %c15_i32 dim 0 : vector<16x32xf32>, i32 -> vector<16x32xf32>
    %c3512 = arith.constant 3512 : index
    %c0_132 = arith.constant 0 : index
    %401 = vector.load %arg2[%c3512, %c0_132] : memref<4032x128xf32, #tpu.memory_space<vmem>>, vector<16x1xf32>
    %402 = vector.broadcast %401 : vector<16x1xf32> to vector<16x32xf32>
    %403 = arith.mulf %400, %402 : vector<16x32xf32>
    %404 = tpu.concatenate %399, %393, %403 in 1 : vector<16x32xf32>, vector<16x32xf32>, vector<16x32xf32> -> vector<16x96xf32>
    %cst_133 = arith.constant dense<0.000000e+00> : vector<16x64xf32>
    %405 = tpu.matmul %404, %394, %cst_133 {dimension_numbers = #tpu.dot_dimension_numbers<[1], [0], [0], [1], [0, 0, 1, 1], [], []>} : vector<16x96xf32>, vector<96x64xf32>, vector<16x64xf32> -> vector<16x64xf32>
    %406 = vector.broadcast %395 : vector<1x64xf32> to vector<16x64xf32>
    %407 = arith.addf %405, %406 : vector<16x64xf32>
    %c3472 = arith.constant 3472 : index
    %c0_134 = arith.constant 0 : index
    %408 = vector.load %arg2[%c3472, %c0_134] : memref<4032x128xf32, #tpu.memory_space<vmem>>, vector<2x16xf32>
    %409 = arith.mulf %407, %407 : vector<16x64xf32>
    %410 = tpu.concatenate %407, %409 in 1 : vector<16x64xf32>, vector<16x64xf32> -> vector<16x128xf32>
    %cst_135 = arith.constant dense<0.000000e+00> : vector<2x128xf32>
    %411 = tpu.matmul %408, %410, %cst_135 {dimension_numbers = #tpu.dot_dimension_numbers<[1], [0], [0], [1], [0, 0, 1, 1], [], []>} : vector<2x16xf32>, vector<16x128xf32>, vector<2x128xf32> -> vector<2x128xf32>
    %c3856 = arith.constant 3856 : index
    %c0_136 = arith.constant 0 : index
    %412 = vector.load %arg2[%c3856, %c0_136] : memref<4032x128xf32, #tpu.memory_space<vmem>>, vector<128x128xf32>
    %cst_137 = arith.constant dense<0.000000e+00> : vector<2x128xf32>
    %413 = tpu.matmul %411, %412, %cst_137 {dimension_numbers = #tpu.dot_dimension_numbers<[1], [0], [0], [1], [0, 0, 1, 1], [], []>} : vector<2x128xf32>, vector<128x128xf32>, vector<2x128xf32> -> vector<2x128xf32>
    %cst_138 = arith.constant 1.562500e-02 : f32
    %414 = vector.broadcast %cst_138 : f32 to vector<2x128xf32>
    %415 = arith.mulf %413, %414 : vector<2x128xf32>
    %416 = vector.extract_strided_slice %415 {offsets = [0, 0], sizes = [2, 64], strides = [1, 1]} : vector<2x128xf32> to vector<2x64xf32>
    %417 = vector.extract_strided_slice %415 {offsets = [0, 64], sizes = [2, 64], strides = [1, 1]} : vector<2x128xf32> to vector<2x64xf32>
    %418 = arith.mulf %416, %416 : vector<2x64xf32>
    %419 = arith.subf %417, %418 : vector<2x64xf32>
    %cst_139 = arith.constant 0.000000e+00 : f32
    %420 = vector.broadcast %cst_139 : f32 to vector<2x64xf32>
    %421 = arith.maximumf %419, %420 : vector<2x64xf32>
    %cst_140 = arith.constant 9.99999974E-6 : f32
    %422 = vector.broadcast %cst_140 : f32 to vector<2x64xf32>
    %423 = arith.addf %421, %422 : vector<2x64xf32>
    %424 = math.rsqrt %423 : vector<2x64xf32>
    %c576 = arith.constant 576 : index
    %c0_141 = arith.constant 0 : index
    %425 = vector.load %arg2[%c576, %c0_141] : memref<4032x128xf32, #tpu.memory_space<vmem>>, vector<1x64xf32>
    %426 = vector.broadcast %425 : vector<1x64xf32> to vector<2x64xf32>
    %427 = arith.mulf %424, %426 : vector<2x64xf32>
    %c584 = arith.constant 584 : index
    %c0_142 = arith.constant 0 : index
    %428 = vector.load %arg2[%c584, %c0_142] : memref<4032x128xf32, #tpu.memory_space<vmem>>, vector<1x64xf32>
    %429 = arith.mulf %416, %427 : vector<2x64xf32>
    %430 = vector.broadcast %428 : vector<1x64xf32> to vector<2x64xf32>
    %431 = arith.subf %430, %429 : vector<2x64xf32>
    %c3480 = arith.constant 3480 : index
    %c0_143 = arith.constant 0 : index
    %432 = vector.load %arg2[%c3480, %c0_143] : memref<4032x128xf32, #tpu.memory_space<vmem>>, vector<16x2xf32>
    %433 = vector.extract_strided_slice %432 {offsets = [0, 0], sizes = [16, 1], strides = [1, 1]} : vector<16x2xf32> to vector<16x1xf32>
    %434 = vector.extract_strided_slice %427 {offsets = [0, 0], sizes = [1, 64], strides = [1, 1]} : vector<2x64xf32> to vector<1x64xf32>
    %435 = vector.broadcast %433 : vector<16x1xf32> to vector<16x64xf32>
    %436 = vector.broadcast %434 : vector<1x64xf32> to vector<16x64xf32>
    %437 = arith.mulf %435, %436 : vector<16x64xf32>
    %438 = vector.extract_strided_slice %432 {offsets = [0, 1], sizes = [16, 1], strides = [1, 1]} : vector<16x2xf32> to vector<16x1xf32>
    %439 = vector.extract_strided_slice %427 {offsets = [1, 0], sizes = [1, 64], strides = [1, 1]} : vector<2x64xf32> to vector<1x64xf32>
    %440 = vector.broadcast %438 : vector<16x1xf32> to vector<16x64xf32>
    %441 = vector.broadcast %439 : vector<1x64xf32> to vector<16x64xf32>
    %442 = arith.mulf %440, %441 : vector<16x64xf32>
    %443 = arith.addf %437, %442 : vector<16x64xf32>
    %444 = arith.mulf %407, %443 : vector<16x64xf32>
    %c3480_144 = arith.constant 3480 : index
    %c0_145 = arith.constant 0 : index
    %445 = vector.load %arg2[%c3480_144, %c0_145] : memref<4032x128xf32, #tpu.memory_space<vmem>>, vector<16x2xf32>
    %446 = vector.extract_strided_slice %445 {offsets = [0, 0], sizes = [16, 1], strides = [1, 1]} : vector<16x2xf32> to vector<16x1xf32>
    %447 = vector.extract_strided_slice %431 {offsets = [0, 0], sizes = [1, 64], strides = [1, 1]} : vector<2x64xf32> to vector<1x64xf32>
    %448 = vector.broadcast %446 : vector<16x1xf32> to vector<16x64xf32>
    %449 = vector.broadcast %447 : vector<1x64xf32> to vector<16x64xf32>
    %450 = arith.mulf %448, %449 : vector<16x64xf32>
    %451 = vector.extract_strided_slice %445 {offsets = [0, 1], sizes = [16, 1], strides = [1, 1]} : vector<16x2xf32> to vector<16x1xf32>
    %452 = vector.extract_strided_slice %431 {offsets = [1, 0], sizes = [1, 64], strides = [1, 1]} : vector<2x64xf32> to vector<1x64xf32>
    %453 = vector.broadcast %451 : vector<16x1xf32> to vector<16x64xf32>
    %454 = vector.broadcast %452 : vector<1x64xf32> to vector<16x64xf32>
    %455 = arith.mulf %453, %454 : vector<16x64xf32>
    %456 = arith.addf %450, %455 : vector<16x64xf32>
    %457 = arith.addf %444, %456 : vector<16x64xf32>
    %458 = arith.negf %457 : vector<16x64xf32>
    %459 = math.exp %458 : vector<16x64xf32>
    %cst_146 = arith.constant 1.000000e+00 : f32
    %460 = vector.broadcast %cst_146 : f32 to vector<16x64xf32>
    %461 = arith.addf %460, %459 : vector<16x64xf32>
    %462 = arith.divf %460, %461 : vector<16x64xf32>
    %463 = arith.mulf %457, %462 : vector<16x64xf32>
    %c16_147 = arith.constant 16 : index
    %c0_148 = arith.constant 0 : index
    %464 = vector.load %arg1[%c16_147, %c0_148] : memref<64x128xf32, #tpu.memory_space<vmem>>, vector<2x64xf32>
    %c3480_149 = arith.constant 3480 : index
    %c0_150 = arith.constant 0 : index
    %465 = vector.load %arg2[%c3480_149, %c0_150] : memref<4032x128xf32, #tpu.memory_space<vmem>>, vector<16x2xf32>
    %466 = vector.extract_strided_slice %465 {offsets = [0, 0], sizes = [16, 1], strides = [1, 1]} : vector<16x2xf32> to vector<16x1xf32>
    %467 = vector.extract_strided_slice %464 {offsets = [0, 0], sizes = [1, 64], strides = [1, 1]} : vector<2x64xf32> to vector<1x64xf32>
    %468 = vector.broadcast %466 : vector<16x1xf32> to vector<16x64xf32>
    %469 = vector.broadcast %467 : vector<1x64xf32> to vector<16x64xf32>
    %470 = arith.mulf %468, %469 : vector<16x64xf32>
    %471 = vector.extract_strided_slice %465 {offsets = [0, 1], sizes = [16, 1], strides = [1, 1]} : vector<16x2xf32> to vector<16x1xf32>
    %472 = vector.extract_strided_slice %464 {offsets = [1, 0], sizes = [1, 64], strides = [1, 1]} : vector<2x64xf32> to vector<1x64xf32>
    %473 = vector.broadcast %471 : vector<16x1xf32> to vector<16x64xf32>
    %474 = vector.broadcast %472 : vector<1x64xf32> to vector<16x64xf32>
    %475 = arith.mulf %473, %474 : vector<16x64xf32>
    %476 = arith.addf %470, %475 : vector<16x64xf32>
    %477 = arith.addf %463, %476 : vector<16x64xf32>
    %c592 = arith.constant 592 : index
    %c0_151 = arith.constant 0 : index
    %478 = vector.load %arg2[%c592, %c0_151] : memref<4032x128xf32, #tpu.memory_space<vmem>>, vector<192x64xf32>
    %c784 = arith.constant 784 : index
    %c0_152 = arith.constant 0 : index
    %479 = vector.load %arg2[%c784, %c0_152] : memref<4032x128xf32, #tpu.memory_space<vmem>>, vector<1x64xf32>
    %c1_i32_153 = arith.constant 1 : i32
    %480 = tpu.dynamic_rotate %477 by %c1_i32_153 dim 0 : vector<16x64xf32>, i32 -> vector<16x64xf32>
    %c3496_154 = arith.constant 3496 : index
    %c0_155 = arith.constant 0 : index
    %481 = vector.load %arg2[%c3496_154, %c0_155] : memref<4032x128xf32, #tpu.memory_space<vmem>>, vector<16x1xf32>
    %482 = vector.broadcast %481 : vector<16x1xf32> to vector<16x64xf32>
    %483 = arith.mulf %480, %482 : vector<16x64xf32>
    %c15_i32_156 = arith.constant 15 : i32
    %484 = tpu.dynamic_rotate %477 by %c15_i32_156 dim 0 : vector<16x64xf32>, i32 -> vector<16x64xf32>
    %c3512_157 = arith.constant 3512 : index
    %c0_158 = arith.constant 0 : index
    %485 = vector.load %arg2[%c3512_157, %c0_158] : memref<4032x128xf32, #tpu.memory_space<vmem>>, vector<16x1xf32>
    %486 = vector.broadcast %485 : vector<16x1xf32> to vector<16x64xf32>
    %487 = arith.mulf %484, %486 : vector<16x64xf32>
    %488 = tpu.concatenate %483, %477, %487 in 1 : vector<16x64xf32>, vector<16x64xf32>, vector<16x64xf32> -> vector<16x192xf32>
    %cst_159 = arith.constant dense<0.000000e+00> : vector<16x64xf32>
    %489 = tpu.matmul %488, %478, %cst_159 {dimension_numbers = #tpu.dot_dimension_numbers<[1], [0], [0], [1], [0, 0, 1, 1], [], []>} : vector<16x192xf32>, vector<192x64xf32>, vector<16x64xf32> -> vector<16x64xf32>
    %490 = vector.broadcast %479 : vector<1x64xf32> to vector<16x64xf32>
    %491 = arith.addf %489, %490 : vector<16x64xf32>
    %c3472_160 = arith.constant 3472 : index
    %c0_161 = arith.constant 0 : index
    %492 = vector.load %arg2[%c3472_160, %c0_161] : memref<4032x128xf32, #tpu.memory_space<vmem>>, vector<2x16xf32>
    %493 = arith.mulf %491, %491 : vector<16x64xf32>
    %494 = tpu.concatenate %491, %493 in 1 : vector<16x64xf32>, vector<16x64xf32> -> vector<16x128xf32>
    %cst_162 = arith.constant dense<0.000000e+00> : vector<2x128xf32>
    %495 = tpu.matmul %492, %494, %cst_162 {dimension_numbers = #tpu.dot_dimension_numbers<[1], [0], [0], [1], [0, 0, 1, 1], [], []>} : vector<2x16xf32>, vector<16x128xf32>, vector<2x128xf32> -> vector<2x128xf32>
    %c3856_163 = arith.constant 3856 : index
    %c0_164 = arith.constant 0 : index
    %496 = vector.load %arg2[%c3856_163, %c0_164] : memref<4032x128xf32, #tpu.memory_space<vmem>>, vector<128x128xf32>
    %cst_165 = arith.constant dense<0.000000e+00> : vector<2x128xf32>
    %497 = tpu.matmul %495, %496, %cst_165 {dimension_numbers = #tpu.dot_dimension_numbers<[1], [0], [0], [1], [0, 0, 1, 1], [], []>} : vector<2x128xf32>, vector<128x128xf32>, vector<2x128xf32> -> vector<2x128xf32>
    %cst_166 = arith.constant 1.562500e-02 : f32
    %498 = vector.broadcast %cst_166 : f32 to vector<2x128xf32>
    %499 = arith.mulf %497, %498 : vector<2x128xf32>
    %500 = vector.extract_strided_slice %499 {offsets = [0, 0], sizes = [2, 64], strides = [1, 1]} : vector<2x128xf32> to vector<2x64xf32>
    %501 = vector.extract_strided_slice %499 {offsets = [0, 64], sizes = [2, 64], strides = [1, 1]} : vector<2x128xf32> to vector<2x64xf32>
    %502 = arith.mulf %500, %500 : vector<2x64xf32>
    %503 = arith.subf %501, %502 : vector<2x64xf32>
    %cst_167 = arith.constant 0.000000e+00 : f32
    %504 = vector.broadcast %cst_167 : f32 to vector<2x64xf32>
    %505 = arith.maximumf %503, %504 : vector<2x64xf32>
    %cst_168 = arith.constant 9.99999974E-6 : f32
    %506 = vector.broadcast %cst_168 : f32 to vector<2x64xf32>
    %507 = arith.addf %505, %506 : vector<2x64xf32>
    %508 = math.rsqrt %507 : vector<2x64xf32>
    %c792 = arith.constant 792 : index
    %c0_169 = arith.constant 0 : index
    %509 = vector.load %arg2[%c792, %c0_169] : memref<4032x128xf32, #tpu.memory_space<vmem>>, vector<1x64xf32>
    %510 = vector.broadcast %509 : vector<1x64xf32> to vector<2x64xf32>
    %511 = arith.mulf %508, %510 : vector<2x64xf32>
    %c800 = arith.constant 800 : index
    %c0_170 = arith.constant 0 : index
    %512 = vector.load %arg2[%c800, %c0_170] : memref<4032x128xf32, #tpu.memory_space<vmem>>, vector<1x64xf32>
    %513 = arith.mulf %500, %511 : vector<2x64xf32>
    %514 = vector.broadcast %512 : vector<1x64xf32> to vector<2x64xf32>
    %515 = arith.subf %514, %513 : vector<2x64xf32>
    %c3480_171 = arith.constant 3480 : index
    %c0_172 = arith.constant 0 : index
    %516 = vector.load %arg2[%c3480_171, %c0_172] : memref<4032x128xf32, #tpu.memory_space<vmem>>, vector<16x2xf32>
    %517 = vector.extract_strided_slice %516 {offsets = [0, 0], sizes = [16, 1], strides = [1, 1]} : vector<16x2xf32> to vector<16x1xf32>
    %518 = vector.extract_strided_slice %511 {offsets = [0, 0], sizes = [1, 64], strides = [1, 1]} : vector<2x64xf32> to vector<1x64xf32>
    %519 = vector.broadcast %517 : vector<16x1xf32> to vector<16x64xf32>
    %520 = vector.broadcast %518 : vector<1x64xf32> to vector<16x64xf32>
    %521 = arith.mulf %519, %520 : vector<16x64xf32>
    %522 = vector.extract_strided_slice %516 {offsets = [0, 1], sizes = [16, 1], strides = [1, 1]} : vector<16x2xf32> to vector<16x1xf32>
    %523 = vector.extract_strided_slice %511 {offsets = [1, 0], sizes = [1, 64], strides = [1, 1]} : vector<2x64xf32> to vector<1x64xf32>
    %524 = vector.broadcast %522 : vector<16x1xf32> to vector<16x64xf32>
    %525 = vector.broadcast %523 : vector<1x64xf32> to vector<16x64xf32>
    %526 = arith.mulf %524, %525 : vector<16x64xf32>
    %527 = arith.addf %521, %526 : vector<16x64xf32>
    %528 = arith.mulf %491, %527 : vector<16x64xf32>
    %c3480_173 = arith.constant 3480 : index
    %c0_174 = arith.constant 0 : index
    %529 = vector.load %arg2[%c3480_173, %c0_174] : memref<4032x128xf32, #tpu.memory_space<vmem>>, vector<16x2xf32>
    %530 = vector.extract_strided_slice %529 {offsets = [0, 0], sizes = [16, 1], strides = [1, 1]} : vector<16x2xf32> to vector<16x1xf32>
    %531 = vector.extract_strided_slice %515 {offsets = [0, 0], sizes = [1, 64], strides = [1, 1]} : vector<2x64xf32> to vector<1x64xf32>
    %532 = vector.broadcast %530 : vector<16x1xf32> to vector<16x64xf32>
    %533 = vector.broadcast %531 : vector<1x64xf32> to vector<16x64xf32>
    %534 = arith.mulf %532, %533 : vector<16x64xf32>
    %535 = vector.extract_strided_slice %529 {offsets = [0, 1], sizes = [16, 1], strides = [1, 1]} : vector<16x2xf32> to vector<16x1xf32>
    %536 = vector.extract_strided_slice %515 {offsets = [1, 0], sizes = [1, 64], strides = [1, 1]} : vector<2x64xf32> to vector<1x64xf32>
    %537 = vector.broadcast %535 : vector<16x1xf32> to vector<16x64xf32>
    %538 = vector.broadcast %536 : vector<1x64xf32> to vector<16x64xf32>
    %539 = arith.mulf %537, %538 : vector<16x64xf32>
    %540 = arith.addf %534, %539 : vector<16x64xf32>
    %541 = arith.addf %528, %540 : vector<16x64xf32>
    %542 = arith.negf %541 : vector<16x64xf32>
    %543 = math.exp %542 : vector<16x64xf32>
    %cst_175 = arith.constant 1.000000e+00 : f32
    %544 = vector.broadcast %cst_175 : f32 to vector<16x64xf32>
    %545 = arith.addf %544, %543 : vector<16x64xf32>
    %546 = arith.divf %544, %545 : vector<16x64xf32>
    %547 = arith.mulf %541, %546 : vector<16x64xf32>
    %c808 = arith.constant 808 : index
    %c0_176 = arith.constant 0 : index
    %548 = vector.load %arg2[%c808, %c0_176] : memref<4032x128xf32, #tpu.memory_space<vmem>>, vector<32x64xf32>
    %c840 = arith.constant 840 : index
    %c0_177 = arith.constant 0 : index
    %549 = vector.load %arg2[%c840, %c0_177] : memref<4032x128xf32, #tpu.memory_space<vmem>>, vector<1x64xf32>
    %cst_178 = arith.constant dense<0.000000e+00> : vector<16x64xf32>
    %550 = tpu.matmul %393, %548, %cst_178 {dimension_numbers = #tpu.dot_dimension_numbers<[1], [0], [0], [1], [0, 0, 1, 1], [], []>} : vector<16x32xf32>, vector<32x64xf32>, vector<16x64xf32> -> vector<16x64xf32>
    %551 = vector.broadcast %549 : vector<1x64xf32> to vector<16x64xf32>
    %552 = arith.addf %550, %551 : vector<16x64xf32>
    %553 = arith.addf %547, %552 : vector<16x64xf32>
    %c848 = arith.constant 848 : index
    %c0_179 = arith.constant 0 : index
    %554 = vector.load %arg2[%c848, %c0_179] : memref<4032x128xf32, #tpu.memory_space<vmem>>, vector<192x64xf32>
    %c1040 = arith.constant 1040 : index
    %c0_180 = arith.constant 0 : index
    %555 = vector.load %arg2[%c1040, %c0_180] : memref<4032x128xf32, #tpu.memory_space<vmem>>, vector<1x64xf32>
    %c1_i32_181 = arith.constant 1 : i32
    %556 = tpu.dynamic_rotate %553 by %c1_i32_181 dim 0 : vector<16x64xf32>, i32 -> vector<16x64xf32>
    %c3496_182 = arith.constant 3496 : index
    %c0_183 = arith.constant 0 : index
    %557 = vector.load %arg2[%c3496_182, %c0_183] : memref<4032x128xf32, #tpu.memory_space<vmem>>, vector<16x1xf32>
    %558 = vector.broadcast %557 : vector<16x1xf32> to vector<16x64xf32>
    %559 = arith.mulf %556, %558 : vector<16x64xf32>
    %c15_i32_184 = arith.constant 15 : i32
    %560 = tpu.dynamic_rotate %553 by %c15_i32_184 dim 0 : vector<16x64xf32>, i32 -> vector<16x64xf32>
    %c3512_185 = arith.constant 3512 : index
    %c0_186 = arith.constant 0 : index
    %561 = vector.load %arg2[%c3512_185, %c0_186] : memref<4032x128xf32, #tpu.memory_space<vmem>>, vector<16x1xf32>
    %562 = vector.broadcast %561 : vector<16x1xf32> to vector<16x64xf32>
    %563 = arith.mulf %560, %562 : vector<16x64xf32>
    %564 = tpu.concatenate %559, %553, %563 in 1 : vector<16x64xf32>, vector<16x64xf32>, vector<16x64xf32> -> vector<16x192xf32>
    %cst_187 = arith.constant dense<0.000000e+00> : vector<16x64xf32>
    %565 = tpu.matmul %564, %554, %cst_187 {dimension_numbers = #tpu.dot_dimension_numbers<[1], [0], [0], [1], [0, 0, 1, 1], [], []>} : vector<16x192xf32>, vector<192x64xf32>, vector<16x64xf32> -> vector<16x64xf32>
    %566 = vector.broadcast %555 : vector<1x64xf32> to vector<16x64xf32>
    %567 = arith.addf %565, %566 : vector<16x64xf32>
    %c3472_188 = arith.constant 3472 : index
    %c0_189 = arith.constant 0 : index
    %568 = vector.load %arg2[%c3472_188, %c0_189] : memref<4032x128xf32, #tpu.memory_space<vmem>>, vector<2x16xf32>
    %569 = arith.mulf %567, %567 : vector<16x64xf32>
    %570 = tpu.concatenate %567, %569 in 1 : vector<16x64xf32>, vector<16x64xf32> -> vector<16x128xf32>
    %cst_190 = arith.constant dense<0.000000e+00> : vector<2x128xf32>
    %571 = tpu.matmul %568, %570, %cst_190 {dimension_numbers = #tpu.dot_dimension_numbers<[1], [0], [0], [1], [0, 0, 1, 1], [], []>} : vector<2x16xf32>, vector<16x128xf32>, vector<2x128xf32> -> vector<2x128xf32>
    %c3856_191 = arith.constant 3856 : index
    %c0_192 = arith.constant 0 : index
    %572 = vector.load %arg2[%c3856_191, %c0_192] : memref<4032x128xf32, #tpu.memory_space<vmem>>, vector<128x128xf32>
    %cst_193 = arith.constant dense<0.000000e+00> : vector<2x128xf32>
    %573 = tpu.matmul %571, %572, %cst_193 {dimension_numbers = #tpu.dot_dimension_numbers<[1], [0], [0], [1], [0, 0, 1, 1], [], []>} : vector<2x128xf32>, vector<128x128xf32>, vector<2x128xf32> -> vector<2x128xf32>
    %cst_194 = arith.constant 1.562500e-02 : f32
    %574 = vector.broadcast %cst_194 : f32 to vector<2x128xf32>
    %575 = arith.mulf %573, %574 : vector<2x128xf32>
    %576 = vector.extract_strided_slice %575 {offsets = [0, 0], sizes = [2, 64], strides = [1, 1]} : vector<2x128xf32> to vector<2x64xf32>
    %577 = vector.extract_strided_slice %575 {offsets = [0, 64], sizes = [2, 64], strides = [1, 1]} : vector<2x128xf32> to vector<2x64xf32>
    %578 = arith.mulf %576, %576 : vector<2x64xf32>
    %579 = arith.subf %577, %578 : vector<2x64xf32>
    %cst_195 = arith.constant 0.000000e+00 : f32
    %580 = vector.broadcast %cst_195 : f32 to vector<2x64xf32>
    %581 = arith.maximumf %579, %580 : vector<2x64xf32>
    %cst_196 = arith.constant 9.99999974E-6 : f32
    %582 = vector.broadcast %cst_196 : f32 to vector<2x64xf32>
    %583 = arith.addf %581, %582 : vector<2x64xf32>
    %584 = math.rsqrt %583 : vector<2x64xf32>
    %c1048 = arith.constant 1048 : index
    %c0_197 = arith.constant 0 : index
    %585 = vector.load %arg2[%c1048, %c0_197] : memref<4032x128xf32, #tpu.memory_space<vmem>>, vector<1x64xf32>
    %586 = vector.broadcast %585 : vector<1x64xf32> to vector<2x64xf32>
    %587 = arith.mulf %584, %586 : vector<2x64xf32>
    %c1056 = arith.constant 1056 : index
    %c0_198 = arith.constant 0 : index
    %588 = vector.load %arg2[%c1056, %c0_198] : memref<4032x128xf32, #tpu.memory_space<vmem>>, vector<1x64xf32>
    %589 = arith.mulf %576, %587 : vector<2x64xf32>
    %590 = vector.broadcast %588 : vector<1x64xf32> to vector<2x64xf32>
    %591 = arith.subf %590, %589 : vector<2x64xf32>
    %c3480_199 = arith.constant 3480 : index
    %c0_200 = arith.constant 0 : index
    %592 = vector.load %arg2[%c3480_199, %c0_200] : memref<4032x128xf32, #tpu.memory_space<vmem>>, vector<16x2xf32>
    %593 = vector.extract_strided_slice %592 {offsets = [0, 0], sizes = [16, 1], strides = [1, 1]} : vector<16x2xf32> to vector<16x1xf32>
    %594 = vector.extract_strided_slice %587 {offsets = [0, 0], sizes = [1, 64], strides = [1, 1]} : vector<2x64xf32> to vector<1x64xf32>
    %595 = vector.broadcast %593 : vector<16x1xf32> to vector<16x64xf32>
    %596 = vector.broadcast %594 : vector<1x64xf32> to vector<16x64xf32>
    %597 = arith.mulf %595, %596 : vector<16x64xf32>
    %598 = vector.extract_strided_slice %592 {offsets = [0, 1], sizes = [16, 1], strides = [1, 1]} : vector<16x2xf32> to vector<16x1xf32>
    %599 = vector.extract_strided_slice %587 {offsets = [1, 0], sizes = [1, 64], strides = [1, 1]} : vector<2x64xf32> to vector<1x64xf32>
    %600 = vector.broadcast %598 : vector<16x1xf32> to vector<16x64xf32>
    %601 = vector.broadcast %599 : vector<1x64xf32> to vector<16x64xf32>
    %602 = arith.mulf %600, %601 : vector<16x64xf32>
    %603 = arith.addf %597, %602 : vector<16x64xf32>
    %604 = arith.mulf %567, %603 : vector<16x64xf32>
    %c3480_201 = arith.constant 3480 : index
    %c0_202 = arith.constant 0 : index
    %605 = vector.load %arg2[%c3480_201, %c0_202] : memref<4032x128xf32, #tpu.memory_space<vmem>>, vector<16x2xf32>
    %606 = vector.extract_strided_slice %605 {offsets = [0, 0], sizes = [16, 1], strides = [1, 1]} : vector<16x2xf32> to vector<16x1xf32>
    %607 = vector.extract_strided_slice %591 {offsets = [0, 0], sizes = [1, 64], strides = [1, 1]} : vector<2x64xf32> to vector<1x64xf32>
    %608 = vector.broadcast %606 : vector<16x1xf32> to vector<16x64xf32>
    %609 = vector.broadcast %607 : vector<1x64xf32> to vector<16x64xf32>
    %610 = arith.mulf %608, %609 : vector<16x64xf32>
    %611 = vector.extract_strided_slice %605 {offsets = [0, 1], sizes = [16, 1], strides = [1, 1]} : vector<16x2xf32> to vector<16x1xf32>
    %612 = vector.extract_strided_slice %591 {offsets = [1, 0], sizes = [1, 64], strides = [1, 1]} : vector<2x64xf32> to vector<1x64xf32>
    %613 = vector.broadcast %611 : vector<16x1xf32> to vector<16x64xf32>
    %614 = vector.broadcast %612 : vector<1x64xf32> to vector<16x64xf32>
    %615 = arith.mulf %613, %614 : vector<16x64xf32>
    %616 = arith.addf %610, %615 : vector<16x64xf32>
    %617 = arith.addf %604, %616 : vector<16x64xf32>
    %618 = arith.negf %617 : vector<16x64xf32>
    %619 = math.exp %618 : vector<16x64xf32>
    %cst_203 = arith.constant 1.000000e+00 : f32
    %620 = vector.broadcast %cst_203 : f32 to vector<16x64xf32>
    %621 = arith.addf %620, %619 : vector<16x64xf32>
    %622 = arith.divf %620, %621 : vector<16x64xf32>
    %623 = arith.mulf %617, %622 : vector<16x64xf32>
    %c24 = arith.constant 24 : index
    %c0_204 = arith.constant 0 : index
    %624 = vector.load %arg1[%c24, %c0_204] : memref<64x128xf32, #tpu.memory_space<vmem>>, vector<2x64xf32>
    %c3480_205 = arith.constant 3480 : index
    %c0_206 = arith.constant 0 : index
    %625 = vector.load %arg2[%c3480_205, %c0_206] : memref<4032x128xf32, #tpu.memory_space<vmem>>, vector<16x2xf32>
    %626 = vector.extract_strided_slice %625 {offsets = [0, 0], sizes = [16, 1], strides = [1, 1]} : vector<16x2xf32> to vector<16x1xf32>
    %627 = vector.extract_strided_slice %624 {offsets = [0, 0], sizes = [1, 64], strides = [1, 1]} : vector<2x64xf32> to vector<1x64xf32>
    %628 = vector.broadcast %626 : vector<16x1xf32> to vector<16x64xf32>
    %629 = vector.broadcast %627 : vector<1x64xf32> to vector<16x64xf32>
    %630 = arith.mulf %628, %629 : vector<16x64xf32>
    %631 = vector.extract_strided_slice %625 {offsets = [0, 1], sizes = [16, 1], strides = [1, 1]} : vector<16x2xf32> to vector<16x1xf32>
    %632 = vector.extract_strided_slice %624 {offsets = [1, 0], sizes = [1, 64], strides = [1, 1]} : vector<2x64xf32> to vector<1x64xf32>
    %633 = vector.broadcast %631 : vector<16x1xf32> to vector<16x64xf32>
    %634 = vector.broadcast %632 : vector<1x64xf32> to vector<16x64xf32>
    %635 = arith.mulf %633, %634 : vector<16x64xf32>
    %636 = arith.addf %630, %635 : vector<16x64xf32>
    %637 = arith.addf %623, %636 : vector<16x64xf32>
    %c1064 = arith.constant 1064 : index
    %c0_207 = arith.constant 0 : index
    %638 = vector.load %arg2[%c1064, %c0_207] : memref<4032x128xf32, #tpu.memory_space<vmem>>, vector<192x64xf32>
    %c1256 = arith.constant 1256 : index
    %c0_208 = arith.constant 0 : index
    %639 = vector.load %arg2[%c1256, %c0_208] : memref<4032x128xf32, #tpu.memory_space<vmem>>, vector<1x64xf32>
    %c1_i32_209 = arith.constant 1 : i32
    %640 = tpu.dynamic_rotate %637 by %c1_i32_209 dim 0 : vector<16x64xf32>, i32 -> vector<16x64xf32>
    %c3496_210 = arith.constant 3496 : index
    %c0_211 = arith.constant 0 : index
    %641 = vector.load %arg2[%c3496_210, %c0_211] : memref<4032x128xf32, #tpu.memory_space<vmem>>, vector<16x1xf32>
    %642 = vector.broadcast %641 : vector<16x1xf32> to vector<16x64xf32>
    %643 = arith.mulf %640, %642 : vector<16x64xf32>
    %c15_i32_212 = arith.constant 15 : i32
    %644 = tpu.dynamic_rotate %637 by %c15_i32_212 dim 0 : vector<16x64xf32>, i32 -> vector<16x64xf32>
    %c3512_213 = arith.constant 3512 : index
    %c0_214 = arith.constant 0 : index
    %645 = vector.load %arg2[%c3512_213, %c0_214] : memref<4032x128xf32, #tpu.memory_space<vmem>>, vector<16x1xf32>
    %646 = vector.broadcast %645 : vector<16x1xf32> to vector<16x64xf32>
    %647 = arith.mulf %644, %646 : vector<16x64xf32>
    %648 = tpu.concatenate %643, %637, %647 in 1 : vector<16x64xf32>, vector<16x64xf32>, vector<16x64xf32> -> vector<16x192xf32>
    %cst_215 = arith.constant dense<0.000000e+00> : vector<16x64xf32>
    %649 = tpu.matmul %648, %638, %cst_215 {dimension_numbers = #tpu.dot_dimension_numbers<[1], [0], [0], [1], [0, 0, 1, 1], [], []>} : vector<16x192xf32>, vector<192x64xf32>, vector<16x64xf32> -> vector<16x64xf32>
    %650 = vector.broadcast %639 : vector<1x64xf32> to vector<16x64xf32>
    %651 = arith.addf %649, %650 : vector<16x64xf32>
    %c3472_216 = arith.constant 3472 : index
    %c0_217 = arith.constant 0 : index
    %652 = vector.load %arg2[%c3472_216, %c0_217] : memref<4032x128xf32, #tpu.memory_space<vmem>>, vector<2x16xf32>
    %653 = arith.mulf %651, %651 : vector<16x64xf32>
    %654 = tpu.concatenate %651, %653 in 1 : vector<16x64xf32>, vector<16x64xf32> -> vector<16x128xf32>
    %cst_218 = arith.constant dense<0.000000e+00> : vector<2x128xf32>
    %655 = tpu.matmul %652, %654, %cst_218 {dimension_numbers = #tpu.dot_dimension_numbers<[1], [0], [0], [1], [0, 0, 1, 1], [], []>} : vector<2x16xf32>, vector<16x128xf32>, vector<2x128xf32> -> vector<2x128xf32>
    %c3856_219 = arith.constant 3856 : index
    %c0_220 = arith.constant 0 : index
    %656 = vector.load %arg2[%c3856_219, %c0_220] : memref<4032x128xf32, #tpu.memory_space<vmem>>, vector<128x128xf32>
    %cst_221 = arith.constant dense<0.000000e+00> : vector<2x128xf32>
    %657 = tpu.matmul %655, %656, %cst_221 {dimension_numbers = #tpu.dot_dimension_numbers<[1], [0], [0], [1], [0, 0, 1, 1], [], []>} : vector<2x128xf32>, vector<128x128xf32>, vector<2x128xf32> -> vector<2x128xf32>
    %cst_222 = arith.constant 1.562500e-02 : f32
    %658 = vector.broadcast %cst_222 : f32 to vector<2x128xf32>
    %659 = arith.mulf %657, %658 : vector<2x128xf32>
    %660 = vector.extract_strided_slice %659 {offsets = [0, 0], sizes = [2, 64], strides = [1, 1]} : vector<2x128xf32> to vector<2x64xf32>
    %661 = vector.extract_strided_slice %659 {offsets = [0, 64], sizes = [2, 64], strides = [1, 1]} : vector<2x128xf32> to vector<2x64xf32>
    %662 = arith.mulf %660, %660 : vector<2x64xf32>
    %663 = arith.subf %661, %662 : vector<2x64xf32>
    %cst_223 = arith.constant 0.000000e+00 : f32
    %664 = vector.broadcast %cst_223 : f32 to vector<2x64xf32>
    %665 = arith.maximumf %663, %664 : vector<2x64xf32>
    %cst_224 = arith.constant 9.99999974E-6 : f32
    %666 = vector.broadcast %cst_224 : f32 to vector<2x64xf32>
    %667 = arith.addf %665, %666 : vector<2x64xf32>
    %668 = math.rsqrt %667 : vector<2x64xf32>
    %c1264 = arith.constant 1264 : index
    %c0_225 = arith.constant 0 : index
    %669 = vector.load %arg2[%c1264, %c0_225] : memref<4032x128xf32, #tpu.memory_space<vmem>>, vector<1x64xf32>
    %670 = vector.broadcast %669 : vector<1x64xf32> to vector<2x64xf32>
    %671 = arith.mulf %668, %670 : vector<2x64xf32>
    %c1272 = arith.constant 1272 : index
    %c0_226 = arith.constant 0 : index
    %672 = vector.load %arg2[%c1272, %c0_226] : memref<4032x128xf32, #tpu.memory_space<vmem>>, vector<1x64xf32>
    %673 = arith.mulf %660, %671 : vector<2x64xf32>
    %674 = vector.broadcast %672 : vector<1x64xf32> to vector<2x64xf32>
    %675 = arith.subf %674, %673 : vector<2x64xf32>
    %c3480_227 = arith.constant 3480 : index
    %c0_228 = arith.constant 0 : index
    %676 = vector.load %arg2[%c3480_227, %c0_228] : memref<4032x128xf32, #tpu.memory_space<vmem>>, vector<16x2xf32>
    %677 = vector.extract_strided_slice %676 {offsets = [0, 0], sizes = [16, 1], strides = [1, 1]} : vector<16x2xf32> to vector<16x1xf32>
    %678 = vector.extract_strided_slice %671 {offsets = [0, 0], sizes = [1, 64], strides = [1, 1]} : vector<2x64xf32> to vector<1x64xf32>
    %679 = vector.broadcast %677 : vector<16x1xf32> to vector<16x64xf32>
    %680 = vector.broadcast %678 : vector<1x64xf32> to vector<16x64xf32>
    %681 = arith.mulf %679, %680 : vector<16x64xf32>
    %682 = vector.extract_strided_slice %676 {offsets = [0, 1], sizes = [16, 1], strides = [1, 1]} : vector<16x2xf32> to vector<16x1xf32>
    %683 = vector.extract_strided_slice %671 {offsets = [1, 0], sizes = [1, 64], strides = [1, 1]} : vector<2x64xf32> to vector<1x64xf32>
    %684 = vector.broadcast %682 : vector<16x1xf32> to vector<16x64xf32>
    %685 = vector.broadcast %683 : vector<1x64xf32> to vector<16x64xf32>
    %686 = arith.mulf %684, %685 : vector<16x64xf32>
    %687 = arith.addf %681, %686 : vector<16x64xf32>
    %688 = arith.mulf %651, %687 : vector<16x64xf32>
    %c3480_229 = arith.constant 3480 : index
    %c0_230 = arith.constant 0 : index
    %689 = vector.load %arg2[%c3480_229, %c0_230] : memref<4032x128xf32, #tpu.memory_space<vmem>>, vector<16x2xf32>
    %690 = vector.extract_strided_slice %689 {offsets = [0, 0], sizes = [16, 1], strides = [1, 1]} : vector<16x2xf32> to vector<16x1xf32>
    %691 = vector.extract_strided_slice %675 {offsets = [0, 0], sizes = [1, 64], strides = [1, 1]} : vector<2x64xf32> to vector<1x64xf32>
    %692 = vector.broadcast %690 : vector<16x1xf32> to vector<16x64xf32>
    %693 = vector.broadcast %691 : vector<1x64xf32> to vector<16x64xf32>
    %694 = arith.mulf %692, %693 : vector<16x64xf32>
    %695 = vector.extract_strided_slice %689 {offsets = [0, 1], sizes = [16, 1], strides = [1, 1]} : vector<16x2xf32> to vector<16x1xf32>
    %696 = vector.extract_strided_slice %675 {offsets = [1, 0], sizes = [1, 64], strides = [1, 1]} : vector<2x64xf32> to vector<1x64xf32>
    %697 = vector.broadcast %695 : vector<16x1xf32> to vector<16x64xf32>
    %698 = vector.broadcast %696 : vector<1x64xf32> to vector<16x64xf32>
    %699 = arith.mulf %697, %698 : vector<16x64xf32>
    %700 = arith.addf %694, %699 : vector<16x64xf32>
    %701 = arith.addf %688, %700 : vector<16x64xf32>
    %702 = arith.negf %701 : vector<16x64xf32>
    %703 = math.exp %702 : vector<16x64xf32>
    %cst_231 = arith.constant 1.000000e+00 : f32
    %704 = vector.broadcast %cst_231 : f32 to vector<16x64xf32>
    %705 = arith.addf %704, %703 : vector<16x64xf32>
    %706 = arith.divf %704, %705 : vector<16x64xf32>
    %707 = arith.mulf %701, %706 : vector<16x64xf32>
    %708 = arith.addf %707, %553 : vector<16x64xf32>
    %c1280 = arith.constant 1280 : index
    %c0_232 = arith.constant 0 : index
    %709 = vector.load %arg2[%c1280, %c0_232] : memref<4032x128xf32, #tpu.memory_space<vmem>>, vector<192x64xf32>
    %c1472 = arith.constant 1472 : index
    %c0_233 = arith.constant 0 : index
    %710 = vector.load %arg2[%c1472, %c0_233] : memref<4032x128xf32, #tpu.memory_space<vmem>>, vector<1x64xf32>
    %c1_i32_234 = arith.constant 1 : i32
    %711 = tpu.dynamic_rotate %708 by %c1_i32_234 dim 0 : vector<16x64xf32>, i32 -> vector<16x64xf32>
    %c3496_235 = arith.constant 3496 : index
    %c0_236 = arith.constant 0 : index
    %712 = vector.load %arg2[%c3496_235, %c0_236] : memref<4032x128xf32, #tpu.memory_space<vmem>>, vector<16x1xf32>
    %713 = vector.broadcast %712 : vector<16x1xf32> to vector<16x64xf32>
    %714 = arith.mulf %711, %713 : vector<16x64xf32>
    %c15_i32_237 = arith.constant 15 : i32
    %715 = tpu.dynamic_rotate %708 by %c15_i32_237 dim 0 : vector<16x64xf32>, i32 -> vector<16x64xf32>
    %c3512_238 = arith.constant 3512 : index
    %c0_239 = arith.constant 0 : index
    %716 = vector.load %arg2[%c3512_238, %c0_239] : memref<4032x128xf32, #tpu.memory_space<vmem>>, vector<16x1xf32>
    %717 = vector.broadcast %716 : vector<16x1xf32> to vector<16x64xf32>
    %718 = arith.mulf %715, %717 : vector<16x64xf32>
    %719 = tpu.concatenate %714, %708, %718 in 1 : vector<16x64xf32>, vector<16x64xf32>, vector<16x64xf32> -> vector<16x192xf32>
    %cst_240 = arith.constant dense<0.000000e+00> : vector<16x64xf32>
    %720 = tpu.matmul %719, %709, %cst_240 {dimension_numbers = #tpu.dot_dimension_numbers<[1], [0], [0], [1], [0, 0, 1, 1], [], []>} : vector<16x192xf32>, vector<192x64xf32>, vector<16x64xf32> -> vector<16x64xf32>
    %721 = vector.broadcast %710 : vector<1x64xf32> to vector<16x64xf32>
    %722 = arith.addf %720, %721 : vector<16x64xf32>
    %c3472_241 = arith.constant 3472 : index
    %c0_242 = arith.constant 0 : index
    %723 = vector.load %arg2[%c3472_241, %c0_242] : memref<4032x128xf32, #tpu.memory_space<vmem>>, vector<2x16xf32>
    %724 = arith.mulf %722, %722 : vector<16x64xf32>
    %725 = tpu.concatenate %722, %724 in 1 : vector<16x64xf32>, vector<16x64xf32> -> vector<16x128xf32>
    %cst_243 = arith.constant dense<0.000000e+00> : vector<2x128xf32>
    %726 = tpu.matmul %723, %725, %cst_243 {dimension_numbers = #tpu.dot_dimension_numbers<[1], [0], [0], [1], [0, 0, 1, 1], [], []>} : vector<2x16xf32>, vector<16x128xf32>, vector<2x128xf32> -> vector<2x128xf32>
    %c3856_244 = arith.constant 3856 : index
    %c0_245 = arith.constant 0 : index
    %727 = vector.load %arg2[%c3856_244, %c0_245] : memref<4032x128xf32, #tpu.memory_space<vmem>>, vector<128x128xf32>
    %cst_246 = arith.constant dense<0.000000e+00> : vector<2x128xf32>
    %728 = tpu.matmul %726, %727, %cst_246 {dimension_numbers = #tpu.dot_dimension_numbers<[1], [0], [0], [1], [0, 0, 1, 1], [], []>} : vector<2x128xf32>, vector<128x128xf32>, vector<2x128xf32> -> vector<2x128xf32>
    %cst_247 = arith.constant 1.562500e-02 : f32
    %729 = vector.broadcast %cst_247 : f32 to vector<2x128xf32>
    %730 = arith.mulf %728, %729 : vector<2x128xf32>
    %731 = vector.extract_strided_slice %730 {offsets = [0, 0], sizes = [2, 64], strides = [1, 1]} : vector<2x128xf32> to vector<2x64xf32>
    %732 = vector.extract_strided_slice %730 {offsets = [0, 64], sizes = [2, 64], strides = [1, 1]} : vector<2x128xf32> to vector<2x64xf32>
    %733 = arith.mulf %731, %731 : vector<2x64xf32>
    %734 = arith.subf %732, %733 : vector<2x64xf32>
    %cst_248 = arith.constant 0.000000e+00 : f32
    %735 = vector.broadcast %cst_248 : f32 to vector<2x64xf32>
    %736 = arith.maximumf %734, %735 : vector<2x64xf32>
    %cst_249 = arith.constant 9.99999974E-6 : f32
    %737 = vector.broadcast %cst_249 : f32 to vector<2x64xf32>
    %738 = arith.addf %736, %737 : vector<2x64xf32>
    %739 = math.rsqrt %738 : vector<2x64xf32>
    %c1480 = arith.constant 1480 : index
    %c0_250 = arith.constant 0 : index
    %740 = vector.load %arg2[%c1480, %c0_250] : memref<4032x128xf32, #tpu.memory_space<vmem>>, vector<1x64xf32>
    %741 = vector.broadcast %740 : vector<1x64xf32> to vector<2x64xf32>
    %742 = arith.mulf %739, %741 : vector<2x64xf32>
    %c1488 = arith.constant 1488 : index
    %c0_251 = arith.constant 0 : index
    %743 = vector.load %arg2[%c1488, %c0_251] : memref<4032x128xf32, #tpu.memory_space<vmem>>, vector<1x64xf32>
    %744 = arith.mulf %731, %742 : vector<2x64xf32>
    %745 = vector.broadcast %743 : vector<1x64xf32> to vector<2x64xf32>
    %746 = arith.subf %745, %744 : vector<2x64xf32>
    %c3480_252 = arith.constant 3480 : index
    %c0_253 = arith.constant 0 : index
    %747 = vector.load %arg2[%c3480_252, %c0_253] : memref<4032x128xf32, #tpu.memory_space<vmem>>, vector<16x2xf32>
    %748 = vector.extract_strided_slice %747 {offsets = [0, 0], sizes = [16, 1], strides = [1, 1]} : vector<16x2xf32> to vector<16x1xf32>
    %749 = vector.extract_strided_slice %742 {offsets = [0, 0], sizes = [1, 64], strides = [1, 1]} : vector<2x64xf32> to vector<1x64xf32>
    %750 = vector.broadcast %748 : vector<16x1xf32> to vector<16x64xf32>
    %751 = vector.broadcast %749 : vector<1x64xf32> to vector<16x64xf32>
    %752 = arith.mulf %750, %751 : vector<16x64xf32>
    %753 = vector.extract_strided_slice %747 {offsets = [0, 1], sizes = [16, 1], strides = [1, 1]} : vector<16x2xf32> to vector<16x1xf32>
    %754 = vector.extract_strided_slice %742 {offsets = [1, 0], sizes = [1, 64], strides = [1, 1]} : vector<2x64xf32> to vector<1x64xf32>
    %755 = vector.broadcast %753 : vector<16x1xf32> to vector<16x64xf32>
    %756 = vector.broadcast %754 : vector<1x64xf32> to vector<16x64xf32>
    %757 = arith.mulf %755, %756 : vector<16x64xf32>
    %758 = arith.addf %752, %757 : vector<16x64xf32>
    %759 = arith.mulf %722, %758 : vector<16x64xf32>
    %c3480_254 = arith.constant 3480 : index
    %c0_255 = arith.constant 0 : index
    %760 = vector.load %arg2[%c3480_254, %c0_255] : memref<4032x128xf32, #tpu.memory_space<vmem>>, vector<16x2xf32>
    %761 = vector.extract_strided_slice %760 {offsets = [0, 0], sizes = [16, 1], strides = [1, 1]} : vector<16x2xf32> to vector<16x1xf32>
    %762 = vector.extract_strided_slice %746 {offsets = [0, 0], sizes = [1, 64], strides = [1, 1]} : vector<2x64xf32> to vector<1x64xf32>
    %763 = vector.broadcast %761 : vector<16x1xf32> to vector<16x64xf32>
    %764 = vector.broadcast %762 : vector<1x64xf32> to vector<16x64xf32>
    %765 = arith.mulf %763, %764 : vector<16x64xf32>
    %766 = vector.extract_strided_slice %760 {offsets = [0, 1], sizes = [16, 1], strides = [1, 1]} : vector<16x2xf32> to vector<16x1xf32>
    %767 = vector.extract_strided_slice %746 {offsets = [1, 0], sizes = [1, 64], strides = [1, 1]} : vector<2x64xf32> to vector<1x64xf32>
    %768 = vector.broadcast %766 : vector<16x1xf32> to vector<16x64xf32>
    %769 = vector.broadcast %767 : vector<1x64xf32> to vector<16x64xf32>
    %770 = arith.mulf %768, %769 : vector<16x64xf32>
    %771 = arith.addf %765, %770 : vector<16x64xf32>
    %772 = arith.addf %759, %771 : vector<16x64xf32>
    %773 = arith.negf %772 : vector<16x64xf32>
    %774 = math.exp %773 : vector<16x64xf32>
    %cst_256 = arith.constant 1.000000e+00 : f32
    %775 = vector.broadcast %cst_256 : f32 to vector<16x64xf32>
    %776 = arith.addf %775, %774 : vector<16x64xf32>
    %777 = arith.divf %775, %776 : vector<16x64xf32>
    %778 = arith.mulf %772, %777 : vector<16x64xf32>
    %c32 = arith.constant 32 : index
    %c0_257 = arith.constant 0 : index
    %779 = vector.load %arg1[%c32, %c0_257] : memref<64x128xf32, #tpu.memory_space<vmem>>, vector<2x64xf32>
    %c3480_258 = arith.constant 3480 : index
    %c0_259 = arith.constant 0 : index
    %780 = vector.load %arg2[%c3480_258, %c0_259] : memref<4032x128xf32, #tpu.memory_space<vmem>>, vector<16x2xf32>
    %781 = vector.extract_strided_slice %780 {offsets = [0, 0], sizes = [16, 1], strides = [1, 1]} : vector<16x2xf32> to vector<16x1xf32>
    %782 = vector.extract_strided_slice %779 {offsets = [0, 0], sizes = [1, 64], strides = [1, 1]} : vector<2x64xf32> to vector<1x64xf32>
    %783 = vector.broadcast %781 : vector<16x1xf32> to vector<16x64xf32>
    %784 = vector.broadcast %782 : vector<1x64xf32> to vector<16x64xf32>
    %785 = arith.mulf %783, %784 : vector<16x64xf32>
    %786 = vector.extract_strided_slice %780 {offsets = [0, 1], sizes = [16, 1], strides = [1, 1]} : vector<16x2xf32> to vector<16x1xf32>
    %787 = vector.extract_strided_slice %779 {offsets = [1, 0], sizes = [1, 64], strides = [1, 1]} : vector<2x64xf32> to vector<1x64xf32>
    %788 = vector.broadcast %786 : vector<16x1xf32> to vector<16x64xf32>
    %789 = vector.broadcast %787 : vector<1x64xf32> to vector<16x64xf32>
    %790 = arith.mulf %788, %789 : vector<16x64xf32>
    %791 = arith.addf %785, %790 : vector<16x64xf32>
    %792 = arith.addf %778, %791 : vector<16x64xf32>
    %c1496 = arith.constant 1496 : index
    %c0_260 = arith.constant 0 : index
    %793 = vector.load %arg2[%c1496, %c0_260] : memref<4032x128xf32, #tpu.memory_space<vmem>>, vector<192x64xf32>
    %c1688 = arith.constant 1688 : index
    %c0_261 = arith.constant 0 : index
    %794 = vector.load %arg2[%c1688, %c0_261] : memref<4032x128xf32, #tpu.memory_space<vmem>>, vector<1x64xf32>
    %c1_i32_262 = arith.constant 1 : i32
    %795 = tpu.dynamic_rotate %792 by %c1_i32_262 dim 0 : vector<16x64xf32>, i32 -> vector<16x64xf32>
    %c3496_263 = arith.constant 3496 : index
    %c0_264 = arith.constant 0 : index
    %796 = vector.load %arg2[%c3496_263, %c0_264] : memref<4032x128xf32, #tpu.memory_space<vmem>>, vector<16x1xf32>
    %797 = vector.broadcast %796 : vector<16x1xf32> to vector<16x64xf32>
    %798 = arith.mulf %795, %797 : vector<16x64xf32>
    %c15_i32_265 = arith.constant 15 : i32
    %799 = tpu.dynamic_rotate %792 by %c15_i32_265 dim 0 : vector<16x64xf32>, i32 -> vector<16x64xf32>
    %c3512_266 = arith.constant 3512 : index
    %c0_267 = arith.constant 0 : index
    %800 = vector.load %arg2[%c3512_266, %c0_267] : memref<4032x128xf32, #tpu.memory_space<vmem>>, vector<16x1xf32>
    %801 = vector.broadcast %800 : vector<16x1xf32> to vector<16x64xf32>
    %802 = arith.mulf %799, %801 : vector<16x64xf32>
    %803 = tpu.concatenate %798, %792, %802 in 1 : vector<16x64xf32>, vector<16x64xf32>, vector<16x64xf32> -> vector<16x192xf32>
    %cst_268 = arith.constant dense<0.000000e+00> : vector<16x64xf32>
    %804 = tpu.matmul %803, %793, %cst_268 {dimension_numbers = #tpu.dot_dimension_numbers<[1], [0], [0], [1], [0, 0, 1, 1], [], []>} : vector<16x192xf32>, vector<192x64xf32>, vector<16x64xf32> -> vector<16x64xf32>
    %805 = vector.broadcast %794 : vector<1x64xf32> to vector<16x64xf32>
    %806 = arith.addf %804, %805 : vector<16x64xf32>
    %c3472_269 = arith.constant 3472 : index
    %c0_270 = arith.constant 0 : index
    %807 = vector.load %arg2[%c3472_269, %c0_270] : memref<4032x128xf32, #tpu.memory_space<vmem>>, vector<2x16xf32>
    %808 = arith.mulf %806, %806 : vector<16x64xf32>
    %809 = tpu.concatenate %806, %808 in 1 : vector<16x64xf32>, vector<16x64xf32> -> vector<16x128xf32>
    %cst_271 = arith.constant dense<0.000000e+00> : vector<2x128xf32>
    %810 = tpu.matmul %807, %809, %cst_271 {dimension_numbers = #tpu.dot_dimension_numbers<[1], [0], [0], [1], [0, 0, 1, 1], [], []>} : vector<2x16xf32>, vector<16x128xf32>, vector<2x128xf32> -> vector<2x128xf32>
    %c3856_272 = arith.constant 3856 : index
    %c0_273 = arith.constant 0 : index
    %811 = vector.load %arg2[%c3856_272, %c0_273] : memref<4032x128xf32, #tpu.memory_space<vmem>>, vector<128x128xf32>
    %cst_274 = arith.constant dense<0.000000e+00> : vector<2x128xf32>
    %812 = tpu.matmul %810, %811, %cst_274 {dimension_numbers = #tpu.dot_dimension_numbers<[1], [0], [0], [1], [0, 0, 1, 1], [], []>} : vector<2x128xf32>, vector<128x128xf32>, vector<2x128xf32> -> vector<2x128xf32>
    %cst_275 = arith.constant 1.562500e-02 : f32
    %813 = vector.broadcast %cst_275 : f32 to vector<2x128xf32>
    %814 = arith.mulf %812, %813 : vector<2x128xf32>
    %815 = vector.extract_strided_slice %814 {offsets = [0, 0], sizes = [2, 64], strides = [1, 1]} : vector<2x128xf32> to vector<2x64xf32>
    %816 = vector.extract_strided_slice %814 {offsets = [0, 64], sizes = [2, 64], strides = [1, 1]} : vector<2x128xf32> to vector<2x64xf32>
    %817 = arith.mulf %815, %815 : vector<2x64xf32>
    %818 = arith.subf %816, %817 : vector<2x64xf32>
    %cst_276 = arith.constant 0.000000e+00 : f32
    %819 = vector.broadcast %cst_276 : f32 to vector<2x64xf32>
    %820 = arith.maximumf %818, %819 : vector<2x64xf32>
    %cst_277 = arith.constant 9.99999974E-6 : f32
    %821 = vector.broadcast %cst_277 : f32 to vector<2x64xf32>
    %822 = arith.addf %820, %821 : vector<2x64xf32>
    %823 = math.rsqrt %822 : vector<2x64xf32>
    %c1696 = arith.constant 1696 : index
    %c0_278 = arith.constant 0 : index
    %824 = vector.load %arg2[%c1696, %c0_278] : memref<4032x128xf32, #tpu.memory_space<vmem>>, vector<1x64xf32>
    %825 = vector.broadcast %824 : vector<1x64xf32> to vector<2x64xf32>
    %826 = arith.mulf %823, %825 : vector<2x64xf32>
    %c1704 = arith.constant 1704 : index
    %c0_279 = arith.constant 0 : index
    %827 = vector.load %arg2[%c1704, %c0_279] : memref<4032x128xf32, #tpu.memory_space<vmem>>, vector<1x64xf32>
    %828 = arith.mulf %815, %826 : vector<2x64xf32>
    %829 = vector.broadcast %827 : vector<1x64xf32> to vector<2x64xf32>
    %830 = arith.subf %829, %828 : vector<2x64xf32>
    %c3480_280 = arith.constant 3480 : index
    %c0_281 = arith.constant 0 : index
    %831 = vector.load %arg2[%c3480_280, %c0_281] : memref<4032x128xf32, #tpu.memory_space<vmem>>, vector<16x2xf32>
    %832 = vector.extract_strided_slice %831 {offsets = [0, 0], sizes = [16, 1], strides = [1, 1]} : vector<16x2xf32> to vector<16x1xf32>
    %833 = vector.extract_strided_slice %826 {offsets = [0, 0], sizes = [1, 64], strides = [1, 1]} : vector<2x64xf32> to vector<1x64xf32>
    %834 = vector.broadcast %832 : vector<16x1xf32> to vector<16x64xf32>
    %835 = vector.broadcast %833 : vector<1x64xf32> to vector<16x64xf32>
    %836 = arith.mulf %834, %835 : vector<16x64xf32>
    %837 = vector.extract_strided_slice %831 {offsets = [0, 1], sizes = [16, 1], strides = [1, 1]} : vector<16x2xf32> to vector<16x1xf32>
    %838 = vector.extract_strided_slice %826 {offsets = [1, 0], sizes = [1, 64], strides = [1, 1]} : vector<2x64xf32> to vector<1x64xf32>
    %839 = vector.broadcast %837 : vector<16x1xf32> to vector<16x64xf32>
    %840 = vector.broadcast %838 : vector<1x64xf32> to vector<16x64xf32>
    %841 = arith.mulf %839, %840 : vector<16x64xf32>
    %842 = arith.addf %836, %841 : vector<16x64xf32>
    %843 = arith.mulf %806, %842 : vector<16x64xf32>
    %c3480_282 = arith.constant 3480 : index
    %c0_283 = arith.constant 0 : index
    %844 = vector.load %arg2[%c3480_282, %c0_283] : memref<4032x128xf32, #tpu.memory_space<vmem>>, vector<16x2xf32>
    %845 = vector.extract_strided_slice %844 {offsets = [0, 0], sizes = [16, 1], strides = [1, 1]} : vector<16x2xf32> to vector<16x1xf32>
    %846 = vector.extract_strided_slice %830 {offsets = [0, 0], sizes = [1, 64], strides = [1, 1]} : vector<2x64xf32> to vector<1x64xf32>
    %847 = vector.broadcast %845 : vector<16x1xf32> to vector<16x64xf32>
    %848 = vector.broadcast %846 : vector<1x64xf32> to vector<16x64xf32>
    %849 = arith.mulf %847, %848 : vector<16x64xf32>
    %850 = vector.extract_strided_slice %844 {offsets = [0, 1], sizes = [16, 1], strides = [1, 1]} : vector<16x2xf32> to vector<16x1xf32>
    %851 = vector.extract_strided_slice %830 {offsets = [1, 0], sizes = [1, 64], strides = [1, 1]} : vector<2x64xf32> to vector<1x64xf32>
    %852 = vector.broadcast %850 : vector<16x1xf32> to vector<16x64xf32>
    %853 = vector.broadcast %851 : vector<1x64xf32> to vector<16x64xf32>
    %854 = arith.mulf %852, %853 : vector<16x64xf32>
    %855 = arith.addf %849, %854 : vector<16x64xf32>
    %856 = arith.addf %843, %855 : vector<16x64xf32>
    %857 = arith.negf %856 : vector<16x64xf32>
    %858 = math.exp %857 : vector<16x64xf32>
    %cst_284 = arith.constant 1.000000e+00 : f32
    %859 = vector.broadcast %cst_284 : f32 to vector<16x64xf32>
    %860 = arith.addf %859, %858 : vector<16x64xf32>
    %861 = arith.divf %859, %860 : vector<16x64xf32>
    %862 = arith.mulf %856, %861 : vector<16x64xf32>
    %863 = arith.addf %862, %708 : vector<16x64xf32>
    %c1712 = arith.constant 1712 : index
    %c0_285 = arith.constant 0 : index
    %864 = vector.load %arg2[%c1712, %c0_285] : memref<4032x128xf32, #tpu.memory_space<vmem>>, vector<192x64xf32>
    %c1904 = arith.constant 1904 : index
    %c0_286 = arith.constant 0 : index
    %865 = vector.load %arg2[%c1904, %c0_286] : memref<4032x128xf32, #tpu.memory_space<vmem>>, vector<1x64xf32>
    %c1_i32_287 = arith.constant 1 : i32
    %866 = tpu.dynamic_rotate %863 by %c1_i32_287 dim 0 : vector<16x64xf32>, i32 -> vector<16x64xf32>
    %c3496_288 = arith.constant 3496 : index
    %c0_289 = arith.constant 0 : index
    %867 = vector.load %arg2[%c3496_288, %c0_289] : memref<4032x128xf32, #tpu.memory_space<vmem>>, vector<16x1xf32>
    %868 = vector.broadcast %867 : vector<16x1xf32> to vector<16x64xf32>
    %869 = arith.mulf %866, %868 : vector<16x64xf32>
    %c15_i32_290 = arith.constant 15 : i32
    %870 = tpu.dynamic_rotate %863 by %c15_i32_290 dim 0 : vector<16x64xf32>, i32 -> vector<16x64xf32>
    %c3512_291 = arith.constant 3512 : index
    %c0_292 = arith.constant 0 : index
    %871 = vector.load %arg2[%c3512_291, %c0_292] : memref<4032x128xf32, #tpu.memory_space<vmem>>, vector<16x1xf32>
    %872 = vector.broadcast %871 : vector<16x1xf32> to vector<16x64xf32>
    %873 = arith.mulf %870, %872 : vector<16x64xf32>
    %874 = tpu.concatenate %869, %863, %873 in 1 : vector<16x64xf32>, vector<16x64xf32>, vector<16x64xf32> -> vector<16x192xf32>
    %cst_293 = arith.constant dense<0.000000e+00> : vector<16x64xf32>
    %875 = tpu.matmul %874, %864, %cst_293 {dimension_numbers = #tpu.dot_dimension_numbers<[1], [0], [0], [1], [0, 0, 1, 1], [], []>} : vector<16x192xf32>, vector<192x64xf32>, vector<16x64xf32> -> vector<16x64xf32>
    %876 = vector.broadcast %865 : vector<1x64xf32> to vector<16x64xf32>
    %877 = arith.addf %875, %876 : vector<16x64xf32>
    %c3472_294 = arith.constant 3472 : index
    %c0_295 = arith.constant 0 : index
    %878 = vector.load %arg2[%c3472_294, %c0_295] : memref<4032x128xf32, #tpu.memory_space<vmem>>, vector<2x16xf32>
    %879 = arith.mulf %877, %877 : vector<16x64xf32>
    %880 = tpu.concatenate %877, %879 in 1 : vector<16x64xf32>, vector<16x64xf32> -> vector<16x128xf32>
    %cst_296 = arith.constant dense<0.000000e+00> : vector<2x128xf32>
    %881 = tpu.matmul %878, %880, %cst_296 {dimension_numbers = #tpu.dot_dimension_numbers<[1], [0], [0], [1], [0, 0, 1, 1], [], []>} : vector<2x16xf32>, vector<16x128xf32>, vector<2x128xf32> -> vector<2x128xf32>
    %c3856_297 = arith.constant 3856 : index
    %c0_298 = arith.constant 0 : index
    %882 = vector.load %arg2[%c3856_297, %c0_298] : memref<4032x128xf32, #tpu.memory_space<vmem>>, vector<128x128xf32>
    %cst_299 = arith.constant dense<0.000000e+00> : vector<2x128xf32>
    %883 = tpu.matmul %881, %882, %cst_299 {dimension_numbers = #tpu.dot_dimension_numbers<[1], [0], [0], [1], [0, 0, 1, 1], [], []>} : vector<2x128xf32>, vector<128x128xf32>, vector<2x128xf32> -> vector<2x128xf32>
    %cst_300 = arith.constant 1.562500e-02 : f32
    %884 = vector.broadcast %cst_300 : f32 to vector<2x128xf32>
    %885 = arith.mulf %883, %884 : vector<2x128xf32>
    %886 = vector.extract_strided_slice %885 {offsets = [0, 0], sizes = [2, 64], strides = [1, 1]} : vector<2x128xf32> to vector<2x64xf32>
    %887 = vector.extract_strided_slice %885 {offsets = [0, 64], sizes = [2, 64], strides = [1, 1]} : vector<2x128xf32> to vector<2x64xf32>
    %888 = arith.mulf %886, %886 : vector<2x64xf32>
    %889 = arith.subf %887, %888 : vector<2x64xf32>
    %cst_301 = arith.constant 0.000000e+00 : f32
    %890 = vector.broadcast %cst_301 : f32 to vector<2x64xf32>
    %891 = arith.maximumf %889, %890 : vector<2x64xf32>
    %cst_302 = arith.constant 9.99999974E-6 : f32
    %892 = vector.broadcast %cst_302 : f32 to vector<2x64xf32>
    %893 = arith.addf %891, %892 : vector<2x64xf32>
    %894 = math.rsqrt %893 : vector<2x64xf32>
    %c1912 = arith.constant 1912 : index
    %c0_303 = arith.constant 0 : index
    %895 = vector.load %arg2[%c1912, %c0_303] : memref<4032x128xf32, #tpu.memory_space<vmem>>, vector<1x64xf32>
    %896 = vector.broadcast %895 : vector<1x64xf32> to vector<2x64xf32>
    %897 = arith.mulf %894, %896 : vector<2x64xf32>
    %c1920 = arith.constant 1920 : index
    %c0_304 = arith.constant 0 : index
    %898 = vector.load %arg2[%c1920, %c0_304] : memref<4032x128xf32, #tpu.memory_space<vmem>>, vector<1x64xf32>
    %899 = arith.mulf %886, %897 : vector<2x64xf32>
    %900 = vector.broadcast %898 : vector<1x64xf32> to vector<2x64xf32>
    %901 = arith.subf %900, %899 : vector<2x64xf32>
    %c3480_305 = arith.constant 3480 : index
    %c0_306 = arith.constant 0 : index
    %902 = vector.load %arg2[%c3480_305, %c0_306] : memref<4032x128xf32, #tpu.memory_space<vmem>>, vector<16x2xf32>
    %903 = vector.extract_strided_slice %902 {offsets = [0, 0], sizes = [16, 1], strides = [1, 1]} : vector<16x2xf32> to vector<16x1xf32>
    %904 = vector.extract_strided_slice %897 {offsets = [0, 0], sizes = [1, 64], strides = [1, 1]} : vector<2x64xf32> to vector<1x64xf32>
    %905 = vector.broadcast %903 : vector<16x1xf32> to vector<16x64xf32>
    %906 = vector.broadcast %904 : vector<1x64xf32> to vector<16x64xf32>
    %907 = arith.mulf %905, %906 : vector<16x64xf32>
    %908 = vector.extract_strided_slice %902 {offsets = [0, 1], sizes = [16, 1], strides = [1, 1]} : vector<16x2xf32> to vector<16x1xf32>
    %909 = vector.extract_strided_slice %897 {offsets = [1, 0], sizes = [1, 64], strides = [1, 1]} : vector<2x64xf32> to vector<1x64xf32>
    %910 = vector.broadcast %908 : vector<16x1xf32> to vector<16x64xf32>
    %911 = vector.broadcast %909 : vector<1x64xf32> to vector<16x64xf32>
    %912 = arith.mulf %910, %911 : vector<16x64xf32>
    %913 = arith.addf %907, %912 : vector<16x64xf32>
    %914 = arith.mulf %877, %913 : vector<16x64xf32>
    %c3480_307 = arith.constant 3480 : index
    %c0_308 = arith.constant 0 : index
    %915 = vector.load %arg2[%c3480_307, %c0_308] : memref<4032x128xf32, #tpu.memory_space<vmem>>, vector<16x2xf32>
    %916 = vector.extract_strided_slice %915 {offsets = [0, 0], sizes = [16, 1], strides = [1, 1]} : vector<16x2xf32> to vector<16x1xf32>
    %917 = vector.extract_strided_slice %901 {offsets = [0, 0], sizes = [1, 64], strides = [1, 1]} : vector<2x64xf32> to vector<1x64xf32>
    %918 = vector.broadcast %916 : vector<16x1xf32> to vector<16x64xf32>
    %919 = vector.broadcast %917 : vector<1x64xf32> to vector<16x64xf32>
    %920 = arith.mulf %918, %919 : vector<16x64xf32>
    %921 = vector.extract_strided_slice %915 {offsets = [0, 1], sizes = [16, 1], strides = [1, 1]} : vector<16x2xf32> to vector<16x1xf32>
    %922 = vector.extract_strided_slice %901 {offsets = [1, 0], sizes = [1, 64], strides = [1, 1]} : vector<2x64xf32> to vector<1x64xf32>
    %923 = vector.broadcast %921 : vector<16x1xf32> to vector<16x64xf32>
    %924 = vector.broadcast %922 : vector<1x64xf32> to vector<16x64xf32>
    %925 = arith.mulf %923, %924 : vector<16x64xf32>
    %926 = arith.addf %920, %925 : vector<16x64xf32>
    %927 = arith.addf %914, %926 : vector<16x64xf32>
    %928 = arith.negf %927 : vector<16x64xf32>
    %929 = math.exp %928 : vector<16x64xf32>
    %cst_309 = arith.constant 1.000000e+00 : f32
    %930 = vector.broadcast %cst_309 : f32 to vector<16x64xf32>
    %931 = arith.addf %930, %929 : vector<16x64xf32>
    %932 = arith.divf %930, %931 : vector<16x64xf32>
    %933 = arith.mulf %927, %932 : vector<16x64xf32>
    %c40 = arith.constant 40 : index
    %c0_310 = arith.constant 0 : index
    %934 = vector.load %arg1[%c40, %c0_310] : memref<64x128xf32, #tpu.memory_space<vmem>>, vector<2x64xf32>
    %c3480_311 = arith.constant 3480 : index
    %c0_312 = arith.constant 0 : index
    %935 = vector.load %arg2[%c3480_311, %c0_312] : memref<4032x128xf32, #tpu.memory_space<vmem>>, vector<16x2xf32>
    %936 = vector.extract_strided_slice %935 {offsets = [0, 0], sizes = [16, 1], strides = [1, 1]} : vector<16x2xf32> to vector<16x1xf32>
    %937 = vector.extract_strided_slice %934 {offsets = [0, 0], sizes = [1, 64], strides = [1, 1]} : vector<2x64xf32> to vector<1x64xf32>
    %938 = vector.broadcast %936 : vector<16x1xf32> to vector<16x64xf32>
    %939 = vector.broadcast %937 : vector<1x64xf32> to vector<16x64xf32>
    %940 = arith.mulf %938, %939 : vector<16x64xf32>
    %941 = vector.extract_strided_slice %935 {offsets = [0, 1], sizes = [16, 1], strides = [1, 1]} : vector<16x2xf32> to vector<16x1xf32>
    %942 = vector.extract_strided_slice %934 {offsets = [1, 0], sizes = [1, 64], strides = [1, 1]} : vector<2x64xf32> to vector<1x64xf32>
    %943 = vector.broadcast %941 : vector<16x1xf32> to vector<16x64xf32>
    %944 = vector.broadcast %942 : vector<1x64xf32> to vector<16x64xf32>
    %945 = arith.mulf %943, %944 : vector<16x64xf32>
    %946 = arith.addf %940, %945 : vector<16x64xf32>
    %947 = arith.addf %933, %946 : vector<16x64xf32>
    %c1928 = arith.constant 1928 : index
    %c0_313 = arith.constant 0 : index
    %948 = vector.load %arg2[%c1928, %c0_313] : memref<4032x128xf32, #tpu.memory_space<vmem>>, vector<192x64xf32>
    %c2120 = arith.constant 2120 : index
    %c0_314 = arith.constant 0 : index
    %949 = vector.load %arg2[%c2120, %c0_314] : memref<4032x128xf32, #tpu.memory_space<vmem>>, vector<1x64xf32>
    %c1_i32_315 = arith.constant 1 : i32
    %950 = tpu.dynamic_rotate %947 by %c1_i32_315 dim 0 : vector<16x64xf32>, i32 -> vector<16x64xf32>
    %c3496_316 = arith.constant 3496 : index
    %c0_317 = arith.constant 0 : index
    %951 = vector.load %arg2[%c3496_316, %c0_317] : memref<4032x128xf32, #tpu.memory_space<vmem>>, vector<16x1xf32>
    %952 = vector.broadcast %951 : vector<16x1xf32> to vector<16x64xf32>
    %953 = arith.mulf %950, %952 : vector<16x64xf32>
    %c15_i32_318 = arith.constant 15 : i32
    %954 = tpu.dynamic_rotate %947 by %c15_i32_318 dim 0 : vector<16x64xf32>, i32 -> vector<16x64xf32>
    %c3512_319 = arith.constant 3512 : index
    %c0_320 = arith.constant 0 : index
    %955 = vector.load %arg2[%c3512_319, %c0_320] : memref<4032x128xf32, #tpu.memory_space<vmem>>, vector<16x1xf32>
    %956 = vector.broadcast %955 : vector<16x1xf32> to vector<16x64xf32>
    %957 = arith.mulf %954, %956 : vector<16x64xf32>
    %958 = tpu.concatenate %953, %947, %957 in 1 : vector<16x64xf32>, vector<16x64xf32>, vector<16x64xf32> -> vector<16x192xf32>
    %cst_321 = arith.constant dense<0.000000e+00> : vector<16x64xf32>
    %959 = tpu.matmul %958, %948, %cst_321 {dimension_numbers = #tpu.dot_dimension_numbers<[1], [0], [0], [1], [0, 0, 1, 1], [], []>} : vector<16x192xf32>, vector<192x64xf32>, vector<16x64xf32> -> vector<16x64xf32>
    %960 = vector.broadcast %949 : vector<1x64xf32> to vector<16x64xf32>
    %961 = arith.addf %959, %960 : vector<16x64xf32>
    %c3472_322 = arith.constant 3472 : index
    %c0_323 = arith.constant 0 : index
    %962 = vector.load %arg2[%c3472_322, %c0_323] : memref<4032x128xf32, #tpu.memory_space<vmem>>, vector<2x16xf32>
    %963 = arith.mulf %961, %961 : vector<16x64xf32>
    %964 = tpu.concatenate %961, %963 in 1 : vector<16x64xf32>, vector<16x64xf32> -> vector<16x128xf32>
    %cst_324 = arith.constant dense<0.000000e+00> : vector<2x128xf32>
    %965 = tpu.matmul %962, %964, %cst_324 {dimension_numbers = #tpu.dot_dimension_numbers<[1], [0], [0], [1], [0, 0, 1, 1], [], []>} : vector<2x16xf32>, vector<16x128xf32>, vector<2x128xf32> -> vector<2x128xf32>
    %c3856_325 = arith.constant 3856 : index
    %c0_326 = arith.constant 0 : index
    %966 = vector.load %arg2[%c3856_325, %c0_326] : memref<4032x128xf32, #tpu.memory_space<vmem>>, vector<128x128xf32>
    %cst_327 = arith.constant dense<0.000000e+00> : vector<2x128xf32>
    %967 = tpu.matmul %965, %966, %cst_327 {dimension_numbers = #tpu.dot_dimension_numbers<[1], [0], [0], [1], [0, 0, 1, 1], [], []>} : vector<2x128xf32>, vector<128x128xf32>, vector<2x128xf32> -> vector<2x128xf32>
    %cst_328 = arith.constant 1.562500e-02 : f32
    %968 = vector.broadcast %cst_328 : f32 to vector<2x128xf32>
    %969 = arith.mulf %967, %968 : vector<2x128xf32>
    %970 = vector.extract_strided_slice %969 {offsets = [0, 0], sizes = [2, 64], strides = [1, 1]} : vector<2x128xf32> to vector<2x64xf32>
    %971 = vector.extract_strided_slice %969 {offsets = [0, 64], sizes = [2, 64], strides = [1, 1]} : vector<2x128xf32> to vector<2x64xf32>
    %972 = arith.mulf %970, %970 : vector<2x64xf32>
    %973 = arith.subf %971, %972 : vector<2x64xf32>
    %cst_329 = arith.constant 0.000000e+00 : f32
    %974 = vector.broadcast %cst_329 : f32 to vector<2x64xf32>
    %975 = arith.maximumf %973, %974 : vector<2x64xf32>
    %cst_330 = arith.constant 9.99999974E-6 : f32
    %976 = vector.broadcast %cst_330 : f32 to vector<2x64xf32>
    %977 = arith.addf %975, %976 : vector<2x64xf32>
    %978 = math.rsqrt %977 : vector<2x64xf32>
    %c2128 = arith.constant 2128 : index
    %c0_331 = arith.constant 0 : index
    %979 = vector.load %arg2[%c2128, %c0_331] : memref<4032x128xf32, #tpu.memory_space<vmem>>, vector<1x64xf32>
    %980 = vector.broadcast %979 : vector<1x64xf32> to vector<2x64xf32>
    %981 = arith.mulf %978, %980 : vector<2x64xf32>
    %c2136 = arith.constant 2136 : index
    %c0_332 = arith.constant 0 : index
    %982 = vector.load %arg2[%c2136, %c0_332] : memref<4032x128xf32, #tpu.memory_space<vmem>>, vector<1x64xf32>
    %983 = arith.mulf %970, %981 : vector<2x64xf32>
    %984 = vector.broadcast %982 : vector<1x64xf32> to vector<2x64xf32>
    %985 = arith.subf %984, %983 : vector<2x64xf32>
    %c3480_333 = arith.constant 3480 : index
    %c0_334 = arith.constant 0 : index
    %986 = vector.load %arg2[%c3480_333, %c0_334] : memref<4032x128xf32, #tpu.memory_space<vmem>>, vector<16x2xf32>
    %987 = vector.extract_strided_slice %986 {offsets = [0, 0], sizes = [16, 1], strides = [1, 1]} : vector<16x2xf32> to vector<16x1xf32>
    %988 = vector.extract_strided_slice %981 {offsets = [0, 0], sizes = [1, 64], strides = [1, 1]} : vector<2x64xf32> to vector<1x64xf32>
    %989 = vector.broadcast %987 : vector<16x1xf32> to vector<16x64xf32>
    %990 = vector.broadcast %988 : vector<1x64xf32> to vector<16x64xf32>
    %991 = arith.mulf %989, %990 : vector<16x64xf32>
    %992 = vector.extract_strided_slice %986 {offsets = [0, 1], sizes = [16, 1], strides = [1, 1]} : vector<16x2xf32> to vector<16x1xf32>
    %993 = vector.extract_strided_slice %981 {offsets = [1, 0], sizes = [1, 64], strides = [1, 1]} : vector<2x64xf32> to vector<1x64xf32>
    %994 = vector.broadcast %992 : vector<16x1xf32> to vector<16x64xf32>
    %995 = vector.broadcast %993 : vector<1x64xf32> to vector<16x64xf32>
    %996 = arith.mulf %994, %995 : vector<16x64xf32>
    %997 = arith.addf %991, %996 : vector<16x64xf32>
    %998 = arith.mulf %961, %997 : vector<16x64xf32>
    %c3480_335 = arith.constant 3480 : index
    %c0_336 = arith.constant 0 : index
    %999 = vector.load %arg2[%c3480_335, %c0_336] : memref<4032x128xf32, #tpu.memory_space<vmem>>, vector<16x2xf32>
    %1000 = vector.extract_strided_slice %999 {offsets = [0, 0], sizes = [16, 1], strides = [1, 1]} : vector<16x2xf32> to vector<16x1xf32>
    %1001 = vector.extract_strided_slice %985 {offsets = [0, 0], sizes = [1, 64], strides = [1, 1]} : vector<2x64xf32> to vector<1x64xf32>
    %1002 = vector.broadcast %1000 : vector<16x1xf32> to vector<16x64xf32>
    %1003 = vector.broadcast %1001 : vector<1x64xf32> to vector<16x64xf32>
    %1004 = arith.mulf %1002, %1003 : vector<16x64xf32>
    %1005 = vector.extract_strided_slice %999 {offsets = [0, 1], sizes = [16, 1], strides = [1, 1]} : vector<16x2xf32> to vector<16x1xf32>
    %1006 = vector.extract_strided_slice %985 {offsets = [1, 0], sizes = [1, 64], strides = [1, 1]} : vector<2x64xf32> to vector<1x64xf32>
    %1007 = vector.broadcast %1005 : vector<16x1xf32> to vector<16x64xf32>
    %1008 = vector.broadcast %1006 : vector<1x64xf32> to vector<16x64xf32>
    %1009 = arith.mulf %1007, %1008 : vector<16x64xf32>
    %1010 = arith.addf %1004, %1009 : vector<16x64xf32>
    %1011 = arith.addf %998, %1010 : vector<16x64xf32>
    %1012 = arith.negf %1011 : vector<16x64xf32>
    %1013 = math.exp %1012 : vector<16x64xf32>
    %cst_337 = arith.constant 1.000000e+00 : f32
    %1014 = vector.broadcast %cst_337 : f32 to vector<16x64xf32>
    %1015 = arith.addf %1014, %1013 : vector<16x64xf32>
    %1016 = arith.divf %1014, %1015 : vector<16x64xf32>
    %1017 = arith.mulf %1011, %1016 : vector<16x64xf32>
    %1018 = arith.addf %1017, %863 : vector<16x64xf32>
    %c2144 = arith.constant 2144 : index
    %c0_338 = arith.constant 0 : index
    %1019 = vector.load %arg2[%c2144, %c0_338] : memref<4032x128xf32, #tpu.memory_space<vmem>>, vector<384x32xf32>
    %c2528 = arith.constant 2528 : index
    %c0_339 = arith.constant 0 : index
    %1020 = vector.load %arg2[%c2528, %c0_339] : memref<4032x128xf32, #tpu.memory_space<vmem>>, vector<1x32xf32>
    %c1_i32_340 = arith.constant 1 : i32
    %1021 = tpu.dynamic_rotate %1018 by %c1_i32_340 dim 0 : vector<16x64xf32>, i32 -> vector<16x64xf32>
    %c3496_341 = arith.constant 3496 : index
    %c0_342 = arith.constant 0 : index
    %1022 = vector.load %arg2[%c3496_341, %c0_342] : memref<4032x128xf32, #tpu.memory_space<vmem>>, vector<16x1xf32>
    %1023 = vector.broadcast %1022 : vector<16x1xf32> to vector<16x64xf32>
    %1024 = arith.mulf %1021, %1023 : vector<16x64xf32>
    %c1_i32_343 = arith.constant 1 : i32
    %1025 = tpu.dynamic_rotate %708 by %c1_i32_343 dim 0 : vector<16x64xf32>, i32 -> vector<16x64xf32>
    %c3496_344 = arith.constant 3496 : index
    %c0_345 = arith.constant 0 : index
    %1026 = vector.load %arg2[%c3496_344, %c0_345] : memref<4032x128xf32, #tpu.memory_space<vmem>>, vector<16x1xf32>
    %1027 = vector.broadcast %1026 : vector<16x1xf32> to vector<16x64xf32>
    %1028 = arith.mulf %1025, %1027 : vector<16x64xf32>
    %c15_i32_346 = arith.constant 15 : i32
    %1029 = tpu.dynamic_rotate %1018 by %c15_i32_346 dim 0 : vector<16x64xf32>, i32 -> vector<16x64xf32>
    %c3512_347 = arith.constant 3512 : index
    %c0_348 = arith.constant 0 : index
    %1030 = vector.load %arg2[%c3512_347, %c0_348] : memref<4032x128xf32, #tpu.memory_space<vmem>>, vector<16x1xf32>
    %1031 = vector.broadcast %1030 : vector<16x1xf32> to vector<16x64xf32>
    %1032 = arith.mulf %1029, %1031 : vector<16x64xf32>
    %c15_i32_349 = arith.constant 15 : i32
    %1033 = tpu.dynamic_rotate %708 by %c15_i32_349 dim 0 : vector<16x64xf32>, i32 -> vector<16x64xf32>
    %c3512_350 = arith.constant 3512 : index
    %c0_351 = arith.constant 0 : index
    %1034 = vector.load %arg2[%c3512_350, %c0_351] : memref<4032x128xf32, #tpu.memory_space<vmem>>, vector<16x1xf32>
    %1035 = vector.broadcast %1034 : vector<16x1xf32> to vector<16x64xf32>
    %1036 = arith.mulf %1033, %1035 : vector<16x64xf32>
    %1037 = tpu.concatenate %1024, %1028, %1018, %708, %1032, %1036 in 1 : vector<16x64xf32>, vector<16x64xf32>, vector<16x64xf32>, vector<16x64xf32>, vector<16x64xf32>, vector<16x64xf32> -> vector<16x384xf32>
    %cst_352 = arith.constant dense<0.000000e+00> : vector<16x32xf32>
    %1038 = tpu.matmul %1037, %1019, %cst_352 {dimension_numbers = #tpu.dot_dimension_numbers<[1], [0], [0], [1], [0, 0, 1, 1], [], []>} : vector<16x384xf32>, vector<384x32xf32>, vector<16x32xf32> -> vector<16x32xf32>
    %1039 = vector.broadcast %1020 : vector<1x32xf32> to vector<16x32xf32>
    %1040 = arith.addf %1038, %1039 : vector<16x32xf32>
    %c3472_353 = arith.constant 3472 : index
    %c0_354 = arith.constant 0 : index
    %1041 = vector.load %arg2[%c3472_353, %c0_354] : memref<4032x128xf32, #tpu.memory_space<vmem>>, vector<2x16xf32>
    %1042 = arith.mulf %1040, %1040 : vector<16x32xf32>
    %1043 = tpu.concatenate %1040, %1042 in 1 : vector<16x32xf32>, vector<16x32xf32> -> vector<16x64xf32>
    %cst_355 = arith.constant dense<0.000000e+00> : vector<2x64xf32>
    %1044 = tpu.matmul %1041, %1043, %cst_355 {dimension_numbers = #tpu.dot_dimension_numbers<[1], [0], [0], [1], [0, 0, 1, 1], [], []>} : vector<2x16xf32>, vector<16x64xf32>, vector<2x64xf32> -> vector<2x64xf32>
    %c3792_356 = arith.constant 3792 : index
    %c0_357 = arith.constant 0 : index
    %1045 = vector.load %arg2[%c3792_356, %c0_357] : memref<4032x128xf32, #tpu.memory_space<vmem>>, vector<64x64xf32>
    %cst_358 = arith.constant dense<0.000000e+00> : vector<2x64xf32>
    %1046 = tpu.matmul %1044, %1045, %cst_358 {dimension_numbers = #tpu.dot_dimension_numbers<[1], [0], [0], [1], [0, 0, 1, 1], [], []>} : vector<2x64xf32>, vector<64x64xf32>, vector<2x64xf32> -> vector<2x64xf32>
    %cst_359 = arith.constant 3.125000e-02 : f32
    %1047 = vector.broadcast %cst_359 : f32 to vector<2x64xf32>
    %1048 = arith.mulf %1046, %1047 : vector<2x64xf32>
    %1049 = vector.extract_strided_slice %1048 {offsets = [0, 0], sizes = [2, 32], strides = [1, 1]} : vector<2x64xf32> to vector<2x32xf32>
    %1050 = vector.extract_strided_slice %1048 {offsets = [0, 32], sizes = [2, 32], strides = [1, 1]} : vector<2x64xf32> to vector<2x32xf32>
    %1051 = arith.mulf %1049, %1049 : vector<2x32xf32>
    %1052 = arith.subf %1050, %1051 : vector<2x32xf32>
    %cst_360 = arith.constant 0.000000e+00 : f32
    %1053 = vector.broadcast %cst_360 : f32 to vector<2x32xf32>
    %1054 = arith.maximumf %1052, %1053 : vector<2x32xf32>
    %cst_361 = arith.constant 9.99999974E-6 : f32
    %1055 = vector.broadcast %cst_361 : f32 to vector<2x32xf32>
    %1056 = arith.addf %1054, %1055 : vector<2x32xf32>
    %1057 = math.rsqrt %1056 : vector<2x32xf32>
    %c2536 = arith.constant 2536 : index
    %c0_362 = arith.constant 0 : index
    %1058 = vector.load %arg2[%c2536, %c0_362] : memref<4032x128xf32, #tpu.memory_space<vmem>>, vector<1x32xf32>
    %1059 = vector.broadcast %1058 : vector<1x32xf32> to vector<2x32xf32>
    %1060 = arith.mulf %1057, %1059 : vector<2x32xf32>
    %c2544 = arith.constant 2544 : index
    %c0_363 = arith.constant 0 : index
    %1061 = vector.load %arg2[%c2544, %c0_363] : memref<4032x128xf32, #tpu.memory_space<vmem>>, vector<1x32xf32>
    %1062 = arith.mulf %1049, %1060 : vector<2x32xf32>
    %1063 = vector.broadcast %1061 : vector<1x32xf32> to vector<2x32xf32>
    %1064 = arith.subf %1063, %1062 : vector<2x32xf32>
    %c3480_364 = arith.constant 3480 : index
    %c0_365 = arith.constant 0 : index
    %1065 = vector.load %arg2[%c3480_364, %c0_365] : memref<4032x128xf32, #tpu.memory_space<vmem>>, vector<16x2xf32>
    %1066 = vector.extract_strided_slice %1065 {offsets = [0, 0], sizes = [16, 1], strides = [1, 1]} : vector<16x2xf32> to vector<16x1xf32>
    %1067 = vector.extract_strided_slice %1060 {offsets = [0, 0], sizes = [1, 32], strides = [1, 1]} : vector<2x32xf32> to vector<1x32xf32>
    %1068 = vector.broadcast %1066 : vector<16x1xf32> to vector<16x32xf32>
    %1069 = vector.broadcast %1067 : vector<1x32xf32> to vector<16x32xf32>
    %1070 = arith.mulf %1068, %1069 : vector<16x32xf32>
    %1071 = vector.extract_strided_slice %1065 {offsets = [0, 1], sizes = [16, 1], strides = [1, 1]} : vector<16x2xf32> to vector<16x1xf32>
    %1072 = vector.extract_strided_slice %1060 {offsets = [1, 0], sizes = [1, 32], strides = [1, 1]} : vector<2x32xf32> to vector<1x32xf32>
    %1073 = vector.broadcast %1071 : vector<16x1xf32> to vector<16x32xf32>
    %1074 = vector.broadcast %1072 : vector<1x32xf32> to vector<16x32xf32>
    %1075 = arith.mulf %1073, %1074 : vector<16x32xf32>
    %1076 = arith.addf %1070, %1075 : vector<16x32xf32>
    %1077 = arith.mulf %1040, %1076 : vector<16x32xf32>
    %c3480_366 = arith.constant 3480 : index
    %c0_367 = arith.constant 0 : index
    %1078 = vector.load %arg2[%c3480_366, %c0_367] : memref<4032x128xf32, #tpu.memory_space<vmem>>, vector<16x2xf32>
    %1079 = vector.extract_strided_slice %1078 {offsets = [0, 0], sizes = [16, 1], strides = [1, 1]} : vector<16x2xf32> to vector<16x1xf32>
    %1080 = vector.extract_strided_slice %1064 {offsets = [0, 0], sizes = [1, 32], strides = [1, 1]} : vector<2x32xf32> to vector<1x32xf32>
    %1081 = vector.broadcast %1079 : vector<16x1xf32> to vector<16x32xf32>
    %1082 = vector.broadcast %1080 : vector<1x32xf32> to vector<16x32xf32>
    %1083 = arith.mulf %1081, %1082 : vector<16x32xf32>
    %1084 = vector.extract_strided_slice %1078 {offsets = [0, 1], sizes = [16, 1], strides = [1, 1]} : vector<16x2xf32> to vector<16x1xf32>
    %1085 = vector.extract_strided_slice %1064 {offsets = [1, 0], sizes = [1, 32], strides = [1, 1]} : vector<2x32xf32> to vector<1x32xf32>
    %1086 = vector.broadcast %1084 : vector<16x1xf32> to vector<16x32xf32>
    %1087 = vector.broadcast %1085 : vector<1x32xf32> to vector<16x32xf32>
    %1088 = arith.mulf %1086, %1087 : vector<16x32xf32>
    %1089 = arith.addf %1083, %1088 : vector<16x32xf32>
    %1090 = arith.addf %1077, %1089 : vector<16x32xf32>
    %1091 = arith.negf %1090 : vector<16x32xf32>
    %1092 = math.exp %1091 : vector<16x32xf32>
    %cst_368 = arith.constant 1.000000e+00 : f32
    %1093 = vector.broadcast %cst_368 : f32 to vector<16x32xf32>
    %1094 = arith.addf %1093, %1092 : vector<16x32xf32>
    %1095 = arith.divf %1093, %1094 : vector<16x32xf32>
    %1096 = arith.mulf %1090, %1095 : vector<16x32xf32>
    %c48 = arith.constant 48 : index
    %c0_369 = arith.constant 0 : index
    %1097 = vector.load %arg1[%c48, %c0_369] : memref<64x128xf32, #tpu.memory_space<vmem>>, vector<2x32xf32>
    %c3480_370 = arith.constant 3480 : index
    %c0_371 = arith.constant 0 : index
    %1098 = vector.load %arg2[%c3480_370, %c0_371] : memref<4032x128xf32, #tpu.memory_space<vmem>>, vector<16x2xf32>
    %1099 = vector.extract_strided_slice %1098 {offsets = [0, 0], sizes = [16, 1], strides = [1, 1]} : vector<16x2xf32> to vector<16x1xf32>
    %1100 = vector.extract_strided_slice %1097 {offsets = [0, 0], sizes = [1, 32], strides = [1, 1]} : vector<2x32xf32> to vector<1x32xf32>
    %1101 = vector.broadcast %1099 : vector<16x1xf32> to vector<16x32xf32>
    %1102 = vector.broadcast %1100 : vector<1x32xf32> to vector<16x32xf32>
    %1103 = arith.mulf %1101, %1102 : vector<16x32xf32>
    %1104 = vector.extract_strided_slice %1098 {offsets = [0, 1], sizes = [16, 1], strides = [1, 1]} : vector<16x2xf32> to vector<16x1xf32>
    %1105 = vector.extract_strided_slice %1097 {offsets = [1, 0], sizes = [1, 32], strides = [1, 1]} : vector<2x32xf32> to vector<1x32xf32>
    %1106 = vector.broadcast %1104 : vector<16x1xf32> to vector<16x32xf32>
    %1107 = vector.broadcast %1105 : vector<1x32xf32> to vector<16x32xf32>
    %1108 = arith.mulf %1106, %1107 : vector<16x32xf32>
    %1109 = arith.addf %1103, %1108 : vector<16x32xf32>
    %1110 = arith.addf %1096, %1109 : vector<16x32xf32>
    %c2552 = arith.constant 2552 : index
    %c0_372 = arith.constant 0 : index
    %1111 = vector.load %arg2[%c2552, %c0_372] : memref<4032x128xf32, #tpu.memory_space<vmem>>, vector<96x32xf32>
    %c2648 = arith.constant 2648 : index
    %c0_373 = arith.constant 0 : index
    %1112 = vector.load %arg2[%c2648, %c0_373] : memref<4032x128xf32, #tpu.memory_space<vmem>>, vector<1x32xf32>
    %c1_i32_374 = arith.constant 1 : i32
    %1113 = tpu.dynamic_rotate %1110 by %c1_i32_374 dim 0 : vector<16x32xf32>, i32 -> vector<16x32xf32>
    %c3496_375 = arith.constant 3496 : index
    %c0_376 = arith.constant 0 : index
    %1114 = vector.load %arg2[%c3496_375, %c0_376] : memref<4032x128xf32, #tpu.memory_space<vmem>>, vector<16x1xf32>
    %1115 = vector.broadcast %1114 : vector<16x1xf32> to vector<16x32xf32>
    %1116 = arith.mulf %1113, %1115 : vector<16x32xf32>
    %c15_i32_377 = arith.constant 15 : i32
    %1117 = tpu.dynamic_rotate %1110 by %c15_i32_377 dim 0 : vector<16x32xf32>, i32 -> vector<16x32xf32>
    %c3512_378 = arith.constant 3512 : index
    %c0_379 = arith.constant 0 : index
    %1118 = vector.load %arg2[%c3512_378, %c0_379] : memref<4032x128xf32, #tpu.memory_space<vmem>>, vector<16x1xf32>
    %1119 = vector.broadcast %1118 : vector<16x1xf32> to vector<16x32xf32>
    %1120 = arith.mulf %1117, %1119 : vector<16x32xf32>
    %1121 = tpu.concatenate %1116, %1110, %1120 in 1 : vector<16x32xf32>, vector<16x32xf32>, vector<16x32xf32> -> vector<16x96xf32>
    %cst_380 = arith.constant dense<0.000000e+00> : vector<16x32xf32>
    %1122 = tpu.matmul %1121, %1111, %cst_380 {dimension_numbers = #tpu.dot_dimension_numbers<[1], [0], [0], [1], [0, 0, 1, 1], [], []>} : vector<16x96xf32>, vector<96x32xf32>, vector<16x32xf32> -> vector<16x32xf32>
    %1123 = vector.broadcast %1112 : vector<1x32xf32> to vector<16x32xf32>
    %1124 = arith.addf %1122, %1123 : vector<16x32xf32>
    %c3472_381 = arith.constant 3472 : index
    %c0_382 = arith.constant 0 : index
    %1125 = vector.load %arg2[%c3472_381, %c0_382] : memref<4032x128xf32, #tpu.memory_space<vmem>>, vector<2x16xf32>
    %1126 = arith.mulf %1124, %1124 : vector<16x32xf32>
    %1127 = tpu.concatenate %1124, %1126 in 1 : vector<16x32xf32>, vector<16x32xf32> -> vector<16x64xf32>
    %cst_383 = arith.constant dense<0.000000e+00> : vector<2x64xf32>
    %1128 = tpu.matmul %1125, %1127, %cst_383 {dimension_numbers = #tpu.dot_dimension_numbers<[1], [0], [0], [1], [0, 0, 1, 1], [], []>} : vector<2x16xf32>, vector<16x64xf32>, vector<2x64xf32> -> vector<2x64xf32>
    %c3792_384 = arith.constant 3792 : index
    %c0_385 = arith.constant 0 : index
    %1129 = vector.load %arg2[%c3792_384, %c0_385] : memref<4032x128xf32, #tpu.memory_space<vmem>>, vector<64x64xf32>
    %cst_386 = arith.constant dense<0.000000e+00> : vector<2x64xf32>
    %1130 = tpu.matmul %1128, %1129, %cst_386 {dimension_numbers = #tpu.dot_dimension_numbers<[1], [0], [0], [1], [0, 0, 1, 1], [], []>} : vector<2x64xf32>, vector<64x64xf32>, vector<2x64xf32> -> vector<2x64xf32>
    %cst_387 = arith.constant 3.125000e-02 : f32
    %1131 = vector.broadcast %cst_387 : f32 to vector<2x64xf32>
    %1132 = arith.mulf %1130, %1131 : vector<2x64xf32>
    %1133 = vector.extract_strided_slice %1132 {offsets = [0, 0], sizes = [2, 32], strides = [1, 1]} : vector<2x64xf32> to vector<2x32xf32>
    %1134 = vector.extract_strided_slice %1132 {offsets = [0, 32], sizes = [2, 32], strides = [1, 1]} : vector<2x64xf32> to vector<2x32xf32>
    %1135 = arith.mulf %1133, %1133 : vector<2x32xf32>
    %1136 = arith.subf %1134, %1135 : vector<2x32xf32>
    %cst_388 = arith.constant 0.000000e+00 : f32
    %1137 = vector.broadcast %cst_388 : f32 to vector<2x32xf32>
    %1138 = arith.maximumf %1136, %1137 : vector<2x32xf32>
    %cst_389 = arith.constant 9.99999974E-6 : f32
    %1139 = vector.broadcast %cst_389 : f32 to vector<2x32xf32>
    %1140 = arith.addf %1138, %1139 : vector<2x32xf32>
    %1141 = math.rsqrt %1140 : vector<2x32xf32>
    %c2656 = arith.constant 2656 : index
    %c0_390 = arith.constant 0 : index
    %1142 = vector.load %arg2[%c2656, %c0_390] : memref<4032x128xf32, #tpu.memory_space<vmem>>, vector<1x32xf32>
    %1143 = vector.broadcast %1142 : vector<1x32xf32> to vector<2x32xf32>
    %1144 = arith.mulf %1141, %1143 : vector<2x32xf32>
    %c2664 = arith.constant 2664 : index
    %c0_391 = arith.constant 0 : index
    %1145 = vector.load %arg2[%c2664, %c0_391] : memref<4032x128xf32, #tpu.memory_space<vmem>>, vector<1x32xf32>
    %1146 = arith.mulf %1133, %1144 : vector<2x32xf32>
    %1147 = vector.broadcast %1145 : vector<1x32xf32> to vector<2x32xf32>
    %1148 = arith.subf %1147, %1146 : vector<2x32xf32>
    %c3480_392 = arith.constant 3480 : index
    %c0_393 = arith.constant 0 : index
    %1149 = vector.load %arg2[%c3480_392, %c0_393] : memref<4032x128xf32, #tpu.memory_space<vmem>>, vector<16x2xf32>
    %1150 = vector.extract_strided_slice %1149 {offsets = [0, 0], sizes = [16, 1], strides = [1, 1]} : vector<16x2xf32> to vector<16x1xf32>
    %1151 = vector.extract_strided_slice %1144 {offsets = [0, 0], sizes = [1, 32], strides = [1, 1]} : vector<2x32xf32> to vector<1x32xf32>
    %1152 = vector.broadcast %1150 : vector<16x1xf32> to vector<16x32xf32>
    %1153 = vector.broadcast %1151 : vector<1x32xf32> to vector<16x32xf32>
    %1154 = arith.mulf %1152, %1153 : vector<16x32xf32>
    %1155 = vector.extract_strided_slice %1149 {offsets = [0, 1], sizes = [16, 1], strides = [1, 1]} : vector<16x2xf32> to vector<16x1xf32>
    %1156 = vector.extract_strided_slice %1144 {offsets = [1, 0], sizes = [1, 32], strides = [1, 1]} : vector<2x32xf32> to vector<1x32xf32>
    %1157 = vector.broadcast %1155 : vector<16x1xf32> to vector<16x32xf32>
    %1158 = vector.broadcast %1156 : vector<1x32xf32> to vector<16x32xf32>
    %1159 = arith.mulf %1157, %1158 : vector<16x32xf32>
    %1160 = arith.addf %1154, %1159 : vector<16x32xf32>
    %1161 = arith.mulf %1124, %1160 : vector<16x32xf32>
    %c3480_394 = arith.constant 3480 : index
    %c0_395 = arith.constant 0 : index
    %1162 = vector.load %arg2[%c3480_394, %c0_395] : memref<4032x128xf32, #tpu.memory_space<vmem>>, vector<16x2xf32>
    %1163 = vector.extract_strided_slice %1162 {offsets = [0, 0], sizes = [16, 1], strides = [1, 1]} : vector<16x2xf32> to vector<16x1xf32>
    %1164 = vector.extract_strided_slice %1148 {offsets = [0, 0], sizes = [1, 32], strides = [1, 1]} : vector<2x32xf32> to vector<1x32xf32>
    %1165 = vector.broadcast %1163 : vector<16x1xf32> to vector<16x32xf32>
    %1166 = vector.broadcast %1164 : vector<1x32xf32> to vector<16x32xf32>
    %1167 = arith.mulf %1165, %1166 : vector<16x32xf32>
    %1168 = vector.extract_strided_slice %1162 {offsets = [0, 1], sizes = [16, 1], strides = [1, 1]} : vector<16x2xf32> to vector<16x1xf32>
    %1169 = vector.extract_strided_slice %1148 {offsets = [1, 0], sizes = [1, 32], strides = [1, 1]} : vector<2x32xf32> to vector<1x32xf32>
    %1170 = vector.broadcast %1168 : vector<16x1xf32> to vector<16x32xf32>
    %1171 = vector.broadcast %1169 : vector<1x32xf32> to vector<16x32xf32>
    %1172 = arith.mulf %1170, %1171 : vector<16x32xf32>
    %1173 = arith.addf %1167, %1172 : vector<16x32xf32>
    %1174 = arith.addf %1161, %1173 : vector<16x32xf32>
    %1175 = arith.negf %1174 : vector<16x32xf32>
    %1176 = math.exp %1175 : vector<16x32xf32>
    %cst_396 = arith.constant 1.000000e+00 : f32
    %1177 = vector.broadcast %cst_396 : f32 to vector<16x32xf32>
    %1178 = arith.addf %1177, %1176 : vector<16x32xf32>
    %1179 = arith.divf %1177, %1178 : vector<16x32xf32>
    %1180 = arith.mulf %1174, %1179 : vector<16x32xf32>
    %c2672 = arith.constant 2672 : index
    %c0_397 = arith.constant 0 : index
    %1181 = vector.load %arg2[%c2672, %c0_397] : memref<4032x128xf32, #tpu.memory_space<vmem>>, vector<128x32xf32>
    %c2800 = arith.constant 2800 : index
    %c0_398 = arith.constant 0 : index
    %1182 = vector.load %arg2[%c2800, %c0_398] : memref<4032x128xf32, #tpu.memory_space<vmem>>, vector<1x32xf32>
    %1183 = tpu.concatenate %1018, %708 in 1 : vector<16x64xf32>, vector<16x64xf32> -> vector<16x128xf32>
    %cst_399 = arith.constant dense<0.000000e+00> : vector<16x32xf32>
    %1184 = tpu.matmul %1183, %1181, %cst_399 {dimension_numbers = #tpu.dot_dimension_numbers<[1], [0], [0], [1], [0, 0, 1, 1], [], []>} : vector<16x128xf32>, vector<128x32xf32>, vector<16x32xf32> -> vector<16x32xf32>
    %1185 = vector.broadcast %1182 : vector<1x32xf32> to vector<16x32xf32>
    %1186 = arith.addf %1184, %1185 : vector<16x32xf32>
    %1187 = arith.addf %1180, %1186 : vector<16x32xf32>
    %c2808 = arith.constant 2808 : index
    %c0_400 = arith.constant 0 : index
    %1188 = vector.load %arg2[%c2808, %c0_400] : memref<4032x128xf32, #tpu.memory_space<vmem>>, vector<96x32xf32>
    %c2904 = arith.constant 2904 : index
    %c0_401 = arith.constant 0 : index
    %1189 = vector.load %arg2[%c2904, %c0_401] : memref<4032x128xf32, #tpu.memory_space<vmem>>, vector<1x32xf32>
    %c1_i32_402 = arith.constant 1 : i32
    %1190 = tpu.dynamic_rotate %1187 by %c1_i32_402 dim 0 : vector<16x32xf32>, i32 -> vector<16x32xf32>
    %c3496_403 = arith.constant 3496 : index
    %c0_404 = arith.constant 0 : index
    %1191 = vector.load %arg2[%c3496_403, %c0_404] : memref<4032x128xf32, #tpu.memory_space<vmem>>, vector<16x1xf32>
    %1192 = vector.broadcast %1191 : vector<16x1xf32> to vector<16x32xf32>
    %1193 = arith.mulf %1190, %1192 : vector<16x32xf32>
    %c15_i32_405 = arith.constant 15 : i32
    %1194 = tpu.dynamic_rotate %1187 by %c15_i32_405 dim 0 : vector<16x32xf32>, i32 -> vector<16x32xf32>
    %c3512_406 = arith.constant 3512 : index
    %c0_407 = arith.constant 0 : index
    %1195 = vector.load %arg2[%c3512_406, %c0_407] : memref<4032x128xf32, #tpu.memory_space<vmem>>, vector<16x1xf32>
    %1196 = vector.broadcast %1195 : vector<16x1xf32> to vector<16x32xf32>
    %1197 = arith.mulf %1194, %1196 : vector<16x32xf32>
    %1198 = tpu.concatenate %1193, %1187, %1197 in 1 : vector<16x32xf32>, vector<16x32xf32>, vector<16x32xf32> -> vector<16x96xf32>
    %cst_408 = arith.constant dense<0.000000e+00> : vector<16x32xf32>
    %1199 = tpu.matmul %1198, %1188, %cst_408 {dimension_numbers = #tpu.dot_dimension_numbers<[1], [0], [0], [1], [0, 0, 1, 1], [], []>} : vector<16x96xf32>, vector<96x32xf32>, vector<16x32xf32> -> vector<16x32xf32>
    %1200 = vector.broadcast %1189 : vector<1x32xf32> to vector<16x32xf32>
    %1201 = arith.addf %1199, %1200 : vector<16x32xf32>
    %c3472_409 = arith.constant 3472 : index
    %c0_410 = arith.constant 0 : index
    %1202 = vector.load %arg2[%c3472_409, %c0_410] : memref<4032x128xf32, #tpu.memory_space<vmem>>, vector<2x16xf32>
    %1203 = arith.mulf %1201, %1201 : vector<16x32xf32>
    %1204 = tpu.concatenate %1201, %1203 in 1 : vector<16x32xf32>, vector<16x32xf32> -> vector<16x64xf32>
    %cst_411 = arith.constant dense<0.000000e+00> : vector<2x64xf32>
    %1205 = tpu.matmul %1202, %1204, %cst_411 {dimension_numbers = #tpu.dot_dimension_numbers<[1], [0], [0], [1], [0, 0, 1, 1], [], []>} : vector<2x16xf32>, vector<16x64xf32>, vector<2x64xf32> -> vector<2x64xf32>
    %c3792_412 = arith.constant 3792 : index
    %c0_413 = arith.constant 0 : index
    %1206 = vector.load %arg2[%c3792_412, %c0_413] : memref<4032x128xf32, #tpu.memory_space<vmem>>, vector<64x64xf32>
    %cst_414 = arith.constant dense<0.000000e+00> : vector<2x64xf32>
    %1207 = tpu.matmul %1205, %1206, %cst_414 {dimension_numbers = #tpu.dot_dimension_numbers<[1], [0], [0], [1], [0, 0, 1, 1], [], []>} : vector<2x64xf32>, vector<64x64xf32>, vector<2x64xf32> -> vector<2x64xf32>
    %cst_415 = arith.constant 3.125000e-02 : f32
    %1208 = vector.broadcast %cst_415 : f32 to vector<2x64xf32>
    %1209 = arith.mulf %1207, %1208 : vector<2x64xf32>
    %1210 = vector.extract_strided_slice %1209 {offsets = [0, 0], sizes = [2, 32], strides = [1, 1]} : vector<2x64xf32> to vector<2x32xf32>
    %1211 = vector.extract_strided_slice %1209 {offsets = [0, 32], sizes = [2, 32], strides = [1, 1]} : vector<2x64xf32> to vector<2x32xf32>
    %1212 = arith.mulf %1210, %1210 : vector<2x32xf32>
    %1213 = arith.subf %1211, %1212 : vector<2x32xf32>
    %cst_416 = arith.constant 0.000000e+00 : f32
    %1214 = vector.broadcast %cst_416 : f32 to vector<2x32xf32>
    %1215 = arith.maximumf %1213, %1214 : vector<2x32xf32>
    %cst_417 = arith.constant 9.99999974E-6 : f32
    %1216 = vector.broadcast %cst_417 : f32 to vector<2x32xf32>
    %1217 = arith.addf %1215, %1216 : vector<2x32xf32>
    %1218 = math.rsqrt %1217 : vector<2x32xf32>
    %c2912 = arith.constant 2912 : index
    %c0_418 = arith.constant 0 : index
    %1219 = vector.load %arg2[%c2912, %c0_418] : memref<4032x128xf32, #tpu.memory_space<vmem>>, vector<1x32xf32>
    %1220 = vector.broadcast %1219 : vector<1x32xf32> to vector<2x32xf32>
    %1221 = arith.mulf %1218, %1220 : vector<2x32xf32>
    %c2920 = arith.constant 2920 : index
    %c0_419 = arith.constant 0 : index
    %1222 = vector.load %arg2[%c2920, %c0_419] : memref<4032x128xf32, #tpu.memory_space<vmem>>, vector<1x32xf32>
    %1223 = arith.mulf %1210, %1221 : vector<2x32xf32>
    %1224 = vector.broadcast %1222 : vector<1x32xf32> to vector<2x32xf32>
    %1225 = arith.subf %1224, %1223 : vector<2x32xf32>
    %c3480_420 = arith.constant 3480 : index
    %c0_421 = arith.constant 0 : index
    %1226 = vector.load %arg2[%c3480_420, %c0_421] : memref<4032x128xf32, #tpu.memory_space<vmem>>, vector<16x2xf32>
    %1227 = vector.extract_strided_slice %1226 {offsets = [0, 0], sizes = [16, 1], strides = [1, 1]} : vector<16x2xf32> to vector<16x1xf32>
    %1228 = vector.extract_strided_slice %1221 {offsets = [0, 0], sizes = [1, 32], strides = [1, 1]} : vector<2x32xf32> to vector<1x32xf32>
    %1229 = vector.broadcast %1227 : vector<16x1xf32> to vector<16x32xf32>
    %1230 = vector.broadcast %1228 : vector<1x32xf32> to vector<16x32xf32>
    %1231 = arith.mulf %1229, %1230 : vector<16x32xf32>
    %1232 = vector.extract_strided_slice %1226 {offsets = [0, 1], sizes = [16, 1], strides = [1, 1]} : vector<16x2xf32> to vector<16x1xf32>
    %1233 = vector.extract_strided_slice %1221 {offsets = [1, 0], sizes = [1, 32], strides = [1, 1]} : vector<2x32xf32> to vector<1x32xf32>
    %1234 = vector.broadcast %1232 : vector<16x1xf32> to vector<16x32xf32>
    %1235 = vector.broadcast %1233 : vector<1x32xf32> to vector<16x32xf32>
    %1236 = arith.mulf %1234, %1235 : vector<16x32xf32>
    %1237 = arith.addf %1231, %1236 : vector<16x32xf32>
    %1238 = arith.mulf %1201, %1237 : vector<16x32xf32>
    %c3480_422 = arith.constant 3480 : index
    %c0_423 = arith.constant 0 : index
    %1239 = vector.load %arg2[%c3480_422, %c0_423] : memref<4032x128xf32, #tpu.memory_space<vmem>>, vector<16x2xf32>
    %1240 = vector.extract_strided_slice %1239 {offsets = [0, 0], sizes = [16, 1], strides = [1, 1]} : vector<16x2xf32> to vector<16x1xf32>
    %1241 = vector.extract_strided_slice %1225 {offsets = [0, 0], sizes = [1, 32], strides = [1, 1]} : vector<2x32xf32> to vector<1x32xf32>
    %1242 = vector.broadcast %1240 : vector<16x1xf32> to vector<16x32xf32>
    %1243 = vector.broadcast %1241 : vector<1x32xf32> to vector<16x32xf32>
    %1244 = arith.mulf %1242, %1243 : vector<16x32xf32>
    %1245 = vector.extract_strided_slice %1239 {offsets = [0, 1], sizes = [16, 1], strides = [1, 1]} : vector<16x2xf32> to vector<16x1xf32>
    %1246 = vector.extract_strided_slice %1225 {offsets = [1, 0], sizes = [1, 32], strides = [1, 1]} : vector<2x32xf32> to vector<1x32xf32>
    %1247 = vector.broadcast %1245 : vector<16x1xf32> to vector<16x32xf32>
    %1248 = vector.broadcast %1246 : vector<1x32xf32> to vector<16x32xf32>
    %1249 = arith.mulf %1247, %1248 : vector<16x32xf32>
    %1250 = arith.addf %1244, %1249 : vector<16x32xf32>
    %1251 = arith.addf %1238, %1250 : vector<16x32xf32>
    %1252 = arith.negf %1251 : vector<16x32xf32>
    %1253 = math.exp %1252 : vector<16x32xf32>
    %cst_424 = arith.constant 1.000000e+00 : f32
    %1254 = vector.broadcast %cst_424 : f32 to vector<16x32xf32>
    %1255 = arith.addf %1254, %1253 : vector<16x32xf32>
    %1256 = arith.divf %1254, %1255 : vector<16x32xf32>
    %1257 = arith.mulf %1251, %1256 : vector<16x32xf32>
    %c56 = arith.constant 56 : index
    %c0_425 = arith.constant 0 : index
    %1258 = vector.load %arg1[%c56, %c0_425] : memref<64x128xf32, #tpu.memory_space<vmem>>, vector<2x32xf32>
    %c3480_426 = arith.constant 3480 : index
    %c0_427 = arith.constant 0 : index
    %1259 = vector.load %arg2[%c3480_426, %c0_427] : memref<4032x128xf32, #tpu.memory_space<vmem>>, vector<16x2xf32>
    %1260 = vector.extract_strided_slice %1259 {offsets = [0, 0], sizes = [16, 1], strides = [1, 1]} : vector<16x2xf32> to vector<16x1xf32>
    %1261 = vector.extract_strided_slice %1258 {offsets = [0, 0], sizes = [1, 32], strides = [1, 1]} : vector<2x32xf32> to vector<1x32xf32>
    %1262 = vector.broadcast %1260 : vector<16x1xf32> to vector<16x32xf32>
    %1263 = vector.broadcast %1261 : vector<1x32xf32> to vector<16x32xf32>
    %1264 = arith.mulf %1262, %1263 : vector<16x32xf32>
    %1265 = vector.extract_strided_slice %1259 {offsets = [0, 1], sizes = [16, 1], strides = [1, 1]} : vector<16x2xf32> to vector<16x1xf32>
    %1266 = vector.extract_strided_slice %1258 {offsets = [1, 0], sizes = [1, 32], strides = [1, 1]} : vector<2x32xf32> to vector<1x32xf32>
    %1267 = vector.broadcast %1265 : vector<16x1xf32> to vector<16x32xf32>
    %1268 = vector.broadcast %1266 : vector<1x32xf32> to vector<16x32xf32>
    %1269 = arith.mulf %1267, %1268 : vector<16x32xf32>
    %1270 = arith.addf %1264, %1269 : vector<16x32xf32>
    %1271 = arith.addf %1257, %1270 : vector<16x32xf32>
    %c2928 = arith.constant 2928 : index
    %c0_428 = arith.constant 0 : index
    %1272 = vector.load %arg2[%c2928, %c0_428] : memref<4032x128xf32, #tpu.memory_space<vmem>>, vector<96x32xf32>
    %c3024 = arith.constant 3024 : index
    %c0_429 = arith.constant 0 : index
    %1273 = vector.load %arg2[%c3024, %c0_429] : memref<4032x128xf32, #tpu.memory_space<vmem>>, vector<1x32xf32>
    %c1_i32_430 = arith.constant 1 : i32
    %1274 = tpu.dynamic_rotate %1271 by %c1_i32_430 dim 0 : vector<16x32xf32>, i32 -> vector<16x32xf32>
    %c3496_431 = arith.constant 3496 : index
    %c0_432 = arith.constant 0 : index
    %1275 = vector.load %arg2[%c3496_431, %c0_432] : memref<4032x128xf32, #tpu.memory_space<vmem>>, vector<16x1xf32>
    %1276 = vector.broadcast %1275 : vector<16x1xf32> to vector<16x32xf32>
    %1277 = arith.mulf %1274, %1276 : vector<16x32xf32>
    %c15_i32_433 = arith.constant 15 : i32
    %1278 = tpu.dynamic_rotate %1271 by %c15_i32_433 dim 0 : vector<16x32xf32>, i32 -> vector<16x32xf32>
    %c3512_434 = arith.constant 3512 : index
    %c0_435 = arith.constant 0 : index
    %1279 = vector.load %arg2[%c3512_434, %c0_435] : memref<4032x128xf32, #tpu.memory_space<vmem>>, vector<16x1xf32>
    %1280 = vector.broadcast %1279 : vector<16x1xf32> to vector<16x32xf32>
    %1281 = arith.mulf %1278, %1280 : vector<16x32xf32>
    %1282 = tpu.concatenate %1277, %1271, %1281 in 1 : vector<16x32xf32>, vector<16x32xf32>, vector<16x32xf32> -> vector<16x96xf32>
    %cst_436 = arith.constant dense<0.000000e+00> : vector<16x32xf32>
    %1283 = tpu.matmul %1282, %1272, %cst_436 {dimension_numbers = #tpu.dot_dimension_numbers<[1], [0], [0], [1], [0, 0, 1, 1], [], []>} : vector<16x96xf32>, vector<96x32xf32>, vector<16x32xf32> -> vector<16x32xf32>
    %1284 = vector.broadcast %1273 : vector<1x32xf32> to vector<16x32xf32>
    %1285 = arith.addf %1283, %1284 : vector<16x32xf32>
    %c3472_437 = arith.constant 3472 : index
    %c0_438 = arith.constant 0 : index
    %1286 = vector.load %arg2[%c3472_437, %c0_438] : memref<4032x128xf32, #tpu.memory_space<vmem>>, vector<2x16xf32>
    %1287 = arith.mulf %1285, %1285 : vector<16x32xf32>
    %1288 = tpu.concatenate %1285, %1287 in 1 : vector<16x32xf32>, vector<16x32xf32> -> vector<16x64xf32>
    %cst_439 = arith.constant dense<0.000000e+00> : vector<2x64xf32>
    %1289 = tpu.matmul %1286, %1288, %cst_439 {dimension_numbers = #tpu.dot_dimension_numbers<[1], [0], [0], [1], [0, 0, 1, 1], [], []>} : vector<2x16xf32>, vector<16x64xf32>, vector<2x64xf32> -> vector<2x64xf32>
    %c3792_440 = arith.constant 3792 : index
    %c0_441 = arith.constant 0 : index
    %1290 = vector.load %arg2[%c3792_440, %c0_441] : memref<4032x128xf32, #tpu.memory_space<vmem>>, vector<64x64xf32>
    %cst_442 = arith.constant dense<0.000000e+00> : vector<2x64xf32>
    %1291 = tpu.matmul %1289, %1290, %cst_442 {dimension_numbers = #tpu.dot_dimension_numbers<[1], [0], [0], [1], [0, 0, 1, 1], [], []>} : vector<2x64xf32>, vector<64x64xf32>, vector<2x64xf32> -> vector<2x64xf32>
    %cst_443 = arith.constant 3.125000e-02 : f32
    %1292 = vector.broadcast %cst_443 : f32 to vector<2x64xf32>
    %1293 = arith.mulf %1291, %1292 : vector<2x64xf32>
    %1294 = vector.extract_strided_slice %1293 {offsets = [0, 0], sizes = [2, 32], strides = [1, 1]} : vector<2x64xf32> to vector<2x32xf32>
    %1295 = vector.extract_strided_slice %1293 {offsets = [0, 32], sizes = [2, 32], strides = [1, 1]} : vector<2x64xf32> to vector<2x32xf32>
    %1296 = arith.mulf %1294, %1294 : vector<2x32xf32>
    %1297 = arith.subf %1295, %1296 : vector<2x32xf32>
    %cst_444 = arith.constant 0.000000e+00 : f32
    %1298 = vector.broadcast %cst_444 : f32 to vector<2x32xf32>
    %1299 = arith.maximumf %1297, %1298 : vector<2x32xf32>
    %cst_445 = arith.constant 9.99999974E-6 : f32
    %1300 = vector.broadcast %cst_445 : f32 to vector<2x32xf32>
    %1301 = arith.addf %1299, %1300 : vector<2x32xf32>
    %1302 = math.rsqrt %1301 : vector<2x32xf32>
    %c3032 = arith.constant 3032 : index
    %c0_446 = arith.constant 0 : index
    %1303 = vector.load %arg2[%c3032, %c0_446] : memref<4032x128xf32, #tpu.memory_space<vmem>>, vector<1x32xf32>
    %1304 = vector.broadcast %1303 : vector<1x32xf32> to vector<2x32xf32>
    %1305 = arith.mulf %1302, %1304 : vector<2x32xf32>
    %c3040 = arith.constant 3040 : index
    %c0_447 = arith.constant 0 : index
    %1306 = vector.load %arg2[%c3040, %c0_447] : memref<4032x128xf32, #tpu.memory_space<vmem>>, vector<1x32xf32>
    %1307 = arith.mulf %1294, %1305 : vector<2x32xf32>
    %1308 = vector.broadcast %1306 : vector<1x32xf32> to vector<2x32xf32>
    %1309 = arith.subf %1308, %1307 : vector<2x32xf32>
    %c3480_448 = arith.constant 3480 : index
    %c0_449 = arith.constant 0 : index
    %1310 = vector.load %arg2[%c3480_448, %c0_449] : memref<4032x128xf32, #tpu.memory_space<vmem>>, vector<16x2xf32>
    %1311 = vector.extract_strided_slice %1310 {offsets = [0, 0], sizes = [16, 1], strides = [1, 1]} : vector<16x2xf32> to vector<16x1xf32>
    %1312 = vector.extract_strided_slice %1305 {offsets = [0, 0], sizes = [1, 32], strides = [1, 1]} : vector<2x32xf32> to vector<1x32xf32>
    %1313 = vector.broadcast %1311 : vector<16x1xf32> to vector<16x32xf32>
    %1314 = vector.broadcast %1312 : vector<1x32xf32> to vector<16x32xf32>
    %1315 = arith.mulf %1313, %1314 : vector<16x32xf32>
    %1316 = vector.extract_strided_slice %1310 {offsets = [0, 1], sizes = [16, 1], strides = [1, 1]} : vector<16x2xf32> to vector<16x1xf32>
    %1317 = vector.extract_strided_slice %1305 {offsets = [1, 0], sizes = [1, 32], strides = [1, 1]} : vector<2x32xf32> to vector<1x32xf32>
    %1318 = vector.broadcast %1316 : vector<16x1xf32> to vector<16x32xf32>
    %1319 = vector.broadcast %1317 : vector<1x32xf32> to vector<16x32xf32>
    %1320 = arith.mulf %1318, %1319 : vector<16x32xf32>
    %1321 = arith.addf %1315, %1320 : vector<16x32xf32>
    %1322 = arith.mulf %1285, %1321 : vector<16x32xf32>
    %c3480_450 = arith.constant 3480 : index
    %c0_451 = arith.constant 0 : index
    %1323 = vector.load %arg2[%c3480_450, %c0_451] : memref<4032x128xf32, #tpu.memory_space<vmem>>, vector<16x2xf32>
    %1324 = vector.extract_strided_slice %1323 {offsets = [0, 0], sizes = [16, 1], strides = [1, 1]} : vector<16x2xf32> to vector<16x1xf32>
    %1325 = vector.extract_strided_slice %1309 {offsets = [0, 0], sizes = [1, 32], strides = [1, 1]} : vector<2x32xf32> to vector<1x32xf32>
    %1326 = vector.broadcast %1324 : vector<16x1xf32> to vector<16x32xf32>
    %1327 = vector.broadcast %1325 : vector<1x32xf32> to vector<16x32xf32>
    %1328 = arith.mulf %1326, %1327 : vector<16x32xf32>
    %1329 = vector.extract_strided_slice %1323 {offsets = [0, 1], sizes = [16, 1], strides = [1, 1]} : vector<16x2xf32> to vector<16x1xf32>
    %1330 = vector.extract_strided_slice %1309 {offsets = [1, 0], sizes = [1, 32], strides = [1, 1]} : vector<2x32xf32> to vector<1x32xf32>
    %1331 = vector.broadcast %1329 : vector<16x1xf32> to vector<16x32xf32>
    %1332 = vector.broadcast %1330 : vector<1x32xf32> to vector<16x32xf32>
    %1333 = arith.mulf %1331, %1332 : vector<16x32xf32>
    %1334 = arith.addf %1328, %1333 : vector<16x32xf32>
    %1335 = arith.addf %1322, %1334 : vector<16x32xf32>
    %1336 = arith.negf %1335 : vector<16x32xf32>
    %1337 = math.exp %1336 : vector<16x32xf32>
    %cst_452 = arith.constant 1.000000e+00 : f32
    %1338 = vector.broadcast %cst_452 : f32 to vector<16x32xf32>
    %1339 = arith.addf %1338, %1337 : vector<16x32xf32>
    %1340 = arith.divf %1338, %1339 : vector<16x32xf32>
    %1341 = arith.mulf %1335, %1340 : vector<16x32xf32>
    %1342 = arith.addf %1341, %1187 : vector<16x32xf32>
    %c15_i32_453 = arith.constant 15 : i32
    %1343 = tpu.dynamic_rotate %1342 by %c15_i32_453 dim 0 : vector<16x32xf32>, i32 -> vector<16x32xf32>
    %c3512_454 = arith.constant 3512 : index
    %c0_455 = arith.constant 0 : index
    %1344 = vector.load %arg2[%c3512_454, %c0_455] : memref<4032x128xf32, #tpu.memory_space<vmem>>, vector<16x1xf32>
    %1345 = vector.broadcast %1344 : vector<16x1xf32> to vector<16x32xf32>
    %1346 = arith.mulf %1343, %1345 : vector<16x32xf32>
    %1347 = tpu.concatenate %1342, %1346 in 1 : vector<16x32xf32>, vector<16x32xf32> -> vector<16x64xf32>
    %c3384 = arith.constant 3384 : index
    %c0_456 = arith.constant 0 : index
    %1348 = vector.load %arg2[%c3384, %c0_456] : memref<4032x128xf32, #tpu.memory_space<vmem>>, vector<64x64xf32>
    %cst_457 = arith.constant dense<0.000000e+00> : vector<16x64xf32>
    %1349 = tpu.matmul %1347, %1348, %cst_457 {dimension_numbers = #tpu.dot_dimension_numbers<[1], [0], [0], [1], [0, 0, 1, 1], [], []>} : vector<16x64xf32>, vector<64x64xf32>, vector<16x64xf32> -> vector<16x64xf32>
    %1350 = vector.extract_strided_slice %1349 {offsets = [0, 0], sizes = [16, 32], strides = [1, 1]} : vector<16x64xf32> to vector<16x32xf32>
    %1351 = vector.extract_strided_slice %1349 {offsets = [0, 32], sizes = [16, 32], strides = [1, 1]} : vector<16x64xf32> to vector<16x32xf32>
    %1352 = tpu.concatenate %1350, %1351 in 0 : vector<16x32xf32>, vector<16x32xf32> -> vector<32x32xf32>
    %c4000 = arith.constant 4000 : index
    %c0_458 = arith.constant 0 : index
    %1353 = vector.load %arg2[%c4000, %c0_458] : memref<4032x128xf32, #tpu.memory_space<vmem>>, vector<32x32xf32>
    %cst_459 = arith.constant dense<0.000000e+00> : vector<32x32xf32>
    %1354 = tpu.matmul %1353, %1352, %cst_459 {dimension_numbers = #tpu.dot_dimension_numbers<[1], [0], [0], [1], [0, 0, 1, 1], [], []>} : vector<32x32xf32>, vector<32x32xf32>, vector<32x32xf32> -> vector<32x32xf32>
    %c3448 = arith.constant 3448 : index
    %c0_460 = arith.constant 0 : index
    %1355 = vector.load %arg2[%c3448, %c0_460] : memref<4032x128xf32, #tpu.memory_space<vmem>>, vector<1x32xf32>
    %1356 = vector.broadcast %1355 : vector<1x32xf32> to vector<32x32xf32>
    %1357 = arith.addf %1354, %1356 : vector<32x32xf32>
    %c3048 = arith.constant 3048 : index
    %c0_461 = arith.constant 0 : index
    %1358 = vector.load %arg2[%c3048, %c0_461] : memref<4032x128xf32, #tpu.memory_space<vmem>>, vector<96x16xf32>
    %c3144 = arith.constant 3144 : index
    %c0_462 = arith.constant 0 : index
    %1359 = vector.load %arg2[%c3144, %c0_462] : memref<4032x128xf32, #tpu.memory_space<vmem>>, vector<1x16xf32>
    %c1_i32_463 = arith.constant 1 : i32
    %1360 = tpu.dynamic_rotate %1357 by %c1_i32_463 dim 0 : vector<32x32xf32>, i32 -> vector<32x32xf32>
    %c3632_464 = arith.constant 3632 : index
    %c0_465 = arith.constant 0 : index
    %1361 = vector.load %arg2[%c3632_464, %c0_465] : memref<4032x128xf32, #tpu.memory_space<vmem>>, vector<32x1xf32>
    %1362 = vector.broadcast %1361 : vector<32x1xf32> to vector<32x32xf32>
    %1363 = arith.mulf %1360, %1362 : vector<32x32xf32>
    %c31_i32_466 = arith.constant 31 : i32
    %1364 = tpu.dynamic_rotate %1357 by %c31_i32_466 dim 0 : vector<32x32xf32>, i32 -> vector<32x32xf32>
    %c3664_467 = arith.constant 3664 : index
    %c0_468 = arith.constant 0 : index
    %1365 = vector.load %arg2[%c3664_467, %c0_468] : memref<4032x128xf32, #tpu.memory_space<vmem>>, vector<32x1xf32>
    %1366 = vector.broadcast %1365 : vector<32x1xf32> to vector<32x32xf32>
    %1367 = arith.mulf %1364, %1366 : vector<32x32xf32>
    %1368 = tpu.concatenate %1363, %1357, %1367 in 1 : vector<32x32xf32>, vector<32x32xf32>, vector<32x32xf32> -> vector<32x96xf32>
    %cst_469 = arith.constant dense<0.000000e+00> : vector<32x16xf32>
    %1369 = tpu.matmul %1368, %1358, %cst_469 {dimension_numbers = #tpu.dot_dimension_numbers<[1], [0], [0], [1], [0, 0, 1, 1], [], []>} : vector<32x96xf32>, vector<96x16xf32>, vector<32x16xf32> -> vector<32x16xf32>
    %1370 = vector.broadcast %1359 : vector<1x16xf32> to vector<32x16xf32>
    %1371 = arith.addf %1369, %1370 : vector<32x16xf32>
    %c3528_470 = arith.constant 3528 : index
    %c0_471 = arith.constant 0 : index
    %1372 = vector.load %arg2[%c3528_470, %c0_471] : memref<4032x128xf32, #tpu.memory_space<vmem>>, vector<2x32xf32>
    %1373 = arith.mulf %1371, %1371 : vector<32x16xf32>
    %1374 = tpu.concatenate %1371, %1373 in 1 : vector<32x16xf32>, vector<32x16xf32> -> vector<32x32xf32>
    %cst_472 = arith.constant dense<0.000000e+00> : vector<2x32xf32>
    %1375 = tpu.matmul %1372, %1374, %cst_472 {dimension_numbers = #tpu.dot_dimension_numbers<[1], [0], [0], [1], [0, 0, 1, 1], [], []>} : vector<2x32xf32>, vector<32x32xf32>, vector<2x32xf32> -> vector<2x32xf32>
    %c3760 = arith.constant 3760 : index
    %c0_473 = arith.constant 0 : index
    %1376 = vector.load %arg2[%c3760, %c0_473] : memref<4032x128xf32, #tpu.memory_space<vmem>>, vector<32x32xf32>
    %cst_474 = arith.constant dense<0.000000e+00> : vector<2x32xf32>
    %1377 = tpu.matmul %1375, %1376, %cst_474 {dimension_numbers = #tpu.dot_dimension_numbers<[1], [0], [0], [1], [0, 0, 1, 1], [], []>} : vector<2x32xf32>, vector<32x32xf32>, vector<2x32xf32> -> vector<2x32xf32>
    %cst_475 = arith.constant 3.125000e-02 : f32
    %1378 = vector.broadcast %cst_475 : f32 to vector<2x32xf32>
    %1379 = arith.mulf %1377, %1378 : vector<2x32xf32>
    %1380 = vector.extract_strided_slice %1379 {offsets = [0, 0], sizes = [2, 16], strides = [1, 1]} : vector<2x32xf32> to vector<2x16xf32>
    %1381 = vector.extract_strided_slice %1379 {offsets = [0, 16], sizes = [2, 16], strides = [1, 1]} : vector<2x32xf32> to vector<2x16xf32>
    %1382 = arith.mulf %1380, %1380 : vector<2x16xf32>
    %1383 = arith.subf %1381, %1382 : vector<2x16xf32>
    %cst_476 = arith.constant 0.000000e+00 : f32
    %1384 = vector.broadcast %cst_476 : f32 to vector<2x16xf32>
    %1385 = arith.maximumf %1383, %1384 : vector<2x16xf32>
    %cst_477 = arith.constant 9.99999974E-6 : f32
    %1386 = vector.broadcast %cst_477 : f32 to vector<2x16xf32>
    %1387 = arith.addf %1385, %1386 : vector<2x16xf32>
    %1388 = math.rsqrt %1387 : vector<2x16xf32>
    %c3152 = arith.constant 3152 : index
    %c0_478 = arith.constant 0 : index
    %1389 = vector.load %arg2[%c3152, %c0_478] : memref<4032x128xf32, #tpu.memory_space<vmem>>, vector<1x16xf32>
    %1390 = vector.broadcast %1389 : vector<1x16xf32> to vector<2x16xf32>
    %1391 = arith.mulf %1388, %1390 : vector<2x16xf32>
    %c3160 = arith.constant 3160 : index
    %c0_479 = arith.constant 0 : index
    %1392 = vector.load %arg2[%c3160, %c0_479] : memref<4032x128xf32, #tpu.memory_space<vmem>>, vector<1x16xf32>
    %1393 = arith.mulf %1380, %1391 : vector<2x16xf32>
    %1394 = vector.broadcast %1392 : vector<1x16xf32> to vector<2x16xf32>
    %1395 = arith.subf %1394, %1393 : vector<2x16xf32>
    %c3536_480 = arith.constant 3536 : index
    %c0_481 = arith.constant 0 : index
    %1396 = vector.load %arg2[%c3536_480, %c0_481] : memref<4032x128xf32, #tpu.memory_space<vmem>>, vector<32x2xf32>
    %1397 = vector.extract_strided_slice %1396 {offsets = [0, 0], sizes = [32, 1], strides = [1, 1]} : vector<32x2xf32> to vector<32x1xf32>
    %1398 = vector.extract_strided_slice %1391 {offsets = [0, 0], sizes = [1, 16], strides = [1, 1]} : vector<2x16xf32> to vector<1x16xf32>
    %1399 = vector.broadcast %1397 : vector<32x1xf32> to vector<32x16xf32>
    %1400 = vector.broadcast %1398 : vector<1x16xf32> to vector<32x16xf32>
    %1401 = arith.mulf %1399, %1400 : vector<32x16xf32>
    %1402 = vector.extract_strided_slice %1396 {offsets = [0, 1], sizes = [32, 1], strides = [1, 1]} : vector<32x2xf32> to vector<32x1xf32>
    %1403 = vector.extract_strided_slice %1391 {offsets = [1, 0], sizes = [1, 16], strides = [1, 1]} : vector<2x16xf32> to vector<1x16xf32>
    %1404 = vector.broadcast %1402 : vector<32x1xf32> to vector<32x16xf32>
    %1405 = vector.broadcast %1403 : vector<1x16xf32> to vector<32x16xf32>
    %1406 = arith.mulf %1404, %1405 : vector<32x16xf32>
    %1407 = arith.addf %1401, %1406 : vector<32x16xf32>
    %1408 = arith.mulf %1371, %1407 : vector<32x16xf32>
    %c3536_482 = arith.constant 3536 : index
    %c0_483 = arith.constant 0 : index
    %1409 = vector.load %arg2[%c3536_482, %c0_483] : memref<4032x128xf32, #tpu.memory_space<vmem>>, vector<32x2xf32>
    %1410 = vector.extract_strided_slice %1409 {offsets = [0, 0], sizes = [32, 1], strides = [1, 1]} : vector<32x2xf32> to vector<32x1xf32>
    %1411 = vector.extract_strided_slice %1395 {offsets = [0, 0], sizes = [1, 16], strides = [1, 1]} : vector<2x16xf32> to vector<1x16xf32>
    %1412 = vector.broadcast %1410 : vector<32x1xf32> to vector<32x16xf32>
    %1413 = vector.broadcast %1411 : vector<1x16xf32> to vector<32x16xf32>
    %1414 = arith.mulf %1412, %1413 : vector<32x16xf32>
    %1415 = vector.extract_strided_slice %1409 {offsets = [0, 1], sizes = [32, 1], strides = [1, 1]} : vector<32x2xf32> to vector<32x1xf32>
    %1416 = vector.extract_strided_slice %1395 {offsets = [1, 0], sizes = [1, 16], strides = [1, 1]} : vector<2x16xf32> to vector<1x16xf32>
    %1417 = vector.broadcast %1415 : vector<32x1xf32> to vector<32x16xf32>
    %1418 = vector.broadcast %1416 : vector<1x16xf32> to vector<32x16xf32>
    %1419 = arith.mulf %1417, %1418 : vector<32x16xf32>
    %1420 = arith.addf %1414, %1419 : vector<32x16xf32>
    %1421 = arith.addf %1408, %1420 : vector<32x16xf32>
    %1422 = arith.negf %1421 : vector<32x16xf32>
    %1423 = math.exp %1422 : vector<32x16xf32>
    %cst_484 = arith.constant 1.000000e+00 : f32
    %1424 = vector.broadcast %cst_484 : f32 to vector<32x16xf32>
    %1425 = arith.addf %1424, %1423 : vector<32x16xf32>
    %1426 = arith.divf %1424, %1425 : vector<32x16xf32>
    %1427 = arith.mulf %1421, %1426 : vector<32x16xf32>
    %c3168 = arith.constant 3168 : index
    %c0_485 = arith.constant 0 : index
    %1428 = vector.load %arg2[%c3168, %c0_485] : memref<4032x128xf32, #tpu.memory_space<vmem>>, vector<48x16xf32>
    %c3216 = arith.constant 3216 : index
    %c0_486 = arith.constant 0 : index
    %1429 = vector.load %arg2[%c3216, %c0_486] : memref<4032x128xf32, #tpu.memory_space<vmem>>, vector<1x16xf32>
    %c1_i32_487 = arith.constant 1 : i32
    %1430 = tpu.dynamic_rotate %1427 by %c1_i32_487 dim 0 : vector<32x16xf32>, i32 -> vector<32x16xf32>
    %c3632_488 = arith.constant 3632 : index
    %c0_489 = arith.constant 0 : index
    %1431 = vector.load %arg2[%c3632_488, %c0_489] : memref<4032x128xf32, #tpu.memory_space<vmem>>, vector<32x1xf32>
    %1432 = vector.broadcast %1431 : vector<32x1xf32> to vector<32x16xf32>
    %1433 = arith.mulf %1430, %1432 : vector<32x16xf32>
    %c31_i32_490 = arith.constant 31 : i32
    %1434 = tpu.dynamic_rotate %1427 by %c31_i32_490 dim 0 : vector<32x16xf32>, i32 -> vector<32x16xf32>
    %c3664_491 = arith.constant 3664 : index
    %c0_492 = arith.constant 0 : index
    %1435 = vector.load %arg2[%c3664_491, %c0_492] : memref<4032x128xf32, #tpu.memory_space<vmem>>, vector<32x1xf32>
    %1436 = vector.broadcast %1435 : vector<32x1xf32> to vector<32x16xf32>
    %1437 = arith.mulf %1434, %1436 : vector<32x16xf32>
    %1438 = tpu.concatenate %1433, %1427, %1437 in 1 : vector<32x16xf32>, vector<32x16xf32>, vector<32x16xf32> -> vector<32x48xf32>
    %cst_493 = arith.constant dense<0.000000e+00> : vector<32x16xf32>
    %1439 = tpu.matmul %1438, %1428, %cst_493 {dimension_numbers = #tpu.dot_dimension_numbers<[1], [0], [0], [1], [0, 0, 1, 1], [], []>} : vector<32x48xf32>, vector<48x16xf32>, vector<32x16xf32> -> vector<32x16xf32>
    %1440 = vector.broadcast %1429 : vector<1x16xf32> to vector<32x16xf32>
    %1441 = arith.addf %1439, %1440 : vector<32x16xf32>
    %c3528_494 = arith.constant 3528 : index
    %c0_495 = arith.constant 0 : index
    %1442 = vector.load %arg2[%c3528_494, %c0_495] : memref<4032x128xf32, #tpu.memory_space<vmem>>, vector<2x32xf32>
    %1443 = arith.mulf %1441, %1441 : vector<32x16xf32>
    %1444 = tpu.concatenate %1441, %1443 in 1 : vector<32x16xf32>, vector<32x16xf32> -> vector<32x32xf32>
    %cst_496 = arith.constant dense<0.000000e+00> : vector<2x32xf32>
    %1445 = tpu.matmul %1442, %1444, %cst_496 {dimension_numbers = #tpu.dot_dimension_numbers<[1], [0], [0], [1], [0, 0, 1, 1], [], []>} : vector<2x32xf32>, vector<32x32xf32>, vector<2x32xf32> -> vector<2x32xf32>
    %c3760_497 = arith.constant 3760 : index
    %c0_498 = arith.constant 0 : index
    %1446 = vector.load %arg2[%c3760_497, %c0_498] : memref<4032x128xf32, #tpu.memory_space<vmem>>, vector<32x32xf32>
    %cst_499 = arith.constant dense<0.000000e+00> : vector<2x32xf32>
    %1447 = tpu.matmul %1445, %1446, %cst_499 {dimension_numbers = #tpu.dot_dimension_numbers<[1], [0], [0], [1], [0, 0, 1, 1], [], []>} : vector<2x32xf32>, vector<32x32xf32>, vector<2x32xf32> -> vector<2x32xf32>
    %cst_500 = arith.constant 3.125000e-02 : f32
    %1448 = vector.broadcast %cst_500 : f32 to vector<2x32xf32>
    %1449 = arith.mulf %1447, %1448 : vector<2x32xf32>
    %1450 = vector.extract_strided_slice %1449 {offsets = [0, 0], sizes = [2, 16], strides = [1, 1]} : vector<2x32xf32> to vector<2x16xf32>
    %1451 = vector.extract_strided_slice %1449 {offsets = [0, 16], sizes = [2, 16], strides = [1, 1]} : vector<2x32xf32> to vector<2x16xf32>
    %1452 = arith.mulf %1450, %1450 : vector<2x16xf32>
    %1453 = arith.subf %1451, %1452 : vector<2x16xf32>
    %cst_501 = arith.constant 0.000000e+00 : f32
    %1454 = vector.broadcast %cst_501 : f32 to vector<2x16xf32>
    %1455 = arith.maximumf %1453, %1454 : vector<2x16xf32>
    %cst_502 = arith.constant 9.99999974E-6 : f32
    %1456 = vector.broadcast %cst_502 : f32 to vector<2x16xf32>
    %1457 = arith.addf %1455, %1456 : vector<2x16xf32>
    %1458 = math.rsqrt %1457 : vector<2x16xf32>
    %c3224 = arith.constant 3224 : index
    %c0_503 = arith.constant 0 : index
    %1459 = vector.load %arg2[%c3224, %c0_503] : memref<4032x128xf32, #tpu.memory_space<vmem>>, vector<1x16xf32>
    %1460 = vector.broadcast %1459 : vector<1x16xf32> to vector<2x16xf32>
    %1461 = arith.mulf %1458, %1460 : vector<2x16xf32>
    %c3232 = arith.constant 3232 : index
    %c0_504 = arith.constant 0 : index
    %1462 = vector.load %arg2[%c3232, %c0_504] : memref<4032x128xf32, #tpu.memory_space<vmem>>, vector<1x16xf32>
    %1463 = arith.mulf %1450, %1461 : vector<2x16xf32>
    %1464 = vector.broadcast %1462 : vector<1x16xf32> to vector<2x16xf32>
    %1465 = arith.subf %1464, %1463 : vector<2x16xf32>
    %c3536_505 = arith.constant 3536 : index
    %c0_506 = arith.constant 0 : index
    %1466 = vector.load %arg2[%c3536_505, %c0_506] : memref<4032x128xf32, #tpu.memory_space<vmem>>, vector<32x2xf32>
    %1467 = vector.extract_strided_slice %1466 {offsets = [0, 0], sizes = [32, 1], strides = [1, 1]} : vector<32x2xf32> to vector<32x1xf32>
    %1468 = vector.extract_strided_slice %1461 {offsets = [0, 0], sizes = [1, 16], strides = [1, 1]} : vector<2x16xf32> to vector<1x16xf32>
    %1469 = vector.broadcast %1467 : vector<32x1xf32> to vector<32x16xf32>
    %1470 = vector.broadcast %1468 : vector<1x16xf32> to vector<32x16xf32>
    %1471 = arith.mulf %1469, %1470 : vector<32x16xf32>
    %1472 = vector.extract_strided_slice %1466 {offsets = [0, 1], sizes = [32, 1], strides = [1, 1]} : vector<32x2xf32> to vector<32x1xf32>
    %1473 = vector.extract_strided_slice %1461 {offsets = [1, 0], sizes = [1, 16], strides = [1, 1]} : vector<2x16xf32> to vector<1x16xf32>
    %1474 = vector.broadcast %1472 : vector<32x1xf32> to vector<32x16xf32>
    %1475 = vector.broadcast %1473 : vector<1x16xf32> to vector<32x16xf32>
    %1476 = arith.mulf %1474, %1475 : vector<32x16xf32>
    %1477 = arith.addf %1471, %1476 : vector<32x16xf32>
    %1478 = arith.mulf %1441, %1477 : vector<32x16xf32>
    %c3536_507 = arith.constant 3536 : index
    %c0_508 = arith.constant 0 : index
    %1479 = vector.load %arg2[%c3536_507, %c0_508] : memref<4032x128xf32, #tpu.memory_space<vmem>>, vector<32x2xf32>
    %1480 = vector.extract_strided_slice %1479 {offsets = [0, 0], sizes = [32, 1], strides = [1, 1]} : vector<32x2xf32> to vector<32x1xf32>
    %1481 = vector.extract_strided_slice %1465 {offsets = [0, 0], sizes = [1, 16], strides = [1, 1]} : vector<2x16xf32> to vector<1x16xf32>
    %1482 = vector.broadcast %1480 : vector<32x1xf32> to vector<32x16xf32>
    %1483 = vector.broadcast %1481 : vector<1x16xf32> to vector<32x16xf32>
    %1484 = arith.mulf %1482, %1483 : vector<32x16xf32>
    %1485 = vector.extract_strided_slice %1479 {offsets = [0, 1], sizes = [32, 1], strides = [1, 1]} : vector<32x2xf32> to vector<32x1xf32>
    %1486 = vector.extract_strided_slice %1465 {offsets = [1, 0], sizes = [1, 16], strides = [1, 1]} : vector<2x16xf32> to vector<1x16xf32>
    %1487 = vector.broadcast %1485 : vector<32x1xf32> to vector<32x16xf32>
    %1488 = vector.broadcast %1486 : vector<1x16xf32> to vector<32x16xf32>
    %1489 = arith.mulf %1487, %1488 : vector<32x16xf32>
    %1490 = arith.addf %1484, %1489 : vector<32x16xf32>
    %1491 = arith.addf %1478, %1490 : vector<32x16xf32>
    %1492 = arith.negf %1491 : vector<32x16xf32>
    %1493 = math.exp %1492 : vector<32x16xf32>
    %cst_509 = arith.constant 1.000000e+00 : f32
    %1494 = vector.broadcast %cst_509 : f32 to vector<32x16xf32>
    %1495 = arith.addf %1494, %1493 : vector<32x16xf32>
    %1496 = arith.divf %1494, %1495 : vector<32x16xf32>
    %1497 = arith.mulf %1491, %1496 : vector<32x16xf32>
    %c3240 = arith.constant 3240 : index
    %c0_510 = arith.constant 0 : index
    %1498 = vector.load %arg2[%c3240, %c0_510] : memref<4032x128xf32, #tpu.memory_space<vmem>>, vector<32x16xf32>
    %c3272 = arith.constant 3272 : index
    %c0_511 = arith.constant 0 : index
    %1499 = vector.load %arg2[%c3272, %c0_511] : memref<4032x128xf32, #tpu.memory_space<vmem>>, vector<1x16xf32>
    %cst_512 = arith.constant dense<0.000000e+00> : vector<32x16xf32>
    %1500 = tpu.matmul %1357, %1498, %cst_512 {dimension_numbers = #tpu.dot_dimension_numbers<[1], [0], [0], [1], [0, 0, 1, 1], [], []>} : vector<32x32xf32>, vector<32x16xf32>, vector<32x16xf32> -> vector<32x16xf32>
    %1501 = vector.broadcast %1499 : vector<1x16xf32> to vector<32x16xf32>
    %1502 = arith.addf %1500, %1501 : vector<32x16xf32>
    %1503 = arith.addf %1497, %1502 : vector<32x16xf32>
    %c3456 = arith.constant 3456 : index
    %c0_513 = arith.constant 0 : index
    %1504 = vector.load %arg2[%c3456, %c0_513] : memref<4032x128xf32, #tpu.memory_space<vmem>>, vector<1x16xf32>
    %c3464 = arith.constant 3464 : index
    %c0_514 = arith.constant 0 : index
    %1505 = vector.load %arg2[%c3464, %c0_514] : memref<4032x128xf32, #tpu.memory_space<vmem>>, vector<1x1xf32>
    %1506 = vector.broadcast %1504 : vector<1x16xf32> to vector<32x16xf32>
    %1507 = arith.mulf %1503, %1506 : vector<32x16xf32>
    %cst_515 = arith.constant dense<0.000000e+00> : vector<32xf32>
    %1508 = vector.multi_reduction <add>, %1507, %cst_515 [1] : vector<32x16xf32> to vector<32xf32>
    %1509 = vector.shape_cast %1508 : vector<32xf32> to vector<32x1xf32>
    %1510 = vector.broadcast %1505 : vector<1x1xf32> to vector<32x1xf32>
    %1511 = arith.addf %1509, %1510 : vector<32x1xf32>
    %c0_516 = arith.constant 0 : index
    %c0_517 = arith.constant 0 : index
    %1512 = vector.load %arg3[%c0_516, %c0_517] : memref<32x1xf32, #tpu.memory_space<vmem>>, vector<32x1xf32>
    tpu.vector_store %arg3[%c0_516, %c0_517], %1511 {strides = array<i32>} : memref<32x1xf32, #tpu.memory_space<vmem>>, vector<32x1xf32>,
    return
  }
}

</mosaic_0001>

<bundles_post_ra>
// kernel: unet_forward.1
= control target key start
LH: loop header
LB: loop body
LE: loop exit
PB: predicated region body
PF: predicated region fallthrough
CT: control target
= control target key end

     0   :  { %8 = vsyncpa [#allocation3], 0  ;;  %s12137_s12 = smov [#allocation2]   ;;  %s14566_s0 = inlined_call_operand.vmem [shape: f32[32,1], index: 0, kind: input, shape index: {}]   ;;  %s14567_s1 = inlined_call_operand.vmem [shape: f32[64,128], index: 1, kind: input, shape index: {}]   ;;  %s14568_s2 = inlined_call_operand.hbm [shape: f32[4032,128], index: 2, kind: input, shape index: {}]   ;;  %s14569_s3 = inlined_call_operand.vmem [shape: f32[32,1], index: 3, kind: output, shape index: {}]  }
   0x1   :  { %s18_s13 = sshll.u32 %s12137_s12, 4  ;;  %s12113_s16 = scalar_lea.hbm %s14568_s2, 64512  ;;  %s19_s13 = int_to_ptr.vmem [resolvable:$true] %s18_s13 }
   0x2   :  { %p12114_p0 = scmp.ne.s32.totalorder %s14568_s2, %s12113_s16  ;;  %p12117_p1 = scmp.lt.u32.totalorder %s12113_s16, %s14568_s2 }
   0x4   :  { %p12119_p2 = pnand %p12117_p1, %p12114_p0 }
   0x6   :  { %12122 = shalt.err (!%p12119_p2)
}
   0x7   :  { %s12123_s21 = scalar_lea.vmem %s19_s13, 64512  ;;  %p12128_p4 = scmp.lt.s32.totalorder %s19_s13, %s19_s13 }
   0x8   :  { %p12124_p3 = scmp.ne.s32.totalorder %s19_s13, %s12123_s21  ;;  %p12129_p5 = scmp.lt.s32.totalorder %s12123_s21, %s12123_s21 }
   0xa   :  { %p12130_p6 = por %p12129_p5, %p12128_p4 }
   0xc   :  { %p12131_p7 = pnand %p12130_p6, %p12124_p3 }
   0xe   :  { %12134 = shalt.err (!%p12131_p7)
}
   0xf   :  { %s12138_s22 = smov 128   ;;  %s12139_s23 = smov 8  }
  0x10   :  { %24 = dma.hbm_to_vmem [thread:$0]  %s14568_s2, 64512, %s19_s13, [#allocation3], %s12138_s22, %s12138_s22, %s12139_s23  }
  0x11   :  { %12135 = dma.done.wait [#allocation3], 64512  }
  0x12   :  { %12136 = vsyncadd [#allocation3], 4294902784  ;;  %v12140_v0 = vmov 0   ;;  %v31_v1 = vld [vmem:[%s14566_s0 + $0x18] sm:$0xff]  ;;  %v28_v2 = vld [vmem:[%s14566_s0] sm:$0xff]  ;;  %v54_v31 = vlaneseq  ;;  %s12142_s6 = smov 32  }
  0x13   :  { %11742 = vset.pattern.permute.xlu1 %v12140_v0  ;;  %11741 = vset.pattern.permute.xlu0 %v12140_v0  ;;  %v30_v3 = vld [vmem:[%s14566_s0 + $0x10] sm:$0xff]  ;;  %v29_v4 = vld [vmem:[%s14566_s0 + $0x8] sm:$0xff]  ;;  %v74_v5 = vld [vmem:[#allocation2 + $0xdf8] sm:$0xff]  ;;  %s12141_s0 = smov 16   ;;  %vm429_vm6 = vcmask 130048   ;;  %vm434_vm7 = vcmask 261120  }
  0x14   :  { %51 = vperm.xlu1 %11742, %v31_v1   ;;  %36 = vperm.xlu0 %11741, %v28_v2   ;;  %v73_v6 = vld [vmem:[#allocation2 + $0xdf0] sm:$0xff]  ;;  %v119_v7 = vld [vmem:[#allocation2 + $0xe18] sm:$0xff]  ;;  %v120_v9 = vld [vmem:[#allocation2 + $0xe20] sm:$0xff]  ;;  %v12204_v34 = vshrl.u32 %v54_v31, 7  ;;  %vm443_vm8 = vcmask 392192   ;;  %vm12144_vm9 = vmmov 0  }
  0x15   :  { %v118_v8 = vld [vmem:[#allocation2 + $0xe10] sm:$0xff]  ;;  %v75_v10 = vld [vmem:[#allocation2 + $0xe00] sm:$0xff]  ;;  %v168_v11 = vld [vmem:[#allocation2 + $0xe38] sm:$0xff]  ;;  %vm647_vm10 = vcmask 523264   ;;  %s12147_s7 = smov 96   ;;  %s12148_s10 = smov 64  }
  0x16   :  { %v167_v12 = vld [vmem:[#allocation2 + $0xe30] sm:$0xff]  ;;  %v76_v13 = vld [vmem:[#allocation2 + $0xe08] sm:$0xff]  ;;  %v169_v14 = vld [vmem:[#allocation2 + $0xe40] sm:$0xff]  ;;  %v12211_v37 = vsub.s32 0, %v12204_v34  ;;  %v12214_v39 = vsub.s32 1, %v12204_v34  ;;  %v152_v40 = vsub.s32 2, %v12204_v34 }
  0x17   :  { %v170_v15 = vld [vmem:[#allocation2 + $0xe48] sm:$0xff]  ;;  %v229_v17 = vld [vmem:[#allocation2 + $0xe58] sm:$0xff]  ;;  %v228_v18 = vld [vmem:[#allocation2 + $0xe50] sm:$0xff]  ;;  %v213_v43 = vsub.s32 4, %v12204_v34  ;;  %v262_v49 = vsub.s32 5, %v12204_v34  ;;  %v201_v50 = vsub.s32 3, %v12204_v34 }
  0x18   :  { %46 = vperm.xlu1 %11742, %v30_v3   ;;  %41 = vperm.xlu0 %11741, %v29_v4   ;;  %v121_v16 = vld [vmem:[#allocation2 + $0xe28] sm:$0xff]  ;;  %v277_v19 = vld [vmem:[#allocation2 + $0xe70] sm:$0xff]  ;;  %v230_v20 = vld [vmem:[#allocation2 + $0xe60] sm:$0xff]  ;;  %vm68_vm0 = vcmp.lt.s32.totalorder %v12204_v34, 3  ;;  %vm113_vm1 = vcmp.lt.s32.totalorder %v12204_v34, 2  ;;  %vm162_vm2 = vcmp.lt.s32.totalorder %v12204_v34, 1 }
  0x19   :  { %v279_v21 = vld [vmem:[#allocation2 + $0xe80] sm:$0xff]  ;;  %v278_v22 = vld [vmem:[#allocation2 + $0xe78] sm:$0xff]  ;;  %v326_v23 = vld [vmem:[#allocation2 + $0xe90] sm:$0xff]  ;;  %v311_v2 = vsub.s32 6, %v12204_v34  ;;  %vm223_vm3 = vcmp.lt.s32.totalorder %v12204_v34, 7  ;;  %vm272_vm4 = vcmp.lt.s32.totalorder %v12204_v34, 6 }
  0x1a   :  { %v231_v24 = vld [vmem:[#allocation2 + $0xe68] sm:$0xff]  ;;  %v328_v25 = vld [vmem:[#allocation2 + $0xea0] sm:$0xff]  ;;  %v327_v26 = vld [vmem:[#allocation2 + $0xe98] sm:$0xff]  ;;  %vm321_vm5 = vcmp.lt.s32.totalorder %v12204_v34, 5  ;;  %vm990_vm11 = vcmask 785408   ;;  %vm8894_vm12 = vcmask 7168  }
  0x1b   :  { %v329_v27 = vld [vmem:[#allocation2 + $0xea8] sm:$0xff]  ;;  %v32_v38 = vld [vmem:[#allocation2] sm:$0x7f] }
  0x1c   :  { %84 = vperm.xlu1 %11742, %v74_v5   ;;  %79 = vperm.xlu0 %11741, %v73_v6   ;;  %v280_v28 = vld [vmem:[#allocation2 + $0xe88] sm:$0xff]  ;;  %v57_v44 = vrot.slane %v32_v38, %v12211_v37  ;;  %v104_v45 = vrot.slane %v32_v38, %v12214_v39  ;;  %v153_v46 = vrot.slane %v32_v38, %v152_v40 }
  0x1d   :  { %v214_v51 = vrot.slane %v32_v38, %v213_v43  ;;  %v263_v60 = vrot.slane %v32_v38, %v262_v49  ;;  %v12247_v63 = vrot.slane %v32_v38, %v201_v50 }
  0x20   :  { %129 = vperm.xlu1 %11742, %v119_v7   ;;  %124 = vperm.xlu0 %11741, %v118_v8  }
  0x24   :  { %134 = vperm.xlu1 %11742, %v120_v9   ;;  %89 = vperm.xlu0 %11741, %v75_v10  }
  0x28   :  { %178 = vperm.xlu1 %11742, %v168_v11   ;;  %173 = vperm.xlu0 %11741, %v167_v12  }
  0x2c   :  { %94 = vperm.xlu1 %11742, %v76_v13   ;;  %183 = vperm.xlu0 %11741, %v169_v14  }
  0x30   :  { %188 = vperm.xlu1 %11742, %v170_v15   ;;  %139 = vperm.xlu0 %11741, %v121_v16  }
  0x34   :  { %239 = vperm.xlu1 %11742, %v229_v17   ;;  %234 = vperm.xlu0 %11741, %v228_v18  }
  0x38   :  { %283 = vperm.xlu1 %11742, %v277_v19   ;;  %244 = vperm.xlu0 %11741, %v230_v20   ;;  %v12272_v19 = vrot.slane %v32_v38, %v311_v2 }
  0x3c   :  { %293 = vperm.xlu1 %11742, %v279_v21   ;;  %288 = vperm.xlu0 %11741, %v278_v22  }
  0x40   :  { %332 = vperm.xlu1 %11742, %v326_v23   ;;  %249 = vperm.xlu0 %11741, %v231_v24  }
  0x44   :  { %342 = vperm.xlu1 %11742, %v328_v25   ;;  %337 = vperm.xlu0 %11741, %v327_v26  }
  0x48   :  { %347 = vperm.xlu1 %11742, %v329_v27   ;;  %298 = vperm.xlu0 %11741, %v280_v28  }
  0x93   :  { %v12196_v29 = vpop.permute.xlu1 %51  ;;  %v12198_v30 = vpop.permute.xlu0 %36 }
  0x94   :  { %v58_v52 = vmul.f32 %v57_v44, %v12198_v30  ;;  %v61_v54 = vmul.f32 %v57_v44, %v12196_v29  ;;  %v105_v55 = vmul.f32 %v104_v45, %v12198_v30  ;;  %v108_v56 = vmul.f32 %v104_v45, %v12196_v29 }
  0x95   :  { %v157_v57 = vmul.f32 %v153_v46, %v12196_v29  ;;  %v12244_v61 = vmul.f32 %v153_v46, %v12198_v30  ;;  %v12250_v1 = vmul.f32 %v214_v51, %v12198_v30  ;;  %v12266_v16 = vmul.f32 %v263_v60, %v12198_v30 }
  0x96   :  { %v62_v3 = vrot.slane %v58_v52, 5  ;;  %v65_v7 = vrot.slane %v61_v54, 5  ;;  %v109_v8 = vrot.slane %v105_v55, 6  ;;  %v112_v9 = vrot.slane %v108_v56, 6 }
  0x97   :  { %v12200_v32 = vpop.permute.xlu1 %46  ;;  %v12202_v33 = vpop.permute.xlu0 %41  ;;  %v161_v10 = vrot.slane %v157_v57, 7  ;;  %v158_v14 = vrot.slane %v12244_v61, 7  ;;  %v12278_v23 = vmul.f32 %v12247_v63, %v12198_v30  ;;  %v219_v26 = vrot.slane %v12250_v1, 1 }
  0x98   :  { %v59_v53 = vmul.f32 %v57_v44, %v12202_v33  ;;  %v106_v62 = vmul.f32 %v104_v45, %v12202_v33  ;;  %v107_v5 = vmul.f32 %v104_v45, %v12200_v32  ;;  %v60_v6 = vmul.f32 %v57_v44, %v12200_v32 }
  0x99   :  { %v156_v13 = vmul.f32 %v153_v46, %v12200_v32  ;;  %v12263_v15 = vmul.f32 %v214_v51, %v12202_v33  ;;  %v12270_v18 = vmul.f32 %v263_v60, %v12202_v33  ;;  %v72_v24 = vsel %vm68_vm0, %v65_v7, %v62_v3 }
  0x9a   :  { %v63_v4 = vrot.slane %v59_v53, 5  ;;  %v110_v17 = vrot.slane %v106_v62, 6  ;;  %v111_v21 = vrot.slane %v107_v5, 6  ;;  %v64_v22 = vrot.slane %v60_v6, 5 }
  0x9b   :  { %v12206_v35 = vpop.permute.xlu1 %84  ;;  %v12208_v36 = vpop.permute.xlu0 %79  ;;  %v117_v25 = vsel %vm113_vm1, %v112_v9, %v109_v8  ;;  %v155_v27 = vmul.f32 %v153_v46, %v12202_v33  ;;  %v160_v31 = vrot.slane %v156_v13, 7  ;;  %v166_v40 = vsel %vm162_vm2, %v161_v10, %v158_v14 }
  0x9c   :  { %v71_v20 = vsel %vm68_vm0, %v62_v3, %v63_v4  ;;  %v220_v43 = vrot.slane %v12263_v15, 1  ;;  %v268_v44 = vrot.slane %v12266_v16, 2  ;;  %v97_v49 = vmul.f32 %v12208_v36, %v72_v24 }
  0x9d   :  { %v98_v45 = vmul.f32 %v12206_v35, %v71_v20  ;;  %v116_v50 = vsel %vm113_vm1, %v109_v8, %v110_v17  ;;  %v269_v46 = vrot.slane %v12270_v18, 2  ;;  %v115_v52 = vsel %vm113_vm1, %v110_v17, %v111_v21 }
  0x9e   :  { %v70_v53 = vsel %vm68_vm0, %v63_v4, %v64_v22  ;;  %v217_v54 = vmul.f32 %v214_v51, %v12200_v32  ;;  %v12303_v55 = vmul.f32 %v214_v51, %v12196_v29  ;;  %v69_v36 = vsel %vm68_vm0, %v64_v22, %v65_v7 }
  0x9f   :  { %v12217_v41 = vpop.permute.xlu1 %129  ;;  %v12219_v42 = vpop.permute.xlu0 %124  ;;  %v114_v56 = vsel %vm113_vm1, %v111_v21, %v112_v9  ;;  %v159_v57 = vrot.slane %v155_v27, 7  ;;  %v12313_v62 = vsel %vm162_vm2, %v160_v31, %v161_v10  ;;  %v266_v51 = vmul.f32 %v263_v60, %v12200_v32 }
  0xa0   :  { %v142_v35 = vmul.f32 %v12219_v42, %v117_v25  ;;  %v143_v61 = vmul.f32 %v12217_v41, %v116_v50  ;;  %v226_v42 = vsel %vm223_vm3, %v219_v26, %v220_v43  ;;  %v275_v41 = vsel %vm272_vm4, %v268_v44, %v269_v46  ;;  %v366_v50 = vld [vmem:[#allocation2 + $0x10] sm:$0xff] }
  0xa1   :  { %v205_v5 = vmul.f32 %v12247_v63, %v12200_v32  ;;  %v12332_v6 = vmul.f32 %v263_v60, %v12196_v29  ;;  %v221_v9 = vrot.slane %v217_v54, 1  ;;  %v222_v10 = vrot.slane %v12303_v55, 1 }
  0xa2   :  { %v146_v13 = vadd.f32 %v142_v35, %v97_v49  ;;  %v164_v15 = vsel %vm162_vm2, %v159_v57, %v160_v31  ;;  %v165_v17 = vsel %vm162_vm2, %v158_v14, %v159_v57  ;;  %v12344_v60 = vmul.f32 %v12272_v19, %v12202_v33 }
  0xa3   :  { %v12224_v47 = vpop.permute.xlu1 %134  ;;  %v12226_v48 = vpop.permute.xlu0 %89  ;;  %v147_v18 = vadd.f32 %v143_v61, %v98_v45  ;;  %v271_v25 = vrot.slane %v12332_v6, 2  ;;  %v204_v27 = vmul.f32 %v12247_v63, %v12202_v33  ;;  %v12355_v14 = vmul.f32 %v12272_v19, %v12198_v30 }
  0xa4   :  { %v144_v7 = vmul.f32 %v12224_v47, %v115_v52  ;;  %v99_v8 = vmul.f32 %v12226_v48, %v70_v53  ;;  %v270_v48 = vrot.slane %v266_v51, 2  ;;  %v225_v45 = vsel %vm223_vm3, %v220_v43, %v221_v9  ;;  %v367_v52 = vld [vmem:[#allocation2 + $0x18] sm:$0xff] }
  0xa5   :  { %v315_v49 = vmul.f32 %v12272_v19, %v12200_v32  ;;  %v318_v30 = vrot.slane %v12344_v60, 3  ;;  %v10716_v54 = vpack.c.bf16 %v367_v52, %v366_v50 }
  0xa6   :  { %v148_v31 = vadd.f32 %v144_v7, %v99_v8  ;;  %v273_v35 = vsel %vm272_vm4, %v270_v48, %v271_v25  ;;  %v274_v43 = vsel %vm272_vm4, %v269_v46, %v270_v48  ;;  %v369_v46 = vld [vmem:[#allocation2 + $0x28] sm:$0xff] }
  0xa7   :  { %v12238_v58 = vpop.permute.xlu1 %178  ;;  %v12240_v59 = vpop.permute.xlu0 %173  ;;  %10717 = vmatprep.subr.bf16.mxu0 %v10716_v54 }
  0xa8   :  { %v191_v4 = vmul.f32 %v12240_v59, %v166_v40  ;;  %v192_v22 = vmul.f32 %v12238_v58, %v165_v17  ;;  %v224_v40 = vsel %vm223_vm3, %v221_v9, %v222_v10  ;;  %v316_v9 = vmul.f32 %v12272_v19, %v12196_v29  ;;  %10719 = vmatpush3.bf16.msra.mxu0 %v10716_v54 }
  0xaa   :  { %v195_v24 = vadd.f32 %v191_v4, %v146_v13  ;;  %v196_v51 = vadd.f32 %v192_v22, %v147_v18  ;;  %v319_v13 = vrot.slane %v315_v49, 3  ;;  %v206_v49 = vmul.f32 %v12247_v63, %v12196_v29 }
  0xab   :  { %v12256_v11 = vpop.permute.xlu1 %94  ;;  %v12258_v12 = vpop.permute.xlu0 %183 }
  0xac   :  { %v193_v21 = vmul.f32 %v12258_v12, %v164_v15  ;;  %v100_v4 = vmul.f32 %v12256_v11, %v69_v36  ;;  %v368_v15 = vld [vmem:[#allocation2 + $0x20] sm:$0xff]  ;;  %v208_v18 = vadd.f32 %v204_v27, %v196_v51  ;;  %v323_v50 = vsel %vm321_vm5, %v318_v30, %v319_v13 }
  0xae   :  { %v197_v61 = vadd.f32 %v193_v21, %v148_v31 }
  0xaf   :  { %v12286_v28 = vpop.permute.xlu1 %188  ;;  %v140_v38 = vpop.permute.xlu0 %139 }
  0xb0   :  { %v145_v53 = vmul.f32 %v140_v38, %v114_v56  ;;  %v207_v38 = vadd.f32 %v12278_v23, %v195_v24  ;;  %v10720_v23 = vpack.c.bf16 %v369_v46, %v368_v15  ;;  %v209_v36 = vadd.f32 %v205_v5, %v197_v61 }
  0xb1   :  { %v194_v19 = vmul.f32 %v12286_v28, %v12313_v62  ;;  %v227_v62 = vsel %vm223_vm3, %v222_v10, %v219_v26 }
  0xb2   :  { %v149_v17 = vadd.f32 %v145_v53, %v100_v4  ;;  %10721 = vmatprep.subr.bf16.mxu0 %v10720_v23 }
  0xb3   :  { %v12315_v2 = vpop.permute.xlu1 %239  ;;  %v12317_v3 = vpop.permute.xlu0 %234  ;;  %10723 = vmatpush3.bf16.msra.mxu0 %v10720_v23 }
  0xb4   :  { %v252_v33 = vmul.f32 %v12317_v3, %v226_v42  ;;  %v317_v42 = vrot.slane %v12355_v14, 3  ;;  %v253_v8 = vmul.f32 %v12315_v2, %v225_v45  ;;  %v320_v45 = vrot.slane %v316_v9, 3 }
  0xb5   :  { %v198_v5 = vadd.f32 %v194_v19, %v149_v17 }
  0xb6   :  { %v256_v60 = vadd.f32 %v252_v33, %v207_v38  ;;  %v324_v11 = vsel %vm321_vm5, %v317_v42, %v318_v30  ;;  %v257_v31 = vadd.f32 %v253_v8, %v208_v18  ;;  %v322_v33 = vsel %vm321_vm5, %v319_v13, %v320_v45 }
  0xb7   :  { %v284_v47 = vpop.permute.xlu1 %283  ;;  %v12346_v20 = vpop.permute.xlu0 %244  ;;  %v210_v26 = vadd.f32 %v206_v49, %v198_v5  ;;  %v325_v9 = vsel %vm321_vm5, %v320_v45, %v317_v42 }
  0xb8   :  { %v301_v56 = vmul.f32 %v284_v47, %v275_v41  ;;  %v254_v7 = vmul.f32 %v12346_v20, %v224_v40  ;;  %v8904_v40 = vld [vmem:[#allocation2 + $0x8] ss:$0 sm:$0xff] }
  0xba   :  { %v305_v22 = vadd.f32 %v301_v56, %v256_v60  ;;  %v258_v14 = vadd.f32 %v254_v7, %v209_v36 }
  0xbb   :  { %v294_v57 = vpop.permute.xlu1 %293  ;;  %v289_v32 = vpop.permute.xlu0 %288 }
  0xbc   :  { %v303_v41 = vmul.f32 %v294_v57, %v273_v35  ;;  %v302_v47 = vmul.f32 %v289_v32, %v274_v43  ;;  %v370_v35 = vld [vmem:[#allocation2 + $0x30] sm:$0xff]  ;;  %v371_v57 = vld [vmem:[#allocation2 + $0x38] sm:$0xff]  ;;  %v276_v32 = vsel %vm272_vm4, %v271_v25, %v268_v44 }
  0xbd   :  { %v10724_v51 = vpack.c.bf16 %v371_v57, %v370_v35 }
  0xbe   :  { %v307_v52 = vadd.f32 %v303_v41, %v258_v14  ;;  %v306_v53 = vadd.f32 %v302_v47, %v257_v31 }
  0xbf   :  { %v333_v48 = vpop.permute.xlu1 %332  ;;  %v12382_v21 = vpop.permute.xlu0 %249  ;;  %10725 = vmatprep.subr.bf16.mxu0 %v10724_v51 }
  0xc0   :  { %v350_v24 = vmul.f32 %v333_v48, %v324_v11  ;;  %v255_v63 = vmul.f32 %v12382_v21, %v227_v62  ;;  %10727 = vmatpush3.bf16.msra.mxu0 %v10724_v51 }
  0xc2   :  { %v354_v27 = vadd.f32 %v350_v24, %v305_v22  ;;  %v259_v7 = vadd.f32 %v255_v63, %v210_v26 }
  0xc3   :  { %v343_v54 = vpop.permute.xlu1 %342  ;;  %v338_v29 = vpop.permute.xlu0 %337 }
  0xc4   :  { %v12399_v61 = vadd.f32 %v8904_v40, %v354_v27  ;;  %v352_v30 = vmul.f32 %v343_v54, %v322_v33  ;;  %v351_v1 = vmul.f32 %v338_v29, %v323_v50 }
  0xc6   :  { %v356_v55 = vadd.f32 %v352_v30, %v307_v52  ;;  %v355_v43 = vadd.f32 %v351_v1, %v306_v53  ;;  %401 = vrot.lane.b32.xlu0 %v12399_v61, %s12141_s0  ;;  %v385_v16 = vrot.slane %v12399_v61, 1  ;;  %v373_v22 = vrot.slane %v12399_v61, 7 }
  0xc7   :  { %v348_v10 = vpop.permute.xlu1 %347  ;;  %v299_v4 = vpop.permute.xlu0 %298 }
  0xc8   :  { %v12409_v38 = vadd.f32 %v8904_v40, %v356_v55  ;;  %v12411_v56 = vadd.f32 %v8904_v40, %v355_v43  ;;  %v304_v8 = vmul.f32 %v299_v4, %v276_v32  ;;  %v353_v13 = vmul.f32 %v348_v10, %v325_v9  ;;  %v8905_v32 = vld [vmem:[#allocation2 + $0x40] ss:$0 sm:$0xff] }
  0xca   :  { %v308_v15 = vadd.f32 %v304_v8, %v259_v7  ;;  %405 = vrot.lane.b32.xlu0 %v12409_v38, %s12141_s0  ;;  %403 = vrot.lane.b32.xlu1 %v12411_v56, %s12141_s0  ;;  %v386_v44 = vrot.slane %v12411_v56, 1  ;;  %v387_v6 = vrot.slane %v12409_v38, 1  ;;  %v374_v31 = vrot.slane %v12411_v56, 7 }
  0xcb   :  { %v375_v45 = vrot.slane %v12409_v38, 7  ;;  %v14572_v7 = vmov 0.0|0.0  }
  0xcc   :  { %v357_v25 = vadd.f32 %v353_v13, %v308_v15  ;;  %v391_v46 = vsel %vm223_vm3, %v385_v16, %v386_v44  ;;  %v390_v60 = vsel %vm223_vm3, %v386_v44, %v387_v6  ;;  %v379_v27 = vsel %vm162_vm2, %v373_v22, %v374_v31  ;;  %10728 = vmatprep.subr.bf16.mxu1 %v14572_v7 }
  0xcd   :  { %v393_v42 = vmul.f32 %v391_v46, %v12317_v3  ;;  %v394_v23 = vmul.f32 %v390_v60, %v12315_v2  ;;  %v378_v62 = vsel %vm162_vm2, %v374_v31, %v375_v45  ;;  %v382_v33 = vmul.f32 %v379_v27, %v12238_v58  ;;  %v639_v27 = vld [vmem:[#allocation2 + $0xed0] sm:$0xff] }
  0xce   :  { %v12425_v17 = vadd.f32 %v8904_v40, %v357_v25  ;;  %v383_v54 = vmul.f32 %v378_v62, %v12258_v12  ;;  %v14570_v46 = vmov 0.0  }
  0xcf   :  { %417 = vrot.lane.b32.xlu0 %v393_v42, %s12142_s6  ;;  %9695 = vmatprep.mubr.msk.f32.mxu1 %vm12144_vm9, %v14570_v46 }
  0xd0   :  { %407 = vrot.lane.b32.xlu1 %v12425_v17, %s12141_s0  ;;  %v388_v11 = vrot.slane %v12425_v17, 1  ;;  %v376_v48 = vrot.slane %v12425_v17, 7 }
  0xd2   :  { %v389_v36 = vsel %vm223_vm3, %v387_v6, %v388_v11  ;;  %v392_v18 = vsel %vm223_vm3, %v388_v11, %v385_v16  ;;  %v380_v24 = vsel %vm162_vm2, %v376_v48, %v373_v22  ;;  %v377_v29 = vsel %vm162_vm2, %v375_v45, %v376_v48 }
  0xd3   :  { %v395_v41 = vmul.f32 %v389_v36, %v12346_v20  ;;  %v396_v47 = vmul.f32 %v392_v18, %v12382_v21  ;;  %v381_v49 = vmul.f32 %v380_v24, %v12240_v59  ;;  %v384_v51 = vmul.f32 %v377_v29, %v12286_v28 }
  0xd4   :  { %419 = vrot.lane.b32.xlu1 %v394_v23, %s12142_s6  ;;  %v12146_v18 = vmov 1  }
  0xd5   :  { %421 = vrot.lane.b32.xlu0 %v395_v41, %s12142_s6  ;;  %v752_v41 = vld [vmem:[#allocation2 + $0xdd0] sm:$0xff] }
  0xd8   :  { %423 = vrot.lane.b32.xlu1 %v396_v47, %s12142_s6 }
 0x138   :  { %v402_v19 = vpop.permute.xlu0 %401 }
 0x139   :  { %v430_v5 = vsel %vm429_vm6, %v381_v49, %v402_v19 }
 0x13c   :  { %v406_v14 = vpop.permute.xlu0 %405  ;;  %v404_v40 = vpop.permute.xlu1 %403 }
 0x13d   :  { %v431_v63 = vsel %vm429_vm6, %v382_v33, %v404_v40  ;;  %v432_v57 = vsel %vm429_vm6, %v383_v54, %v406_v14  ;;  %v641_v33 = vld [vmem:[#allocation2 + $0xee0] sm:$0xff]  ;;  %v642_v54 = vld [vmem:[#allocation2 + $0xee8] sm:$0xff] }
 0x13e   :  { %v12511_v29 = vpack.c.bf16 %v642_v54, %v641_v33 }
 0x141   :  { %v418_v50 = vpop.permute.xlu0 %417 }
 0x142   :  { %v408_v52 = vpop.permute.xlu1 %407  ;;  %v435_v53 = vsel %vm434_vm7, %v430_v5, %v418_v50  ;;  %v640_v50 = vld [vmem:[#allocation2 + $0xed8] sm:$0xff] }
 0x143   :  { %9681 = vmatprep.mubr.msk.f32.mxu0 %vm443_vm8, %v435_v53  ;;  %v433_v43 = vsel %vm429_vm6, %v384_v51, %v408_v52  ;;  %v12503_v52 = vld [vmem:[#allocation2 + $0xdc8] sm:$0x3]  ;;  %v12505_v53 = vpack.c.bf16 %v640_v50, %v639_v27 }
 0x146   :  { %v420_v35 = vpop.permute.xlu1 %419 }
 0x147   :  { %v436_v30 = vsel %vm434_vm7, %v431_v63, %v420_v35  ;;  %v422_v1 = vpop.permute.xlu0 %421  ;;  %v643_v63 = vld [vmem:[#allocation2 + $0xef0] sm:$0xff]  ;;  %v644_v35 = vld [vmem:[#allocation2 + $0xef8] sm:$0xff] }
 0x148   :  { %v437_v55 = vsel %vm434_vm7, %v432_v57, %v422_v1  ;;  %9682 = vmatmul.mubr.msk.f32.vlgmr.msra.gmra.mrb[0].mxu0 %vm443_vm8, %v436_v30  ;;  %v12517_v57 = vpack.c.bf16 %v644_v35, %v643_v63  ;;  %v645_v30 = vld [vmem:[#allocation2 + $0xf00] sm:$0xff]  ;;  %v646_v1 = vld [vmem:[#allocation2 + $0xf08] sm:$0xff] }
 0x149   :  { %9684 = vmatprep.mubr.msk.f32.mxu0 %vm443_vm8, %v437_v55  ;;  %v12521_v51 = vpack.c.bf16 %v646_v1, %v645_v30 }
 0x14a   :  { %v424_v26 = vpop.permute.xlu1 %423 }
 0x14b   :  { %v438_v10 = vsel %vm434_vm7, %v433_v43, %v424_v26  ;;  %v8912_v26 = vld [vmem:[#allocation2 + $0x48] ss:$0 sm:$0xff] }
 0x14c   :  { %9685 = vmatmul.mubr.msk.f32.gmra.mrb[2].mxu0 %vm443_vm8, %v438_v10  ;;  %v754_v10 = vld [vmem:[#allocation2 + $0xde0] sm:$0xff] }
 0x21b   :  { %v9683_v4 = vpop.f32.mrb[0].mxu0 }
 0x21c   :  { %v12472_v8 = vadd.f32 %v9683_v4, %v8905_v32  ;;  %v522_v9 = vpop.f32.mrb[1].mxu0 }
 0x21d   :  { %v12474_v13 = vadd.f32 %v8905_v32, %v522_v9 }
 0x21e   :  { %v543_v15 = vmul.f32 %v12472_v8, %v12472_v8 }
 0x21f   :  { %v542_v16 = vmul.f32 %v12474_v13, %v12474_v13  ;;  %v9686_v44 = vpop.f32.mrb[2].mxu0 }
 0x220   :  { %v12480_v6 = vadd.f32 %v9686_v44, %v8905_v32  ;;  %v532_v25 = vpop.f32.mrb[3].mxu0  ;;  %v753_v44 = vld [vmem:[#allocation2 + $0xdd8] sm:$0xff] }
 0x221   :  { %v12484_v42 = vadd.f32 %v8905_v32, %v532_v25  ;;  %v11743_v60 = vpack.i.bf16 %v543_v15, %v542_v16  ;;  %v755_v32 = vld [vmem:[#allocation2 + $0xde8] sm:$0xff] }
 0x222   :  { %v545_v11 = vmul.f32 %v12480_v6, %v12480_v6 }
 0x223   :  { %v544_v23 = vmul.f32 %v12484_v42, %v12484_v42  ;;  %11744 = vrot.lane.b32.xlu0 %v11743_v60, %s12142_s6 }
 0x225   :  { %v11748_v36 = vpack.i.bf16 %v545_v11, %v544_v23 }
 0x227   :  { %11749 = vrot.lane.b32.xlu1 %v11748_v36, %s12142_s6 }
 0x22b   :  { %758 = vperm.xlu1 %11742, %v752_v41  }
 0x22f   :  { %11753 = vset.pattern.permute.xlu1 %v12146_v18 }
 0x230   :  { %785 = vperm.xlu1 %11753, %v752_v41  }
 0x234   :  { %11755 = vset.pattern.permute.xlu1 %v12140_v0 }
 0x235   :  { %737 = vrot.lane.b32.xlu1 %v8912_v26, %s12142_s6 }
 0x239   :  { %768 = vperm.xlu1 %11755, %v754_v10  }
 0x23d   :  { %773 = vperm.xlu1 %11755, %v755_v32  }
 0x295   :  { %v11745_v47 = vpop.permute.xlu0 %11744 }
 0x296   :  { %v11747_v48 = vunpack.i.h.bf16 %v11745_v47  ;;  %v11746_v19 = vunpack.i.l.bf16 %v11745_v47 }
 0x298   :  { %v562_v22 = vsel %vm434_vm7, %v12474_v13, %v11746_v19  ;;  %v563_v24 = vsel %vm434_vm7, %v12472_v8, %v11747_v48 }
 0x299   :  { %v11750_v14 = vpop.permute.xlu1 %11749  ;;  %v10729_v31 = vpack.c.bf16 %v563_v24, %v562_v22 }
 0x29a   :  { %v11752_v40 = vunpack.i.h.bf16 %v11750_v14  ;;  %v11751_v45 = vunpack.i.l.bf16 %v11750_v14 }
 0x29b   :  { %10730 = vmatpush3.bf16.msra.mxu1 %v10729_v31 }
 0x29c   :  { %10731 = vmatprep.subr.bf16.mxu1 %v14572_v7  ;;  %v564_v49 = vsel %vm434_vm7, %v12484_v42, %v11751_v45  ;;  %v565_v5 = vsel %vm434_vm7, %v12480_v6, %v11752_v40 }
 0x29d   :  { %v10732_v62 = vpack.c.bf16 %v565_v5, %v564_v49 }
 0x29f   :  { %10733 = vmatpush3.bf16.msra.mxu1 %v10732_v62 }
 0x2a0   :  { %10734 = vmatprep.subr.bf16.mxu1 %v14572_v7 }
 0x2a2   :  { %9696 = vmatmul.mubr.msk.f32.vlgmr.msra.gmra.mrb[0].mxu1 %vm434_vm7, %v12503_v52 }
 0x2a3   :  { %10736 = vmatpush3.bf16.msra.mxu1 %v12505_v53  ;;  %9714 = vmatprep.mubr.msk.f32.mxu1 %vm12144_vm9, %v14570_v46 }
 0x2a4   :  { %10737 = vmatprep.subr.bf16.mxu1 %v14572_v7 }
 0x2a7   :  { %10739 = vmatpush3.bf16.msra.mxu1 %v12511_v29 }
 0x2a8   :  { %10740 = vmatprep.subr.bf16.mxu1 %v14572_v7 }
 0x2aa   :  { %v12538_v36 = vpop.permute.xlu1 %758 }
 0x2ab   :  { %10742 = vmatpush3.bf16.msra.mxu1 %v12517_v57  ;;  %14590 = vst [vmem:[#allocation5_spill] sm:$0xff] %v12538_v36 }
 0x2ac   :  { %10743 = vmatprep.subr.bf16.mxu1 %v14572_v7 }
 0x2af   :  { %10745 = vmatpush3.bf16.msra.mxu1 %v12521_v51  ;;  %v12540_v41 = vpop.permute.xlu1 %785 }
 0x2b0   :  { %10770 = vmatprep.subr.bf16.mxu1 %v14572_v7  ;;  %14591 = vst [vmem:[#allocation6_spill] sm:$0xff] %v12540_v41 }
 0x2b3   :  { %v738_v48 = vpop.permute.xlu1 %737 }
 0x2b8   :  { %v12547_v31 = vpop.permute.xlu1 %768 }
 0x2b9   :  { %14593 = vst [vmem:[#allocation8_spill] sm:$0xff] %v12547_v31 }
 0x2bc   :  { %v12561_v35 = vpop.permute.xlu1 %773 }
 0x2bd   :  { %14596 = vst [vmem:[#allocation11_spill] sm:$0xff] %v12561_v35 }
 0x375   :  { %v635_v55 = vpop.f32.mrb[0].mxu1 }
 0x376   :  { %v9697_v43 = vpop.f32.mrb[1].mxu1  ;;  %9715 = vmatmul.mubr.msk.f32.vlgmr.msra.gmra.mrb[2].mxu1 %vm647_vm10, %v635_v55 }
 0x377   :  { %9755 = vmatprep.mubr.msk.f32.mxu1 %vm12144_vm9, %v14570_v46 }
 0x449   :  { %v717_v4 = vpop.f32.mrb[2].mxu1 }
 0x44a   :  { %v12530_v9 = vmul.f32 0.015625, %v717_v4  ;;  %v9716_v15 = vpop.f32.mrb[3].mxu1  ;;  %v911_v4 = vld [vmem:[#allocation2 + $0x68] sm:$0xff] }
 0x44c   :  { %v722_v16 = vmul.f32 %v12530_v9, %v12530_v9 }
 0x44e   :  { %724 = vrot.lane.b32.xlu0 %v722_v16, %s12142_s6  ;;  %v912_v16 = vld [vmem:[#allocation2 + $0x70] sm:$0xff] }
 0x452   :  { %763 = vperm.xlu0 %11741, %v753_v44  }
 0x456   :  { %11754 = vset.pattern.permute.xlu0 %v12146_v18 }
 0x457   :  { %789 = vperm.xlu0 %11754, %v753_v44   ;;  %v10750_v44 = vpack.c.bf16 %v912_v16, %v911_v4 }
 0x45b   :  { %793 = vperm.xlu0 %11754, %v754_v10   ;;  %v909_v10 = vld [vmem:[#allocation2 + $0x58] sm:$0xff] }
 0x45f   :  { %797 = vperm.xlu0 %11754, %v755_v32   ;;  %v910_v32 = vld [vmem:[#allocation2 + $0x60] sm:$0xff] }
 0x460   :  { %v10746_v15 = vpack.c.bf16 %v910_v32, %v909_v10 }
 0x462   :  { %10747 = vmatprep.subr.bf16.mxu0 %v10746_v15 }
 0x463   :  { %11786 = vset.pattern.permute.xlu0 %v12140_v0  ;;  %10749 = vmatpush3.bf16.msra.mxu0 %v10746_v15 }
 0x464   :  { %10751 = vmatprep.subr.bf16.mxu0 %v10750_v44 }
 0x467   :  { %10753 = vmatpush3.bf16.msra.mxu0 %v10750_v44 }
 0x4c0   :  { %v725_v25 = vpop.permute.xlu0 %724 }
 0x4c1   :  { %v727_v60 = vsub.f32 %v12530_v9, %v725_v25  ;;  %v913_v25 = vld [vmem:[#allocation2 + $0x78] sm:$0xff] }
 0x4c3   :  { %v728_v11 = vmax.f32 %v727_v60, 0.0  ;;  %v914_v60 = vld [vmem:[#allocation2 + $0x80] sm:$0xff] }
 0x4c5   :  { %v729_v23 = vadd.f32 1e-05, %v728_v11  ;;  %v10754_v11 = vpack.c.bf16 %v914_v60, %v913_v25 }
 0x4c7   :  { %11880 = vrsqrt.f32 %v729_v23  ;;  %10755 = vmatprep.subr.bf16.mxu0 %v10754_v11  ;;  %v8913_v23 = vld [vmem:[#allocation2 + $0x50] ss:$0 sm:$0xff] }
 0x4c8   :  { %10757 = vmatpush3.bf16.msra.mxu0 %v10754_v11 }
 0x4d1   :  { %v11881_v47 = vpop.eup %11880  ;;  %v12542_v19 = vpop.permute.xlu0 %763 }
 0x4d2   :  { %14592 = vst [vmem:[#allocation7_spill] sm:$0xff] %v12542_v19  ;;  %v740_v22 = vmul.f32 %v11881_v47, %v738_v48 }
 0x4d4   :  { %v779_v24 = vrot.slane %v740_v22, %v12211_v37  ;;  %v803_v14 = vrot.slane %v740_v22, %v12214_v39  ;;  %743 = vrot.lane.b32.xlu1 %v740_v22, %s12147_s7 }
 0x4d6   :  { %v12549_v40 = vpop.permute.xlu0 %789  ;;  %v780_v45 = vmul.f32 %v779_v24, %v12538_v36  ;;  %v804_v49 = vmul.f32 %v803_v14, %v12540_v41  ;;  %v781_v5 = vmul.f32 %v779_v24, %v12542_v19  ;;  %v782_v54 = vmul.f32 %v779_v24, %v12547_v31 }
 0x4d7   :  { %14594 = vst [vmem:[#allocation9_spill] sm:$0xff] %v12549_v40  ;;  %v805_v27 = vmul.f32 %v803_v14, %v12549_v40  ;;  %v783_v55 = vmul.f32 %v779_v24, %v12561_v35 }
 0x4d8   :  { %v808_v50 = vadd.f32 %v804_v49, %v780_v45 }
 0x4d9   :  { %v809_v62 = vadd.f32 %v805_v27, %v781_v5 }
 0x4da   :  { %816 = vrot.lane.b32.xlu0 %v808_v50, %s12147_s7  ;;  %v12556_v33 = vpop.permute.xlu0 %793 }
 0x4db   :  { %14595 = vst [vmem:[#allocation10_spill] sm:$0xff] %v12556_v33  ;;  %818 = vrot.lane.b32.xlu1 %v809_v62, %s12147_s7  ;;  %v806_v63 = vmul.f32 %v803_v14, %v12556_v33 }
 0x4dd   :  { %v810_v30 = vadd.f32 %v806_v63, %v782_v54 }
 0x4de   :  { %v12563_v1 = vpop.permute.xlu0 %797 }
 0x4df   :  { %14597 = vst [vmem:[#allocation12_spill] sm:$0xff] %v12563_v1  ;;  %820 = vrot.lane.b32.xlu0 %v810_v30, %s12147_s7  ;;  %v807_v43 = vmul.f32 %v803_v14, %v12563_v1 }
 0x4e1   :  { %v811_v26 = vadd.f32 %v807_v43, %v783_v55 }
 0x4e3   :  { %822 = vrot.lane.b32.xlu1 %v811_v26, %s12147_s7 }
 0x546   :  { %v744_v47 = vpop.permute.xlu1 %743 }
 0x547   :  { %v746_v48 = vmul.f32 %v744_v47, %v12530_v9 }
 0x549   :  { %v751_v22 = vsub.f32 %v8913_v23, %v746_v48 }
 0x54b   :  { %v835_v24 = vrot.slane %v751_v22, %v12211_v37  ;;  %v843_v14 = vrot.slane %v751_v22, %v12214_v39 }
 0x54c   :  { %v817_v45 = vpop.permute.xlu0 %816 }
 0x54d   :  { %v836_v49 = vmul.f32 %v835_v24, %v12538_v36  ;;  %v844_v5 = vmul.f32 %v843_v14, %v12540_v41  ;;  %v837_v27 = vmul.f32 %v835_v24, %v12542_v19  ;;  %v819_v50 = vpop.permute.xlu1 %818  ;;  %v845_v62 = vmul.f32 %v843_v14, %v12549_v40 }
 0x54e   :  { %v829_v54 = vmul.f32 %v819_v50, %v12472_v8  ;;  %v838_v63 = vmul.f32 %v835_v24, %v12547_v31  ;;  %v846_v9 = vmul.f32 %v843_v14, %v12556_v33  ;;  %v828_v55 = vmul.f32 %v817_v45, %v12474_v13 }
 0x54f   :  { %v848_v30 = vadd.f32 %v844_v5, %v836_v49  ;;  %v849_v43 = vadd.f32 %v845_v62, %v837_v27  ;;  %v839_v32 = vmul.f32 %v835_v24, %v12561_v35  ;;  %v847_v44 = vmul.f32 %v843_v14, %v12563_v1  ;;  %v884_v27 = vld [vmem:[%s14567_s1] sm:$0x3]  ;;  %v916_v62 = vld [vmem:[#allocation2 + $0x90] sm:$0xff] }
 0x550   :  { %v850_v15 = vadd.f32 %v846_v9, %v838_v63  ;;  %v896_v50 = vrot.slane %v884_v27, %v12214_v39 }
 0x551   :  { %v852_v26 = vadd.f32 %v848_v30, %v828_v55  ;;  %v821_v10 = vpop.permute.xlu0 %820  ;;  %v853_v4 = vadd.f32 %v849_v43, %v829_v54  ;;  %v851_v47 = vadd.f32 %v847_v44, %v839_v32  ;;  %v888_v30 = vrot.slane %v884_v27, %v12211_v37  ;;  %v917_v55 = vld [vmem:[#allocation2 + $0x98] sm:$0xff]  ;;  %v918_v43 = vld [vmem:[#allocation2 + $0xa0] sm:$0xff] }
 0x552   :  { %v830_v16 = vmul.f32 %v821_v10, %v12484_v42  ;;  %v897_v10 = vmul.f32 %v896_v50, %v12540_v41  ;;  %v10762_v32 = vpack.c.bf16 %v918_v43, %v917_v55  ;;  %v900_v27 = vmul.f32 %v896_v50, %v12563_v1 }
 0x553   :  { %v8914_v25 = vmul.f32 -1.442695, %v852_v26  ;;  %v8915_v8 = vmul.f32 -1.442695, %v853_v4  ;;  %v892_v55 = vmul.f32 %v888_v30, %v12561_v35 }
 0x554   :  { %v854_v60 = vadd.f32 %v850_v15, %v830_v16  ;;  %v898_v15 = vmul.f32 %v896_v50, %v12549_v40  ;;  %v889_v16 = vmul.f32 %v888_v30, %v12538_v36 }
 0x555   :  { %11882 = vpow2.f32 %v8914_v25  ;;  %v823_v11 = vpop.permute.xlu1 %822  ;;  %v890_v25 = vmul.f32 %v888_v30, %v12542_v19 }
 0x556   :  { %11884 = vpow2.f32 %v8915_v8  ;;  %v8916_v23 = vmul.f32 -1.442695, %v854_v60  ;;  %v831_v13 = vmul.f32 %v823_v11, %v12480_v6  ;;  %v915_v6 = vld [vmem:[#allocation2 + $0x88] sm:$0xff]  ;;  %v891_v8 = vmul.f32 %v888_v30, %v12547_v31 }
 0x557   :  { %v10758_v63 = vpack.c.bf16 %v916_v62, %v915_v6  ;;  %v899_v11 = vmul.f32 %v896_v50, %v12556_v33 }
 0x558   :  { %11886 = vpow2.f32 %v8916_v23  ;;  %v855_v48 = vadd.f32 %v851_v47, %v831_v13  ;;  %v919_v23 = vld [vmem:[#allocation2 + $0xa8] sm:$0xff]  ;;  %v920_v47 = vld [vmem:[#allocation2 + $0xb0] sm:$0xff] }
 0x559   :  { %10759 = vmatprep.subr.bf16.mxu0 %v10758_v63 }
 0x55a   :  { %v8917_v22 = vmul.f32 -1.442695, %v855_v48  ;;  %10761 = vmatpush3.bf16.msra.mxu0 %v10758_v63 }
 0x55b   :  { %10763 = vmatprep.subr.bf16.mxu0 %v10762_v32 }
 0x55c   :  { %11888 = vpow2.f32 %v8917_v22 }
 0x55e   :  { %10765 = vmatpush3.bf16.msra.mxu0 %v10762_v32  ;;  %v904_v32 = vadd.f32 %v900_v27, %v892_v55 }
 0x55f   :  { %v11883_v24 = vpop.eup %11882 }
 0x560   :  { %v11885_v45 = vpop.eup %11884  ;;  %v868_v49 = vadd.f32 1.0, %v11883_v24  ;;  %v901_v24 = vadd.f32 %v897_v10, %v889_v16 }
 0x561   :  { %v869_v42 = vadd.f32 1.0, %v11885_v45  ;;  %v10766_v45 = vpack.c.bf16 %v920_v47, %v919_v23 }
 0x562   :  { %v11887_v5 = vpop.eup %11886  ;;  %11890 = vrcp.f32 %v868_v49 }
 0x563   :  { %11892 = vrcp.f32 %v869_v42  ;;  %v870_v14 = vadd.f32 1.0, %v11887_v5  ;;  %v902_v42 = vadd.f32 %v898_v15, %v890_v25  ;;  %10767 = vmatprep.subr.bf16.mxu0 %v10766_v45  ;;  %v1379_v25 = vld [vmem:[#allocation2 + $0xd8] sm:$0xff] }
 0x564   :  { %10769 = vmatpush3.bf16.msra.mxu0 %v10766_v45 }
 0x565   :  { %11894 = vrcp.f32 %v870_v14 }
 0x566   :  { %v11889_v54 = vpop.eup %11888 }
 0x567   :  { %v871_v9 = vadd.f32 1.0, %v11889_v54  ;;  %v903_v54 = vadd.f32 %v899_v11, %v891_v8 }
 0x569   :  { %11896 = vrcp.f32 %v871_v9 }
 0x56c   :  { %v11891_v44 = vpop.eup %11890 }
 0x56d   :  { %v11893_v13 = vpop.eup %11892  ;;  %v880_v22 = vmul.f32 %v11891_v44, %v852_v26  ;;  %v1378_v44 = vld [vmem:[#allocation2 + $0xd0] sm:$0xff] }
 0x56e   :  { %v881_v49 = vmul.f32 %v11893_v13, %v853_v4  ;;  %v10788_v8 = vpack.c.bf16 %v1379_v25, %v1378_v44 }
 0x56f   :  { %v11895_v5 = vpop.eup %11894  ;;  %v905_v14 = vadd.f32 %v901_v24, %v880_v22 }
 0x570   :  { %v882_v6 = vmul.f32 %v11895_v5, %v854_v60  ;;  %v906_v62 = vadd.f32 %v902_v42, %v881_v49  ;;  %10789 = vmatprep.subr.bf16.mxu0 %v10788_v8 }
 0x571   :  { %950 = vrot.lane.b32.xlu0 %v905_v14, %s12142_s6  ;;  %v922_v63 = vrot.slane %v905_v14, 7  ;;  %v934_v9 = vrot.slane %v905_v14, 1 }
 0x572   :  { %v923_v26 = vrot.slane %v906_v62, 7  ;;  %v935_v43 = vrot.slane %v906_v62, 1  ;;  %952 = vrot.lane.b32.xlu1 %v906_v62, %s12142_s6  ;;  %v907_v4 = vadd.f32 %v903_v54, %v882_v6 }
 0x573   :  { %v11897_v10 = vpop.eup %11896 }
 0x574   :  { %v883_v15 = vmul.f32 %v11897_v10, %v855_v48  ;;  %v924_v50 = vrot.slane %v907_v4, 7  ;;  %v936_v16 = vrot.slane %v907_v4, 1  ;;  %v940_v60 = vsel %vm223_vm3, %v934_v9, %v935_v43 }
 0x575   :  { %954 = vrot.lane.b32.xlu0 %v907_v4, %s12142_s6  ;;  %v928_v30 = vsel %vm162_vm2, %v922_v63, %v923_v26  ;;  %v942_v47 = vmul.f32 %v940_v60, %v12317_v3 }
 0x576   :  { %v908_v11 = vadd.f32 %v904_v32, %v883_v15  ;;  %v927_v23 = vsel %vm162_vm2, %v923_v26, %v924_v50  ;;  %v939_v48 = vsel %vm223_vm3, %v935_v43, %v936_v16 }
 0x577   :  { %v943_v24 = vmul.f32 %v939_v48, %v12315_v2  ;;  %v932_v10 = vmul.f32 %v927_v23, %v12258_v12 }
 0x578   :  { %956 = vrot.lane.b32.xlu1 %v908_v11, %s12142_s6  ;;  %v925_v13 = vrot.slane %v908_v11, 7  ;;  %v937_v22 = vrot.slane %v908_v11, 1 }
 0x579   :  { %966 = vrot.lane.b32.xlu0 %v942_v47, %s12148_s10 }
 0x57a   :  { %v938_v45 = vsel %vm223_vm3, %v936_v16, %v937_v22  ;;  %v929_v49 = vsel %vm162_vm2, %v925_v13, %v922_v63  ;;  %v926_v42 = vsel %vm162_vm2, %v924_v50, %v925_v13  ;;  %v941_v14 = vsel %vm223_vm3, %v937_v22, %v934_v9 }
 0x57b   :  { %v944_v5 = vmul.f32 %v938_v45, %v12346_v20  ;;  %v945_v27 = vmul.f32 %v941_v14, %v12382_v21  ;;  %v930_v63 = vmul.f32 %v929_v49, %v12240_v59  ;;  %v931_v9 = vmul.f32 %v928_v30, %v12238_v58 }
 0x57c   :  { %968 = vrot.lane.b32.xlu1 %v943_v24, %s12148_s10  ;;  %v933_v44 = vmul.f32 %v926_v42, %v12286_v28 }
 0x57d   :  { %970 = vrot.lane.b32.xlu0 %v944_v5, %s12148_s10 }
 0x580   :  { %972 = vrot.lane.b32.xlu1 %v945_v27, %s12148_s10 }
 0x5e3   :  { %v951_v6 = vpop.permute.xlu0 %950 }
 0x5e4   :  { %v953_v62 = vpop.permute.xlu1 %952  ;;  %v978_v26 = vsel %vm434_vm7, %v930_v63, %v951_v6 }
 0x5e5   :  { %v979_v32 = vsel %vm434_vm7, %v931_v9, %v953_v62 }
 0x5e7   :  { %v955_v54 = vpop.permute.xlu0 %954 }
 0x5e8   :  { %v980_v50 = vsel %vm434_vm7, %v932_v10, %v955_v54 }
 0x5ea   :  { %v957_v55 = vpop.permute.xlu1 %956 }
 0x5eb   :  { %v967_v43 = vpop.permute.xlu0 %966  ;;  %v981_v30 = vsel %vm434_vm7, %v933_v44, %v957_v55 }
 0x5ec   :  { %v982_v4 = vsel %vm647_vm10, %v978_v26, %v967_v43 }
 0x5ed   :  { %9741 = vmatprep.mubr.msk.f32.mxu0 %vm990_vm11, %v982_v4 }
 0x5ee   :  { %v969_v15 = vpop.permute.xlu1 %968 }
 0x5ef   :  { %v983_v16 = vsel %vm647_vm10, %v979_v32, %v969_v15  ;;  %v971_v60 = vpop.permute.xlu0 %970 }
 0x5f0   :  { %v984_v25 = vsel %vm647_vm10, %v980_v50, %v971_v60  ;;  %9742 = vmatmul.mubr.msk.f32.vlgmr.msra.gmra.mrb[4].mxu0 %vm990_vm11, %v983_v16 }
 0x5f1   :  { %9744 = vmatprep.mubr.msk.f32.mxu0 %vm990_vm11, %v984_v25  ;;  %10791 = vmatpush3.bf16.msra.mxu0 %v10788_v8  ;;  %v8918_v8 = vld [vmem:[#allocation2 + $0xb8] ss:$0 sm:$0xff]  ;;  %v8925_v25 = vld [vmem:[#allocation2 + $0xc0] ss:$0 sm:$0xff] }
 0x5f2   :  { %v973_v11 = vpop.permute.xlu1 %972 }
 0x5f3   :  { %v985_v23 = vsel %vm647_vm10, %v981_v30, %v973_v11 }
 0x5f4   :  { %9745 = vmatmul.mubr.msk.f32.gmra.mrb[6].mxu0 %vm990_vm11, %v985_v23 }
 0x5f5   :  { %9781 = vmatprep.mubr.msk.f32.mxu0 %vm429_vm6, %v12399_v61 }
 0x5f8   :  { %9782 = vmatmul.mubr.msk.f32.vlgmr.msra.gmra.mrb[8].mxu0 %vm429_vm6, %v12411_v56 }
 0x5f9   :  { %9784 = vmatprep.mubr.msk.f32.mxu0 %vm429_vm6, %v12409_v38 }
 0x5fc   :  { %9785 = vmatmul.mubr.msk.f32.gmra.mrb[10].mxu0 %vm429_vm6, %v12425_v17 }
 0x6c3   :  { %v9743_v47 = vpop.f32.mrb[4].mxu0 }
 0x6c4   :  { %v12649_v48 = vadd.f32 %v9743_v47, %v8918_v8  ;;  %v1069_v13 = vpop.f32.mrb[5].mxu0 }
 0x6c5   :  { %v12651_v22 = vadd.f32 %v8918_v8, %v1069_v13 }
 0x6c6   :  { %v1089_v24 = vmul.f32 %v12649_v48, %v12649_v48 }
 0x6c7   :  { %v1088_v61 = vmul.f32 %v12651_v22, %v12651_v22  ;;  %v9746_v56 = vpop.f32.mrb[6].mxu0 }
 0x6c8   :  { %v12657_v45 = vadd.f32 %v9746_v56, %v8918_v8  ;;  %v1079_v38 = vpop.f32.mrb[7].mxu0 }
 0x6c9   :  { %v12659_v49 = vadd.f32 %v8918_v8, %v1079_v38  ;;  %v11756_v17 = vpack.i.bf16 %v1089_v24, %v1088_v61 }
 0x6ca   :  { %v1091_v42 = vmul.f32 %v12657_v45, %v12657_v45 }
 0x6cb   :  { %v1090_v5 = vmul.f32 %v12659_v49, %v12659_v49  ;;  %11757 = vrot.lane.b32.xlu0 %v11756_v17, %s12142_s6  ;;  %v12666_v14 = vpop.f32.mrb[8].mxu0 }
 0x6cc   :  { %v12668_v27 = vpop.f32.mrb[9].mxu0 }
 0x6cd   :  { %v11761_v6 = vpack.i.bf16 %v1091_v42, %v1090_v5 }
 0x6cf   :  { %v12670_v62 = vpop.f32.mrb[10].mxu0  ;;  %11762 = vrot.lane.b32.xlu1 %v11761_v6, %s12142_s6 }
 0x6d0   :  { %v12673_v54 = vpop.f32.mrb[11].mxu0 }
 0x6d3   :  { %1271 = vrot.lane.b32.xlu1 %v8925_v25, %s12142_s6 }
 0x73d   :  { %v11758_v63 = vpop.permute.xlu0 %11757 }
 0x73e   :  { %v11760_v55 = vunpack.i.h.bf16 %v11758_v63  ;;  %v11759_v26 = vunpack.i.l.bf16 %v11758_v63 }
 0x740   :  { %v1109_v43 = vsel %vm434_vm7, %v12649_v48, %v11760_v55  ;;  %v1108_v9 = vsel %vm434_vm7, %v12651_v22, %v11759_v26 }
 0x741   :  { %v11763_v4 = vpop.permute.xlu1 %11762  ;;  %v10771_v10 = vpack.c.bf16 %v1109_v43, %v1108_v9 }
 0x742   :  { %v11765_v32 = vunpack.i.h.bf16 %v11763_v4  ;;  %v11764_v15 = vunpack.i.l.bf16 %v11763_v4 }
 0x743   :  { %10772 = vmatpush3.bf16.msra.mxu1 %v10771_v10 }
 0x744   :  { %v1111_v50 = vsel %vm434_vm7, %v12657_v45, %v11765_v32  ;;  %v1110_v16 = vsel %vm434_vm7, %v12659_v49, %v11764_v15  ;;  %10773 = vmatprep.subr.bf16.mxu1 %v14572_v7 }
 0x745   :  { %v10774_v60 = vpack.c.bf16 %v1111_v50, %v1110_v16  ;;  %v1272_v56 = vpop.permute.xlu1 %1271 }
 0x747   :  { %10775 = vmatpush3.bf16.msra.mxu1 %v10774_v60  ;;  %v1482_v60 = vld [vmem:[#allocation2 + $0xe8] sm:$0xff] }
 0x748   :  { %10776 = vmatprep.subr.bf16.mxu1 %v14572_v7 }
 0x74a   :  { %9756 = vmatmul.mubr.msk.f32.vlgmr.msra.gmra.mrb[4].mxu1 %vm434_vm7, %v12503_v52 }
 0x74b   :  { %10778 = vmatpush3.bf16.msra.mxu1 %v12505_v53  ;;  %9774 = vmatprep.mubr.msk.f32.mxu1 %vm12144_vm9, %v14570_v46 }
 0x74c   :  { %10779 = vmatprep.subr.bf16.mxu1 %v14572_v7 }
 0x74f   :  { %10781 = vmatpush3.bf16.msra.mxu1 %v12511_v29 }
 0x750   :  { %10782 = vmatprep.subr.bf16.mxu1 %v14572_v7 }
 0x753   :  { %10784 = vmatpush3.bf16.msra.mxu1 %v12517_v57 }
 0x754   :  { %10785 = vmatprep.subr.bf16.mxu1 %v14572_v7 }
 0x757   :  { %10787 = vmatpush3.bf16.msra.mxu1 %v12521_v51 }
 0x758   :  { %10816 = vmatprep.subr.bf16.mxu1 %v14572_v7 }
 0x81d   :  { %v1178_v52 = vpop.f32.mrb[4].mxu1 }
 0x81e   :  { %v9757_v44 = vpop.f32.mrb[5].mxu1  ;;  %9775 = vmatmul.mubr.msk.f32.vlgmr.msra.gmra.mrb[6].mxu1 %vm647_vm10, %v1178_v52  ;;  %v1483_v52 = vld [vmem:[#allocation2 + $0xf0] sm:$0xff] }
 0x81f   :  { %9825 = vmatprep.mubr.msk.f32.mxu1 %vm12144_vm9, %v14570_v46  ;;  %v1484_v44 = vld [vmem:[#allocation2 + $0xf8] sm:$0xff]  ;;  %v10792_v25 = vpack.c.bf16 %v1483_v52, %v1482_v60 }
 0x821   :  { %10793 = vmatprep.subr.bf16.mxu0 %v10792_v25 }
 0x822   :  { %10795 = vmatpush3.bf16.msra.mxu0 %v10792_v25 }
 0x8f1   :  { %v1251_v30 = vpop.f32.mrb[6].mxu1 }
 0x8f2   :  { %v1255_v11 = vmul.f32 0.015625, %v1251_v30  ;;  %v9776_v23 = vpop.f32.mrb[7].mxu1  ;;  %v1485_v30 = vld [vmem:[#allocation2 + $0x100] sm:$0xff] }
 0x8f3   :  { %v10796_v23 = vpack.c.bf16 %v1485_v30, %v1484_v44 }
 0x8f4   :  { %v1256_v8 = vmul.f32 %v1255_v11, %v1255_v11 }
 0x8f5   :  { %10797 = vmatprep.subr.bf16.mxu0 %v10796_v23 }
 0x8f6   :  { %1258 = vrot.lane.b32.xlu0 %v1256_v8, %s12142_s6  ;;  %v1486_v8 = vld [vmem:[#allocation2 + $0x108] sm:$0xff]  ;;  %10799 = vmatpush3.bf16.msra.mxu0 %v10796_v23 }
 0x968   :  { %v1259_v47 = vpop.permute.xlu0 %1258 }
 0x969   :  { %v1261_v13 = vsub.f32 %v1255_v11, %v1259_v47  ;;  %v1487_v47 = vld [vmem:[#allocation2 + $0x110] sm:$0xff] }
 0x96b   :  { %v1262_v24 = vmax.f32 %v1261_v13, 0.0  ;;  %v10800_v13 = vpack.c.bf16 %v1487_v47, %v1486_v8 }
 0x96d   :  { %v1263_v61 = vadd.f32 1e-05, %v1262_v24  ;;  %v1488_v24 = vld [vmem:[#allocation2 + $0x118] sm:$0xff]  ;;  %10801 = vmatprep.subr.bf16.mxu0 %v10800_v13 }
 0x96e   :  { %10803 = vmatpush3.bf16.msra.mxu0 %v10800_v13 }
 0x96f   :  { %11898 = vrsqrt.f32 %v1263_v61  ;;  %v1489_v61 = vld [vmem:[#allocation2 + $0x120] sm:$0xff] }
 0x979   :  { %v11899_v38 = vpop.eup %11898 }
 0x97a   :  { %v1274_v17 = vmul.f32 %v11899_v38, %v1272_v56  ;;  %v10804_v56 = vpack.c.bf16 %v1489_v61, %v1488_v24  ;;  %v8926_v38 = vld [vmem:[#allocation2 + $0xc8] ss:$0 sm:$0xff] }
 0x97c   :  { %v1289_v42 = vrot.slane %v1274_v17, %v12211_v37  ;;  %v1297_v5 = vrot.slane %v1274_v17, %v12214_v39  ;;  %1277 = vrot.lane.b32.xlu0 %v1274_v17, %s12147_s7  ;;  %10805 = vmatprep.subr.bf16.mxu0 %v10804_v56 }
 0x97d   :  { %10807 = vmatpush3.bf16.msra.mxu0 %v10804_v56 }
 0x97e   :  { %v1291_v6 = vmul.f32 %v1289_v42, %v12542_v19  ;;  %v1299_v63 = vmul.f32 %v1297_v5, %v12549_v40  ;;  %v1290_v55 = vmul.f32 %v1289_v42, %v12538_v36  ;;  %v1298_v26 = vmul.f32 %v1297_v5, %v12540_v41 }
 0x97f   :  { %v1293_v43 = vmul.f32 %v1289_v42, %v12561_v35  ;;  %v1301_v9 = vmul.f32 %v1297_v5, %v12563_v1  ;;  %v1292_v32 = vmul.f32 %v1289_v42, %v12547_v31  ;;  %v1300_v15 = vmul.f32 %v1297_v5, %v12556_v33 }
 0x980   :  { %v1303_v4 = vadd.f32 %v1299_v63, %v1291_v6  ;;  %v1302_v10 = vadd.f32 %v1298_v26, %v1290_v55 }
 0x981   :  { %v1305_v50 = vadd.f32 %v1301_v9, %v1293_v43  ;;  %v1304_v16 = vadd.f32 %v1300_v15, %v1292_v32 }
 0x982   :  { %1312 = vrot.lane.b32.xlu0 %v1303_v4, %s12147_s7  ;;  %1310 = vrot.lane.b32.xlu1 %v1302_v10, %s12147_s7 }
 0x986   :  { %1316 = vrot.lane.b32.xlu0 %v1305_v50, %s12147_s7  ;;  %1314 = vrot.lane.b32.xlu1 %v1304_v16, %s12147_s7 }
 0x9ee   :  { %v1278_v17 = vpop.permute.xlu0 %1277 }
 0x9ef   :  { %v1280_v42 = vmul.f32 %v1278_v17, %v1255_v11 }
 0x9f1   :  { %v1285_v5 = vsub.f32 %v8926_v38, %v1280_v42 }
 0x9f3   :  { %v1329_v6 = vrot.slane %v1285_v5, %v12211_v37  ;;  %v1337_v63 = vrot.slane %v1285_v5, %v12214_v39 }
 0x9f4   :  { %v1313_v55 = vpop.permute.xlu0 %1312  ;;  %v1311_v26 = vpop.permute.xlu1 %1310 }
 0x9f5   :  { %v1331_v43 = vmul.f32 %v1329_v6, %v12542_v19  ;;  %v1339_v9 = vmul.f32 %v1337_v63, %v12549_v40  ;;  %v1330_v4 = vmul.f32 %v1329_v6, %v12538_v36  ;;  %v1338_v10 = vmul.f32 %v1337_v63, %v12540_v41 }
 0x9f6   :  { %v1333_v32 = vmul.f32 %v1329_v6, %v12561_v35  ;;  %v1341_v15 = vmul.f32 %v1337_v63, %v12563_v1  ;;  %v1323_v50 = vmul.f32 %v1313_v55, %v12649_v48  ;;  %v1332_v16 = vmul.f32 %v1329_v6, %v12547_v31 }
 0x9f7   :  { %v1343_v11 = vadd.f32 %v1339_v9, %v1331_v43  ;;  %v1340_v60 = vmul.f32 %v1337_v63, %v12556_v33  ;;  %v1342_v52 = vadd.f32 %v1338_v10, %v1330_v4  ;;  %v1322_v44 = vmul.f32 %v1311_v26, %v12651_v22  ;;  %v1490_v9 = vld [vmem:[#allocation2 + $0x128] sm:$0xff]  ;;  %v1491_v4 = vld [vmem:[#allocation2 + $0x130] sm:$0xff] }
 0x9f8   :  { %v1345_v25 = vadd.f32 %v1341_v15, %v1333_v32  ;;  %v1317_v30 = vpop.permute.xlu0 %1316  ;;  %v1315_v23 = vpop.permute.xlu1 %1314  ;;  %v10808_v10 = vpack.c.bf16 %v1491_v4, %v1490_v9  ;;  %v1492_v32 = vld [vmem:[#allocation2 + $0x138] sm:$0xff]  ;;  %v1493_v15 = vld [vmem:[#allocation2 + $0x140] sm:$0xff] }
 0x9f9   :  { %v1347_v8 = vadd.f32 %v1343_v11, %v1323_v50  ;;  %v1325_v47 = vmul.f32 %v1317_v30, %v12657_v45  ;;  %v1344_v13 = vadd.f32 %v1340_v60, %v1332_v16  ;;  %v1324_v24 = vmul.f32 %v1315_v23, %v12659_v49  ;;  %v8931_v11 = vld [vmem:[#allocation2 + $0xe0] ss:$0 sm:$0xff] }
 0x9fa   :  { %v1346_v61 = vadd.f32 %v1342_v52, %v1322_v44  ;;  %10809 = vmatprep.subr.bf16.mxu0 %v10808_v10  ;;  %v10812_v50 = vpack.c.bf16 %v1493_v15, %v1492_v32  ;;  %v1465_v52 = vadd.f32 %v12666_v14, %v8931_v11  ;;  %v1460_v30 = vadd.f32 %v8931_v11, %v12668_v27 }
 0x9fb   :  { %v8928_v56 = vmul.f32 -1.442695, %v1347_v8  ;;  %v1349_v38 = vadd.f32 %v1345_v25, %v1325_v47  ;;  %v1348_v48 = vadd.f32 %v1344_v13, %v1324_v24  ;;  %10811 = vmatpush3.bf16.msra.mxu0 %v10808_v10  ;;  %v1475_v13 = vadd.f32 %v12670_v62, %v8931_v11 }
 0x9fc   :  { %v8927_v17 = vmul.f32 -1.442695, %v1346_v61  ;;  %10813 = vmatprep.subr.bf16.mxu0 %v10812_v50 }
 0x9fd   :  { %11900 = vpow2.f32 %v8928_v56  ;;  %v8930_v42 = vmul.f32 -1.442695, %v1349_v38  ;;  %v8929_v5 = vmul.f32 -1.442695, %v1348_v48 }
 0x9fe   :  { %11902 = vpow2.f32 %v8927_v17  ;;  %v1470_v17 = vadd.f32 %v8931_v11, %v12673_v54 }
 0x9ff   :  { %11904 = vpow2.f32 %v8930_v42  ;;  %10815 = vmatpush3.bf16.msra.mxu0 %v10812_v50 }
 0xa00   :  { %11906 = vpow2.f32 %v8929_v5 }
 0xa07   :  { %v11901_v22 = vpop.eup %11900 }
 0xa08   :  { %v11903_v6 = vpop.eup %11902  ;;  %v1363_v63 = vadd.f32 1.0, %v11901_v22 }
 0xa09   :  { %v11905_v55 = vpop.eup %11904  ;;  %v1362_v26 = vadd.f32 1.0, %v11903_v6 }
 0xa0a   :  { %v11907_v45 = vpop.eup %11906  ;;  %11908 = vrcp.f32 %v1363_v63  ;;  %v1365_v43 = vadd.f32 1.0, %v11905_v55 }
 0xa0b   :  { %11910 = vrcp.f32 %v1362_v26  ;;  %v1364_v49 = vadd.f32 1.0, %v11907_v45 }
 0xa0c   :  { %11912 = vrcp.f32 %v1365_v43 }
 0xa0d   :  { %11914 = vrcp.f32 %v1364_v49 }
 0xa14   :  { %v11909_v16 = vpop.eup %11908 }
 0xa15   :  { %v11911_v60 = vpop.eup %11910  ;;  %v1375_v44 = vmul.f32 %v11909_v16, %v1347_v8 }
 0xa16   :  { %v11913_v25 = vpop.eup %11912  ;;  %v1374_v23 = vmul.f32 %v11911_v60, %v1346_v61 }
 0xa17   :  { %v11915_v47 = vpop.eup %11914  ;;  %v1377_v24 = vmul.f32 %v11913_v25, %v1349_v38  ;;  %v12734_v56 = vadd.f32 %v1465_v52, %v1375_v44 }
 0xa18   :  { %v1376_v42 = vmul.f32 %v11915_v47, %v1348_v48  ;;  %v12737_v5 = vadd.f32 %v1460_v30, %v1374_v23 }
 0xa19   :  { %1525 = vrot.lane.b32.xlu0 %v12734_v56, %s12142_s6  ;;  %v12741_v14 = vadd.f32 %v1475_v13, %v1377_v24  ;;  %v1508_v8 = vrot.slane %v12734_v56, 1  ;;  %v1496_v43 = vrot.slane %v12734_v56, 7 }
 0xa1a   :  { %1523 = vrot.lane.b32.xlu1 %v12737_v5, %s12142_s6  ;;  %v12746_v27 = vadd.f32 %v1470_v17, %v1376_v42  ;;  %v1507_v62 = vrot.slane %v12737_v5, 1  ;;  %v1495_v49 = vrot.slane %v12737_v5, 7 }
 0xa1b   :  { %v1510_v54 = vrot.slane %v12741_v14, 1  ;;  %v1498_v4 = vrot.slane %v12741_v14, 7 }
 0xa1c   :  { %v1509_v61 = vrot.slane %v12746_v27, 1  ;;  %v1513_v38 = vsel %vm223_vm3, %v1507_v62, %v1508_v8  ;;  %v1501_v32 = vsel %vm162_vm2, %v1495_v49, %v1496_v43  ;;  %v1497_v15 = vrot.slane %v12746_v27, 7 }
 0xa1d   :  { %1529 = vrot.lane.b32.xlu0 %v12741_v14, %s12142_s6  ;;  %v1515_v6 = vmul.f32 %v1513_v38, %v12317_v3  ;;  %v1514_v63 = vsel %vm223_vm3, %v1510_v54, %v1507_v62  ;;  %v1502_v11 = vsel %vm162_vm2, %v1498_v4, %v1495_v49  ;;  %v1504_v60 = vmul.f32 %v1501_v32, %v12238_v58 }
 0xa1e   :  { %1527 = vrot.lane.b32.xlu1 %v12746_v27, %s12142_s6  ;;  %v1512_v48 = vsel %vm223_vm3, %v1508_v8, %v1509_v61  ;;  %v1511_v55 = vsel %vm223_vm3, %v1509_v61, %v1510_v54  ;;  %v1518_v26 = vmul.f32 %v1514_v63, %v12382_v21  ;;  %v1503_v52 = vmul.f32 %v1502_v11, %v12240_v59 }
 0xa1f   :  { %v1516_v22 = vmul.f32 %v1512_v48, %v12315_v2  ;;  %v1517_v45 = vmul.f32 %v1511_v55, %v12346_v20  ;;  %v1499_v44 = vsel %vm162_vm2, %v1497_v15, %v1498_v4  ;;  %v1500_v30 = vsel %vm162_vm2, %v1496_v43, %v1497_v15 }
 0xa20   :  { %v1506_v17 = vmul.f32 %v1499_v44, %v12286_v28  ;;  %v1505_v8 = vmul.f32 %v1500_v30, %v12258_v12 }
 0xa21   :  { %1541 = vrot.lane.b32.xlu0 %v1516_v22, %s12148_s10 }
 0xa22   :  { %1539 = vrot.lane.b32.xlu1 %v1515_v6, %s12148_s10  ;;  %v8936_v6 = vld [vmem:[#allocation2 + $0x148] ss:$0 sm:$0xff] }
 0xa25   :  { %1545 = vrot.lane.b32.xlu0 %v1518_v26, %s12148_s10 }
 0xa26   :  { %1543 = vrot.lane.b32.xlu1 %v1517_v45, %s12148_s10 }
 0xa8b   :  { %v1526_v9 = vpop.permute.xlu0 %1525 }
 0xa8c   :  { %v1524_v10 = vpop.permute.xlu1 %1523  ;;  %v1552_v25 = vsel %vm434_vm7, %v1504_v60, %v1526_v9 }
 0xa8d   :  { %v1551_v47 = vsel %vm434_vm7, %v1503_v52, %v1524_v10 }
 0xa8f   :  { %v1530_v50 = vpop.permute.xlu0 %1529 }
 0xa90   :  { %v1528_v16 = vpop.permute.xlu1 %1527  ;;  %v1554_v62 = vsel %vm434_vm7, %v1506_v17, %v1530_v50 }
 0xa91   :  { %v1553_v54 = vsel %vm434_vm7, %v1505_v8, %v1528_v16 }
 0xa93   :  { %v1542_v23 = vpop.permute.xlu0 %1541 }
 0xa94   :  { %v1556_v13 = vsel %vm647_vm10, %v1552_v25, %v1542_v23  ;;  %v1540_v24 = vpop.permute.xlu1 %1539 }
 0xa95   :  { %v1555_v42 = vsel %vm647_vm10, %v1551_v47, %v1540_v24 }
 0xa96   :  { %9811 = vmatprep.mubr.msk.f32.mxu0 %vm990_vm11, %v1555_v42 }
 0xa97   :  { %9812 = vmatmul.mubr.msk.f32.vlgmr.msra.gmra.mrb[12].mxu0 %vm990_vm11, %v1556_v13  ;;  %v1546_v61 = vpop.permute.xlu0 %1545 }
 0xa98   :  { %v1558_v38 = vsel %vm647_vm10, %v1554_v62, %v1546_v61  ;;  %v1544_v48 = vpop.permute.xlu1 %1543  ;;  %v12827_v62 = vld [vmem:[#allocation2 + $0xdc8] sm:$0x3] }
 0xa99   :  { %v1557_v22 = vsel %vm647_vm10, %v1553_v54, %v1544_v48 }
 0xa9a   :  { %9814 = vmatprep.mubr.msk.f32.mxu0 %vm990_vm11, %v1557_v22 }
 0xa9b   :  { %9815 = vmatmul.mubr.msk.f32.gmra.mrb[14].mxu0 %vm990_vm11, %v1558_v38  ;;  %v8943_v38 = vld [vmem:[#allocation2 + $0x150] ss:$0 sm:$0xff] }
 0xb6a   :  { %v9813_v63 = vpop.f32.mrb[12].mxu0 }
 0xb6b   :  { %v12799_v55 = vadd.f32 %v9813_v63, %v8936_v6  ;;  %v1641_v26 = vpop.f32.mrb[13].mxu0 }
 0xb6c   :  { %v12801_v45 = vadd.f32 %v8936_v6, %v1641_v26 }
 0xb6d   :  { %v1661_v43 = vmul.f32 %v12799_v55, %v12799_v55 }
 0xb6e   :  { %v1660_v49 = vmul.f32 %v12801_v45, %v12801_v45  ;;  %v9816_v9 = vpop.f32.mrb[14].mxu0 }
 0xb6f   :  { %v12807_v4 = vadd.f32 %v9816_v9, %v8936_v6  ;;  %v1651_v10 = vpop.f32.mrb[15].mxu0 }
 0xb70   :  { %v12809_v32 = vadd.f32 %v8936_v6, %v1651_v10  ;;  %v11766_v15 = vpack.i.bf16 %v1661_v43, %v1660_v49 }
 0xb71   :  { %v1663_v11 = vmul.f32 %v12807_v4, %v12807_v4 }
 0xb72   :  { %v1662_v50 = vmul.f32 %v12809_v32, %v12809_v32  ;;  %11767 = vrot.lane.b32.xlu1 %v11766_v15, %s12142_s6 }
 0xb74   :  { %v11771_v16 = vpack.i.bf16 %v1663_v11, %v1662_v50 }
 0xb76   :  { %11772 = vrot.lane.b32.xlu0 %v11771_v16, %s12142_s6 }
 0xb7a   :  { %1843 = vrot.lane.b32.xlu0 %v8943_v38, %s12142_s6  ;;  %v1977_v38 = vld [vmem:[#allocation2 + $0x170] sm:$0xff] }
 0xbe4   :  { %v11768_v60 = vpop.permute.xlu1 %11767 }
 0xbe5   :  { %v11770_v52 = vunpack.i.h.bf16 %v11768_v60  ;;  %v11769_v44 = vunpack.i.l.bf16 %v11768_v60 }
 0xbe7   :  { %v1681_v25 = vsel %vm434_vm7, %v12799_v55, %v11770_v52  ;;  %v1680_v30 = vsel %vm434_vm7, %v12801_v45, %v11769_v44 }
 0xbe8   :  { %v11773_v23 = vpop.permute.xlu0 %11772  ;;  %v10817_v47 = vpack.c.bf16 %v1681_v25, %v1680_v30 }
 0xbe9   :  { %v11775_v13 = vunpack.i.h.bf16 %v11773_v23  ;;  %v11774_v24 = vunpack.i.l.bf16 %v11773_v23 }
 0xbea   :  { %10818 = vmatpush3.bf16.msra.mxu1 %v10817_v47 }
 0xbeb   :  { %v1683_v17 = vsel %vm434_vm7, %v12807_v4, %v11775_v13  ;;  %v1682_v42 = vsel %vm434_vm7, %v12809_v32, %v11774_v24  ;;  %10819 = vmatprep.subr.bf16.mxu1 %v14572_v7 }
 0xbec   :  { %v10820_v8 = vpack.c.bf16 %v1683_v17, %v1682_v42  ;;  %v1844_v10 = vpop.permute.xlu0 %1843 }
 0xbee   :  { %10821 = vmatpush3.bf16.msra.mxu1 %v10820_v8 }
 0xbef   :  { %10822 = vmatprep.subr.bf16.mxu1 %v14572_v7 }
 0xbf1   :  { %9826 = vmatmul.mubr.msk.f32.vlgmr.msra.gmra.mrb[8].mxu1 %vm434_vm7, %v12827_v62 }
 0xbf2   :  { %10824 = vmatpush3.bf16.msra.mxu1 %v12505_v53  ;;  %9844 = vmatprep.mubr.msk.f32.mxu1 %vm12144_vm9, %v14570_v46 }
 0xbf3   :  { %10825 = vmatprep.subr.bf16.mxu1 %v14572_v7 }
 0xbf6   :  { %10827 = vmatpush3.bf16.msra.mxu1 %v12511_v29 }
 0xbf7   :  { %10828 = vmatprep.subr.bf16.mxu1 %v14572_v7 }
 0xbfa   :  { %10830 = vmatpush3.bf16.msra.mxu1 %v12517_v57 }
 0xbfb   :  { %10831 = vmatprep.subr.bf16.mxu1 %v14572_v7 }
 0xbfe   :  { %10833 = vmatpush3.bf16.msra.mxu1 %v12521_v51 }
 0xbff   :  { %10858 = vmatprep.subr.bf16.mxu1 %v14572_v7 }
 0xcc4   :  { %v1750_v61 = vpop.f32.mrb[8].mxu1 }
 0xcc5   :  { %v9827_v54 = vpop.f32.mrb[9].mxu1  ;;  %9845 = vmatmul.mubr.msk.f32.vlgmr.msra.gmra.mrb[10].mxu1 %vm647_vm10, %v1750_v61  ;;  %v1975_v61 = vld [vmem:[#allocation2 + $0x160] sm:$0xff] }
 0xcc6   :  { %9885 = vmatprep.mubr.msk.f32.mxu1 %vm12144_vm9, %v14570_v46  ;;  %v1976_v54 = vld [vmem:[#allocation2 + $0x168] sm:$0xff] }
 0xd98   :  { %v1823_v48 = vpop.f32.mrb[10].mxu1 }
 0xd99   :  { %v1827_v22 = vmul.f32 0.015625, %v1823_v48  ;;  %v9846_v6 = vpop.f32.mrb[11].mxu1  ;;  %v10834_v48 = vpack.c.bf16 %v1976_v54, %v1975_v61 }
 0xd9a   :  { %v1978_v6 = vld [vmem:[#allocation2 + $0x178] sm:$0xff] }
 0xd9b   :  { %v1828_v63 = vmul.f32 %v1827_v22, %v1827_v22  ;;  %10835 = vmatprep.subr.bf16.mxu0 %v10834_v48 }
 0xd9c   :  { %10837 = vmatpush3.bf16.msra.mxu0 %v10834_v48 }
 0xd9d   :  { %1830 = vrot.lane.b32.xlu1 %v1828_v63, %s12142_s6  ;;  %v10838_v63 = vpack.c.bf16 %v1978_v6, %v1977_v38 }
 0xd9f   :  { %10839 = vmatprep.subr.bf16.mxu0 %v10838_v63 }
 0xda0   :  { %10841 = vmatpush3.bf16.msra.mxu0 %v10838_v63 }
 0xe0f   :  { %v1831_v26 = vpop.permute.xlu1 %1830 }
 0xe10   :  { %v1833_v43 = vsub.f32 %v1827_v22, %v1831_v26  ;;  %v1979_v26 = vld [vmem:[#allocation2 + $0x180] sm:$0xff] }
 0xe12   :  { %v1834_v49 = vmax.f32 %v1833_v43, 0.0  ;;  %v1980_v43 = vld [vmem:[#allocation2 + $0x188] sm:$0xff] }
 0xe14   :  { %v1835_v9 = vadd.f32 1e-05, %v1834_v49  ;;  %v10842_v49 = vpack.c.bf16 %v1980_v43, %v1979_v26 }
 0xe16   :  { %11916 = vrsqrt.f32 %v1835_v9  ;;  %v1981_v9 = vld [vmem:[#allocation2 + $0x190] sm:$0xff]  ;;  %10843 = vmatprep.subr.bf16.mxu0 %v10842_v49 }
 0xe17   :  { %10845 = vmatpush3.bf16.msra.mxu0 %v10842_v49 }
 0xe20   :  { %v11917_v15 = vpop.eup %11916 }
 0xe21   :  { %v1846_v11 = vmul.f32 %v11917_v15, %v1844_v10  ;;  %v1982_v10 = vld [vmem:[#allocation2 + $0x198] sm:$0xff] }
 0xe22   :  { %v10846_v15 = vpack.c.bf16 %v1982_v10, %v1981_v9 }
 0xe23   :  { %v1861_v50 = vrot.slane %v1846_v11, %v12211_v37  ;;  %v1869_v16 = vrot.slane %v1846_v11, %v12214_v39  ;;  %1849 = vrot.lane.b32.xlu1 %v1846_v11, %s12147_s7  ;;  %v8944_v11 = vld [vmem:[#allocation2 + $0x158] ss:$0 sm:$0xff] }
 0xe24   :  { %10847 = vmatprep.subr.bf16.mxu0 %v10846_v15 }
 0xe25   :  { %v1863_v60 = vmul.f32 %v1861_v50, %v12542_v19  ;;  %v1871_v52 = vmul.f32 %v1869_v16, %v12549_v40  ;;  %v1862_v44 = vmul.f32 %v1861_v50, %v12538_v36  ;;  %v1870_v25 = vmul.f32 %v1869_v16, %v12540_v41  ;;  %10849 = vmatpush3.bf16.msra.mxu0 %v10846_v15 }
 0xe26   :  { %v1865_v30 = vmul.f32 %v1861_v50, %v12561_v35  ;;  %v1873_v23 = vmul.f32 %v1869_v16, %v12563_v1  ;;  %v1864_v24 = vmul.f32 %v1861_v50, %v12547_v31  ;;  %v1872_v17 = vmul.f32 %v1869_v16, %v12556_v33 }
 0xe27   :  { %v1875_v47 = vadd.f32 %v1871_v52, %v1863_v60  ;;  %v1874_v13 = vadd.f32 %v1870_v25, %v1862_v44 }
 0xe28   :  { %v1877_v42 = vadd.f32 %v1873_v23, %v1865_v30  ;;  %v1876_v8 = vadd.f32 %v1872_v17, %v1864_v24 }
 0xe29   :  { %1884 = vrot.lane.b32.xlu1 %v1875_v47, %s12147_s7  ;;  %1882 = vrot.lane.b32.xlu0 %v1874_v13, %s12147_s7 }
 0xe2d   :  { %1888 = vrot.lane.b32.xlu1 %v1877_v42, %s12147_s7  ;;  %1886 = vrot.lane.b32.xlu0 %v1876_v8, %s12147_s7 }
 0xe95   :  { %v1850_v50 = vpop.permute.xlu1 %1849 }
 0xe96   :  { %v1852_v16 = vmul.f32 %v1850_v50, %v1827_v22 }
 0xe98   :  { %v1857_v60 = vsub.f32 %v8944_v11, %v1852_v16 }
 0xe9a   :  { %v1901_v52 = vrot.slane %v1857_v60, %v12211_v37  ;;  %v1909_v44 = vrot.slane %v1857_v60, %v12214_v39 }
 0xe9b   :  { %v1885_v25 = vpop.permute.xlu1 %1884  ;;  %v1883_v30 = vpop.permute.xlu0 %1882 }
 0xe9c   :  { %v1903_v23 = vmul.f32 %v1901_v52, %v12542_v19  ;;  %v1911_v47 = vmul.f32 %v1909_v44, %v12549_v40  ;;  %v1902_v13 = vmul.f32 %v1901_v52, %v12538_v36  ;;  %v1910_v24 = vmul.f32 %v1909_v44, %v12540_v41 }
 0xe9d   :  { %v1905_v17 = vmul.f32 %v1901_v52, %v12561_v35  ;;  %v1913_v42 = vmul.f32 %v1909_v44, %v12563_v1  ;;  %v1895_v8 = vmul.f32 %v1885_v25, %v12799_v55  ;;  %v1904_v61 = vmul.f32 %v1901_v52, %v12547_v31 }
 0xe9e   :  { %v1915_v22 = vadd.f32 %v1911_v47, %v1903_v23  ;;  %v1912_v54 = vmul.f32 %v1909_v44, %v12556_v33  ;;  %v1914_v38 = vadd.f32 %v1910_v24, %v1902_v13  ;;  %v1894_v48 = vmul.f32 %v1883_v30, %v12801_v45  ;;  %v1950_v13 = vld [vmem:[%s14567_s1 + $0x8] sm:$0x3]  ;;  %v1983_v24 = vld [vmem:[#allocation2 + $0x1a0] sm:$0xff] }
 0xe9f   :  { %v1917_v6 = vadd.f32 %v1913_v42, %v1905_v17  ;;  %v1889_v63 = vpop.permute.xlu1 %1888  ;;  %v1887_v26 = vpop.permute.xlu0 %1886  ;;  %v1984_v17 = vld [vmem:[#allocation2 + $0x1a8] sm:$0xff]  ;;  %v1962_v42 = vrot.slane %v1950_v13, %v12214_v39 }
 0xea0   :  { %v1919_v43 = vadd.f32 %v1915_v22, %v1895_v8  ;;  %v1897_v49 = vmul.f32 %v1889_v63, %v12807_v4  ;;  %v1916_v9 = vadd.f32 %v1912_v54, %v1904_v61  ;;  %v1896_v10 = vmul.f32 %v1887_v26, %v12809_v32  ;;  %v1985_v54 = vld [vmem:[#allocation2 + $0x1b0] sm:$0xff] }
 0xea1   :  { %v1918_v15 = vadd.f32 %v1914_v38, %v1894_v48  ;;  %v10850_v22 = vpack.c.bf16 %v1984_v17, %v1983_v24  ;;  %v1954_v8 = vrot.slane %v1950_v13, %v12211_v37  ;;  %v1964_v61 = vmul.f32 %v1962_v42, %v12549_v40  ;;  %v1986_v38 = vld [vmem:[#allocation2 + $0x1b8] sm:$0xff] }
 0xea2   :  { %v8946_v11 = vmul.f32 -1.442695, %v1919_v43  ;;  %v1921_v50 = vadd.f32 %v1917_v6, %v1897_v49  ;;  %v1920_v55 = vadd.f32 %v1916_v9, %v1896_v10  ;;  %v1963_v48 = vmul.f32 %v1962_v42, %v12540_v41 }
 0xea3   :  { %v8945_v16 = vmul.f32 -1.442695, %v1918_v15  ;;  %10851 = vmatprep.subr.bf16.mxu0 %v10850_v22  ;;  %v10854_v6 = vpack.c.bf16 %v1986_v38, %v1985_v54  ;;  %v1956_v63 = vmul.f32 %v1954_v8, %v12542_v19  ;;  %v1966_v26 = vmul.f32 %v1962_v42, %v12563_v1 }
 0xea4   :  { %11918 = vpow2.f32 %v8946_v11  ;;  %v8948_v60 = vmul.f32 -1.442695, %v1921_v50  ;;  %v8947_v52 = vmul.f32 -1.442695, %v1920_v55  ;;  %10853 = vmatpush3.bf16.msra.mxu0 %v10850_v22  ;;  %v1955_v9 = vmul.f32 %v1954_v8, %v12538_v36 }
 0xea5   :  { %11920 = vpow2.f32 %v8945_v16  ;;  %v1957_v10 = vmul.f32 %v1954_v8, %v12547_v31  ;;  %v1965_v11 = vmul.f32 %v1962_v42, %v12556_v33  ;;  %10855 = vmatprep.subr.bf16.mxu0 %v10854_v6 }
 0xea6   :  { %11922 = vpow2.f32 %v8948_v60 }
 0xea7   :  { %11924 = vpow2.f32 %v8947_v52  ;;  %v1968_v52 = vadd.f32 %v1964_v61, %v1956_v63  ;;  %v1969_v17 = vadd.f32 %v1965_v11, %v1957_v10 }
 0xea8   :  { %10857 = vmatpush3.bf16.msra.mxu0 %v10854_v6 }
 0xeae   :  { %v11919_v45 = vpop.eup %11918 }
 0xeaf   :  { %v11921_v44 = vpop.eup %11920  ;;  %v1935_v25 = vadd.f32 1.0, %v11919_v45  ;;  %v1958_v45 = vmul.f32 %v1954_v8, %v12561_v35 }
 0xeb0   :  { %v11923_v30 = vpop.eup %11922  ;;  %v1934_v23 = vadd.f32 1.0, %v11921_v44 }
 0xeb1   :  { %v11925_v4 = vpop.eup %11924  ;;  %11926 = vrcp.f32 %v1935_v25  ;;  %v1937_v47 = vadd.f32 1.0, %v11923_v30  ;;  %v1967_v30 = vadd.f32 %v1963_v48, %v1955_v9 }
 0xeb2   :  { %11928 = vrcp.f32 %v1934_v23  ;;  %v1936_v32 = vadd.f32 1.0, %v11925_v4 }
 0xeb3   :  { %11930 = vrcp.f32 %v1937_v47 }
 0xeb4   :  { %11932 = vrcp.f32 %v1936_v32  ;;  %v1970_v32 = vadd.f32 %v1966_v26, %v1958_v45 }
 0xebb   :  { %v11927_v49 = vpop.eup %11926 }
 0xebc   :  { %v11929_v16 = vpop.eup %11928  ;;  %v1947_v60 = vmul.f32 %v11927_v49, %v1919_v43 }
 0xebd   :  { %v11931_v44 = vpop.eup %11930  ;;  %v1946_v25 = vmul.f32 %v11929_v16, %v1918_v15 }
 0xebe   :  { %v11933_v23 = vpop.eup %11932  ;;  %v1949_v4 = vmul.f32 %v11931_v44, %v1921_v50  ;;  %v1972_v47 = vadd.f32 %v1968_v52, %v1947_v60 }
 0xebf   :  { %v1948_v13 = vmul.f32 %v11933_v23, %v1920_v55  ;;  %v1971_v24 = vadd.f32 %v1967_v30, %v1946_v25 }
 0xec0   :  { %2018 = vrot.lane.b32.xlu1 %v1972_v47, %s12142_s6  ;;  %v1989_v42 = vrot.slane %v1972_v47, 7  ;;  %v2001_v22 = vrot.slane %v1972_v47, 1  ;;  %v1974_v54 = vadd.f32 %v1970_v32, %v1949_v4 }
 0xec1   :  { %2016 = vrot.lane.b32.xlu0 %v1971_v24, %s12142_s6  ;;  %v1988_v43 = vrot.slane %v1971_v24, 7  ;;  %v2000_v8 = vrot.slane %v1971_v24, 1  ;;  %v1973_v61 = vadd.f32 %v1969_v17, %v1948_v13 }
 0xec2   :  { %v1991_v38 = vrot.slane %v1974_v54, 7  ;;  %v2003_v15 = vrot.slane %v1974_v54, 1 }
 0xec3   :  { %v1990_v48 = vrot.slane %v1973_v61, 7  ;;  %v2002_v6 = vrot.slane %v1973_v61, 1  ;;  %v1994_v50 = vsel %vm162_vm2, %v1988_v43, %v1989_v42  ;;  %v2006_v55 = vsel %vm223_vm3, %v2000_v8, %v2001_v22 }
 0xec4   :  { %2022 = vrot.lane.b32.xlu1 %v1974_v54, %s12142_s6  ;;  %v1995_v63 = vsel %vm162_vm2, %v1991_v38, %v1988_v43  ;;  %v2008_v11 = vmul.f32 %v2006_v55, %v12317_v3  ;;  %v2007_v16 = vsel %vm223_vm3, %v2003_v15, %v2000_v8  ;;  %v1997_v4 = vmul.f32 %v1994_v50, %v12238_v58  ;;  %v8949_v50 = vld [vmem:[#allocation2 + $0x1c0] ss:$0 sm:$0xff] }
 0xec5   :  { %2020 = vrot.lane.b32.xlu0 %v1973_v61, %s12142_s6  ;;  %v2005_v26 = vsel %vm223_vm3, %v2001_v22, %v2002_v6  ;;  %v1992_v9 = vsel %vm162_vm2, %v1990_v48, %v1991_v38  ;;  %v1993_v10 = vsel %vm162_vm2, %v1989_v42, %v1990_v48  ;;  %v2004_v60 = vsel %vm223_vm3, %v2002_v6, %v2003_v15 }
 0xec6   :  { %v2009_v49 = vmul.f32 %v2005_v26, %v12315_v2  ;;  %v2011_v52 = vmul.f32 %v2007_v16, %v12382_v21  ;;  %v2010_v45 = vmul.f32 %v2004_v60, %v12346_v20  ;;  %v1996_v47 = vmul.f32 %v1995_v63, %v12240_v59 }
 0xec7   :  { %v1999_v22 = vmul.f32 %v1992_v9, %v12286_v28  ;;  %v1998_v43 = vmul.f32 %v1993_v10, %v12258_v12 }
 0xec8   :  { %2034 = vrot.lane.b32.xlu1 %v2009_v49, %s12148_s10 }
 0xec9   :  { %2032 = vrot.lane.b32.xlu0 %v2008_v11, %s12148_s10 }
 0xecc   :  { %2038 = vrot.lane.b32.xlu1 %v2011_v52, %s12148_s10 }
 0xecd   :  { %2036 = vrot.lane.b32.xlu0 %v2010_v45, %s12148_s10 }
 0xf32   :  { %v2019_v44 = vpop.permute.xlu1 %2018 }
 0xf33   :  { %v2017_v25 = vpop.permute.xlu0 %2016  ;;  %v2045_v32 = vsel %vm434_vm7, %v1997_v4, %v2019_v44 }
 0xf34   :  { %v2044_v24 = vsel %vm434_vm7, %v1996_v47, %v2017_v25 }
 0xf36   :  { %v2023_v30 = vpop.permute.xlu1 %2022 }
 0xf37   :  { %v2021_v23 = vpop.permute.xlu0 %2020  ;;  %v2047_v8 = vsel %vm434_vm7, %v1999_v22, %v2023_v30 }
 0xf38   :  { %v2046_v38 = vsel %vm434_vm7, %v1998_v43, %v2021_v23 }
 0xf3a   :  { %v2035_v13 = vpop.permute.xlu1 %2034 }
 0xf3b   :  { %v2049_v17 = vsel %vm647_vm10, %v2045_v32, %v2035_v13  ;;  %v2033_v42 = vpop.permute.xlu0 %2032 }
 0xf3c   :  { %v2048_v54 = vsel %vm647_vm10, %v2044_v24, %v2033_v42 }
 0xf3d   :  { %9871 = vmatprep.mubr.msk.f32.mxu0 %vm990_vm11, %v2048_v54 }
 0xf3e   :  { %9872 = vmatmul.mubr.msk.f32.vlgmr.msra.gmra.mrb[16].mxu0 %vm990_vm11, %v2049_v17  ;;  %v2039_v61 = vpop.permute.xlu1 %2038 }
 0xf3f   :  { %v2051_v15 = vsel %vm647_vm10, %v2047_v8, %v2039_v61  ;;  %v2037_v48 = vpop.permute.xlu0 %2036 }
 0xf40   :  { %v2050_v6 = vsel %vm647_vm10, %v2046_v38, %v2037_v48 }
 0xf41   :  { %9874 = vmatprep.mubr.msk.f32.mxu0 %vm990_vm11, %v2050_v6 }
 0xf42   :  { %9875 = vmatmul.mubr.msk.f32.gmra.mrb[18].mxu0 %vm990_vm11, %v2051_v15 }
0x1011   :  { %v9873_v55 = vpop.f32.mrb[16].mxu0 }
0x1012   :  { %v12932_v63 = vadd.f32 %v9873_v55, %v8949_v50  ;;  %v2134_v26 = vpop.f32.mrb[17].mxu0 }
0x1013   :  { %v12934_v49 = vadd.f32 %v8949_v50, %v2134_v26 }
0x1014   :  { %v2154_v9 = vmul.f32 %v12932_v63, %v12932_v63 }
0x1015   :  { %v2153_v10 = vmul.f32 %v12934_v49, %v12934_v49  ;;  %v9876_v11 = vpop.f32.mrb[18].mxu0 }
0x1016   :  { %v12940_v16 = vadd.f32 %v9876_v11, %v8949_v50  ;;  %v2144_v60 = vpop.f32.mrb[19].mxu0 }
0x1017   :  { %v12942_v52 = vadd.f32 %v8949_v50, %v2144_v60  ;;  %v11776_v45 = vpack.i.bf16 %v2154_v9, %v2153_v10 }
0x1018   :  { %v2156_v44 = vmul.f32 %v12940_v16, %v12940_v16 }
0x1019   :  { %v2155_v25 = vmul.f32 %v12942_v52, %v12942_v52  ;;  %11777 = vrot.lane.b32.xlu0 %v11776_v45, %s12142_s6 }
0x101b   :  { %v11781_v30 = vpack.i.bf16 %v2156_v44, %v2155_v25 }
0x101d   :  { %11782 = vrot.lane.b32.xlu1 %v11781_v30, %s12142_s6 }
0x108b   :  { %v11778_v23 = vpop.permute.xlu0 %11777 }
0x108c   :  { %v11780_v4 = vunpack.i.h.bf16 %v11778_v23  ;;  %v11779_v47 = vunpack.i.l.bf16 %v11778_v23 }
0x108e   :  { %v2174_v32 = vsel %vm434_vm7, %v12932_v63, %v11780_v4  ;;  %v2173_v13 = vsel %vm434_vm7, %v12934_v49, %v11779_v47 }
0x108f   :  { %v11783_v24 = vpop.permute.xlu1 %11782  ;;  %v10859_v17 = vpack.c.bf16 %v2174_v32, %v2173_v13 }
0x1090   :  { %v11785_v42 = vunpack.i.h.bf16 %v11783_v24  ;;  %v11784_v22 = vunpack.i.l.bf16 %v11783_v24 }
0x1091   :  { %10860 = vmatpush3.bf16.msra.mxu1 %v10859_v17 }
0x1092   :  { %v2176_v54 = vsel %vm434_vm7, %v12940_v16, %v11785_v42  ;;  %v2175_v43 = vsel %vm434_vm7, %v12942_v52, %v11784_v22  ;;  %10861 = vmatprep.subr.bf16.mxu1 %v14572_v7 }
0x1093   :  { %v10862_v8 = vpack.c.bf16 %v2176_v54, %v2175_v43 }
0x1095   :  { %10863 = vmatpush3.bf16.msra.mxu1 %v10862_v8  ;;  %v2447_v8 = vld [vmem:[#allocation2 + $0xcd0] sm:$0xff] }
0x1096   :  { %10864 = vmatprep.subr.bf16.mxu1 %v14572_v7 }
0x1098   :  { %9886 = vmatmul.mubr.msk.f32.vlgmr.msra.gmra.mrb[12].mxu1 %vm434_vm7, %v12827_v62  ;;  %v8956_v62 = vld [vmem:[#allocation2 + $0x1c8] ss:$0 sm:$0xff] }
0x1099   :  { %10866 = vmatpush3.bf16.msra.mxu1 %v12505_v53  ;;  %9904 = vmatprep.mubr.msk.f32.mxu1 %vm12144_vm9, %v14570_v46 }
0x109a   :  { %10867 = vmatprep.subr.bf16.mxu1 %v14572_v7  ;;  %2336 = vrot.lane.b32.xlu1 %v8956_v62, %s12142_s6 }
0x109d   :  { %10869 = vmatpush3.bf16.msra.mxu1 %v12511_v29 }
0x109e   :  { %10870 = vmatprep.subr.bf16.mxu1 %v14572_v7 }
0x10a1   :  { %10872 = vmatpush3.bf16.msra.mxu1 %v12517_v57 }
0x10a2   :  { %10873 = vmatprep.subr.bf16.mxu1 %v14572_v7 }
0x10a5   :  { %10875 = vmatpush3.bf16.msra.mxu1 %v12521_v51 }
0x110c   :  { %v2337_v11 = vpop.permute.xlu1 %2336 }
0x116b   :  { %v2243_v61 = vpop.f32.mrb[12].mxu1 }
0x116c   :  { %v9887_v38 = vpop.f32.mrb[13].mxu1  ;;  %9905 = vmatmul.mubr.msk.f32.vlgmr.msra.gmra.mrb[14].mxu1 %vm647_vm10, %v2243_v61  ;;  %v2448_v61 = vld [vmem:[#allocation2 + $0xcd8] sm:$0xff] }
0x116d   :  { %v2449_v38 = vld [vmem:[#allocation2 + $0xce0] sm:$0xff]  ;;  %v10876_v62 = vpack.c.bf16 %v2448_v61, %v2447_v8 }
0x116f   :  { %10877 = vmatprep.subr.bf16.mxu0 %v10876_v62 }
0x1170   :  { %10879 = vmatpush3.bf16.msra.mxu0 %v10876_v62 }
0x123f   :  { %v2316_v15 = vpop.f32.mrb[14].mxu1 }
0x1240   :  { %v2320_v48 = vmul.f32 0.015625, %v2316_v15  ;;  %v9906_v6 = vpop.f32.mrb[15].mxu1  ;;  %v2450_v15 = vld [vmem:[#allocation2 + $0xce8] sm:$0xff] }
0x1241   :  { %v10880_v6 = vpack.c.bf16 %v2450_v15, %v2449_v38 }
0x1242   :  { %v2321_v50 = vmul.f32 %v2320_v48, %v2320_v48 }
0x1243   :  { %10881 = vmatprep.subr.bf16.mxu0 %v10880_v6 }
0x1244   :  { %2323 = vrot.lane.b32.xlu0 %v2321_v50, %s12142_s6  ;;  %v2451_v50 = vld [vmem:[#allocation2 + $0xcf0] sm:$0xff]  ;;  %10883 = vmatpush3.bf16.msra.mxu0 %v10880_v6 }
0x12b6   :  { %v2324_v55 = vpop.permute.xlu0 %2323 }
0x12b7   :  { %v2326_v26 = vsub.f32 %v2320_v48, %v2324_v55  ;;  %v2452_v55 = vld [vmem:[#allocation2 + $0xcf8] sm:$0xff] }
0x12b9   :  { %v2327_v9 = vmax.f32 %v2326_v26, 0.0  ;;  %v10884_v26 = vpack.c.bf16 %v2452_v55, %v2451_v50 }
0x12bb   :  { %v2328_v10 = vadd.f32 1e-05, %v2327_v9  ;;  %v2453_v9 = vld [vmem:[#allocation2 + $0xd00] sm:$0xff]  ;;  %10885 = vmatprep.subr.bf16.mxu0 %v10884_v26 }
0x12bc   :  { %10887 = vmatpush3.bf16.msra.mxu0 %v10884_v26 }
0x12bd   :  { %11934 = vrsqrt.f32 %v2328_v10  ;;  %v2454_v10 = vld [vmem:[#allocation2 + $0xd08] sm:$0xff] }
0x12c7   :  { %v11935_v60 = vpop.eup %11934 }
0x12c8   :  { %v2339_v45 = vmul.f32 %v11935_v60, %v2337_v11  ;;  %v10888_v11 = vpack.c.bf16 %v2454_v10, %v2453_v9  ;;  %v8957_v60 = vld [vmem:[#allocation2 + $0x1d0] ss:$0 sm:$0xff] }
0x12ca   :  { %v2354_v44 = vrot.slane %v2339_v45, %v12211_v37  ;;  %v2362_v25 = vrot.slane %v2339_v45, %v12214_v39  ;;  %2342 = vrot.lane.b32.xlu0 %v2339_v45, %s12147_s7  ;;  %10889 = vmatprep.subr.bf16.mxu0 %v10888_v11 }
0x12cb   :  { %10891 = vmatpush3.bf16.msra.mxu0 %v10888_v11 }
0x12cc   :  { %v2356_v30 = vmul.f32 %v2354_v44, %v12542_v19  ;;  %v2364_v23 = vmul.f32 %v2362_v25, %v12549_v40  ;;  %v2355_v4 = vmul.f32 %v2354_v44, %v12538_v36  ;;  %v2363_v47 = vmul.f32 %v2362_v25, %v12540_v41 }
0x12cd   :  { %v2358_v32 = vmul.f32 %v2354_v44, %v12561_v35  ;;  %v2366_v13 = vmul.f32 %v2362_v25, %v12563_v1  ;;  %v2357_v42 = vmul.f32 %v2354_v44, %v12547_v31  ;;  %v2365_v22 = vmul.f32 %v2362_v25, %v12556_v33 }
0x12ce   :  { %v2368_v24 = vadd.f32 %v2364_v23, %v2356_v30  ;;  %v2367_v17 = vadd.f32 %v2363_v47, %v2355_v4 }
0x12cf   :  { %v2370_v54 = vadd.f32 %v2366_v13, %v2358_v32  ;;  %v2369_v43 = vadd.f32 %v2365_v22, %v2357_v42 }
0x12d0   :  { %2377 = vrot.lane.b32.xlu0 %v2368_v24, %s12147_s7  ;;  %2375 = vrot.lane.b32.xlu1 %v2367_v17, %s12147_s7 }
0x12d4   :  { %2381 = vrot.lane.b32.xlu0 %v2370_v54, %s12147_s7  ;;  %2379 = vrot.lane.b32.xlu1 %v2369_v43, %s12147_s7 }
0x133c   :  { %v2343_v45 = vpop.permute.xlu0 %2342 }
0x133d   :  { %v2345_v44 = vmul.f32 %v2343_v45, %v2320_v48 }
0x133f   :  { %v2350_v25 = vsub.f32 %v8957_v60, %v2345_v44 }
0x1341   :  { %v2394_v30 = vrot.slane %v2350_v25, %v12211_v37  ;;  %v2402_v23 = vrot.slane %v2350_v25, %v12214_v39 }
0x1342   :  { %v2378_v4 = vpop.permute.xlu0 %2377  ;;  %v2376_v47 = vpop.permute.xlu1 %2375 }
0x1343   :  { %v2396_v32 = vmul.f32 %v2394_v30, %v12542_v19  ;;  %v2404_v13 = vmul.f32 %v2402_v23, %v12549_v40  ;;  %v2395_v24 = vmul.f32 %v2394_v30, %v12538_v36  ;;  %v2403_v17 = vmul.f32 %v2402_v23, %v12540_v41 }
0x1344   :  { %v2398_v42 = vmul.f32 %v2394_v30, %v12561_v35  ;;  %v2406_v22 = vmul.f32 %v2402_v23, %v12563_v1  ;;  %v2388_v54 = vmul.f32 %v2378_v4, %v12932_v63  ;;  %v2397_v43 = vmul.f32 %v2394_v30, %v12547_v31  ;;  %v4761_v1 = vld [vmem:[#allocation2 + $0x5f0] sm:$0xff]  ;;  %v4763_v35 = vld [vmem:[#allocation2 + $0x600] sm:$0xff] }
0x1345   :  { %v2408_v48 = vadd.f32 %v2404_v13, %v2396_v32  ;;  %v2405_v8 = vmul.f32 %v2402_v23, %v12556_v33  ;;  %v2407_v61 = vadd.f32 %v2403_v17, %v2395_v24  ;;  %v2387_v38 = vmul.f32 %v2376_v47, %v12934_v49  ;;  %v2455_v13 = vld [vmem:[#allocation2 + $0xd10] sm:$0xff]  ;;  %v2456_v24 = vld [vmem:[#allocation2 + $0xd18] sm:$0xff] }
0x1346   :  { %v2410_v62 = vadd.f32 %v2406_v22, %v2398_v42  ;;  %v2382_v15 = vpop.permute.xlu0 %2381  ;;  %v2380_v6 = vpop.permute.xlu1 %2379  ;;  %v10892_v17 = vpack.c.bf16 %v2456_v24, %v2455_v13  ;;  %v2457_v42 = vld [vmem:[#allocation2 + $0xd20] sm:$0xff]  ;;  %v2458_v22 = vld [vmem:[#allocation2 + $0xd28] sm:$0xff]  ;;  %v2743_v24 = vld [vmem:[#allocation2 + $0xdb8] sm:$0xff] }
0x1347   :  { %v2412_v50 = vadd.f32 %v2408_v48, %v2388_v54  ;;  %v2390_v55 = vmul.f32 %v2382_v15, %v12940_v16  ;;  %v2409_v26 = vadd.f32 %v2405_v8, %v2397_v43  ;;  %v2389_v9 = vmul.f32 %v2380_v6, %v12942_v52 }
0x1348   :  { %v2411_v10 = vadd.f32 %v2407_v61, %v2387_v38  ;;  %10893 = vmatprep.subr.bf16.mxu0 %v10892_v17  ;;  %v10896_v48 = vpack.c.bf16 %v2458_v22, %v2457_v42  ;;  %v2726_v42 = vld [vmem:[#allocation2 + $0xdb0] sm:$0xff] }
0x1349   :  { %v8959_v11 = vmul.f32 -1.442695, %v2412_v50  ;;  %v2414_v60 = vadd.f32 %v2410_v62, %v2390_v55  ;;  %v2413_v63 = vadd.f32 %v2409_v26, %v2389_v9  ;;  %10895 = vmatpush3.bf16.msra.mxu0 %v10892_v17  ;;  %v2725_v17 = vld [vmem:[#allocation2 + $0xda8] sm:$0xff] }
0x134a   :  { %v8958_v45 = vmul.f32 -1.442695, %v2411_v10  ;;  %10897 = vmatprep.subr.bf16.mxu0 %v10896_v48 }
0x134b   :  { %11936 = vpow2.f32 %v8959_v11  ;;  %v8961_v44 = vmul.f32 -1.442695, %v2414_v60  ;;  %v8960_v25 = vmul.f32 -1.442695, %v2413_v63 }
0x134c   :  { %11938 = vpow2.f32 %v8958_v45 }
0x134d   :  { %11940 = vpow2.f32 %v8961_v44  ;;  %10899 = vmatpush3.bf16.msra.mxu0 %v10896_v48 }
0x134e   :  { %11942 = vpow2.f32 %v8960_v25  ;;  %10932 = vmatprep.subr.bf16.mxu0 %v14572_v7 }
0x1355   :  { %v11937_v49 = vpop.eup %11936 }
0x1356   :  { %v11939_v30 = vpop.eup %11938  ;;  %v2428_v23 = vadd.f32 1.0, %v11937_v49 }
0x1357   :  { %v11941_v4 = vpop.eup %11940  ;;  %v2427_v47 = vadd.f32 1.0, %v11939_v30 }
0x1358   :  { %v11943_v16 = vpop.eup %11942  ;;  %11944 = vrcp.f32 %v2428_v23  ;;  %v2430_v32 = vadd.f32 1.0, %v11941_v4 }
0x1359   :  { %11946 = vrcp.f32 %v2427_v47  ;;  %v2429_v52 = vadd.f32 1.0, %v11943_v16 }
0x135a   :  { %11948 = vrcp.f32 %v2430_v32 }
0x135b   :  { %11950 = vrcp.f32 %v2429_v52 }
0x1362   :  { %v11945_v54 = vpop.eup %11944 }
0x1363   :  { %v11947_v43 = vpop.eup %11946  ;;  %v2440_v8 = vmul.f32 %v11945_v54, %v2412_v50 }
0x1364   :  { %v11949_v61 = vpop.eup %11948  ;;  %v2439_v38 = vmul.f32 %v11947_v43, %v2411_v10 }
0x1365   :  { %v11951_v62 = vpop.eup %11950  ;;  %v2442_v15 = vmul.f32 %v11949_v61, %v2414_v60  ;;  %v2444_v6 = vadd.f32 %v2440_v8, %v12734_v56 }
0x1366   :  { %v2441_v55 = vmul.f32 %v11951_v62, %v2413_v63  ;;  %v2443_v26 = vadd.f32 %v2439_v38, %v12737_v5 }
0x1367   :  { %2490 = vrot.lane.b32.xlu0 %v2444_v6, %s12142_s6  ;;  %v2473_v9 = vrot.slane %v2444_v6, 1  ;;  %v2446_v11 = vadd.f32 %v2442_v15, %v12741_v14  ;;  %v2461_v45 = vrot.slane %v2444_v6, 7 }
0x1368   :  { %2488 = vrot.lane.b32.xlu1 %v2443_v26, %s12142_s6  ;;  %v2472_v50 = vrot.slane %v2443_v26, 1  ;;  %v2445_v10 = vadd.f32 %v2441_v55, %v12746_v27  ;;  %v2460_v44 = vrot.slane %v2443_v26, 7 }
0x1369   :  { %v2463_v25 = vrot.slane %v2446_v11, 7  ;;  %v2475_v49 = vrot.slane %v2446_v11, 1 }
0x136a   :  { %v2474_v60 = vrot.slane %v2445_v10, 1  ;;  %v2466_v56 = vsel %vm162_vm2, %v2460_v44, %v2461_v45  ;;  %v2462_v63 = vrot.slane %v2445_v10, 7  ;;  %v2478_v5 = vsel %vm223_vm3, %v2472_v50, %v2473_v9 }
0x136b   :  { %2494 = vrot.lane.b32.xlu0 %v2446_v11, %s12142_s6  ;;  %v2467_v14 = vsel %vm162_vm2, %v2463_v25, %v2460_v44  ;;  %v2480_v47 = vmul.f32 %v2478_v5, %v12317_v3  ;;  %v2479_v16 = vsel %vm223_vm3, %v2475_v49, %v2472_v50  ;;  %v2469_v8 = vmul.f32 %v2466_v56, %v12238_v58  ;;  %v2744_v56 = vld [vmem:[#allocation2 + $0xdc0] sm:$0xff] }
0x136c   :  { %2492 = vrot.lane.b32.xlu1 %v2445_v10, %s12142_s6  ;;  %v2477_v27 = vsel %vm223_vm3, %v2473_v9, %v2474_v60  ;;  %v2464_v23 = vsel %vm162_vm2, %v2462_v63, %v2463_v25  ;;  %v2465_v4 = vsel %vm162_vm2, %v2461_v45, %v2462_v63  ;;  %v2476_v32 = vsel %vm223_vm3, %v2474_v60, %v2475_v49  ;;  %v2625_v60 = vld [vmem:[#allocation2 + $0xf90] sm:$0xff] }
0x136d   :  { %v2481_v30 = vmul.f32 %v2477_v27, %v12315_v2  ;;  %v2483_v52 = vmul.f32 %v2479_v16, %v12382_v21  ;;  %v2482_v13 = vmul.f32 %v2476_v32, %v12346_v20  ;;  %v2468_v61 = vmul.f32 %v2467_v14, %v12240_v59  ;;  %9945 = vmatprep.mubr.msk.f32.mxu1 %vm434_vm7, %v2625_v60  ;;  %v8962_v63 = vld [vmem:[#allocation2 + $0xd30] ss:$0 sm:$0xff] }
0x136e   :  { %v2471_v26 = vmul.f32 %v2464_v23, %v12286_v28  ;;  %v2470_v11 = vmul.f32 %v2465_v4, %v12258_v12 }
0x136f   :  { %2506 = vrot.lane.b32.xlu0 %v2481_v30, %s12148_s10 }
0x1370   :  { %2504 = vrot.lane.b32.xlu1 %v2480_v47, %s12148_s10 }
0x1373   :  { %2510 = vrot.lane.b32.xlu0 %v2483_v52, %s12148_s10 }
0x1374   :  { %2508 = vrot.lane.b32.xlu1 %v2482_v13, %s12148_s10  ;;  %v2626_v13 = vld [vmem:[#allocation2 + $0xf98] sm:$0xff] }
0x1377   :  { %2752 = vperm.xlu0 %11786, %v2744_v56  }
0x1378   :  { %2747 = vperm.xlu1 %11755, %v2743_v24   ;;  %v2708_v24 = vld [vmem:[#allocation2 + $0x1d8] sm:$0xff] }
0x137c   :  { %2729 = vperm.xlu1 %11755, %v2725_v17   ;;  %v2709_v17 = vld [vmem:[#allocation2 + $0x1e0] sm:$0xff] }
0x1380   :  { %2734 = vperm.xlu1 %11755, %v2726_v42   ;;  %v2710_v42 = vld [vmem:[#allocation2 + $0x1e8] sm:$0xff] }
0x1384   :  { %11792 = vset.pattern.permute.xlu1 %v12146_v18 }
0x13d9   :  { %v2491_v22 = vpop.permute.xlu0 %2490 }
0x13da   :  { %v2489_v48 = vpop.permute.xlu1 %2488  ;;  %v2517_v38 = vsel %vm434_vm7, %v2469_v8, %v2491_v22  ;;  %v10908_v22 = vpack.c.bf16 %v2709_v17, %v2708_v24  ;;  %v2713_v8 = vld [vmem:[#allocation2 + $0x200] sm:$0xff] }
0x13db   :  { %v2516_v15 = vsel %vm434_vm7, %v2468_v61, %v2489_v48  ;;  %v2711_v48 = vld [vmem:[#allocation2 + $0x1f0] sm:$0xff] }
0x13dd   :  { %v2495_v54 = vpop.permute.xlu0 %2494 }
0x13de   :  { %v2493_v43 = vpop.permute.xlu1 %2492  ;;  %v2519_v45 = vsel %vm434_vm7, %v2471_v26, %v2495_v54  ;;  %v10912_v54 = vpack.c.bf16 %v2711_v48, %v2710_v42 }
0x13df   :  { %v2518_v10 = vsel %vm434_vm7, %v2470_v11, %v2493_v43  ;;  %v2712_v43 = vld [vmem:[#allocation2 + $0x1f8] sm:$0xff]  ;;  %v2719_v11 = vld [vmem:[#allocation2 + $0x230] sm:$0xff] }
0x13e0   :  { %v10916_v61 = vpack.c.bf16 %v2713_v8, %v2712_v43  ;;  %v8969_v8 = vld [vmem:[#allocation2 + $0x238] ss:$0 sm:$0xff] }
0x13e1   :  { %v2507_v62 = vpop.permute.xlu0 %2506 }
0x13e2   :  { %v2521_v6 = vsel %vm647_vm10, %v2517_v38, %v2507_v62  ;;  %v2505_v55 = vpop.permute.xlu1 %2504  ;;  %v2714_v38 = vld [vmem:[#allocation2 + $0x208] sm:$0xff]  ;;  %v2715_v62 = vld [vmem:[#allocation2 + $0x210] sm:$0xff] }
0x13e3   :  { %v2520_v9 = vsel %vm647_vm10, %v2516_v15, %v2505_v55  ;;  %v10920_v15 = vpack.c.bf16 %v2715_v62, %v2714_v38  ;;  %v2717_v55 = vld [vmem:[#allocation2 + $0x220] sm:$0xff] }
0x13e4   :  { %9931 = vmatprep.mubr.msk.f32.mxu0 %vm990_vm11, %v2520_v9  ;;  %v2718_v9 = vld [vmem:[#allocation2 + $0x228] sm:$0xff] }
0x13e5   :  { %9932 = vmatmul.mubr.msk.f32.vlgmr.msra.gmra.mrb[20].mxu0 %vm990_vm11, %v2521_v6  ;;  %v2511_v50 = vpop.permute.xlu0 %2510  ;;  %v2716_v6 = vld [vmem:[#allocation2 + $0x218] sm:$0xff] }
0x13e6   :  { %v2523_v44 = vsel %vm647_vm10, %v2519_v45, %v2511_v50  ;;  %v2509_v25 = vpop.permute.xlu1 %2508  ;;  %v10924_v26 = vpack.c.bf16 %v2717_v55, %v2716_v6  ;;  %v10928_v45 = vpack.c.bf16 %v2719_v11, %v2718_v9  ;;  %v13107_v9 = vld [vmem:[#allocation2 + $0xd98] sm:$0xff] }
0x13e7   :  { %v2522_v49 = vsel %vm647_vm10, %v2518_v10, %v2509_v25 }
0x13e8   :  { %9934 = vmatprep.mubr.msk.f32.mxu0 %vm990_vm11, %v2522_v49 }
0x13e9   :  { %9935 = vmatmul.mubr.msk.f32.gmra.mrb[22].mxu0 %vm990_vm11, %v2523_v44 }
0x13ea   :  { %9979 = vmatprep.mubr.msk.f32.mxu0 %vm12144_vm9, %v14570_v46 }
0x13f6   :  { %v13070_v56 = vpop.permute.xlu0 %2752 }
0x14b8   :  { %v9933_v5 = vpop.f32.mrb[20].mxu0 }
0x14b9   :  { %v2612_v14 = vadd.f32 %v9933_v5, %v8962_v63  ;;  %v2606_v27 = vpop.f32.mrb[21].mxu0 }
0x14ba   :  { %v2607_v30 = vadd.f32 %v8962_v63, %v2606_v27 }
0x14bc   :  { %v10900_v23 = vpack.c.bf16 %v2612_v14, %v2607_v30  ;;  %v9936_v4 = vpop.f32.mrb[22].mxu0 }
0x14bd   :  { %v2622_v47 = vadd.f32 %v9936_v4, %v8962_v63  ;;  %v2616_v16 = vpop.f32.mrb[23].mxu0 }
0x14be   :  { %v2617_v32 = vadd.f32 %v8962_v63, %v2616_v16  ;;  %10901 = vmatprep.subr.bf16.mxu1 %v10900_v23  ;;  %v13072_v63 = vpop.permute.xlu1 %2747 }
0x14bf   :  { %10903 = vmatpush3.bf16.msra.mxu1 %v10900_v23 }
0x14c0   :  { %v10904_v52 = vpack.c.bf16 %v2622_v47, %v2617_v32 }
0x14c2   :  { %10905 = vmatprep.subr.bf16.mxu1 %v10904_v52  ;;  %v13086_v47 = vpop.permute.xlu1 %2729 }
0x14c3   :  { %10907 = vmatpush3.bf16.msra.mxu1 %v10904_v52 }
0x14c4   :  { %10909 = vmatprep.subr.bf16.mxu1 %v10908_v22 }
0x14c6   :  { %9946 = vmatmul.mubr.msk.f32.vlgmr.msra.gmra.mrb[16].mxu1 %vm434_vm7, %v2626_v13  ;;  %v13088_v16 = vpop.permute.xlu1 %2734 }
0x14c7   :  { %10911 = vmatpush3.bf16.msra.mxu1 %v10908_v22 }
0x14c8   :  { %10913 = vmatprep.subr.bf16.mxu1 %v10912_v54 }
0x14cb   :  { %10915 = vmatpush3.bf16.msra.mxu1 %v10912_v54 }
0x14cc   :  { %10917 = vmatprep.subr.bf16.mxu1 %v10916_v61 }
0x14cf   :  { %10919 = vmatpush3.bf16.msra.mxu1 %v10916_v61 }
0x14d0   :  { %10921 = vmatprep.subr.bf16.mxu1 %v10920_v15 }
0x14d3   :  { %10923 = vmatpush3.bf16.msra.mxu1 %v10920_v15 }
0x14d4   :  { %10925 = vmatprep.subr.bf16.mxu1 %v10924_v26 }
0x14d7   :  { %10927 = vmatpush3.bf16.msra.mxu1 %v10924_v26 }
0x14d8   :  { %10929 = vmatprep.subr.bf16.mxu1 %v10928_v45 }
0x14db   :  { %10931 = vmatpush3.bf16.msra.mxu1 %v10928_v45 }
0x14dc   :  { %10959 = vmatprep.subr.bf16.mxu1 %v14572_v7 }
0x1599   :  { %v13058_v50 = vpop.f32.mrb[16].mxu1 }
0x159a   :  { %v2722_v10 = vrot.slane %v13058_v50, 7  ;;  %v2740_v44 = vrot.slane %v13058_v50, 1  ;;  %2761 = vrot.lane.b32.xlu1 %v13058_v50, %s12142_s6  ;;  %v13064_v25 = vpop.f32.mrb[17].mxu1 }
0x159b   :  { %v2721_v49 = vrot.slane %v13064_v25, 7  ;;  %v2739_v60 = vrot.slane %v13064_v25, 1  ;;  %2759 = vrot.lane.b32.xlu0 %v13064_v25, %s12142_s6 }
0x159d   :  { %v2742_v5 = vsel %vm223_vm3, %v2740_v44, %v2739_v60  ;;  %v2741_v14 = vsel %vm223_vm3, %v2739_v60, %v2740_v44  ;;  %v2723_v27 = vsel %vm162_vm2, %v2721_v49, %v2722_v10  ;;  %v2724_v30 = vsel %vm162_vm2, %v2722_v10, %v2721_v49  ;;  %v2948_v60 = vld [vmem:[#allocation2 + $0xf10] sm:$0xff] }
0x159e   :  { %v2756_v23 = vmul.f32 %v13070_v56, %v2742_v5  ;;  %v2755_v4 = vmul.f32 %v13072_v63, %v2741_v14  ;;  %v2738_v13 = vmul.f32 %v13088_v16, %v2723_v27  ;;  %v2737_v24 = vmul.f32 %v13086_v47, %v2724_v30  ;;  %v2949_v5 = vld [vmem:[#allocation2 + $0xf18] sm:$0xff]  ;;  %v13115_v27 = vld [vmem:[#allocation2 + $0xd90] sm:$0x3] }
0x159f   :  { %v13117_v30 = vpack.c.bf16 %v2949_v5, %v2948_v60  ;;  %v3066_v60 = vld [vmem:[#allocation2 + $0xda0] sm:$0xff] }
0x15a0   :  { %2769 = vrot.lane.b32.xlu1 %v2756_v23, %s12148_s10  ;;  %2767 = vrot.lane.b32.xlu0 %v2755_v4, %s12148_s10  ;;  %v2951_v23 = vld [vmem:[#allocation2 + $0xf28] sm:$0xff] }
0x160c   :  { %v2762_v52 = vpop.permute.xlu1 %2761 }
0x160d   :  { %v2760_v32 = vpop.permute.xlu0 %2759  ;;  %v2774_v17 = vsel %vm434_vm7, %v2738_v13, %v2762_v52  ;;  %v2953_v52 = vld [vmem:[#allocation2 + $0xf38] sm:$0xff] }
0x160e   :  { %v2773_v42 = vsel %vm434_vm7, %v2737_v24, %v2760_v32  ;;  %v2952_v32 = vld [vmem:[#allocation2 + $0xf30] sm:$0xff]  ;;  %v2954_v24 = vld [vmem:[#allocation2 + $0xf40] sm:$0xff] }
0x160f   :  { %v13129_v13 = vpack.c.bf16 %v2953_v52, %v2952_v32 }
0x1612   :  { %v2770_v22 = vpop.permute.xlu1 %2769  ;;  %v2768_v48 = vpop.permute.xlu0 %2767 }
0x1613   :  { %v2776_v54 = vsel %vm647_vm10, %v2774_v17, %v2770_v22  ;;  %v2775_v43 = vsel %vm647_vm10, %v2773_v42, %v2768_v48  ;;  %v2955_v17 = vld [vmem:[#allocation2 + $0xf48] sm:$0xff]  ;;  %v2956_v22 = vld [vmem:[#allocation2 + $0xf50] sm:$0xff]  ;;  %v2957_v48 = vld [vmem:[#allocation2 + $0xf58] sm:$0xff] }
0x1614   :  { %9972 = vmatprep.mubr.msk.f32.mxu1 %vm990_vm11, %v2775_v43  ;;  %v13133_v42 = vpack.c.bf16 %v2955_v17, %v2954_v24  ;;  %v2958_v43 = vld [vmem:[#allocation2 + $0xf60] sm:$0xff] }
0x1615   :  { %9973 = vmatmul.mubr.msk.f32.vlgmr.msra.gmra.mrb[18].mxu1 %vm990_vm11, %v2776_v54  ;;  %v13137_v54 = vpack.c.bf16 %v2957_v48, %v2956_v22 }
0x16e8   :  { %v9974_v61 = vpop.f32.mrb[18].mxu1 }
0x16e9   :  { %v13098_v38 = vadd.f32 %v9974_v61, %v8969_v8  ;;  %v2853_v62 = vpop.f32.mrb[19].mxu1 }
0x16ea   :  { %v13100_v15 = vadd.f32 %v8969_v8, %v2853_v62  ;;  %v2959_v8 = vld [vmem:[#allocation2 + $0xf68] sm:$0xff]  ;;  %v2960_v62 = vld [vmem:[#allocation2 + $0xf70] sm:$0xff] }
0x16eb   :  { %v2864_v6 = vmul.f32 %v13098_v38, %v13098_v38  ;;  %v13141_v61 = vpack.c.bf16 %v2959_v8, %v2958_v43 }
0x16ec   :  { %v2863_v55 = vmul.f32 %v13100_v15, %v13100_v15 }
0x16ee   :  { %v11787_v26 = vpack.i.bf16 %v2864_v6, %v2863_v55  ;;  %v2961_v6 = vld [vmem:[#allocation2 + $0xf78] sm:$0xff] }
0x16ef   :  { %v13145_v55 = vpack.c.bf16 %v2961_v6, %v2960_v62 }
0x16f0   :  { %11788 = vrot.lane.b32.xlu0 %v11787_v26, %s12148_s10  ;;  %v2962_v26 = vld [vmem:[#allocation2 + $0xf80] sm:$0xff] }
0x16f4   :  { %3069 = vperm.xlu0 %11786, %v13107_v9  }
0x16f8   :  { %11794 = vset.pattern.permute.xlu0 %v12146_v18  ;;  %v2950_v18 = vld [vmem:[#allocation2 + $0xf20] sm:$0xff] }
0x16f9   :  { %v13123_v4 = vpack.c.bf16 %v2951_v23, %v2950_v18 }
0x1762   :  { %v11789_v11 = vpop.permute.xlu0 %11788 }
0x1763   :  { %v11791_v45 = vunpack.i.h.bf16 %v11789_v11  ;;  %v11790_v10 = vunpack.i.l.bf16 %v11789_v11  ;;  %v2963_v11 = vld [vmem:[#allocation2 + $0xf88] sm:$0xff] }
0x1765   :  { %v2874_v44 = vsel %vm647_vm10, %v13098_v38, %v11791_v45  ;;  %v2873_v49 = vsel %vm647_vm10, %v13100_v15, %v11790_v10  ;;  %v13149_v45 = vpack.c.bf16 %v2963_v11, %v2962_v26 }
0x1766   :  { %v10933_v14 = vpack.c.bf16 %v2874_v44, %v2873_v49  ;;  %v8973_v49 = vld [vmem:[#allocation2 + $0x240] ss:$0 sm:$0xff] }
0x1767   :  { %3050 = vrot.lane.b32.xlu0 %v8973_v49, %s12148_s10 }
0x1768   :  { %10934 = vmatpush3.bf16.msra.mxu0 %v10933_v14 }
0x1769   :  { %10935 = vmatprep.subr.bf16.mxu0 %v14572_v7 }
0x176b   :  { %9980 = vmatmul.mubr.msk.f32.vlgmr.msra.gmra.mrb[24].mxu0 %vm429_vm6, %v13115_v27  ;;  %3088 = vperm.xlu0 %11794, %v3066_v60  }
0x176c   :  { %10937 = vmatpush3.bf16.msra.mxu0 %v13117_v30  ;;  %10014 = vmatprep.mubr.msk.f32.mxu0 %vm12144_vm9, %v14570_v46 }
0x176d   :  { %10938 = vmatprep.subr.bf16.mxu0 %v14572_v7 }
0x1770   :  { %10940 = vmatpush3.bf16.msra.mxu0 %v13123_v4 }
0x1771   :  { %10941 = vmatprep.subr.bf16.mxu0 %v14572_v7 }
0x1773   :  { %v13165_v22 = vpop.permute.xlu0 %3069 }
0x1774   :  { %10943 = vmatpush3.bf16.msra.mxu0 %v13129_v13 }
0x1775   :  { %10944 = vmatprep.subr.bf16.mxu0 %v14572_v7 }
0x1778   :  { %10946 = vmatpush3.bf16.msra.mxu0 %v13133_v42 }
0x1779   :  { %10947 = vmatprep.subr.bf16.mxu0 %v14572_v7 }
0x177c   :  { %10949 = vmatpush3.bf16.msra.mxu0 %v13137_v54 }
0x177d   :  { %10950 = vmatprep.subr.bf16.mxu0 %v14572_v7 }
0x1780   :  { %10952 = vmatpush3.bf16.msra.mxu0 %v13141_v61 }
0x1781   :  { %10953 = vmatprep.subr.bf16.mxu0 %v14572_v7 }
0x1784   :  { %10955 = vmatpush3.bf16.msra.mxu0 %v13145_v55 }
0x1785   :  { %10956 = vmatprep.subr.bf16.mxu0 %v14572_v7 }
0x1788   :  { %10958 = vmatpush3.bf16.msra.mxu0 %v13149_v45 }
0x1789   :  { %10995 = vmatprep.subr.bf16.mxu0 %v14572_v7 }
0x17d9   :  { %v3051_v48 = vpop.permute.xlu0 %3050 }
0x17ea   :  { %v13169_v6 = vpop.permute.xlu0 %3088 }
0x183e   :  { %v2944_v10 = vpop.f32.mrb[24].mxu0 }
0x183f   :  { %v9981_v44 = vpop.f32.mrb[25].mxu0  ;;  %10015 = vmatmul.mubr.f32.vlgmr.msra.gmra.mrb[26].mxu0 %v2944_v10 }
0x1840   :  { %10021 = vmatprep.mubr.msk.f32.mxu0 %vm12144_vm9, %v14570_v46 }
0x1912   :  { %v3030_v5 = vpop.f32.mrb[26].mxu0 }
0x1913   :  { %v13157_v14 = vmul.f32 0.015625, %v3030_v5  ;;  %v10016_v18 = vpop.f32.mrb[27].mxu0 }
0x1914   :  { %v3156_v18 = vld [vmem:[#allocation2 + $0x250] sm:$0xff] }
0x1915   :  { %v3035_v23 = vmul.f32 %v13157_v14, %v13157_v14 }
0x1917   :  { %3037 = vrot.lane.b32.xlu1 %v3035_v23, %s12148_s10  ;;  %v3157_v23 = vld [vmem:[#allocation2 + $0x258] sm:$0xff] }
0x191b   :  { %3084 = vperm.xlu1 %11792, %v13107_v9  }
0x191f   :  { %11793 = vset.pattern.permute.xlu1 %v12140_v0 }
0x1920   :  { %3074 = vperm.xlu1 %11793, %v3066_v60  }
0x1989   :  { %v3038_v32 = vpop.permute.xlu1 %3037 }
0x198a   :  { %v3040_v52 = vsub.f32 %v13157_v14, %v3038_v32  ;;  %v3158_v32 = vld [vmem:[#allocation2 + $0x260] sm:$0xff] }
0x198c   :  { %v3041_v24 = vmax.f32 %v3040_v52, 0.0  ;;  %v10960_v52 = vpack.c.bf16 %v3157_v23, %v3156_v18  ;;  %v3168_v23 = vld [vmem:[#allocation2 + $0x2b0] sm:$0xff] }
0x198e   :  { %v3042_v17 = vadd.f32 1e-05, %v3041_v24  ;;  %v3159_v24 = vld [vmem:[#allocation2 + $0x268] sm:$0xff]  ;;  %10961 = vmatpush1.bf16.msra.mxu1 %v10960_v52 }
0x198f   :  { %10962 = vmatprep.subr.bf16.mxu1 %v14572_v7 }
0x1990   :  { %11952 = vrsqrt.f32 %v3042_v17  ;;  %v10963_v17 = vpack.c.bf16 %v3159_v24, %v3158_v32  ;;  %v3169_v32 = vld [vmem:[#allocation2 + $0x2b8] sm:$0xff]  ;;  %v3170_v24 = vld [vmem:[#allocation2 + $0x2c0] sm:$0xff] }
0x1991   :  { %v10978_v52 = vpack.c.bf16 %v3169_v32, %v3168_v23  ;;  %v8974_v32 = vld [vmem:[#allocation2 + $0x248] ss:$0 sm:$0xff] }
0x1992   :  { %10964 = vmatpush1.bf16.msra.mxu1 %v10963_v17  ;;  %v3171_v17 = vld [vmem:[#allocation2 + $0x2c8] sm:$0xff] }
0x1993   :  { %10965 = vmatprep.subr.bf16.mxu1 %v14572_v7 }
0x199a   :  { %v11953_v43 = vpop.eup %11952  ;;  %v13167_v8 = vpop.permute.xlu1 %3084 }
0x199b   :  { %v3053_v62 = vmul.f32 %v11953_v43, %v3051_v48  ;;  %v3160_v48 = vld [vmem:[#allocation2 + $0x270] sm:$0xff]  ;;  %v3161_v43 = vld [vmem:[#allocation2 + $0x278] sm:$0xff] }
0x199d   :  { %v3080_v9 = vrot.slane %v3053_v62, %v12211_v37  ;;  %v3094_v0 = vrot.slane %v3053_v62, %v12214_v39  ;;  %3056 = vrot.lane.b32.xlu1 %v3053_v62, %s12148_s10  ;;  %v10966_v62 = vpack.c.bf16 %v3161_v43, %v3160_v48  ;;  %v10981_v48 = vpack.c.bf16 %v3171_v17, %v3170_v24  ;;  %v3172_v43 = vld [vmem:[#allocation2 + $0x2d0] sm:$0xff] }
0x199f   :  { %v3081_v26 = vmul.f32 %v3080_v9, %v13165_v22  ;;  %v13175_v11 = vpop.permute.xlu1 %3074  ;;  %v3095_v10 = vmul.f32 %v3094_v0, %v13167_v8  ;;  %v3096_v44 = vmul.f32 %v3094_v0, %v13169_v6  ;;  %v3163_v0 = vld [vmem:[#allocation2 + $0x288] sm:$0xff]  ;;  %10967 = vmatpush1.bf16.msra.mxu1 %v10966_v62  ;;  %v3173_v62 = vld [vmem:[#allocation2 + $0x2d8] sm:$0xff] }
0x19a0   :  { %v3082_v49 = vmul.f32 %v3080_v9, %v13175_v11  ;;  %v3162_v9 = vld [vmem:[#allocation2 + $0x280] sm:$0xff]  ;;  %10968 = vmatprep.subr.bf16.mxu1 %v14572_v7 }
0x19a1   :  { %v3097_v60 = vadd.f32 %v3095_v10, %v3081_v26  ;;  %v10969_v26 = vpack.c.bf16 %v3163_v0, %v3162_v9  ;;  %v3164_v10 = vld [vmem:[#allocation2 + $0x290] sm:$0xff]  ;;  %v10984_v9 = vpack.c.bf16 %v3173_v62, %v3172_v43  ;;  %v3174_v0 = vld [vmem:[#allocation2 + $0x2e0] sm:$0xff] }
0x19a2   :  { %v3098_v5 = vadd.f32 %v3096_v44, %v3082_v49  ;;  %v3165_v44 = vld [vmem:[#allocation2 + $0x298] sm:$0xff] }
0x19a3   :  { %3101 = vrot.lane.b32.xlu1 %v3097_v60, %s12148_s10  ;;  %10970 = vmatpush1.bf16.msra.mxu1 %v10969_v26  ;;  %v10972_v49 = vpack.c.bf16 %v3165_v44, %v3164_v10  ;;  %v3166_v60 = vld [vmem:[#allocation2 + $0x2a0] sm:$0xff]  ;;  %v3175_v26 = vld [vmem:[#allocation2 + $0x2e8] sm:$0xff]  ;;  %v3176_v44 = vld [vmem:[#allocation2 + $0x2f0] sm:$0xff] }
0x19a4   :  { %3103 = vrot.lane.b32.xlu0 %v3098_v5, %s12148_s10  ;;  %10971 = vmatprep.subr.bf16.mxu1 %v14572_v7  ;;  %v3167_v5 = vld [vmem:[#allocation2 + $0x2a8] sm:$0xff]  ;;  %v10987_v10 = vpack.c.bf16 %v3175_v26, %v3174_v0 }
0x19a5   :  { %v10975_v18 = vpack.c.bf16 %v3167_v5, %v3166_v60  ;;  %v3178_v5 = vld [vmem:[#allocation2 + $0x300] sm:$0xff] }
0x19a7   :  { %10973 = vmatpush1.bf16.msra.mxu1 %v10972_v49  ;;  %v3177_v49 = vld [vmem:[#allocation2 + $0x2f8] sm:$0xff] }
0x19a8   :  { %10974 = vmatprep.subr.bf16.mxu1 %v14572_v7  ;;  %v10990_v60 = vpack.c.bf16 %v3177_v49, %v3176_v44 }
0x19ab   :  { %10976 = vmatpush1.bf16.msra.mxu1 %v10975_v18  ;;  %v3179_v18 = vld [vmem:[#allocation2 + $0x308] sm:$0xff] }
0x19ac   :  { %10977 = vmatprep.subr.bf16.mxu1 %v14572_v7  ;;  %v10993_v23 = vpack.c.bf16 %v3179_v18, %v3178_v5 }
0x19af   :  { %10979 = vmatpush1.bf16.msra.mxu1 %v10978_v52 }
0x19b0   :  { %10980 = vmatprep.subr.bf16.mxu1 %v14572_v7 }
0x19b3   :  { %10982 = vmatpush1.bf16.msra.mxu1 %v10981_v48 }
0x19b4   :  { %10983 = vmatprep.subr.bf16.mxu1 %v14572_v7 }
0x19b7   :  { %10985 = vmatpush1.bf16.msra.mxu1 %v10984_v9 }
0x19b8   :  { %10986 = vmatprep.subr.bf16.mxu1 %v14572_v7 }
0x19bb   :  { %10988 = vmatpush1.bf16.msra.mxu1 %v10987_v10 }
0x19bc   :  { %10989 = vmatprep.subr.bf16.mxu1 %v14572_v7 }
0x19bf   :  { %10991 = vmatpush1.bf16.msra.mxu1 %v10990_v60 }
0x19c0   :  { %10992 = vmatprep.subr.bf16.mxu1 %v14572_v7 }
0x19c3   :  { %10994 = vmatpush1.bf16.msra.mxu1 %v10993_v23 }
0x1a0f   :  { %v3057_v52 = vpop.permute.xlu1 %3056 }
0x1a10   :  { %v3059_v24 = vmul.f32 %v3057_v52, %v13157_v14 }
0x1a12   :  { %v3064_v17 = vsub.f32 %v8974_v32, %v3059_v24 }
0x1a14   :  { %v3112_v48 = vrot.slane %v3064_v17, %v12211_v37  ;;  %v3118_v43 = vrot.slane %v3064_v17, %v12214_v39 }
0x1a15   :  { %v3102_v62 = vpop.permute.xlu1 %3101 }
0x1a16   :  { %v3113_v9 = vmul.f32 %v3112_v48, %v13165_v22  ;;  %v3119_v0 = vmul.f32 %v3118_v43, %v13167_v8  ;;  %v3104_v26 = vpop.permute.xlu0 %3103  ;;  %v3114_v10 = vmul.f32 %v3112_v48, %v13175_v11  ;;  %v3120_v49 = vmul.f32 %v3118_v43, %v13169_v6  ;;  %v3526_v43 = vld [vmem:[#allocation2 + $0x330] sm:$0xff] }
0x1a17   :  { %v3108_v44 = vmul.f32 %v3104_v26, %v13098_v38  ;;  %v3107_v14 = vmul.f32 %v3102_v62, %v13100_v15  ;;  %v3139_v38 = vld [vmem:[%s14567_s1 + $0x10] sm:$0x3]  ;;  %v3525_v15 = vld [vmem:[#allocation2 + $0x328] sm:$0xff] }
0x1a18   :  { %v3121_v60 = vadd.f32 %v3119_v0, %v3113_v9  ;;  %v3122_v5 = vadd.f32 %v3120_v49, %v3114_v10  ;;  %v3149_v48 = vrot.slane %v3139_v38, %v12214_v39  ;;  %v11022_v62 = vpack.c.bf16 %v3526_v43, %v3525_v15 }
0x1a19   :  { %v3143_v9 = vrot.slane %v3139_v38, %v12211_v37 }
0x1a1a   :  { %v3123_v18 = vadd.f32 %v3121_v60, %v3107_v14  ;;  %v3124_v23 = vadd.f32 %v3122_v5, %v3108_v44  ;;  %11023 = vmatprep.subr.bf16.mxu1 %v11022_v62  ;;  %v3150_v0 = vmul.f32 %v3149_v48, %v13167_v8  ;;  %v3151_v10 = vmul.f32 %v3149_v48, %v13169_v6 }
0x1a1b   :  { %v3145_v26 = vmul.f32 %v3143_v9, %v13175_v11 }
0x1a1c   :  { %v8975_v32 = vmul.f32 -1.442695, %v3123_v18  ;;  %v8976_v52 = vmul.f32 -1.442695, %v3124_v23 }
0x1a1d   :  { %v3153_v5 = vadd.f32 %v3151_v10, %v3145_v26  ;;  %v3528_v26 = vld [vmem:[#allocation2 + $0x340] sm:$0xff] }
0x1a1e   :  { %11954 = vpow2.f32 %v8975_v32 }
0x1a1f   :  { %11956 = vpow2.f32 %v8976_v52 }
0x1a28   :  { %v11955_v24 = vpop.eup %11954 }
0x1a29   :  { %v11957_v17 = vpop.eup %11956  ;;  %v3131_v46 = vadd.f32 1.0, %v11955_v24 }
0x1a2a   :  { %v3132_v7 = vadd.f32 1.0, %v11957_v17 }
0x1a2b   :  { %11958 = vrcp.f32 %v3131_v46 }
0x1a2c   :  { %11960 = vrcp.f32 %v3132_v7  ;;  %v3144_v7 = vmul.f32 %v3143_v9, %v13165_v22 }
0x1a2e   :  { %v3152_v60 = vadd.f32 %v3150_v0, %v3144_v7  ;;  %v3527_v0 = vld [vmem:[#allocation2 + $0x338] sm:$0xff] }
0x1a35   :  { %v11959_v46 = vpop.eup %11958 }
0x1a36   :  { %v11961_v44 = vpop.eup %11960  ;;  %v3137_v49 = vmul.f32 %v11959_v46, %v3123_v18  ;;  %v11026_v46 = vpack.c.bf16 %v3528_v26, %v3527_v0 }
0x1a37   :  { %v3138_v14 = vmul.f32 %v11961_v44, %v3124_v23 }
0x1a38   :  { %v3154_v32 = vadd.f32 %v3152_v60, %v3137_v49 }
0x1a39   :  { %v3155_v52 = vadd.f32 %v3153_v5, %v3138_v14 }
0x1a3a   :  { %3195 = vrot.lane.b32.xlu1 %v3154_v32, %s12148_s10  ;;  %v3187_v24 = vrot.slane %v3154_v32, 1  ;;  %v3181_v17 = vrot.slane %v3154_v32, 7  ;;  %v14598_v32 = vmov 0.0|0.0  }
0x1a3b   :  { %3197 = vrot.lane.b32.xlu0 %v3155_v52, %s12148_s10  ;;  %v3188_v38 = vrot.slane %v3155_v52, 1  ;;  %v3182_v15 = vrot.slane %v3155_v52, 7  ;;  %v8977_v52 = vld [vmem:[#allocation2 + $0x310] ss:$0 sm:$0xff] }
0x1a3d   :  { %v3189_v48 = vsel %vm223_vm3, %v3187_v24, %v3188_v38  ;;  %v3184_v43 = vsel %vm162_vm2, %v3182_v15, %v3181_v17  ;;  %v3190_v18 = vsel %vm223_vm3, %v3188_v38, %v3187_v24  ;;  %v3183_v23 = vsel %vm162_vm2, %v3181_v17, %v3182_v15 }
0x1a3e   :  { %v3191_v9 = vmul.f32 %v3189_v48, %v13072_v63  ;;  %v3185_v10 = vmul.f32 %v3184_v43, %v13086_v47  ;;  %v3192_v49 = vmul.f32 %v3190_v18, %v13070_v56  ;;  %v3186_v14 = vmul.f32 %v3183_v23, %v13088_v16 }
0x1a40   :  { %8978 = vmatprep.mubr.msk.f32.mxu1 %vm647_vm10, %v3191_v9 }
0x1aac   :  { %v3196_v7 = vpop.permute.xlu1 %3195 }
0x1aad   :  { %v3201_v44 = vsel %vm647_vm10, %v3185_v10, %v3196_v7  ;;  %v3198_v60 = vpop.permute.xlu0 %3197 }
0x1aae   :  { %3278 = vmatmul.mubr.f32.vlgmr.msra.gmra.mrb[20].mxu1 %v3201_v44  ;;  %v3202_v5 = vsel %vm647_vm10, %v3186_v14, %v3198_v60  ;;  %v14599_v44 = vmov 0.0   ;;  %v8981_v14 = vld [vmem:[#allocation2 + $0x318] ss:$0 sm:$0xff] }
0x1aaf   :  { %8979 = vmatprep.mubr.msk.f32.mxu1 %vm647_vm10, %v3192_v49  ;;  %11025 = vmatpush3.bf16.msra.mxu1 %v11022_v62 }
0x1ab0   :  { %11027 = vmatprep.subr.bf16.mxu1 %v11026_v46 }
0x1ab2   :  { %3283 = vmatmul.mubr.f32.gmra.mrb[22].mxu1 %v3202_v5 }
0x1ab3   :  { %11029 = vmatpush3.bf16.msra.mxu1 %v11026_v46  ;;  %10067 = vmatprep.mubr.msk.f32.mxu1 %vm434_vm7, %v13064_v25 }
0x1ab4   :  { %11030 = vmatprep.subr.bf16.mxu1 %v14598_v32 }
0x1ab6   :  { %10068 = vmatmul.mubr.msk.f32.vlgmr.msra.gmra.mrb[24].mxu1 %vm434_vm7, %v13058_v50 }
0x1b81   :  { %v3279_v24 = vpop.f32.mrb[20].mxu1 }
0x1b82   :  { %v3281_v17 = vpop.f32.mrb[21].mxu1  ;;  %v13234_v38 = vadd.f32 %v8977_v52, %v3279_v24 }
0x1b84   :  { %v3288_v43 = vmul.f32 %v13234_v38, %v13234_v38 }
0x1b85   :  { %v3284_v62 = vpop.f32.mrb[22].mxu1 }
0x1b86   :  { %v13236_v15 = vadd.f32 %v8977_v52, %v3284_v62  ;;  %v3286_v48 = vpop.f32.mrb[23].mxu1 }
0x1b88   :  { %v3289_v25 = vmul.f32 %v13236_v15, %v13236_v15 }
0x1b89   :  { %v13242_v18 = vpop.f32.mrb[24].mxu1 }
0x1b8a   :  { %v11795_v23 = vpack.i.bf16 %v3289_v25, %v3288_v43  ;;  %v13244_v9 = vpop.f32.mrb[25].mxu1 }
0x1b8c   :  { %11796 = vrot.lane.b32.xlu1 %v11795_v23, %s12148_s10 }
0x1b90   :  { %3456 = vrot.lane.b32.xlu1 %v8981_v14, %s12148_s10 }
0x1bfe   :  { %v11797_v50 = vpop.permute.xlu1 %11796 }
0x1bff   :  { %v11799_v0 = vunpack.i.h.bf16 %v11797_v50  ;;  %v11798_v26 = vunpack.i.l.bf16 %v11797_v50 }
0x1c01   :  { %v3299_v10 = vsel %vm647_vm10, %v13236_v15, %v11799_v0  ;;  %v3298_v7 = vsel %vm647_vm10, %v13234_v38, %v11798_v26 }
0x1c02   :  { %v10996_v46 = vpack.c.bf16 %v3299_v10, %v3298_v7  ;;  %v3457_v23 = vpop.permute.xlu1 %3456 }
0x1c04   :  { %10997 = vmatpush3.bf16.msra.mxu0 %v10996_v46 }
0x1c05   :  { %10998 = vmatprep.subr.bf16.mxu0 %v14598_v32 }
0x1c07   :  { %10022 = vmatmul.mubr.msk.f32.vlgmr.msra.gmra.mrb[28].mxu0 %vm429_vm6, %v13115_v27 }
0x1c08   :  { %11000 = vmatpush3.bf16.msra.mxu0 %v13117_v30  ;;  %10056 = vmatprep.mubr.msk.f32.mxu0 %vm12144_vm9, %v14599_v44 }
0x1c09   :  { %11001 = vmatprep.subr.bf16.mxu0 %v14598_v32 }
0x1c0c   :  { %11003 = vmatpush3.bf16.msra.mxu0 %v13123_v4 }
0x1c0d   :  { %11004 = vmatprep.subr.bf16.mxu0 %v14598_v32 }
0x1c10   :  { %11006 = vmatpush3.bf16.msra.mxu0 %v13129_v13 }
0x1c11   :  { %11007 = vmatprep.subr.bf16.mxu0 %v14598_v32 }
0x1c14   :  { %11009 = vmatpush3.bf16.msra.mxu0 %v13133_v42 }
0x1c15   :  { %11010 = vmatprep.subr.bf16.mxu0 %v14598_v32 }
0x1c18   :  { %11012 = vmatpush3.bf16.msra.mxu0 %v13137_v54 }
0x1c19   :  { %11013 = vmatprep.subr.bf16.mxu0 %v14598_v32 }
0x1c1c   :  { %11015 = vmatpush3.bf16.msra.mxu0 %v13141_v61 }
0x1c1d   :  { %11016 = vmatprep.subr.bf16.mxu0 %v14598_v32 }
0x1c20   :  { %11018 = vmatpush3.bf16.msra.mxu0 %v13145_v55 }
0x1c21   :  { %11019 = vmatprep.subr.bf16.mxu0 %v14598_v32 }
0x1c24   :  { %11021 = vmatpush3.bf16.msra.mxu0 %v13149_v45 }
0x1c25   :  { %11066 = vmatprep.subr.bf16.mxu0 %v14598_v32 }
0x1cda   :  { %v3366_v49 = vpop.f32.mrb[28].mxu0 }
0x1cdb   :  { %v10023_v60 = vpop.f32.mrb[29].mxu0  ;;  %10057 = vmatmul.mubr.f32.vlgmr.msra.gmra.mrb[30].mxu0 %v3366_v49 }
0x1cdc   :  { %10074 = vmatprep.mubr.msk.f32.mxu0 %vm12144_vm9, %v14599_v44 }
0x1dae   :  { %v3436_v5 = vpop.f32.mrb[30].mxu0 }
0x1daf   :  { %v13275_v52 = vmul.f32 0.015625, %v3436_v5  ;;  %v10058_v24 = vpop.f32.mrb[31].mxu0 }
0x1db0   :  { %v3615_v24 = vld [vmem:[#allocation2 + $0x350] sm:$0xff] }
0x1db1   :  { %v3441_v17 = vmul.f32 %v13275_v52, %v13275_v52 }
0x1db3   :  { %3443 = vrot.lane.b32.xlu0 %v3441_v17, %s12148_s10  ;;  %v3616_v17 = vld [vmem:[#allocation2 + $0x358] sm:$0xff] }
0x1e25   :  { %v3444_v62 = vpop.permute.xlu0 %3443 }
0x1e26   :  { %v3446_v48 = vsub.f32 %v13275_v52, %v3444_v62  ;;  %v3617_v62 = vld [vmem:[#allocation2 + $0x360] sm:$0xff] }
0x1e28   :  { %v3447_v43 = vmax.f32 %v3446_v48, 0.0  ;;  %v11031_v48 = vpack.c.bf16 %v3616_v17, %v3615_v24  ;;  %v3627_v17 = vld [vmem:[#allocation2 + $0x3b0] sm:$0xff] }
0x1e2a   :  { %v3448_v25 = vadd.f32 1e-05, %v3447_v43  ;;  %v3618_v43 = vld [vmem:[#allocation2 + $0x368] sm:$0xff]  ;;  %11032 = vmatpush1.bf16.msra.mxu1 %v11031_v48 }
0x1e2b   :  { %11033 = vmatprep.subr.bf16.mxu1 %v14598_v32 }
0x1e2c   :  { %11962 = vrsqrt.f32 %v3448_v25  ;;  %v11034_v25 = vpack.c.bf16 %v3618_v43, %v3617_v62  ;;  %v3628_v62 = vld [vmem:[#allocation2 + $0x3b8] sm:$0xff]  ;;  %v3629_v43 = vld [vmem:[#allocation2 + $0x3c0] sm:$0xff] }
0x1e2d   :  { %v11049_v48 = vpack.c.bf16 %v3628_v62, %v3627_v17  ;;  %v8982_v62 = vld [vmem:[#allocation2 + $0x320] ss:$0 sm:$0xff] }
0x1e2e   :  { %11035 = vmatpush1.bf16.msra.mxu1 %v11034_v25  ;;  %v3630_v25 = vld [vmem:[#allocation2 + $0x3c8] sm:$0xff] }
0x1e2f   :  { %11036 = vmatprep.subr.bf16.mxu1 %v14598_v32 }
0x1e36   :  { %v11963_v50 = vpop.eup %11962 }
0x1e37   :  { %v3459_v0 = vmul.f32 %v11963_v50, %v3457_v23  ;;  %v3619_v23 = vld [vmem:[#allocation2 + $0x370] sm:$0xff]  ;;  %v3620_v50 = vld [vmem:[#allocation2 + $0x378] sm:$0xff] }
0x1e39   :  { %v3474_v26 = vrot.slane %v3459_v0, %v12211_v37  ;;  %v3480_v10 = vrot.slane %v3459_v0, %v12214_v39  ;;  %3462 = vrot.lane.b32.xlu0 %v3459_v0, %s12148_s10  ;;  %v11037_v0 = vpack.c.bf16 %v3620_v50, %v3619_v23  ;;  %v11052_v23 = vpack.c.bf16 %v3630_v25, %v3629_v43  ;;  %v3631_v50 = vld [vmem:[#allocation2 + $0x3d0] sm:$0xff] }
0x1e3b   :  { %v3475_v7 = vmul.f32 %v3474_v26, %v13165_v22  ;;  %v3476_v46 = vmul.f32 %v3474_v26, %v13175_v11  ;;  %v3481_v49 = vmul.f32 %v3480_v10, %v13167_v8  ;;  %v3482_v60 = vmul.f32 %v3480_v10, %v13169_v6  ;;  %v3621_v26 = vld [vmem:[#allocation2 + $0x380] sm:$0xff]  ;;  %v3622_v10 = vld [vmem:[#allocation2 + $0x388] sm:$0xff]  ;;  %11038 = vmatpush1.bf16.msra.mxu1 %v11037_v0  ;;  %v3632_v0 = vld [vmem:[#allocation2 + $0x3d8] sm:$0xff] }
0x1e3c   :  { %11039 = vmatprep.subr.bf16.mxu1 %v14598_v32 }
0x1e3d   :  { %v3484_v14 = vadd.f32 %v3482_v60, %v3476_v46  ;;  %v3483_v5 = vadd.f32 %v3481_v49, %v3475_v7  ;;  %v11040_v7 = vpack.c.bf16 %v3622_v10, %v3621_v26  ;;  %v3623_v46 = vld [vmem:[#allocation2 + $0x390] sm:$0xff]  ;;  %v3624_v49 = vld [vmem:[#allocation2 + $0x398] sm:$0xff]  ;;  %v11055_v26 = vpack.c.bf16 %v3632_v0, %v3631_v50  ;;  %v3633_v10 = vld [vmem:[#allocation2 + $0x3e0] sm:$0xff] }
0x1e3e   :  { %v11043_v60 = vpack.c.bf16 %v3624_v49, %v3623_v46  ;;  %v3635_v49 = vld [vmem:[#allocation2 + $0x3f0] sm:$0xff] }
0x1e3f   :  { %3489 = vrot.lane.b32.xlu0 %v3484_v14, %s12148_s10  ;;  %3487 = vrot.lane.b32.xlu1 %v3483_v5, %s12148_s10  ;;  %v3625_v14 = vld [vmem:[#allocation2 + $0x3a0] sm:$0xff]  ;;  %v3626_v5 = vld [vmem:[#allocation2 + $0x3a8] sm:$0xff] }
0x1e40   :  { %11041 = vmatpush1.bf16.msra.mxu1 %v11040_v7  ;;  %v11046_v24 = vpack.c.bf16 %v3626_v5, %v3625_v14  ;;  %v3634_v7 = vld [vmem:[#allocation2 + $0x3e8] sm:$0xff]  ;;  %v3637_v5 = vld [vmem:[#allocation2 + $0x400] sm:$0xff] }
0x1e41   :  { %11042 = vmatprep.subr.bf16.mxu1 %v14598_v32  ;;  %v11058_v46 = vpack.c.bf16 %v3634_v7, %v3633_v10 }
0x1e44   :  { %11044 = vmatpush1.bf16.msra.mxu1 %v11043_v60  ;;  %v3636_v60 = vld [vmem:[#allocation2 + $0x3f8] sm:$0xff] }
0x1e45   :  { %11045 = vmatprep.subr.bf16.mxu1 %v14598_v32  ;;  %v11061_v14 = vpack.c.bf16 %v3636_v60, %v3635_v49 }
0x1e48   :  { %11047 = vmatpush1.bf16.msra.mxu1 %v11046_v24  ;;  %v3638_v24 = vld [vmem:[#allocation2 + $0x408] sm:$0xff] }
0x1e49   :  { %11048 = vmatprep.subr.bf16.mxu1 %v14598_v32  ;;  %v11064_v17 = vpack.c.bf16 %v3638_v24, %v3637_v5 }
0x1e4c   :  { %11050 = vmatpush1.bf16.msra.mxu1 %v11049_v48 }
0x1e4d   :  { %11051 = vmatprep.subr.bf16.mxu1 %v14598_v32 }
0x1e50   :  { %11053 = vmatpush1.bf16.msra.mxu1 %v11052_v23 }
0x1e51   :  { %11054 = vmatprep.subr.bf16.mxu1 %v14598_v32 }
0x1e54   :  { %11056 = vmatpush1.bf16.msra.mxu1 %v11055_v26 }
0x1e55   :  { %11057 = vmatprep.subr.bf16.mxu1 %v14598_v32 }
0x1e58   :  { %11059 = vmatpush1.bf16.msra.mxu1 %v11058_v46 }
0x1e59   :  { %11060 = vmatprep.subr.bf16.mxu1 %v14598_v32 }
0x1e5c   :  { %11062 = vmatpush1.bf16.msra.mxu1 %v11061_v14 }
0x1e5d   :  { %11063 = vmatprep.subr.bf16.mxu1 %v14598_v32 }
0x1e60   :  { %11065 = vmatpush1.bf16.msra.mxu1 %v11064_v17 }
0x1e61   :  { %11129 = vmatprep.subr.bf16.mxu1 %v14598_v32 }
0x1eab   :  { %v3463_v48 = vpop.permute.xlu0 %3462 }
0x1eac   :  { %v3465_v43 = vmul.f32 %v3463_v48, %v13275_v52 }
0x1eae   :  { %v3470_v25 = vsub.f32 %v8982_v62, %v3465_v43 }
0x1eb0   :  { %v3498_v23 = vrot.slane %v3470_v25, %v12211_v37  ;;  %v3504_v50 = vrot.slane %v3470_v25, %v12214_v39 }
0x1eb1   :  { %v3490_v0 = vpop.permute.xlu0 %3489  ;;  %v3488_v46 = vpop.permute.xlu1 %3487 }
0x1eb2   :  { %v3500_v26 = vmul.f32 %v3498_v23, %v13175_v11  ;;  %v3506_v10 = vmul.f32 %v3504_v50, %v13169_v6  ;;  %v3499_v7 = vmul.f32 %v3498_v23, %v13165_v22  ;;  %v3505_v49 = vmul.f32 %v3504_v50, %v13167_v8  ;;  %v8985_v23 = vld [vmem:[#allocation2 + $0x348] ss:$0 sm:$0xff] }
0x1eb3   :  { %v3494_v14 = vmul.f32 %v3490_v0, %v13236_v15  ;;  %v3493_v52 = vmul.f32 %v3488_v46, %v13234_v38  ;;  %v3610_v15 = vadd.f32 %v13242_v18, %v8985_v23  ;;  %v3605_v38 = vadd.f32 %v8985_v23, %v13244_v9 }
0x1eb4   :  { %v3508_v60 = vadd.f32 %v3506_v10, %v3500_v26  ;;  %v3507_v5 = vadd.f32 %v3505_v49, %v3499_v7 }
0x1eb6   :  { %v3510_v24 = vadd.f32 %v3508_v60, %v3494_v14  ;;  %v3509_v17 = vadd.f32 %v3507_v5, %v3493_v52 }
0x1eb8   :  { %v8984_v62 = vmul.f32 -1.442695, %v3510_v24  ;;  %v8983_v48 = vmul.f32 -1.442695, %v3509_v17 }
0x1eba   :  { %11964 = vpow2.f32 %v8984_v62 }
0x1ebb   :  { %11966 = vpow2.f32 %v8983_v48 }
0x1ec4   :  { %v11965_v43 = vpop.eup %11964 }
0x1ec5   :  { %v11967_v25 = vpop.eup %11966  ;;  %v3518_v33 = vadd.f32 1.0, %v11965_v43 }
0x1ec6   :  { %v3517_v31 = vadd.f32 1.0, %v11967_v25 }
0x1ec7   :  { %11968 = vrcp.f32 %v3518_v33 }
0x1ec8   :  { %11970 = vrcp.f32 %v3517_v31 }
0x1ed1   :  { %v11969_v50 = vpop.eup %11968 }
0x1ed2   :  { %v11971_v26 = vpop.eup %11970  ;;  %v3524_v0 = vmul.f32 %v11969_v50, %v3510_v24  ;;  %v8988_v50 = vld [vmem:[#allocation2 + $0x410] ss:$0 sm:$0xff] }
0x1ed3   :  { %v3523_v10 = vmul.f32 %v11971_v26, %v3509_v17 }
0x1ed4   :  { %v13313_v7 = vadd.f32 %v3610_v15, %v3524_v0 }
0x1ed5   :  { %v13315_v46 = vadd.f32 %v3605_v38, %v3523_v10 }
0x1ed6   :  { %3656 = vrot.lane.b32.xlu0 %v13313_v7, %s12148_s10  ;;  %v3647_v49 = vrot.slane %v13313_v7, 1  ;;  %v3641_v60 = vrot.slane %v13313_v7, 7 }
0x1ed7   :  { %3654 = vrot.lane.b32.xlu1 %v13315_v46, %s12148_s10  ;;  %v3646_v31 = vrot.slane %v13315_v46, 1  ;;  %v3640_v14 = vrot.slane %v13315_v46, 7 }
0x1ed9   :  { %v3648_v33 = vsel %vm223_vm3, %v3646_v31, %v3647_v49  ;;  %v3649_v18 = vsel %vm223_vm3, %v3647_v49, %v3646_v31  ;;  %v3643_v5 = vsel %vm162_vm2, %v3641_v60, %v3640_v14  ;;  %v3642_v17 = vsel %vm162_vm2, %v3640_v14, %v3641_v60 }
0x1eda   :  { %v3650_v9 = vmul.f32 %v3648_v33, %v13072_v63  ;;  %v3644_v52 = vmul.f32 %v3643_v5, %v13086_v47  ;;  %v3651_v48 = vmul.f32 %v3649_v18, %v13070_v56  ;;  %v3645_v25 = vmul.f32 %v3642_v17, %v13088_v16 }
0x1edc   :  { %8989 = vmatprep.mubr.msk.f32.mxu1 %vm647_vm10, %v3650_v9 }
0x1f48   :  { %v3657_v43 = vpop.permute.xlu0 %3656 }
0x1f49   :  { %v3655_v24 = vpop.permute.xlu1 %3654  ;;  %v3661_v23 = vsel %vm647_vm10, %v3645_v25, %v3657_v43 }
0x1f4a   :  { %v3660_v62 = vsel %vm647_vm10, %v3644_v52, %v3655_v24 }
0x1f4b   :  { %3737 = vmatmul.mubr.f32.vlgmr.msra.gmra.mrb[26].mxu1 %v3660_v62  ;;  %v8992_v62 = vld [vmem:[#allocation2 + $0x418] ss:$0 sm:$0xff] }
0x1f4c   :  { %8990 = vmatprep.mubr.msk.f32.mxu1 %vm647_vm10, %v3651_v48 }
0x1f4f   :  { %3742 = vmatmul.mubr.f32.gmra.mrb[28].mxu1 %v3661_v23 }
0x1f50   :  { %10116 = vmatprep.mubr.msk.f32.mxu1 %vm12144_vm9, %v14599_v44 }
0x201e   :  { %v3738_v26 = vpop.f32.mrb[26].mxu1 }
0x201f   :  { %v3740_v15 = vpop.f32.mrb[27].mxu1  ;;  %v13343_v0 = vadd.f32 %v8988_v50, %v3738_v26 }
0x2021   :  { %v3747_v31 = vmul.f32 %v13343_v0, %v13343_v0 }
0x2022   :  { %v3743_v38 = vpop.f32.mrb[28].mxu1 }
0x2023   :  { %v13345_v10 = vadd.f32 %v8988_v50, %v3743_v38  ;;  %v3745_v49 = vpop.f32.mrb[29].mxu1 }
0x2025   :  { %v3748_v33 = vmul.f32 %v13345_v10, %v13345_v10 }
0x2027   :  { %v11800_v18 = vpack.i.bf16 %v3748_v33, %v3747_v31 }
0x2029   :  { %11801 = vrot.lane.b32.xlu1 %v11800_v18, %s12148_s10 }
0x202d   :  { %3915 = vrot.lane.b32.xlu1 %v8992_v62, %s12148_s10  ;;  %v4002_v62 = vld [vmem:[#allocation2 + $0x430] sm:$0xff] }
0x209b   :  { %v11802_v9 = vpop.permute.xlu1 %11801 }
0x209c   :  { %v11804_v60 = vunpack.i.h.bf16 %v11802_v9  ;;  %v11803_v14 = vunpack.i.l.bf16 %v11802_v9 }
0x209e   :  { %v3758_v5 = vsel %vm647_vm10, %v13345_v10, %v11804_v60  ;;  %v3757_v52 = vsel %vm647_vm10, %v13343_v0, %v11803_v14 }
0x209f   :  { %v11067_v24 = vpack.c.bf16 %v3758_v5, %v3757_v52  ;;  %v3916_v49 = vpop.permute.xlu1 %3915 }
0x20a1   :  { %11068 = vmatpush3.bf16.msra.mxu0 %v11067_v24 }
0x20a2   :  { %11069 = vmatprep.subr.bf16.mxu0 %v14598_v32 }
0x20a4   :  { %10075 = vmatmul.mubr.msk.f32.vlgmr.msra.gmra.mrb[32].mxu0 %vm429_vm6, %v13115_v27 }
0x20a5   :  { %11071 = vmatpush3.bf16.msra.mxu0 %v13117_v30  ;;  %10109 = vmatprep.mubr.msk.f32.mxu0 %vm12144_vm9, %v14599_v44 }
0x20a6   :  { %11072 = vmatprep.subr.bf16.mxu0 %v14598_v32 }
0x20a9   :  { %11074 = vmatpush3.bf16.msra.mxu0 %v13123_v4 }
0x20aa   :  { %11075 = vmatprep.subr.bf16.mxu0 %v14598_v32 }
0x20ad   :  { %11077 = vmatpush3.bf16.msra.mxu0 %v13129_v13 }
0x20ae   :  { %11078 = vmatprep.subr.bf16.mxu0 %v14598_v32 }
0x20b1   :  { %11080 = vmatpush3.bf16.msra.mxu0 %v13133_v42 }
0x20b2   :  { %11081 = vmatprep.subr.bf16.mxu0 %v14598_v32 }
0x20b5   :  { %11083 = vmatpush3.bf16.msra.mxu0 %v13137_v54 }
0x20b6   :  { %11084 = vmatprep.subr.bf16.mxu0 %v14598_v32 }
0x20b9   :  { %11086 = vmatpush3.bf16.msra.mxu0 %v13141_v61 }
0x20ba   :  { %11087 = vmatprep.subr.bf16.mxu0 %v14598_v32 }
0x20bd   :  { %11089 = vmatpush3.bf16.msra.mxu0 %v13145_v55 }
0x20be   :  { %11090 = vmatprep.subr.bf16.mxu0 %v14598_v32 }
0x20c1   :  { %11092 = vmatpush3.bf16.msra.mxu0 %v13149_v45 }
0x20c2   :  { %11093 = vmatprep.subr.bf16.mxu0 %v14598_v32 }
0x2177   :  { %v3825_v27 = vpop.f32.mrb[32].mxu0 }
0x2178   :  { %v10076_v17 = vpop.f32.mrb[33].mxu0  ;;  %10110 = vmatmul.mubr.f32.vlgmr.msra.gmra.mrb[34].mxu0 %v3825_v27 }
0x2179   :  { %v4001_v17 = vld [vmem:[#allocation2 + $0x428] sm:$0xff] }
0x224b   :  { %v3895_v48 = vpop.f32.mrb[34].mxu0 }
0x224c   :  { %v13378_v43 = vmul.f32 0.015625, %v3895_v48  ;;  %v10111_v25 = vpop.f32.mrb[35].mxu0  ;;  %v4003_v48 = vld [vmem:[#allocation2 + $0x438] sm:$0xff] }
0x224d   :  { %v11094_v25 = vpack.c.bf16 %v4002_v62, %v4001_v17  ;;  %v4015_v62 = vld [vmem:[#allocation2 + $0x498] sm:$0xff] }
0x224e   :  { %v3900_v23 = vmul.f32 %v13378_v43, %v13378_v43 }
0x224f   :  { %11095 = vmatpush1.bf16.msra.mxu0 %v11094_v25 }
0x2250   :  { %3902 = vrot.lane.b32.xlu0 %v3900_v23, %s12148_s10  ;;  %v4004_v23 = vld [vmem:[#allocation2 + $0x440] sm:$0xff]  ;;  %11096 = vmatprep.subr.bf16.mxu0 %v14598_v32 }
0x22c2   :  { %v3903_v50 = vpop.permute.xlu0 %3902 }
0x22c3   :  { %v3905_v26 = vsub.f32 %v13378_v43, %v3903_v50  ;;  %v11097_v50 = vpack.c.bf16 %v4004_v23, %v4003_v48  ;;  %v4016_v48 = vld [vmem:[#allocation2 + $0x4a0] sm:$0xff]  ;;  %v4017_v23 = vld [vmem:[#allocation2 + $0x4a8] sm:$0xff] }
0x22c4   :  { %v11115_v25 = vpack.c.bf16 %v4016_v48, %v4015_v62 }
0x22c5   :  { %v3906_v15 = vmax.f32 %v3905_v26, 0.0  ;;  %v4005_v26 = vld [vmem:[#allocation2 + $0x448] sm:$0xff]  ;;  %11098 = vmatpush1.bf16.msra.mxu0 %v11097_v50  ;;  %v4018_v50 = vld [vmem:[#allocation2 + $0x4b0] sm:$0xff] }
0x22c6   :  { %11099 = vmatprep.subr.bf16.mxu0 %v14598_v32 }
0x22c7   :  { %v3907_v38 = vadd.f32 1e-05, %v3906_v15  ;;  %v4006_v15 = vld [vmem:[#allocation2 + $0x450] sm:$0xff] }
0x22c9   :  { %11972 = vrsqrt.f32 %v3907_v38  ;;  %v11100_v38 = vpack.c.bf16 %v4006_v15, %v4005_v26  ;;  %v11118_v26 = vpack.c.bf16 %v4018_v50, %v4017_v23  ;;  %v4019_v15 = vld [vmem:[#allocation2 + $0x4b8] sm:$0xff] }
0x22cb   :  { %11101 = vmatpush1.bf16.msra.mxu0 %v11100_v38  ;;  %v4020_v38 = vld [vmem:[#allocation2 + $0x4c0] sm:$0xff] }
0x22cc   :  { %11102 = vmatprep.subr.bf16.mxu0 %v14598_v32 }
0x22d3   :  { %v11973_v31 = vpop.eup %11972 }
0x22d4   :  { %v3918_v33 = vmul.f32 %v11973_v31, %v3916_v49  ;;  %v4007_v49 = vld [vmem:[#allocation2 + $0x458] sm:$0xff]  ;;  %v4008_v31 = vld [vmem:[#allocation2 + $0x460] sm:$0xff] }
0x22d6   :  { %v3933_v18 = vrot.slane %v3918_v33, %v12211_v37  ;;  %v3939_v9 = vrot.slane %v3918_v33, %v12214_v39  ;;  %3921 = vrot.lane.b32.xlu0 %v3918_v33, %s12148_s10  ;;  %v11103_v33 = vpack.c.bf16 %v4008_v31, %v4007_v49  ;;  %v11121_v49 = vpack.c.bf16 %v4020_v38, %v4019_v15  ;;  %v4021_v31 = vld [vmem:[#allocation2 + $0x4c8] sm:$0xff] }
0x22d8   :  { %v3934_v60 = vmul.f32 %v3933_v18, %v13165_v22  ;;  %v3935_v14 = vmul.f32 %v3933_v18, %v13175_v11  ;;  %v3940_v5 = vmul.f32 %v3939_v9, %v13167_v8  ;;  %v3941_v52 = vmul.f32 %v3939_v9, %v13169_v6  ;;  %v4009_v18 = vld [vmem:[#allocation2 + $0x468] sm:$0xff]  ;;  %v4010_v9 = vld [vmem:[#allocation2 + $0x470] sm:$0xff]  ;;  %11104 = vmatpush1.bf16.msra.mxu0 %v11103_v33 }
0x22d9   :  { %11105 = vmatprep.subr.bf16.mxu0 %v14598_v32  ;;  %v4022_v33 = vld [vmem:[#allocation2 + $0x4d0] sm:$0xff] }
0x22da   :  { %v3943_v24 = vadd.f32 %v3941_v52, %v3935_v14  ;;  %v3942_v27 = vadd.f32 %v3940_v5, %v3934_v60  ;;  %v11106_v60 = vpack.c.bf16 %v4010_v9, %v4009_v18  ;;  %v4011_v14 = vld [vmem:[#allocation2 + $0x478] sm:$0xff]  ;;  %v4012_v5 = vld [vmem:[#allocation2 + $0x480] sm:$0xff]  ;;  %v11124_v18 = vpack.c.bf16 %v4022_v33, %v4021_v31 }
0x22db   :  { %v11109_v52 = vpack.c.bf16 %v4012_v5, %v4011_v14  ;;  %v4023_v9 = vld [vmem:[#allocation2 + $0x4d8] sm:$0xff]  ;;  %v8993_v5 = vld [vmem:[#allocation2 + $0x420] ss:$0 sm:$0xff] }
0x22dc   :  { %3948 = vrot.lane.b32.xlu0 %v3943_v24, %s12148_s10  ;;  %3946 = vrot.lane.b32.xlu1 %v3942_v27, %s12148_s10  ;;  %v4013_v24 = vld [vmem:[#allocation2 + $0x488] sm:$0xff]  ;;  %v4014_v27 = vld [vmem:[#allocation2 + $0x490] sm:$0xff] }
0x22dd   :  { %11107 = vmatpush1.bf16.msra.mxu0 %v11106_v60  ;;  %v11112_v17 = vpack.c.bf16 %v4014_v27, %v4013_v24  ;;  %v4024_v60 = vld [vmem:[#allocation2 + $0x4e0] sm:$0xff] }
0x22de   :  { %11108 = vmatprep.subr.bf16.mxu0 %v14598_v32  ;;  %v11127_v14 = vpack.c.bf16 %v4024_v60, %v4023_v9 }
0x22e1   :  { %11110 = vmatpush1.bf16.msra.mxu0 %v11109_v52 }
0x22e2   :  { %11111 = vmatprep.subr.bf16.mxu0 %v14598_v32 }
0x22e5   :  { %11113 = vmatpush1.bf16.msra.mxu0 %v11112_v17 }
0x22e6   :  { %11114 = vmatprep.subr.bf16.mxu0 %v14598_v32 }
0x22e9   :  { %11116 = vmatpush1.bf16.msra.mxu0 %v11115_v25 }
0x22ea   :  { %11117 = vmatprep.subr.bf16.mxu0 %v14598_v32 }
0x22ed   :  { %11119 = vmatpush1.bf16.msra.mxu0 %v11118_v26 }
0x22ee   :  { %11120 = vmatprep.subr.bf16.mxu0 %v14598_v32 }
0x22f1   :  { %11122 = vmatpush1.bf16.msra.mxu0 %v11121_v49 }
0x22f2   :  { %11123 = vmatprep.subr.bf16.mxu0 %v14598_v32 }
0x22f5   :  { %11125 = vmatpush1.bf16.msra.mxu0 %v11124_v18 }
0x22f6   :  { %11126 = vmatprep.subr.bf16.mxu0 %v14598_v32 }
0x22f9   :  { %11128 = vmatpush1.bf16.msra.mxu0 %v11127_v14 }
0x22fa   :  { %11192 = vmatprep.subr.bf16.mxu0 %v14598_v32 }
0x2348   :  { %v3922_v52 = vpop.permute.xlu0 %3921 }
0x2349   :  { %v3924_v24 = vmul.f32 %v3922_v52, %v13378_v43 }
0x234b   :  { %v3929_v27 = vsub.f32 %v8993_v5, %v3924_v24 }
0x234d   :  { %v3957_v17 = vrot.slane %v3929_v27, %v12211_v37  ;;  %v3963_v62 = vrot.slane %v3929_v27, %v12214_v39  ;;  %v3984_v27 = vld [vmem:[%s14567_s1 + $0x18] sm:$0x3] }
0x234e   :  { %v3949_v48 = vpop.permute.xlu0 %3948  ;;  %v3947_v26 = vpop.permute.xlu1 %3946 }
0x234f   :  { %v3959_v25 = vmul.f32 %v3957_v17, %v13175_v11  ;;  %v3965_v23 = vmul.f32 %v3963_v62, %v13169_v6  ;;  %v3958_v50 = vmul.f32 %v3957_v17, %v13165_v22  ;;  %v3964_v15 = vmul.f32 %v3963_v62, %v13167_v8 }
0x2350   :  { %v3953_v49 = vmul.f32 %v3949_v48, %v13345_v10  ;;  %v3952_v43 = vmul.f32 %v3947_v26, %v13343_v0  ;;  %v3994_v10 = vrot.slane %v3984_v27, %v12214_v39  ;;  %v3988_v0 = vrot.slane %v3984_v27, %v12211_v37 }
0x2351   :  { %v3967_v38 = vadd.f32 %v3965_v23, %v3959_v25  ;;  %v3966_v31 = vadd.f32 %v3964_v15, %v3958_v50 }
0x2352   :  { %v3990_v17 = vmul.f32 %v3988_v0, %v13175_v11  ;;  %v3996_v62 = vmul.f32 %v3994_v10, %v13169_v6  ;;  %v3995_v48 = vmul.f32 %v3994_v10, %v13167_v8  ;;  %v3989_v23 = vmul.f32 %v3988_v0, %v13165_v22 }
0x2353   :  { %v3969_v33 = vadd.f32 %v3967_v38, %v3953_v49  ;;  %v3968_v18 = vadd.f32 %v3966_v31, %v3952_v43 }
0x2354   :  { %v3998_v15 = vadd.f32 %v3996_v62, %v3990_v17  ;;  %v3997_v49 = vadd.f32 %v3995_v48, %v3989_v23 }
0x2355   :  { %v8995_v9 = vmul.f32 -1.442695, %v3969_v33  ;;  %v8994_v60 = vmul.f32 -1.442695, %v3968_v18 }
0x2357   :  { %11974 = vpow2.f32 %v8995_v9 }
0x2358   :  { %11976 = vpow2.f32 %v8994_v60 }
0x2361   :  { %v11975_v14 = vpop.eup %11974 }
0x2362   :  { %v11977_v5 = vpop.eup %11976  ;;  %v3977_v52 = vadd.f32 1.0, %v11975_v14 }
0x2363   :  { %v3976_v24 = vadd.f32 1.0, %v11977_v5 }
0x2364   :  { %11978 = vrcp.f32 %v3977_v52 }
0x2365   :  { %11980 = vrcp.f32 %v3976_v24 }
0x236e   :  { %v11979_v25 = vpop.eup %11978 }
0x236f   :  { %v11981_v50 = vpop.eup %11980  ;;  %v3983_v26 = vmul.f32 %v11979_v25, %v3969_v33 }
0x2370   :  { %v3982_v38 = vmul.f32 %v11981_v50, %v3968_v18  ;;  %v8996_v50 = vld [vmem:[#allocation2 + $0x4e8] ss:$0 sm:$0xff] }
0x2371   :  { %v4000_v31 = vadd.f32 %v3998_v15, %v3983_v26 }
0x2372   :  { %v3999_v43 = vadd.f32 %v3997_v49, %v3982_v38 }
0x2373   :  { %4042 = vrot.lane.b32.xlu0 %v4000_v31, %s12148_s10  ;;  %v4033_v9 = vrot.slane %v4000_v31, 1  ;;  %v4027_v60 = vrot.slane %v4000_v31, 7 }
0x2374   :  { %4040 = vrot.lane.b32.xlu1 %v3999_v43, %s12148_s10  ;;  %v4032_v14 = vrot.slane %v3999_v43, 1  ;;  %v4026_v5 = vrot.slane %v3999_v43, 7 }
0x2376   :  { %v4034_v52 = vsel %vm223_vm3, %v4032_v14, %v4033_v9  ;;  %v4029_v24 = vsel %vm162_vm2, %v4027_v60, %v4026_v5  ;;  %v4035_v33 = vsel %vm223_vm3, %v4033_v9, %v4032_v14  ;;  %v4028_v18 = vsel %vm162_vm2, %v4026_v5, %v4027_v60 }
0x2377   :  { %v4036_v27 = vmul.f32 %v4034_v52, %v13072_v63  ;;  %v4030_v10 = vmul.f32 %v4029_v24, %v13086_v47  ;;  %v4037_v62 = vmul.f32 %v4035_v33, %v13070_v56  ;;  %v4031_v25 = vmul.f32 %v4028_v18, %v13088_v16 }
0x2379   :  { %8997 = vmatprep.mubr.msk.f32.mxu0 %vm647_vm10, %v4036_v27 }
0x23e5   :  { %v4043_v48 = vpop.permute.xlu0 %4042 }
0x23e6   :  { %v4041_v0 = vpop.permute.xlu1 %4040  ;;  %v4047_v23 = vsel %vm647_vm10, %v4031_v25, %v4043_v48 }
0x23e7   :  { %v4046_v17 = vsel %vm647_vm10, %v4030_v10, %v4041_v0  ;;  %v13457_v10 = vld [vmem:[#allocation2 + $0xd90] sm:$0x3] }
0x23e8   :  { %4123 = vmatmul.mubr.f32.vlgmr.msra.gmra.mrb[36].mxu0 %v4046_v17 }
0x23e9   :  { %8998 = vmatprep.mubr.msk.f32.mxu0 %vm647_vm10, %v4037_v62  ;;  %v9000_v62 = vld [vmem:[#allocation2 + $0x4f0] ss:$0 sm:$0xff] }
0x23ec   :  { %4128 = vmatmul.mubr.f32.gmra.mrb[38].mxu0 %v4047_v23 }
0x23ed   :  { %10158 = vmatprep.mubr.msk.f32.mxu0 %vm12144_vm9, %v14599_v44 }
0x24bb   :  { %v4124_v26 = vpop.f32.mrb[36].mxu0 }
0x24bc   :  { %v4126_v15 = vpop.f32.mrb[37].mxu0  ;;  %v13443_v38 = vadd.f32 %v8996_v50, %v4124_v26 }
0x24be   :  { %v4133_v9 = vmul.f32 %v13443_v38, %v13443_v38 }
0x24bf   :  { %v4129_v49 = vpop.f32.mrb[38].mxu0 }
0x24c0   :  { %v13445_v31 = vadd.f32 %v8996_v50, %v4129_v49  ;;  %v4131_v43 = vpop.f32.mrb[39].mxu0 }
0x24c2   :  { %v4134_v60 = vmul.f32 %v13445_v31, %v13445_v31 }
0x24c4   :  { %v11805_v14 = vpack.i.bf16 %v4134_v60, %v4133_v9 }
0x24c6   :  { %11806 = vrot.lane.b32.xlu1 %v11805_v14, %s12148_s10 }
0x24ca   :  { %4301 = vrot.lane.b32.xlu1 %v9000_v62, %s12148_s10  ;;  %v4372_v62 = vld [vmem:[#allocation2 + $0x500] sm:$0xff] }
0x2538   :  { %v11807_v5 = vpop.permute.xlu1 %11806 }
0x2539   :  { %v11809_v52 = vunpack.i.h.bf16 %v11807_v5  ;;  %v11808_v24 = vunpack.i.l.bf16 %v11807_v5 }
0x253b   :  { %v4144_v33 = vsel %vm647_vm10, %v13445_v31, %v11809_v52  ;;  %v4143_v18 = vsel %vm647_vm10, %v13443_v38, %v11808_v24 }
0x253c   :  { %v11130_v27 = vpack.c.bf16 %v4144_v33, %v4143_v18  ;;  %v4302_v9 = vpop.permute.xlu1 %4301 }
0x253e   :  { %11131 = vmatpush3.bf16.msra.mxu1 %v11130_v27 }
0x253f   :  { %11132 = vmatprep.subr.bf16.mxu1 %v14598_v32 }
0x2541   :  { %10117 = vmatmul.mubr.msk.f32.vlgmr.msra.gmra.mrb[30].mxu1 %vm429_vm6, %v13457_v10 }
0x2542   :  { %11134 = vmatpush3.bf16.msra.mxu1 %v13117_v30  ;;  %10151 = vmatprep.mubr.msk.f32.mxu1 %vm12144_vm9, %v14599_v44 }
0x2543   :  { %11135 = vmatprep.subr.bf16.mxu1 %v14598_v32 }
0x2546   :  { %11137 = vmatpush3.bf16.msra.mxu1 %v13123_v4 }
0x2547   :  { %11138 = vmatprep.subr.bf16.mxu1 %v14598_v32 }
0x254a   :  { %11140 = vmatpush3.bf16.msra.mxu1 %v13129_v13 }
0x254b   :  { %11141 = vmatprep.subr.bf16.mxu1 %v14598_v32 }
0x254e   :  { %11143 = vmatpush3.bf16.msra.mxu1 %v13133_v42 }
0x254f   :  { %11144 = vmatprep.subr.bf16.mxu1 %v14598_v32 }
0x2552   :  { %11146 = vmatpush3.bf16.msra.mxu1 %v13137_v54 }
0x2553   :  { %11147 = vmatprep.subr.bf16.mxu1 %v14598_v32 }
0x2556   :  { %11149 = vmatpush3.bf16.msra.mxu1 %v13141_v61 }
0x2557   :  { %11150 = vmatprep.subr.bf16.mxu1 %v14598_v32 }
0x255a   :  { %11152 = vmatpush3.bf16.msra.mxu1 %v13145_v55 }
0x255b   :  { %11153 = vmatprep.subr.bf16.mxu1 %v14598_v32 }
0x255e   :  { %11155 = vmatpush3.bf16.msra.mxu1 %v13149_v45 }
0x255f   :  { %11156 = vmatprep.subr.bf16.mxu1 %v14598_v32 }
0x2614   :  { %v4211_v0 = vpop.f32.mrb[30].mxu1 }
0x2615   :  { %v10118_v17 = vpop.f32.mrb[31].mxu1  ;;  %10152 = vmatmul.mubr.f32.vlgmr.msra.gmra.mrb[32].mxu1 %v4211_v0 }
0x26e8   :  { %v4281_v48 = vpop.f32.mrb[32].mxu1 }
0x26e9   :  { %v13480_v25 = vmul.f32 0.015625, %v4281_v48  ;;  %v10153_v23 = vpop.f32.mrb[33].mxu1  ;;  %v4373_v48 = vld [vmem:[#allocation2 + $0x508] sm:$0xff] }
0x26ea   :  { %v4374_v23 = vld [vmem:[#allocation2 + $0x510] sm:$0xff] }
0x26eb   :  { %v4286_v50 = vmul.f32 %v13480_v25, %v13480_v25 }
0x26ed   :  { %4288 = vrot.lane.b32.xlu0 %v4286_v50, %s12148_s10  ;;  %v11157_v50 = vpack.c.bf16 %v4373_v48, %v4372_v62  ;;  %v4385_v62 = vld [vmem:[#allocation2 + $0x568] sm:$0xff] }
0x26ef   :  { %11158 = vmatpush1.bf16.msra.mxu1 %v11157_v50  ;;  %v4387_v50 = vld [vmem:[#allocation2 + $0x578] sm:$0xff] }
0x26f0   :  { %11159 = vmatprep.subr.bf16.mxu1 %v14598_v32 }
0x275f   :  { %v4289_v26 = vpop.permute.xlu0 %4288 }
0x2760   :  { %v4291_v15 = vsub.f32 %v13480_v25, %v4289_v26  ;;  %v4375_v26 = vld [vmem:[#allocation2 + $0x518] sm:$0xff] }
0x2762   :  { %v4292_v49 = vmax.f32 %v4291_v15, 0.0  ;;  %v11160_v15 = vpack.c.bf16 %v4375_v26, %v4374_v23  ;;  %v4386_v23 = vld [vmem:[#allocation2 + $0x570] sm:$0xff] }
0x2763   :  { %v11178_v26 = vpack.c.bf16 %v4387_v50, %v4386_v23 }
0x2764   :  { %v4293_v43 = vadd.f32 1e-05, %v4292_v49  ;;  %v4376_v49 = vld [vmem:[#allocation2 + $0x520] sm:$0xff]  ;;  %11161 = vmatpush1.bf16.msra.mxu1 %v11160_v15 }
0x2765   :  { %11162 = vmatprep.subr.bf16.mxu1 %v14598_v32  ;;  %v4388_v15 = vld [vmem:[#allocation2 + $0x580] sm:$0xff] }
0x2766   :  { %11982 = vrsqrt.f32 %v4293_v43  ;;  %v4377_v43 = vld [vmem:[#allocation2 + $0x528] sm:$0xff] }
0x2770   :  { %v11983_v60 = vpop.eup %11982 }
0x2771   :  { %v4304_v14 = vmul.f32 %v11983_v60, %v4302_v9  ;;  %v11163_v9 = vpack.c.bf16 %v4377_v43, %v4376_v49  ;;  %v4378_v60 = vld [vmem:[#allocation2 + $0x530] sm:$0xff]  ;;  %v4389_v49 = vld [vmem:[#allocation2 + $0x588] sm:$0xff] }
0x2772   :  { %v11181_v43 = vpack.c.bf16 %v4389_v49, %v4388_v15 }
0x2773   :  { %v4319_v5 = vrot.slane %v4304_v14, %v12211_v37  ;;  %v4325_v52 = vrot.slane %v4304_v14, %v12214_v39  ;;  %4307 = vrot.lane.b32.xlu0 %v4304_v14, %s12148_s10  ;;  %v4379_v14 = vld [vmem:[#allocation2 + $0x538] sm:$0xff]  ;;  %11164 = vmatpush1.bf16.msra.mxu1 %v11163_v9  ;;  %v4390_v9 = vld [vmem:[#allocation2 + $0x590] sm:$0xff] }
0x2774   :  { %11165 = vmatprep.subr.bf16.mxu1 %v14598_v32 }
0x2775   :  { %v4320_v24 = vmul.f32 %v4319_v5, %v13165_v22  ;;  %v4321_v33 = vmul.f32 %v4319_v5, %v13175_v11  ;;  %v4326_v18 = vmul.f32 %v4325_v52, %v13167_v8  ;;  %v4327_v27 = vmul.f32 %v4325_v52, %v13169_v6  ;;  %v4380_v52 = vld [vmem:[#allocation2 + $0x540] sm:$0xff] }
0x2776   :  { %v11166_v5 = vpack.c.bf16 %v4379_v14, %v4378_v60  ;;  %v4391_v60 = vld [vmem:[#allocation2 + $0x598] sm:$0xff] }
0x2777   :  { %v4329_v0 = vadd.f32 %v4327_v27, %v4321_v33  ;;  %v4328_v17 = vadd.f32 %v4326_v18, %v4320_v24  ;;  %v4381_v24 = vld [vmem:[#allocation2 + $0x548] sm:$0xff]  ;;  %v4382_v18 = vld [vmem:[#allocation2 + $0x550] sm:$0xff]  ;;  %v4383_v27 = vld [vmem:[#allocation2 + $0x558] sm:$0xff]  ;;  %v11184_v14 = vpack.c.bf16 %v4391_v60, %v4390_v9 }
0x2778   :  { %11167 = vmatpush1.bf16.msra.mxu1 %v11166_v5  ;;  %v11169_v33 = vpack.c.bf16 %v4381_v24, %v4380_v52  ;;  %v4392_v5 = vld [vmem:[#allocation2 + $0x5a0] sm:$0xff]  ;;  %v4393_v52 = vld [vmem:[#allocation2 + $0x5a8] sm:$0xff] }
0x2779   :  { %4334 = vrot.lane.b32.xlu0 %v4329_v0, %s12148_s10  ;;  %4332 = vrot.lane.b32.xlu1 %v4328_v17, %s12148_s10  ;;  %v11172_v0 = vpack.c.bf16 %v4383_v27, %v4382_v18  ;;  %v4384_v17 = vld [vmem:[#allocation2 + $0x560] sm:$0xff]  ;;  %v11187_v24 = vpack.c.bf16 %v4393_v52, %v4392_v5  ;;  %v4395_v18 = vld [vmem:[#allocation2 + $0x5b8] sm:$0xff] }
0x277a   :  { %11168 = vmatprep.subr.bf16.mxu1 %v14598_v32  ;;  %v11175_v48 = vpack.c.bf16 %v4385_v62, %v4384_v17 }
0x277c   :  { %11170 = vmatpush1.bf16.msra.mxu1 %v11169_v33  ;;  %v4394_v33 = vld [vmem:[#allocation2 + $0x5b0] sm:$0xff] }
0x277d   :  { %11171 = vmatprep.subr.bf16.mxu1 %v14598_v32  ;;  %v11190_v27 = vpack.c.bf16 %v4395_v18, %v4394_v33 }
0x2780   :  { %11173 = vmatpush1.bf16.msra.mxu1 %v11172_v0  ;;  %v9001_v0 = vld [vmem:[#allocation2 + $0x4f8] ss:$0 sm:$0xff] }
0x2781   :  { %11174 = vmatprep.subr.bf16.mxu1 %v14598_v32 }
0x2784   :  { %11176 = vmatpush1.bf16.msra.mxu1 %v11175_v48 }
0x2785   :  { %11177 = vmatprep.subr.bf16.mxu1 %v14598_v32 }
0x2788   :  { %11179 = vmatpush1.bf16.msra.mxu1 %v11178_v26 }
0x2789   :  { %11180 = vmatprep.subr.bf16.mxu1 %v14598_v32 }
0x278c   :  { %11182 = vmatpush1.bf16.msra.mxu1 %v11181_v43 }
0x278d   :  { %11183 = vmatprep.subr.bf16.mxu1 %v14598_v32 }
0x2790   :  { %11185 = vmatpush1.bf16.msra.mxu1 %v11184_v14 }
0x2791   :  { %11186 = vmatprep.subr.bf16.mxu1 %v14598_v32 }
0x2794   :  { %11188 = vmatpush1.bf16.msra.mxu1 %v11187_v24 }
0x2795   :  { %11189 = vmatprep.subr.bf16.mxu1 %v14598_v32 }
0x2798   :  { %11191 = vmatpush1.bf16.msra.mxu1 %v11190_v27 }
0x2799   :  { %11255 = vmatprep.subr.bf16.mxu1 %v14598_v32 }
0x27e5   :  { %v4308_v17 = vpop.permute.xlu0 %4307 }
0x27e6   :  { %v4310_v62 = vmul.f32 %v4308_v17, %v13480_v25 }
0x27e8   :  { %v4315_v48 = vsub.f32 %v9001_v0, %v4310_v62 }
0x27ea   :  { %v4343_v23 = vrot.slane %v4315_v48, %v12211_v37  ;;  %v4349_v50 = vrot.slane %v4315_v48, %v12214_v39 }
0x27eb   :  { %v4335_v26 = vpop.permute.xlu0 %4334  ;;  %v4333_v9 = vpop.permute.xlu1 %4332 }
0x27ec   :  { %v4345_v15 = vmul.f32 %v4343_v23, %v13175_v11  ;;  %v4351_v49 = vmul.f32 %v4349_v50, %v13169_v6  ;;  %v4344_v43 = vmul.f32 %v4343_v23, %v13165_v22  ;;  %v4350_v60 = vmul.f32 %v4349_v50, %v13167_v8 }
0x27ed   :  { %v4339_v5 = vmul.f32 %v4335_v26, %v13445_v31  ;;  %v4338_v25 = vmul.f32 %v4333_v9, %v13443_v38 }
0x27ee   :  { %v4353_v14 = vadd.f32 %v4351_v49, %v4345_v15  ;;  %v4352_v52 = vadd.f32 %v4350_v60, %v4344_v43 }
0x27f0   :  { %v4355_v24 = vadd.f32 %v4353_v14, %v4339_v5  ;;  %v4354_v33 = vadd.f32 %v4352_v52, %v4338_v25 }
0x27f2   :  { %v9003_v18 = vmul.f32 -1.442695, %v4355_v24  ;;  %v9002_v27 = vmul.f32 -1.442695, %v4354_v33 }
0x27f4   :  { %11984 = vpow2.f32 %v9003_v18 }
0x27f5   :  { %11986 = vpow2.f32 %v9002_v27 }
0x27fe   :  { %v11985_v0 = vpop.eup %11984 }
0x27ff   :  { %v11987_v17 = vpop.eup %11986  ;;  %v4363_v62 = vadd.f32 1.0, %v11985_v0 }
0x2800   :  { %v4362_v48 = vadd.f32 1.0, %v11987_v17 }
0x2801   :  { %11988 = vrcp.f32 %v4363_v62  ;;  %v9004_v62 = vld [vmem:[#allocation2 + $0x5c0] ss:$0 sm:$0xff] }
0x2802   :  { %11990 = vrcp.f32 %v4362_v48 }
0x280b   :  { %v11989_v23 = vpop.eup %11988 }
0x280c   :  { %v11991_v50 = vpop.eup %11990  ;;  %v4369_v15 = vmul.f32 %v11989_v23, %v4355_v24 }
0x280d   :  { %v4368_v49 = vmul.f32 %v11991_v50, %v4354_v33 }
0x280e   :  { %v13517_v31 = vadd.f32 %v4369_v15, %v13313_v7 }
0x280f   :  { %v13520_v38 = vadd.f32 %v4368_v49, %v13315_v46 }
0x2810   :  { %4413 = vrot.lane.b32.xlu0 %v13517_v31, %s12148_s10  ;;  %v4404_v26 = vrot.slane %v13517_v31, 1  ;;  %v4398_v14 = vrot.slane %v13517_v31, 7 }
0x2811   :  { %4411 = vrot.lane.b32.xlu1 %v13520_v38, %s12148_s10  ;;  %v4403_v43 = vrot.slane %v13520_v38, 1  ;;  %v4397_v46 = vrot.slane %v13520_v38, 7 }
0x2813   :  { %v4405_v9 = vsel %vm223_vm3, %v4403_v43, %v4404_v26  ;;  %v4406_v7 = vsel %vm223_vm3, %v4404_v26, %v4403_v43  ;;  %v4400_v5 = vsel %vm162_vm2, %v4398_v14, %v4397_v46  ;;  %v4399_v24 = vsel %vm162_vm2, %v4397_v46, %v4398_v14 }
0x2814   :  { %v13533_v60 = vmul.f32 %v4405_v9, %v13072_v63  ;;  %v13542_v52 = vmul.f32 %v4400_v5, %v13086_v47  ;;  %v13552_v18 = vmul.f32 %v4406_v7, %v13070_v56  ;;  %v13559_v0 = vmul.f32 %v4399_v24, %v13088_v16 }
0x2816   :  { %9005 = vmatprep.mubr.msk.f32.mxu1 %vm647_vm10, %v13533_v60 }
0x2882   :  { %v13554_v27 = vpop.permute.xlu0 %4413 }
0x2883   :  { %v13544_v25 = vpop.permute.xlu1 %4411  ;;  %v4418_v17 = vsel %vm647_vm10, %v13559_v0, %v13554_v27 }
0x2884   :  { %v4417_v33 = vsel %vm647_vm10, %v13542_v52, %v13544_v25 }
0x2885   :  { %4494 = vmatmul.mubr.f32.vlgmr.msra.gmra.mrb[34].mxu1 %v4417_v33 }
0x2886   :  { %9006 = vmatprep.mubr.msk.f32.mxu1 %vm647_vm10, %v13552_v18 }
0x2889   :  { %4499 = vmatmul.mubr.f32.gmra.mrb[36].mxu1 %v4418_v17 }
0x288a   :  { %10200 = vmatprep.mubr.msk.f32.mxu1 %vm12144_vm9, %v14599_v44 }
0x2958   :  { %v4495_v48 = vpop.f32.mrb[34].mxu1 }
0x2959   :  { %v4497_v23 = vpop.f32.mrb[35].mxu1  ;;  %v13566_v50 = vadd.f32 %v9004_v62, %v4495_v48 }
0x295a   :  { %v9008_v23 = vld [vmem:[#allocation2 + $0x5c8] ss:$0 sm:$0xff] }
0x295b   :  { %v4504_v43 = vmul.f32 %v13566_v50, %v13566_v50 }
0x295c   :  { %v4500_v15 = vpop.f32.mrb[36].mxu1 }
0x295d   :  { %v13568_v49 = vadd.f32 %v9004_v62, %v4500_v15  ;;  %v4502_v26 = vpop.f32.mrb[37].mxu1 }
0x295f   :  { %v4505_v9 = vmul.f32 %v13568_v49, %v13568_v49 }
0x2961   :  { %v11810_v7 = vpack.i.bf16 %v4505_v9, %v4504_v43 }
0x2963   :  { %11811 = vrot.lane.b32.xlu1 %v11810_v7, %s12148_s10 }
0x2967   :  { %4672 = vrot.lane.b32.xlu1 %v9008_v23, %s12148_s10 }
0x29d5   :  { %v11812_v46 = vpop.permute.xlu1 %11811 }
0x29d6   :  { %v11814_v14 = vunpack.i.h.bf16 %v11812_v46  ;;  %v11813_v5 = vunpack.i.l.bf16 %v11812_v46 }
0x29d8   :  { %v4515_v24 = vsel %vm647_vm10, %v13568_v49, %v11814_v14  ;;  %v4514_v33 = vsel %vm647_vm10, %v13566_v50, %v11813_v5 }
0x29d9   :  { %v11193_v17 = vpack.c.bf16 %v4515_v24, %v4514_v33  ;;  %v4673_v24 = vpop.permute.xlu1 %4672 }
0x29db   :  { %11194 = vmatpush3.bf16.msra.mxu0 %v11193_v17 }
0x29dc   :  { %11195 = vmatprep.subr.bf16.mxu0 %v14598_v32 }
0x29de   :  { %10159 = vmatmul.mubr.msk.f32.vlgmr.msra.gmra.mrb[40].mxu0 %vm429_vm6, %v13457_v10 }
0x29df   :  { %11197 = vmatpush3.bf16.msra.mxu0 %v13117_v30  ;;  %10193 = vmatprep.mubr.msk.f32.mxu0 %vm12144_vm9, %v14599_v44 }
0x29e0   :  { %11198 = vmatprep.subr.bf16.mxu0 %v14598_v32 }
0x29e3   :  { %11200 = vmatpush3.bf16.msra.mxu0 %v13123_v4 }
0x29e4   :  { %11201 = vmatprep.subr.bf16.mxu0 %v14598_v32 }
0x29e7   :  { %11203 = vmatpush3.bf16.msra.mxu0 %v13129_v13 }
0x29e8   :  { %11204 = vmatprep.subr.bf16.mxu0 %v14598_v32 }
0x29eb   :  { %11206 = vmatpush3.bf16.msra.mxu0 %v13133_v42 }
0x29ec   :  { %11207 = vmatprep.subr.bf16.mxu0 %v14598_v32 }
0x29ef   :  { %11209 = vmatpush3.bf16.msra.mxu0 %v13137_v54 }
0x29f0   :  { %11210 = vmatprep.subr.bf16.mxu0 %v14598_v32 }
0x29f3   :  { %11212 = vmatpush3.bf16.msra.mxu0 %v13141_v61 }
0x29f4   :  { %11213 = vmatprep.subr.bf16.mxu0 %v14598_v32 }
0x29f7   :  { %11215 = vmatpush3.bf16.msra.mxu0 %v13145_v55 }
0x29f8   :  { %11216 = vmatprep.subr.bf16.mxu0 %v14598_v32 }
0x29fb   :  { %11218 = vmatpush3.bf16.msra.mxu0 %v13149_v45 }
0x29fc   :  { %11219 = vmatprep.subr.bf16.mxu0 %v14598_v32 }
0x2ab1   :  { %v4582_v62 = vpop.f32.mrb[40].mxu0 }
0x2ab2   :  { %v10160_v48 = vpop.f32.mrb[41].mxu0  ;;  %10194 = vmatmul.mubr.f32.vlgmr.msra.gmra.mrb[42].mxu0 %v4582_v62 }
0x2b85   :  { %v4652_v15 = vpop.f32.mrb[42].mxu0 }
0x2b86   :  { %v13601_v26 = vmul.f32 0.015625, %v4652_v15  ;;  %v10195_v43 = vpop.f32.mrb[43].mxu0 }
0x2b88   :  { %v4657_v9 = vmul.f32 %v13601_v26, %v13601_v26 }
0x2b8a   :  { %4659 = vrot.lane.b32.xlu0 %v4657_v9, %s12148_s10 }
0x2bfc   :  { %v4660_v7 = vpop.permute.xlu0 %4659 }
0x2bfd   :  { %v4662_v46 = vsub.f32 %v13601_v26, %v4660_v7 }
0x2bff   :  { %v4663_v14 = vmax.f32 %v4662_v46, 0.0 }
0x2c01   :  { %v4664_v5 = vadd.f32 1e-05, %v4663_v14  ;;  %v4758_v14 = vld [vmem:[#allocation2 + $0x5d8] sm:$0xff] }
0x2c03   :  { %11992 = vrsqrt.f32 %v4664_v5  ;;  %v4759_v5 = vld [vmem:[#allocation2 + $0x5e0] sm:$0xff] }
0x2c0d   :  { %v11993_v33 = vpop.eup %11992 }
0x2c0e   :  { %v4675_v17 = vmul.f32 %v11993_v33, %v4673_v24  ;;  %v4760_v24 = vld [vmem:[#allocation2 + $0x5e8] sm:$0xff]  ;;  %v11220_v33 = vpack.c.bf16 %v4759_v5, %v4758_v14  ;;  %v4771_v5 = vld [vmem:[#allocation2 + $0x640] sm:$0xff] }
0x2c10   :  { %v4690_v62 = vrot.slane %v4675_v17, %v12211_v37  ;;  %v4696_v48 = vrot.slane %v4675_v17, %v12214_v39  ;;  %4678 = vrot.lane.b32.xlu0 %v4675_v17, %s12148_s10  ;;  %11221 = vmatpush1.bf16.msra.mxu0 %v11220_v33  ;;  %v11223_v17 = vpack.c.bf16 %v4761_v1, %v4760_v24  ;;  %v4768_v1 = vld [vmem:[#allocation2 + $0x628] sm:$0xff]  ;;  %v4773_v33 = vld [vmem:[#allocation2 + $0x650] sm:$0xff] }
0x2c11   :  { %11222 = vmatprep.subr.bf16.mxu0 %v14598_v32 }
0x2c12   :  { %v4691_v23 = vmul.f32 %v4690_v62, %v13165_v22  ;;  %v4692_v15 = vmul.f32 %v4690_v62, %v13175_v11  ;;  %v4697_v43 = vmul.f32 %v4696_v48, %v13167_v8  ;;  %v4698_v9 = vmul.f32 %v4696_v48, %v13169_v6  ;;  %v4762_v62 = vld [vmem:[#allocation2 + $0x5f8] sm:$0xff]  ;;  %v4764_v48 = vld [vmem:[#allocation2 + $0x608] sm:$0xff] }
0x2c13   :  { %v11226_v41 = vpack.c.bf16 %v4763_v35, %v4762_v62  ;;  %v4770_v35 = vld [vmem:[#allocation2 + $0x638] sm:$0xff] }
0x2c14   :  { %v4700_v7 = vadd.f32 %v4698_v9, %v4692_v15  ;;  %v4699_v46 = vadd.f32 %v4697_v43, %v4691_v23  ;;  %11224 = vmatpush1.bf16.msra.mxu0 %v11223_v17  ;;  %v4765_v23 = vld [vmem:[#allocation2 + $0x610] sm:$0xff]  ;;  %v4766_v43 = vld [vmem:[#allocation2 + $0x618] sm:$0xff]  ;;  %v4767_v9 = vld [vmem:[#allocation2 + $0x620] sm:$0xff]  ;;  %v11238_v24 = vpack.c.bf16 %v4771_v5, %v4770_v35 }
0x2c15   :  { %11225 = vmatprep.subr.bf16.mxu0 %v14598_v32  ;;  %v11229_v15 = vpack.c.bf16 %v4765_v23, %v4764_v48  ;;  %v4774_v62 = vld [vmem:[#allocation2 + $0x658] sm:$0xff]  ;;  %v4775_v48 = vld [vmem:[#allocation2 + $0x660] sm:$0xff]  ;;  %v4781_v35 = vld [vmem:[#allocation2 + $0x690] sm:$0xff] }
0x2c16   :  { %4705 = vrot.lane.b32.xlu0 %v4700_v7, %s12148_s10  ;;  %4703 = vrot.lane.b32.xlu1 %v4699_v46, %s12148_s10  ;;  %v11232_v7 = vpack.c.bf16 %v4767_v9, %v4766_v43  ;;  %v4769_v46 = vld [vmem:[#allocation2 + $0x630] sm:$0xff]  ;;  %v11244_v23 = vpack.c.bf16 %v4775_v48, %v4774_v62 }
0x2c17   :  { %v11235_v14 = vpack.c.bf16 %v4769_v46, %v4768_v1  ;;  %v4777_v43 = vld [vmem:[#allocation2 + $0x670] sm:$0xff]  ;;  %v4779_v1 = vld [vmem:[#allocation2 + $0x680] sm:$0xff] }
0x2c18   :  { %11227 = vmatpush1.bf16.msra.mxu0 %v11226_v41  ;;  %v4772_v41 = vld [vmem:[#allocation2 + $0x648] sm:$0xff] }
0x2c19   :  { %11228 = vmatprep.subr.bf16.mxu0 %v14598_v32  ;;  %v11241_v17 = vpack.c.bf16 %v4773_v33, %v4772_v41 }
0x2c1c   :  { %11230 = vmatpush1.bf16.msra.mxu0 %v11229_v15  ;;  %v4776_v15 = vld [vmem:[#allocation2 + $0x668] sm:$0xff] }
0x2c1d   :  { %11231 = vmatprep.subr.bf16.mxu0 %v14598_v32  ;;  %v11247_v9 = vpack.c.bf16 %v4777_v43, %v4776_v15 }
0x2c20   :  { %11233 = vmatpush1.bf16.msra.mxu0 %v11232_v7  ;;  %v4778_v7 = vld [vmem:[#allocation2 + $0x678] sm:$0xff] }
0x2c21   :  { %11234 = vmatprep.subr.bf16.mxu0 %v14598_v32  ;;  %v11250_v46 = vpack.c.bf16 %v4779_v1, %v4778_v7 }
0x2c24   :  { %11236 = vmatpush1.bf16.msra.mxu0 %v11235_v14  ;;  %v4780_v14 = vld [vmem:[#allocation2 + $0x688] sm:$0xff] }
0x2c25   :  { %11237 = vmatprep.subr.bf16.mxu0 %v14598_v32  ;;  %v11253_v5 = vpack.c.bf16 %v4781_v35, %v4780_v14 }
0x2c28   :  { %11239 = vmatpush1.bf16.msra.mxu0 %v11238_v24  ;;  %v9009_v24 = vld [vmem:[#allocation2 + $0x5d0] ss:$0 sm:$0xff] }
0x2c29   :  { %11240 = vmatprep.subr.bf16.mxu0 %v14598_v32 }
0x2c2c   :  { %11242 = vmatpush1.bf16.msra.mxu0 %v11241_v17 }
0x2c2d   :  { %11243 = vmatprep.subr.bf16.mxu0 %v14598_v32 }
0x2c30   :  { %11245 = vmatpush1.bf16.msra.mxu0 %v11244_v23 }
0x2c31   :  { %11246 = vmatprep.subr.bf16.mxu0 %v14598_v32 }
0x2c34   :  { %11248 = vmatpush1.bf16.msra.mxu0 %v11247_v9 }
0x2c35   :  { %11249 = vmatprep.subr.bf16.mxu0 %v14598_v32 }
0x2c38   :  { %11251 = vmatpush1.bf16.msra.mxu0 %v11250_v46 }
0x2c39   :  { %11252 = vmatprep.subr.bf16.mxu0 %v14598_v32 }
0x2c3c   :  { %11254 = vmatpush1.bf16.msra.mxu0 %v11253_v5 }
0x2c3d   :  { %11318 = vmatprep.subr.bf16.mxu0 %v14598_v32 }
0x2c82   :  { %v4679_v41 = vpop.permute.xlu0 %4678 }
0x2c83   :  { %v4681_v33 = vmul.f32 %v4679_v41, %v13601_v26 }
0x2c85   :  { %v4686_v17 = vsub.f32 %v9009_v24, %v4681_v33 }
0x2c87   :  { %v4714_v62 = vrot.slane %v4686_v17, %v12211_v37  ;;  %v4720_v48 = vrot.slane %v4686_v17, %v12214_v39 }
0x2c88   :  { %v4706_v23 = vpop.permute.xlu0 %4705  ;;  %v4704_v7 = vpop.permute.xlu1 %4703 }
0x2c89   :  { %v4716_v15 = vmul.f32 %v4714_v62, %v13175_v11  ;;  %v4722_v43 = vmul.f32 %v4720_v48, %v13169_v6  ;;  %v4715_v9 = vmul.f32 %v4714_v62, %v13165_v22  ;;  %v4721_v1 = vmul.f32 %v4720_v48, %v13167_v8  ;;  %v4741_v62 = vld [vmem:[%s14567_s1 + $0x20] sm:$0x3] }
0x2c8a   :  { %v4710_v14 = vmul.f32 %v4706_v23, %v13568_v49  ;;  %v4709_v26 = vmul.f32 %v4704_v7, %v13566_v50  ;;  %v4751_v49 = vrot.slane %v4741_v62, %v12214_v39  ;;  %v4745_v50 = vrot.slane %v4741_v62, %v12211_v37 }
0x2c8b   :  { %v4724_v46 = vadd.f32 %v4722_v43, %v4716_v15  ;;  %v4723_v35 = vadd.f32 %v4721_v1, %v4715_v9 }
0x2c8c   :  { %v4747_v48 = vmul.f32 %v4745_v50, %v13175_v11  ;;  %v4753_v23 = vmul.f32 %v4751_v49, %v13169_v6  ;;  %v4752_v15 = vmul.f32 %v4751_v49, %v13167_v8  ;;  %v4746_v9 = vmul.f32 %v4745_v50, %v13165_v22 }
0x2c8d   :  { %v4726_v5 = vadd.f32 %v4724_v46, %v4710_v14  ;;  %v4725_v24 = vadd.f32 %v4723_v35, %v4709_v26 }
0x2c8e   :  { %v4754_v1 = vadd.f32 %v4752_v15, %v4746_v9 }
0x2c8f   :  { %v9011_v41 = vmul.f32 -1.442695, %v4726_v5  ;;  %v9010_v33 = vmul.f32 -1.442695, %v4725_v24 }
0x2c91   :  { %11994 = vpow2.f32 %v9011_v41 }
0x2c92   :  { %11996 = vpow2.f32 %v9010_v33 }
0x2c9b   :  { %v11995_v17 = vpop.eup %11994 }
0x2c9c   :  { %v11997_v36 = vpop.eup %11996  ;;  %v4734_v40 = vadd.f32 1.0, %v11995_v17 }
0x2c9d   :  { %v4733_v19 = vadd.f32 1.0, %v11997_v36 }
0x2c9e   :  { %11998 = vrcp.f32 %v4734_v40 }
0x2c9f   :  { %12000 = vrcp.f32 %v4733_v19  ;;  %v4755_v19 = vadd.f32 %v4753_v23, %v4747_v48 }
0x2ca8   :  { %v11999_v43 = vpop.eup %11998 }
0x2ca9   :  { %v12001_v36 = vpop.eup %12000  ;;  %v4740_v40 = vmul.f32 %v11999_v43, %v4726_v5 }
0x2caa   :  { %v4739_v7 = vmul.f32 %v12001_v36, %v4725_v24 }
0x2cab   :  { %v4757_v46 = vadd.f32 %v4755_v19, %v4740_v40  ;;  %v9012_v40 = vld [vmem:[#allocation2 + $0x698] ss:$0 sm:$0xff] }
0x2cac   :  { %v4756_v14 = vadd.f32 %v4754_v1, %v4739_v7 }
0x2cad   :  { %4799 = vrot.lane.b32.xlu0 %v4757_v46, %s12148_s10  ;;  %v4790_v35 = vrot.slane %v4757_v46, 1  ;;  %v4784_v26 = vrot.slane %v4757_v46, 7 }
0x2cae   :  { %4797 = vrot.lane.b32.xlu1 %v4756_v14, %s12148_s10  ;;  %v4789_v41 = vrot.slane %v4756_v14, 1  ;;  %v4783_v33 = vrot.slane %v4756_v14, 7 }
0x2cb0   :  { %v4791_v17 = vsel %vm223_vm3, %v4789_v41, %v4790_v35  ;;  %v4786_v62 = vsel %vm162_vm2, %v4784_v26, %v4783_v33  ;;  %v4792_v5 = vsel %vm223_vm3, %v4790_v35, %v4789_v41  ;;  %v4785_v24 = vsel %vm162_vm2, %v4783_v33, %v4784_v26 }
0x2cb1   :  { %v4793_v49 = vmul.f32 %v4791_v17, %v13072_v63  ;;  %v4787_v50 = vmul.f32 %v4786_v62, %v13086_v47  ;;  %v4794_v15 = vmul.f32 %v4792_v5, %v13070_v56  ;;  %v4788_v9 = vmul.f32 %v4785_v24, %v13088_v16 }
0x2cb3   :  { %9013 = vmatprep.mubr.msk.f32.mxu0 %vm647_vm10, %v4793_v49 }
0x2d1f   :  { %v4800_v43 = vpop.permute.xlu0 %4799 }
0x2d20   :  { %v4798_v48 = vpop.permute.xlu1 %4797  ;;  %v4804_v36 = vsel %vm647_vm10, %v4788_v9, %v4800_v43 }
0x2d21   :  { %v4803_v23 = vsel %vm647_vm10, %v4787_v50, %v4798_v48 }
0x2d22   :  { %4880 = vmatmul.mubr.f32.vlgmr.msra.gmra.mrb[44].mxu0 %v4803_v23  ;;  %v9016_v23 = vld [vmem:[#allocation2 + $0x6a0] ss:$0 sm:$0xff] }
0x2d23   :  { %9014 = vmatprep.mubr.msk.f32.mxu0 %vm647_vm10, %v4794_v15 }
0x2d26   :  { %4885 = vmatmul.mubr.f32.gmra.mrb[46].mxu0 %v4804_v36 }
0x2d27   :  { %10242 = vmatprep.mubr.msk.f32.mxu0 %vm12144_vm9, %v14599_v44 }
0x2df5   :  { %v4881_v19 = vpop.f32.mrb[44].mxu0 }
0x2df6   :  { %v4883_v7 = vpop.f32.mrb[45].mxu0  ;;  %v13666_v1 = vadd.f32 %v9012_v40, %v4881_v19 }
0x2df8   :  { %v4890_v26 = vmul.f32 %v13666_v1, %v13666_v1 }
0x2df9   :  { %v4886_v46 = vpop.f32.mrb[46].mxu0 }
0x2dfa   :  { %v13668_v14 = vadd.f32 %v9012_v40, %v4886_v46  ;;  %v4888_v35 = vpop.f32.mrb[47].mxu0 }
0x2dfc   :  { %v4891_v41 = vmul.f32 %v13668_v14, %v13668_v14 }
0x2dfe   :  { %v11815_v33 = vpack.i.bf16 %v4891_v41, %v4890_v26 }
0x2e00   :  { %11816 = vrot.lane.b32.xlu1 %v11815_v33, %s12148_s10 }
0x2e04   :  { %5058 = vrot.lane.b32.xlu1 %v9016_v23, %s12148_s10  ;;  %v5130_v23 = vld [vmem:[#allocation2 + $0x6b8] sm:$0xff] }
0x2e72   :  { %v11817_v17 = vpop.permute.xlu1 %11816 }
0x2e73   :  { %v11819_v62 = vunpack.i.h.bf16 %v11817_v17  ;;  %v11818_v5 = vunpack.i.l.bf16 %v11817_v17 }
0x2e75   :  { %v4901_v24 = vsel %vm647_vm10, %v13668_v14, %v11819_v62  ;;  %v4900_v49 = vsel %vm647_vm10, %v13666_v1, %v11818_v5 }
0x2e76   :  { %v11256_v50 = vpack.c.bf16 %v4901_v24, %v4900_v49  ;;  %v5059_v35 = vpop.permute.xlu1 %5058 }
0x2e78   :  { %11257 = vmatpush3.bf16.msra.mxu1 %v11256_v50 }
0x2e79   :  { %11258 = vmatprep.subr.bf16.mxu1 %v14598_v32 }
0x2e7b   :  { %10201 = vmatmul.mubr.msk.f32.vlgmr.msra.gmra.mrb[38].mxu1 %vm429_vm6, %v13457_v10 }
0x2e7c   :  { %11260 = vmatpush3.bf16.msra.mxu1 %v13117_v30  ;;  %10235 = vmatprep.mubr.msk.f32.mxu1 %vm12144_vm9, %v14599_v44 }
0x2e7d   :  { %11261 = vmatprep.subr.bf16.mxu1 %v14598_v32 }
0x2e80   :  { %11263 = vmatpush3.bf16.msra.mxu1 %v13123_v4 }
0x2e81   :  { %11264 = vmatprep.subr.bf16.mxu1 %v14598_v32 }
0x2e84   :  { %11266 = vmatpush3.bf16.msra.mxu1 %v13129_v13 }
0x2e85   :  { %11267 = vmatprep.subr.bf16.mxu1 %v14598_v32 }
0x2e88   :  { %11269 = vmatpush3.bf16.msra.mxu1 %v13133_v42 }
0x2e89   :  { %11270 = vmatprep.subr.bf16.mxu1 %v14598_v32 }
0x2e8c   :  { %11272 = vmatpush3.bf16.msra.mxu1 %v13137_v54 }
0x2e8d   :  { %11273 = vmatprep.subr.bf16.mxu1 %v14598_v32 }
0x2e90   :  { %11275 = vmatpush3.bf16.msra.mxu1 %v13141_v61 }
0x2e91   :  { %11276 = vmatprep.subr.bf16.mxu1 %v14598_v32 }
0x2e94   :  { %11278 = vmatpush3.bf16.msra.mxu1 %v13145_v55 }
0x2e95   :  { %11279 = vmatprep.subr.bf16.mxu1 %v14598_v32 }
0x2e98   :  { %11281 = vmatpush3.bf16.msra.mxu1 %v13149_v45 }
0x2e99   :  { %11282 = vmatprep.subr.bf16.mxu1 %v14598_v32 }
0x2f4e   :  { %v4968_v10 = vpop.f32.mrb[38].mxu1 }
0x2f4f   :  { %v10202_v48 = vpop.f32.mrb[39].mxu1  ;;  %10236 = vmatmul.mubr.f32.vlgmr.msra.gmra.mrb[40].mxu1 %v4968_v10 }
0x2f50   :  { %v5129_v48 = vld [vmem:[#allocation2 + $0x6b0] sm:$0xff] }
0x3022   :  { %v5038_v15 = vpop.f32.mrb[40].mxu1 }
0x3023   :  { %v13701_v43 = vmul.f32 0.015625, %v5038_v15  ;;  %v10237_v9 = vpop.f32.mrb[41].mxu1  ;;  %v5131_v15 = vld [vmem:[#allocation2 + $0x6c0] sm:$0xff] }
0x3024   :  { %v11283_v9 = vpack.c.bf16 %v5130_v23, %v5129_v48  ;;  %v5143_v23 = vld [vmem:[#allocation2 + $0x720] sm:$0xff] }
0x3025   :  { %v5043_v36 = vmul.f32 %v13701_v43, %v13701_v43 }
0x3026   :  { %11284 = vmatpush1.bf16.msra.mxu1 %v11283_v9 }
0x3027   :  { %5045 = vrot.lane.b32.xlu0 %v5043_v36, %s12148_s10  ;;  %v5132_v36 = vld [vmem:[#allocation2 + $0x6c8] sm:$0xff]  ;;  %11285 = vmatprep.subr.bf16.mxu1 %v14598_v32 }
0x3099   :  { %v5046_v40 = vpop.permute.xlu0 %5045 }
0x309a   :  { %v5048_v19 = vsub.f32 %v13701_v43, %v5046_v40  ;;  %v11286_v40 = vpack.c.bf16 %v5132_v36, %v5131_v15  ;;  %v5144_v15 = vld [vmem:[#allocation2 + $0x728] sm:$0xff]  ;;  %v5145_v36 = vld [vmem:[#allocation2 + $0x730] sm:$0xff] }
0x309b   :  { %v11304_v9 = vpack.c.bf16 %v5144_v15, %v5143_v23 }
0x309c   :  { %v5049_v7 = vmax.f32 %v5048_v19, 0.0  ;;  %v5133_v19 = vld [vmem:[#allocation2 + $0x6d0] sm:$0xff]  ;;  %11287 = vmatpush1.bf16.msra.mxu1 %v11286_v40  ;;  %v5146_v40 = vld [vmem:[#allocation2 + $0x738] sm:$0xff] }
0x309d   :  { %11288 = vmatprep.subr.bf16.mxu1 %v14598_v32 }
0x309e   :  { %v5050_v46 = vadd.f32 1e-05, %v5049_v7  ;;  %v5134_v7 = vld [vmem:[#allocation2 + $0x6d8] sm:$0xff] }
0x30a0   :  { %12002 = vrsqrt.f32 %v5050_v46  ;;  %v11289_v46 = vpack.c.bf16 %v5134_v7, %v5133_v19  ;;  %v11307_v19 = vpack.c.bf16 %v5146_v40, %v5145_v36  ;;  %v5147_v7 = vld [vmem:[#allocation2 + $0x740] sm:$0xff] }
0x30a2   :  { %11290 = vmatpush1.bf16.msra.mxu1 %v11289_v46  ;;  %v5148_v46 = vld [vmem:[#allocation2 + $0x748] sm:$0xff] }
0x30a3   :  { %11291 = vmatprep.subr.bf16.mxu1 %v14598_v32 }
0x30aa   :  { %v12003_v26 = vpop.eup %12002 }
0x30ab   :  { %v5061_v41 = vmul.f32 %v12003_v26, %v5059_v35  ;;  %v5135_v35 = vld [vmem:[#allocation2 + $0x6e0] sm:$0xff]  ;;  %v5136_v26 = vld [vmem:[#allocation2 + $0x6e8] sm:$0xff] }
0x30ad   :  { %v5076_v33 = vrot.slane %v5061_v41, %v12211_v37  ;;  %v5082_v17 = vrot.slane %v5061_v41, %v12214_v39  ;;  %5064 = vrot.lane.b32.xlu0 %v5061_v41, %s12148_s10  ;;  %v11292_v41 = vpack.c.bf16 %v5136_v26, %v5135_v35  ;;  %v11310_v35 = vpack.c.bf16 %v5148_v46, %v5147_v7  ;;  %v5149_v26 = vld [vmem:[#allocation2 + $0x750] sm:$0xff] }
0x30af   :  { %v5077_v62 = vmul.f32 %v5076_v33, %v13165_v22  ;;  %v5078_v5 = vmul.f32 %v5076_v33, %v13175_v11  ;;  %v5083_v24 = vmul.f32 %v5082_v17, %v13167_v8  ;;  %v5084_v49 = vmul.f32 %v5082_v17, %v13169_v6  ;;  %v5137_v33 = vld [vmem:[#allocation2 + $0x6f0] sm:$0xff]  ;;  %v5138_v17 = vld [vmem:[#allocation2 + $0x6f8] sm:$0xff]  ;;  %11293 = vmatpush1.bf16.msra.mxu1 %v11292_v41 }
0x30b0   :  { %11294 = vmatprep.subr.bf16.mxu1 %v14598_v32  ;;  %v5150_v41 = vld [vmem:[#allocation2 + $0x758] sm:$0xff] }
0x30b1   :  { %v5086_v50 = vadd.f32 %v5084_v49, %v5078_v5  ;;  %v5085_v10 = vadd.f32 %v5083_v24, %v5077_v62  ;;  %v11295_v62 = vpack.c.bf16 %v5138_v17, %v5137_v33  ;;  %v5139_v5 = vld [vmem:[#allocation2 + $0x700] sm:$0xff]  ;;  %v5140_v24 = vld [vmem:[#allocation2 + $0x708] sm:$0xff]  ;;  %v11313_v33 = vpack.c.bf16 %v5150_v41, %v5149_v26 }
0x30b2   :  { %v11298_v49 = vpack.c.bf16 %v5140_v24, %v5139_v5  ;;  %v5151_v17 = vld [vmem:[#allocation2 + $0x760] sm:$0xff]  ;;  %v9017_v24 = vld [vmem:[#allocation2 + $0x6a8] ss:$0 sm:$0xff] }
0x30b3   :  { %5091 = vrot.lane.b32.xlu0 %v5086_v50, %s12148_s10  ;;  %5089 = vrot.lane.b32.xlu1 %v5085_v10, %s12148_s10  ;;  %v5141_v50 = vld [vmem:[#allocation2 + $0x710] sm:$0xff]  ;;  %v5142_v10 = vld [vmem:[#allocation2 + $0x718] sm:$0xff] }
0x30b4   :  { %11296 = vmatpush1.bf16.msra.mxu1 %v11295_v62  ;;  %v11301_v48 = vpack.c.bf16 %v5142_v10, %v5141_v50  ;;  %v5152_v62 = vld [vmem:[#allocation2 + $0x768] sm:$0xff] }
0x30b5   :  { %11297 = vmatprep.subr.bf16.mxu1 %v14598_v32  ;;  %v11316_v5 = vpack.c.bf16 %v5152_v62, %v5151_v17 }
0x30b8   :  { %11299 = vmatpush1.bf16.msra.mxu1 %v11298_v49 }
0x30b9   :  { %11300 = vmatprep.subr.bf16.mxu1 %v14598_v32 }
0x30bc   :  { %11302 = vmatpush1.bf16.msra.mxu1 %v11301_v48 }
0x30bd   :  { %11303 = vmatprep.subr.bf16.mxu1 %v14598_v32 }
0x30c0   :  { %11305 = vmatpush1.bf16.msra.mxu1 %v11304_v9 }
0x30c1   :  { %11306 = vmatprep.subr.bf16.mxu1 %v14598_v32 }
0x30c4   :  { %11308 = vmatpush1.bf16.msra.mxu1 %v11307_v19 }
0x30c5   :  { %11309 = vmatprep.subr.bf16.mxu1 %v14598_v32 }
0x30c8   :  { %11311 = vmatpush1.bf16.msra.mxu1 %v11310_v35 }
0x30c9   :  { %11312 = vmatprep.subr.bf16.mxu1 %v14598_v32 }
0x30cc   :  { %11314 = vmatpush1.bf16.msra.mxu1 %v11313_v33 }
0x30cd   :  { %11315 = vmatprep.subr.bf16.mxu1 %v14598_v32 }
0x30d0   :  { %11317 = vmatpush1.bf16.msra.mxu1 %v11316_v5 }
0x30d1   :  { %11381 = vmatprep.subr.bf16.mxu1 %v14598_v32 }
0x311f   :  { %v5065_v49 = vpop.permute.xlu0 %5064 }
0x3120   :  { %v5067_v50 = vmul.f32 %v5065_v49, %v13701_v43 }
0x3122   :  { %v5072_v10 = vsub.f32 %v9017_v24, %v5067_v50 }
0x3124   :  { %v5100_v48 = vrot.slane %v5072_v10, %v12211_v37  ;;  %v5106_v23 = vrot.slane %v5072_v10, %v12214_v39 }
0x3125   :  { %v5092_v15 = vpop.permute.xlu0 %5091  ;;  %v5090_v19 = vpop.permute.xlu1 %5089 }
0x3126   :  { %v5102_v9 = vmul.f32 %v5100_v48, %v13175_v11  ;;  %v5108_v36 = vmul.f32 %v5106_v23, %v13169_v6  ;;  %v5101_v40 = vmul.f32 %v5100_v48, %v13165_v22  ;;  %v5107_v7 = vmul.f32 %v5106_v23, %v13167_v8 }
0x3127   :  { %v5096_v35 = vmul.f32 %v5092_v15, %v13668_v14  ;;  %v5095_v43 = vmul.f32 %v5090_v19, %v13666_v1 }
0x3128   :  { %v5110_v46 = vadd.f32 %v5108_v36, %v5102_v9  ;;  %v5109_v26 = vadd.f32 %v5107_v7, %v5101_v40 }
0x312a   :  { %v5112_v41 = vadd.f32 %v5110_v46, %v5096_v35  ;;  %v5111_v33 = vadd.f32 %v5109_v26, %v5095_v43 }
0x312c   :  { %v9019_v17 = vmul.f32 -1.442695, %v5112_v41  ;;  %v9018_v62 = vmul.f32 -1.442695, %v5111_v33 }
0x312e   :  { %12004 = vpow2.f32 %v9019_v17 }
0x312f   :  { %12006 = vpow2.f32 %v9018_v62 }
0x3138   :  { %v12005_v5 = vpop.eup %12004 }
0x3139   :  { %v12007_v24 = vpop.eup %12006  ;;  %v5120_v49 = vadd.f32 1.0, %v12005_v5 }
0x313a   :  { %v5119_v50 = vadd.f32 1.0, %v12007_v24  ;;  %v9020_v24 = vld [vmem:[#allocation2 + $0x770] ss:$0 sm:$0xff] }
0x313b   :  { %12008 = vrcp.f32 %v5120_v49 }
0x313c   :  { %12010 = vrcp.f32 %v5119_v50 }
0x3145   :  { %v12009_v10 = vpop.eup %12008 }
0x3146   :  { %v12011_v48 = vpop.eup %12010  ;;  %v5126_v23 = vmul.f32 %v12009_v10, %v5112_v41 }
0x3147   :  { %v5125_v9 = vmul.f32 %v12011_v48, %v5111_v33 }
0x3148   :  { %v13738_v14 = vadd.f32 %v5126_v23, %v13517_v31 }
0x3149   :  { %v13741_v1 = vadd.f32 %v5125_v9, %v13520_v38 }
0x314a   :  { %5170 = vrot.lane.b32.xlu0 %v13738_v14, %s12148_s10  ;;  %v5161_v15 = vrot.slane %v13738_v14, 1  ;;  %v5155_v38 = vrot.slane %v13738_v14, 7 }
0x314b   :  { %5168 = vrot.lane.b32.xlu1 %v13741_v1, %s12148_s10  ;;  %v5160_v36 = vrot.slane %v13741_v1, 1  ;;  %v5154_v7 = vrot.slane %v13741_v1, 7 }
0x314d   :  { %v5162_v40 = vsel %vm223_vm3, %v5160_v36, %v5161_v15  ;;  %v5163_v31 = vsel %vm223_vm3, %v5161_v15, %v5160_v36  ;;  %v5157_v46 = vsel %vm162_vm2, %v5155_v38, %v5154_v7  ;;  %v5156_v43 = vsel %vm162_vm2, %v5154_v7, %v5155_v38 }
0x314e   :  { %v5164_v19 = vmul.f32 %v5162_v40, %v13072_v63  ;;  %v5158_v35 = vmul.f32 %v5157_v46, %v13086_v47  ;;  %v5165_v33 = vmul.f32 %v5163_v31, %v13070_v56  ;;  %v5159_v62 = vmul.f32 %v5156_v43, %v13088_v16 }
0x3150   :  { %9021 = vmatprep.mubr.msk.f32.mxu1 %vm647_vm10, %v5164_v19 }
0x31bc   :  { %v5171_v17 = vpop.permute.xlu0 %5170 }
0x31bd   :  { %v5169_v26 = vpop.permute.xlu1 %5168  ;;  %v5175_v5 = vsel %vm647_vm10, %v5159_v62, %v5171_v17 }
0x31be   :  { %v5174_v41 = vsel %vm647_vm10, %v5158_v35, %v5169_v26  ;;  %v13783_v26 = vld [vmem:[#allocation2 + $0xd90] sm:$0x3] }
0x31bf   :  { %5251 = vmatmul.mubr.f32.vlgmr.msra.gmra.mrb[42].mxu1 %v5174_v41 }
0x31c0   :  { %9022 = vmatprep.mubr.msk.f32.mxu1 %vm647_vm10, %v5165_v33  ;;  %v9024_v33 = vld [vmem:[#allocation2 + $0x778] ss:$0 sm:$0xff] }
0x31c3   :  { %5256 = vmatmul.mubr.f32.gmra.mrb[44].mxu1 %v5175_v5 }
0x31c4   :  { %10284 = vmatprep.mubr.msk.f32.mxu1 %vm12144_vm9, %v14599_v44 }
0x3292   :  { %v5252_v49 = vpop.f32.mrb[42].mxu1 }
0x3293   :  { %v5254_v50 = vpop.f32.mrb[43].mxu1  ;;  %v13769_v10 = vadd.f32 %v9020_v24, %v5252_v49 }
0x3295   :  { %v5261_v15 = vmul.f32 %v13769_v10, %v13769_v10 }
0x3296   :  { %v5257_v48 = vpop.f32.mrb[44].mxu1 }
0x3297   :  { %v13771_v23 = vadd.f32 %v9020_v24, %v5257_v48  ;;  %v5259_v9 = vpop.f32.mrb[45].mxu1 }
0x3299   :  { %v5262_v36 = vmul.f32 %v13771_v23, %v13771_v23 }
0x329b   :  { %v11820_v40 = vpack.i.bf16 %v5262_v36, %v5261_v15 }
0x329d   :  { %11821 = vrot.lane.b32.xlu1 %v11820_v40, %s12148_s10 }
0x32a1   :  { %5429 = vrot.lane.b32.xlu1 %v9024_v33, %s12148_s10  ;;  %v5515_v33 = vld [vmem:[#allocation2 + $0x788] sm:$0xff] }
0x330f   :  { %v11822_v31 = vpop.permute.xlu1 %11821 }
0x3310   :  { %v11824_v19 = vunpack.i.h.bf16 %v11822_v31  ;;  %v11823_v38 = vunpack.i.l.bf16 %v11822_v31 }
0x3312   :  { %v5272_v7 = vsel %vm647_vm10, %v13771_v23, %v11824_v19  ;;  %v5271_v46 = vsel %vm647_vm10, %v13769_v10, %v11823_v38 }
0x3313   :  { %v11319_v35 = vpack.c.bf16 %v5272_v7, %v5271_v46  ;;  %v5430_v15 = vpop.permute.xlu1 %5429 }
0x3315   :  { %11320 = vmatpush3.bf16.msra.mxu0 %v11319_v35 }
0x3316   :  { %11321 = vmatprep.subr.bf16.mxu0 %v14598_v32 }
0x3318   :  { %10243 = vmatmul.mubr.msk.f32.vlgmr.msra.gmra.mrb[48].mxu0 %vm429_vm6, %v13783_v26 }
0x3319   :  { %11323 = vmatpush3.bf16.msra.mxu0 %v13117_v30  ;;  %10277 = vmatprep.mubr.msk.f32.mxu0 %vm12144_vm9, %v14599_v44 }
0x331a   :  { %11324 = vmatprep.subr.bf16.mxu0 %v14598_v32 }
0x331d   :  { %11326 = vmatpush3.bf16.msra.mxu0 %v13123_v4 }
0x331e   :  { %11327 = vmatprep.subr.bf16.mxu0 %v14598_v32 }
0x3321   :  { %11329 = vmatpush3.bf16.msra.mxu0 %v13129_v13 }
0x3322   :  { %11330 = vmatprep.subr.bf16.mxu0 %v14598_v32 }
0x3325   :  { %11332 = vmatpush3.bf16.msra.mxu0 %v13133_v42 }
0x3326   :  { %11333 = vmatprep.subr.bf16.mxu0 %v14598_v32 }
0x3329   :  { %11335 = vmatpush3.bf16.msra.mxu0 %v13137_v54 }
0x332a   :  { %11336 = vmatprep.subr.bf16.mxu0 %v14598_v32 }
0x332d   :  { %11338 = vmatpush3.bf16.msra.mxu0 %v13141_v61 }
0x332e   :  { %11339 = vmatprep.subr.bf16.mxu0 %v14598_v32 }
0x3331   :  { %11341 = vmatpush3.bf16.msra.mxu0 %v13145_v55 }
0x3332   :  { %11342 = vmatprep.subr.bf16.mxu0 %v14598_v32 }
0x3335   :  { %11344 = vmatpush3.bf16.msra.mxu0 %v13149_v45 }
0x3336   :  { %11345 = vmatprep.subr.bf16.mxu0 %v14598_v32 }
0x33eb   :  { %v5339_v43 = vpop.f32.mrb[48].mxu0 }
0x33ec   :  { %v10244_v41 = vpop.f32.mrb[49].mxu0  ;;  %10278 = vmatmul.mubr.f32.vlgmr.msra.gmra.mrb[50].mxu0 %v5339_v43 }
0x34bf   :  { %v5409_v17 = vpop.f32.mrb[50].mxu0 }
0x34c0   :  { %v13806_v62 = vmul.f32 0.015625, %v5409_v17  ;;  %v10279_v5 = vpop.f32.mrb[51].mxu0  ;;  %v5516_v17 = vld [vmem:[#allocation2 + $0x790] sm:$0xff] }
0x34c1   :  { %v5517_v5 = vld [vmem:[#allocation2 + $0x798] sm:$0xff] }
0x34c2   :  { %v5414_v24 = vmul.f32 %v13806_v62, %v13806_v62 }
0x34c4   :  { %5416 = vrot.lane.b32.xlu0 %v5414_v24, %s12148_s10  ;;  %v11346_v24 = vpack.c.bf16 %v5516_v17, %v5515_v33  ;;  %v5528_v33 = vld [vmem:[#allocation2 + $0x7f0] sm:$0xff] }
0x34c6   :  { %11347 = vmatpush1.bf16.msra.mxu0 %v11346_v24  ;;  %v5530_v24 = vld [vmem:[#allocation2 + $0x800] sm:$0xff] }
0x34c7   :  { %11348 = vmatprep.subr.bf16.mxu0 %v14598_v32 }
0x3536   :  { %v5417_v49 = vpop.permute.xlu0 %5416 }
0x3537   :  { %v5419_v50 = vsub.f32 %v13806_v62, %v5417_v49  ;;  %v5518_v49 = vld [vmem:[#allocation2 + $0x7a0] sm:$0xff] }
0x3539   :  { %v5420_v48 = vmax.f32 %v5419_v50, 0.0  ;;  %v11349_v50 = vpack.c.bf16 %v5518_v49, %v5517_v5  ;;  %v5529_v5 = vld [vmem:[#allocation2 + $0x7f8] sm:$0xff] }
0x353a   :  { %v11367_v49 = vpack.c.bf16 %v5530_v24, %v5529_v5 }
0x353b   :  { %v5421_v9 = vadd.f32 1e-05, %v5420_v48  ;;  %v5519_v48 = vld [vmem:[#allocation2 + $0x7a8] sm:$0xff]  ;;  %11350 = vmatpush1.bf16.msra.mxu0 %v11349_v50 }
0x353c   :  { %11351 = vmatprep.subr.bf16.mxu0 %v14598_v32  ;;  %v5531_v50 = vld [vmem:[#allocation2 + $0x808] sm:$0xff] }
0x353d   :  { %12012 = vrsqrt.f32 %v5421_v9  ;;  %v5520_v9 = vld [vmem:[#allocation2 + $0x7b0] sm:$0xff] }
0x3547   :  { %v12013_v36 = vpop.eup %12012 }
0x3548   :  { %v5432_v40 = vmul.f32 %v12013_v36, %v5430_v15  ;;  %v11352_v15 = vpack.c.bf16 %v5520_v9, %v5519_v48  ;;  %v5521_v36 = vld [vmem:[#allocation2 + $0x7b8] sm:$0xff]  ;;  %v5532_v48 = vld [vmem:[#allocation2 + $0x810] sm:$0xff] }
0x3549   :  { %v11370_v9 = vpack.c.bf16 %v5532_v48, %v5531_v50 }
0x354a   :  { %v5447_v31 = vrot.slane %v5432_v40, %v12211_v37  ;;  %v5453_v19 = vrot.slane %v5432_v40, %v12214_v39  ;;  %5435 = vrot.lane.b32.xlu0 %v5432_v40, %s12148_s10  ;;  %v5522_v40 = vld [vmem:[#allocation2 + $0x7c0] sm:$0xff]  ;;  %11353 = vmatpush1.bf16.msra.mxu0 %v11352_v15  ;;  %v5533_v15 = vld [vmem:[#allocation2 + $0x818] sm:$0xff] }
0x354b   :  { %11354 = vmatprep.subr.bf16.mxu0 %v14598_v32 }
0x354c   :  { %v5448_v38 = vmul.f32 %v5447_v31, %v13165_v22  ;;  %v5449_v7 = vmul.f32 %v5447_v31, %v13175_v11  ;;  %v5454_v46 = vmul.f32 %v5453_v19, %v13167_v8  ;;  %v5455_v35 = vmul.f32 %v5453_v19, %v13169_v6  ;;  %v5523_v19 = vld [vmem:[#allocation2 + $0x7c8] sm:$0xff] }
0x354d   :  { %v11355_v31 = vpack.c.bf16 %v5522_v40, %v5521_v36  ;;  %v5534_v36 = vld [vmem:[#allocation2 + $0x820] sm:$0xff] }
0x354e   :  { %v5457_v43 = vadd.f32 %v5455_v35, %v5449_v7  ;;  %v5456_v41 = vadd.f32 %v5454_v46, %v5448_v38  ;;  %v5524_v38 = vld [vmem:[#allocation2 + $0x7d0] sm:$0xff]  ;;  %v5525_v46 = vld [vmem:[#allocation2 + $0x7d8] sm:$0xff]  ;;  %v5526_v35 = vld [vmem:[#allocation2 + $0x7e0] sm:$0xff]  ;;  %v11373_v40 = vpack.c.bf16 %v5534_v36, %v5533_v15 }
0x354f   :  { %11356 = vmatpush1.bf16.msra.mxu0 %v11355_v31  ;;  %v11358_v7 = vpack.c.bf16 %v5524_v38, %v5523_v19  ;;  %v5535_v31 = vld [vmem:[#allocation2 + $0x828] sm:$0xff]  ;;  %v5536_v19 = vld [vmem:[#allocation2 + $0x830] sm:$0xff] }
0x3550   :  { %5462 = vrot.lane.b32.xlu0 %v5457_v43, %s12148_s10  ;;  %5460 = vrot.lane.b32.xlu1 %v5456_v41, %s12148_s10  ;;  %v11361_v43 = vpack.c.bf16 %v5526_v35, %v5525_v46  ;;  %v5527_v41 = vld [vmem:[#allocation2 + $0x7e8] sm:$0xff]  ;;  %v11376_v38 = vpack.c.bf16 %v5536_v19, %v5535_v31  ;;  %v5538_v46 = vld [vmem:[#allocation2 + $0x840] sm:$0xff] }
0x3551   :  { %11357 = vmatprep.subr.bf16.mxu0 %v14598_v32  ;;  %v11364_v17 = vpack.c.bf16 %v5528_v33, %v5527_v41 }
0x3553   :  { %11359 = vmatpush1.bf16.msra.mxu0 %v11358_v7  ;;  %v5537_v7 = vld [vmem:[#allocation2 + $0x838] sm:$0xff] }
0x3554   :  { %11360 = vmatprep.subr.bf16.mxu0 %v14598_v32  ;;  %v11379_v35 = vpack.c.bf16 %v5538_v46, %v5537_v7 }
0x3557   :  { %11362 = vmatpush1.bf16.msra.mxu0 %v11361_v43  ;;  %v9025_v43 = vld [vmem:[#allocation2 + $0x780] ss:$0 sm:$0xff] }
0x3558   :  { %11363 = vmatprep.subr.bf16.mxu0 %v14598_v32 }
0x355b   :  { %11365 = vmatpush1.bf16.msra.mxu0 %v11364_v17 }
0x355c   :  { %11366 = vmatprep.subr.bf16.mxu0 %v14598_v32 }
0x355f   :  { %11368 = vmatpush1.bf16.msra.mxu0 %v11367_v49 }
0x3560   :  { %11369 = vmatprep.subr.bf16.mxu0 %v14598_v32 }
0x3563   :  { %11371 = vmatpush1.bf16.msra.mxu0 %v11370_v9 }
0x3564   :  { %11372 = vmatprep.subr.bf16.mxu0 %v14598_v32 }
0x3567   :  { %11374 = vmatpush1.bf16.msra.mxu0 %v11373_v40 }
0x3568   :  { %11375 = vmatprep.subr.bf16.mxu0 %v14598_v32 }
0x356b   :  { %11377 = vmatpush1.bf16.msra.mxu0 %v11376_v38 }
0x356c   :  { %11378 = vmatprep.subr.bf16.mxu0 %v14598_v32 }
0x356f   :  { %11380 = vmatpush1.bf16.msra.mxu0 %v11379_v35 }
0x35bc   :  { %v5436_v41 = vpop.permute.xlu0 %5435 }
0x35bd   :  { %v5438_v33 = vmul.f32 %v5436_v41, %v13806_v62 }
0x35bf   :  { %v5443_v17 = vsub.f32 %v9025_v43, %v5438_v33 }
0x35c1   :  { %v5471_v5 = vrot.slane %v5443_v17, %v12211_v37  ;;  %v5477_v24 = vrot.slane %v5443_v17, %v12214_v39 }
0x35c2   :  { %v5463_v49 = vpop.permute.xlu0 %5462  ;;  %v5461_v15 = vpop.permute.xlu1 %5460 }
0x35c3   :  { %v5473_v50 = vmul.f32 %v5471_v5, %v13175_v11  ;;  %v5479_v48 = vmul.f32 %v5477_v24, %v13169_v6  ;;  %v5472_v9 = vmul.f32 %v5471_v5, %v13165_v22  ;;  %v5478_v36 = vmul.f32 %v5477_v24, %v13167_v8  ;;  %v5498_v5 = vld [vmem:[%s14567_s1 + $0x28] sm:$0x3] }
0x35c4   :  { %v5467_v31 = vmul.f32 %v5463_v49, %v13771_v23  ;;  %v5466_v62 = vmul.f32 %v5461_v15, %v13769_v10  ;;  %v5508_v23 = vrot.slane %v5498_v5, %v12214_v39  ;;  %v5502_v10 = vrot.slane %v5498_v5, %v12211_v37 }
0x35c5   :  { %v5481_v40 = vadd.f32 %v5479_v48, %v5473_v50  ;;  %v5480_v19 = vadd.f32 %v5478_v36, %v5472_v9 }
0x35c6   :  { %v5504_v24 = vmul.f32 %v5502_v10, %v13175_v11  ;;  %v5510_v49 = vmul.f32 %v5508_v23, %v13169_v6  ;;  %v5509_v50 = vmul.f32 %v5508_v23, %v13167_v8  ;;  %v5503_v9 = vmul.f32 %v5502_v10, %v13165_v22 }
0x35c7   :  { %v5483_v38 = vadd.f32 %v5481_v40, %v5467_v31  ;;  %v5482_v7 = vadd.f32 %v5480_v19, %v5466_v62 }
0x35c8   :  { %v5512_v36 = vadd.f32 %v5510_v49, %v5504_v24  ;;  %v5511_v31 = vadd.f32 %v5509_v50, %v5503_v9 }
0x35c9   :  { %v9027_v46 = vmul.f32 -1.442695, %v5483_v38  ;;  %v9026_v35 = vmul.f32 -1.442695, %v5482_v7 }
0x35cb   :  { %12014 = vpow2.f32 %v9027_v46 }
0x35cc   :  { %12016 = vpow2.f32 %v9026_v35 }
0x35d5   :  { %v12015_v43 = vpop.eup %12014 }
0x35d6   :  { %v12017_v41 = vpop.eup %12016  ;;  %v5491_v33 = vadd.f32 1.0, %v12015_v43 }
0x35d7   :  { %v5490_v17 = vadd.f32 1.0, %v12017_v41 }
0x35d8   :  { %12018 = vrcp.f32 %v5491_v33 }
0x35d9   :  { %12020 = vrcp.f32 %v5490_v17 }
0x35e2   :  { %v12019_v48 = vpop.eup %12018 }
0x35e3   :  { %v12021_v15 = vpop.eup %12020  ;;  %v5497_v40 = vmul.f32 %v12019_v48, %v5483_v38 }
0x35e4   :  { %v5496_v19 = vmul.f32 %v12021_v15, %v5482_v7 }
0x35e5   :  { %v5514_v62 = vadd.f32 %v5512_v36, %v5497_v40  ;;  %v9028_v36 = vld [vmem:[#allocation2 + $0x848] ss:$0 sm:$0xff] }
0x35e6   :  { %v5513_v46 = vadd.f32 %v5511_v31, %v5496_v19 }
0x35e7   :  { %v5541_v35 = vrot.slane %v5514_v62, 7  ;;  %v5547_v43 = vrot.slane %v5514_v62, 1  ;;  %5556 = vrot.lane.b32.xlu0 %v5514_v62, %s12148_s10 }
0x35e8   :  { %v5540_v41 = vrot.slane %v5513_v46, 7  ;;  %v5546_v33 = vrot.slane %v5513_v46, 1  ;;  %5554 = vrot.lane.b32.xlu1 %v5513_v46, %s12148_s10 }
0x35ea   :  { %v5548_v17 = vsel %vm223_vm3, %v5546_v33, %v5547_v43  ;;  %v5543_v5 = vsel %vm162_vm2, %v5541_v35, %v5540_v41  ;;  %v5549_v38 = vsel %vm223_vm3, %v5547_v43, %v5546_v33  ;;  %v5542_v7 = vsel %vm162_vm2, %v5540_v41, %v5541_v35 }
0x35eb   :  { %v5550_v23 = vmul.f32 %v5548_v17, %v13072_v63  ;;  %v5544_v10 = vmul.f32 %v5543_v5, %v13086_v47  ;;  %v5551_v50 = vmul.f32 %v5549_v38, %v13070_v56  ;;  %v5545_v9 = vmul.f32 %v5542_v7, %v13088_v16 }
0x35ed   :  { %9029 = vmatprep.mubr.msk.f32.mxu0 %vm647_vm10, %v5550_v23 }
0x3659   :  { %v5557_v48 = vpop.permute.xlu0 %5556 }
0x365a   :  { %v5555_v24 = vpop.permute.xlu1 %5554  ;;  %v5561_v15 = vsel %vm647_vm10, %v5545_v9, %v5557_v48 }
0x365b   :  { %v5560_v49 = vsel %vm647_vm10, %v5544_v10, %v5555_v24 }
0x365c   :  { %5637 = vmatmul.mubr.f32.vlgmr.msra.gmra.mrb[52].mxu0 %v5560_v49 }
0x365d   :  { %9030 = vmatprep.mubr.msk.f32.mxu0 %vm647_vm10, %v5551_v50 }
0x3660   :  { %5642 = vmatmul.mubr.f32.gmra.mrb[54].mxu0 %v5561_v15 }
0x372f   :  { %v5638_v40 = vpop.f32.mrb[52].mxu0 }
0x3730   :  { %v5640_v31 = vpop.f32.mrb[53].mxu0  ;;  %v13868_v19 = vadd.f32 %v9028_v36, %v5638_v40 }
0x3732   :  { %v5647_v43 = vmul.f32 %v13868_v19, %v13868_v19 }
0x3733   :  { %v5643_v62 = vpop.f32.mrb[54].mxu0 }
0x3734   :  { %v13870_v46 = vadd.f32 %v9028_v36, %v5643_v62  ;;  %v5645_v35 = vpop.f32.mrb[55].mxu0 }
0x3736   :  { %v5648_v41 = vmul.f32 %v13870_v46, %v13870_v46 }
0x3738   :  { %v11825_v33 = vpack.i.bf16 %v5648_v41, %v5647_v43 }
0x373a   :  { %11826 = vrot.lane.b32.xlu1 %v11825_v33, %s12148_s10 }
0x37ac   :  { %v11827_v17 = vpop.permute.xlu1 %11826 }
0x37ad   :  { %v11829_v5 = vunpack.i.h.bf16 %v11827_v17  ;;  %v11828_v38 = vunpack.i.l.bf16 %v11827_v17  ;;  %v5902_v17 = vld [vmem:[#allocation2 + $0x8e0] sm:$0xff] }
0x37af   :  { %v5658_v7 = vsel %vm647_vm10, %v13870_v46, %v11829_v5  ;;  %v5657_v23 = vsel %vm647_vm10, %v13868_v19, %v11828_v38  ;;  %v5903_v5 = vld [vmem:[#allocation2 + $0x8e8] sm:$0xff] }
0x37b0   :  { %v11382_v10 = vpack.c.bf16 %v5658_v7, %v5657_v23  ;;  %v11408_v38 = vpack.c.bf16 %v5903_v5, %v5902_v17  ;;  %v5886_v7 = vld [vmem:[#allocation2 + $0x860] sm:$0xff]  ;;  %v5887_v23 = vld [vmem:[#allocation2 + $0x868] sm:$0xff]  ;;  %v5892_v17 = vld [vmem:[#allocation2 + $0x890] sm:$0xff] }
0x37b1   :  { %v5893_v5 = vld [vmem:[#allocation2 + $0x898] sm:$0xff] }
0x37b2   :  { %11383 = vmatpush3.bf16.msra.mxu1 %v11382_v10  ;;  %v5918_v10 = vld [vmem:[#allocation2 + $0x960] sm:$0xff] }
0x37b3   :  { %11384 = vmatprep.subr.bf16.mxu1 %v14598_v32 }
0x37b5   :  { %10285 = vmatmul.mubr.msk.f32.vlgmr.msra.gmra.mrb[46].mxu1 %vm429_vm6, %v13783_v26 }
0x37b6   :  { %11386 = vmatpush3.bf16.msra.mxu1 %v13117_v30  ;;  %10319 = vmatprep.mubr.msk.f32.mxu1 %vm12144_vm9, %v14599_v44 }
0x37b7   :  { %11387 = vmatprep.subr.bf16.mxu1 %v14598_v32 }
0x37ba   :  { %11389 = vmatpush3.bf16.msra.mxu1 %v13123_v4 }
0x37bb   :  { %11390 = vmatprep.subr.bf16.mxu1 %v14598_v32 }
0x37be   :  { %11392 = vmatpush3.bf16.msra.mxu1 %v13129_v13  ;;  %v9032_v13 = vld [vmem:[#allocation2 + $0x850] ss:$0 sm:$0xff] }
0x37bf   :  { %11393 = vmatprep.subr.bf16.mxu1 %v14598_v32  ;;  %5815 = vrot.lane.b32.xlu1 %v9032_v13, %s12148_s10  ;;  %v11830_v13 = vpack.i.bf16 %v13552_v18, %v13533_v60  ;;  %v5907_v60 = vld [vmem:[#allocation2 + $0x908] sm:$0xff] }
0x37c2   :  { %11395 = vmatpush3.bf16.msra.mxu1 %v13133_v42 }
0x37c3   :  { %11396 = vmatprep.subr.bf16.mxu1 %v14598_v32 }
0x37c6   :  { %11398 = vmatpush3.bf16.msra.mxu1 %v13137_v54 }
0x37c7   :  { %11399 = vmatprep.subr.bf16.mxu1 %v14598_v32 }
0x37ca   :  { %11401 = vmatpush3.bf16.msra.mxu1 %v13141_v61 }
0x37cb   :  { %11402 = vmatprep.subr.bf16.mxu1 %v14598_v32 }
0x37ce   :  { %11404 = vmatpush3.bf16.msra.mxu1 %v13145_v55 }
0x37cf   :  { %11405 = vmatprep.subr.bf16.mxu1 %v14598_v32 }
0x37d2   :  { %11407 = vmatpush3.bf16.msra.mxu1 %v13149_v45 }
0x37d3   :  { %11409 = vmatprep.subr.bf16.mxu1 %v11408_v38  ;;  %v5924_v38 = vld [vmem:[#allocation2 + $0x990] sm:$0xff] }
0x3831   :  { %v5816_v48 = vpop.permute.xlu1 %5815 }
0x3888   :  { %v5725_v30 = vpop.f32.mrb[46].mxu1 }
0x3889   :  { %10320 = vmatmul.mubr.f32.vlgmr.msra.gmra.mrb[48].mxu1 %v5725_v30  ;;  %v10286_v4 = vpop.f32.mrb[47].mxu1  ;;  %v11410_v30 = vpack.c.bf16 %v5887_v23, %v5886_v7  ;;  %v11422_v7 = vpack.c.bf16 %v5893_v5, %v5892_v17  ;;  %v5925_v23 = vld [vmem:[#allocation2 + $0x998] sm:$0xff]  ;;  %v5931_v17 = vld [vmem:[#allocation2 + $0x9c8] sm:$0xff]  ;;  %v5916_v5 = vld [vmem:[#allocation2 + $0x950] sm:$0xff] }
0x388a   :  { %v5919_v4 = vld [vmem:[#allocation2 + $0x968] sm:$0xff] }
0x388b   :  { %11411 = vmatpush3.bf16.msra.mxu1 %v11410_v30  ;;  %v5910_v30 = vld [vmem:[#allocation2 + $0x920] sm:$0xff] }
0x395c   :  { %v5795_v42 = vpop.f32.mrb[48].mxu1 }
0x395d   :  { %v13902_v54 = vmul.f32 0.015625, %v5795_v42  ;;  %v10321_v24 = vpop.f32.mrb[49].mxu1  ;;  %v11440_v42 = vpack.c.bf16 %v5919_v4, %v5918_v10  ;;  %v11452_v10 = vpack.c.bf16 %v5925_v23, %v5924_v38  ;;  %v5911_v4 = vld [vmem:[#allocation2 + $0x928] sm:$0xff]  ;;  %v5917_v38 = vld [vmem:[#allocation2 + $0x958] sm:$0xff] }
0x395e   :  { %v5904_v24 = vld [vmem:[#allocation2 + $0x8f0] sm:$0xff]  ;;  %v11436_v23 = vpack.c.bf16 %v5917_v38, %v5916_v5 }
0x395f   :  { %v5800_v61 = vmul.f32 %v13902_v54, %v13902_v54  ;;  %11441 = vmatprep.subr.bf16.mxu0 %v11440_v42 }
0x3960   :  { %11443 = vmatpush3.bf16.msra.mxu0 %v11440_v42  ;;  %v5894_v42 = vld [vmem:[#allocation2 + $0x8a0] sm:$0xff] }
0x3961   :  { %5802 = vrot.lane.b32.xlu0 %v5800_v61, %s12148_s10  ;;  %v5905_v61 = vld [vmem:[#allocation2 + $0x8f8] sm:$0xff] }
0x39d3   :  { %v5803_v55 = vpop.permute.xlu0 %5802 }
0x39d4   :  { %v5805_v49 = vsub.f32 %v13902_v54, %v5803_v55  ;;  %v5888_v55 = vld [vmem:[#allocation2 + $0x870] sm:$0xff] }
0x39d6   :  { %v5806_v50 = vmax.f32 %v5805_v49, 0.0  ;;  %v5920_v49 = vld [vmem:[#allocation2 + $0x970] sm:$0xff] }
0x39d8   :  { %v5807_v45 = vadd.f32 1e-05, %v5806_v50 }
0x39da   :  { %12022 = vrsqrt.f32 %v5807_v45  ;;  %v5921_v45 = vld [vmem:[#allocation2 + $0x978] sm:$0xff] }
0x39e4   :  { %v12023_v9 = vpop.eup %12022 }
0x39e5   :  { %v5818_v15 = vmul.f32 %v12023_v9, %v5816_v48  ;;  %v11444_v48 = vpack.c.bf16 %v5921_v45, %v5920_v49  ;;  %v5906_v9 = vld [vmem:[#allocation2 + $0x900] sm:$0xff]  ;;  %v5912_v49 = vld [vmem:[#allocation2 + $0x930] sm:$0xff] }
0x39e6   :  { %v11416_v18 = vpack.c.bf16 %v5907_v60, %v5906_v9  ;;  %v5897_v9 = vld [vmem:[#allocation2 + $0x8b8] sm:$0xff]  ;;  %v5928_v60 = vld [vmem:[#allocation2 + $0x9b0] sm:$0xff] }
0x39e7   :  { %v5833_v36 = vrot.slane %v5818_v15, %v12211_v37  ;;  %v5839_v40 = vrot.slane %v5818_v15, %v12214_v39  ;;  %5821 = vrot.lane.b32.xlu0 %v5818_v15, %s12148_s10  ;;  %11445 = vmatprep.subr.bf16.mxu0 %v11444_v48  ;;  %v5890_v15 = vld [vmem:[#allocation2 + $0x880] sm:$0xff] }
0x39e8   :  { %11447 = vmatpush3.bf16.msra.mxu0 %v11444_v48  ;;  %v5896_v48 = vld [vmem:[#allocation2 + $0x8b0] sm:$0xff] }
0x39e9   :  { %v5834_v31 = vmul.f32 %v5833_v36, %v13165_v22  ;;  %v5835_v62 = vmul.f32 %v5833_v36, %v13175_v11  ;;  %v5840_v35 = vmul.f32 %v5839_v40, %v13167_v8  ;;  %v5841_v43 = vmul.f32 %v5839_v40, %v13169_v6  ;;  %v5891_v36 = vld [vmem:[#allocation2 + $0x888] sm:$0xff]  ;;  %v5922_v40 = vld [vmem:[#allocation2 + $0x980] sm:$0xff] }
0x39eb   :  { %v5843_v41 = vadd.f32 %v5841_v43, %v5835_v62  ;;  %v5842_v33 = vadd.f32 %v5840_v35, %v5834_v31  ;;  %v11418_v31 = vpack.c.bf16 %v5891_v36, %v5890_v15  ;;  %v5923_v62 = vld [vmem:[#allocation2 + $0x988] sm:$0xff]  ;;  %v5908_v43 = vld [vmem:[#allocation2 + $0x910] sm:$0xff]  ;;  %v5929_v15 = vld [vmem:[#allocation2 + $0x9b8] sm:$0xff] }
0x39ec   :  { %v11448_v35 = vpack.c.bf16 %v5923_v62, %v5922_v40  ;;  %v11460_v36 = vpack.c.bf16 %v5929_v15, %v5928_v60  ;;  %v5914_v40 = vld [vmem:[#allocation2 + $0x940] sm:$0xff] }
0x39ed   :  { %5848 = vrot.lane.b32.xlu0 %v5843_v41, %s12148_s10  ;;  %5846 = vrot.lane.b32.xlu1 %v5842_v33, %s12148_s10  ;;  %v5909_v41 = vld [vmem:[#allocation2 + $0x918] sm:$0xff] }
0x39ee   :  { %11449 = vmatprep.subr.bf16.mxu0 %v11448_v35  ;;  %v11420_v33 = vpack.c.bf16 %v5909_v41, %v5908_v43  ;;  %v5899_v43 = vld [vmem:[#allocation2 + $0x8c8] sm:$0xff]  ;;  %v5930_v41 = vld [vmem:[#allocation2 + $0x9c0] sm:$0xff] }
0x39ef   :  { %11451 = vmatpush3.bf16.msra.mxu0 %v11448_v35  ;;  %v5898_v35 = vld [vmem:[#allocation2 + $0x8c0] sm:$0xff] }
0x39f0   :  { %11453 = vmatprep.subr.bf16.mxu0 %v11452_v10 }
0x39f1   :  { %5951 = vrot.lane.b32.xlu0 %v13559_v0, %s12148_s10  ;;  %5949 = vrot.lane.b32.xlu1 %v13542_v52, %s12148_s10  ;;  %v11412_v0 = vpack.c.bf16 %v5905_v61, %v5904_v24  ;;  %v5889_v52 = vld [vmem:[#allocation2 + $0x878] sm:$0xff]  ;;  %v5895_v24 = vld [vmem:[#allocation2 + $0x8a8] sm:$0xff]  ;;  %v5926_v61 = vld [vmem:[#allocation2 + $0x9a0] sm:$0xff] }
0x39f2   :  { %v11414_v50 = vpack.c.bf16 %v5889_v52, %v5888_v55  ;;  %v5927_v55 = vld [vmem:[#allocation2 + $0x9a8] sm:$0xff] }
0x39f3   :  { %11413 = vmatprep.subr.bf16.mxu1 %v11412_v0  ;;  %11455 = vmatpush3.bf16.msra.mxu0 %v11452_v10  ;;  %v11426_v0 = vpack.c.bf16 %v5895_v24, %v5894_v42  ;;  %v11456_v52 = vpack.c.bf16 %v5927_v55, %v5926_v61  ;;  %v5900_v10 = vld [vmem:[#allocation2 + $0x8d0] sm:$0xff]  ;;  %v5933_v42 = vld [vmem:[#allocation2 + $0x9d8] sm:$0xff] }
0x39f4   :  { %11415 = vmatpush3.bf16.msra.mxu1 %v11414_v50  ;;  %v5913_v50 = vld [vmem:[#allocation2 + $0x938] sm:$0xff] }
0x39f5   :  { %11831 = vrot.lane.b32.xlu1 %v11830_v13, %s12148_s10  ;;  %11417 = vmatprep.subr.bf16.mxu1 %v11416_v18  ;;  %v11424_v13 = vpack.c.bf16 %v5911_v4, %v5910_v30  ;;  %v11428_v45 = vpack.c.bf16 %v5913_v50, %v5912_v49  ;;  %v11430_v18 = vpack.c.bf16 %v5897_v9, %v5896_v48  ;;  %v5901_v30 = vld [vmem:[#allocation2 + $0x8d8] sm:$0xff]  ;;  %v5932_v4 = vld [vmem:[#allocation2 + $0x9d0] sm:$0xff] }
0x39f6   :  { %11457 = vmatprep.subr.bf16.mxu0 %v11456_v52  ;;  %v11468_v24 = vpack.c.bf16 %v5933_v42, %v5932_v4  ;;  %v9033_v61 = vld [vmem:[#allocation2 + $0x858] ss:$0 sm:$0xff] }
0x39f7   :  { %11459 = vmatpush3.bf16.msra.mxu0 %v11456_v52 }
0x39f8   :  { %11419 = vmatpush3.bf16.msra.mxu1 %v11418_v31  ;;  %v5915_v31 = vld [vmem:[#allocation2 + $0x948] sm:$0xff]  ;;  %11461 = vmatprep.subr.bf16.mxu0 %v11460_v36 }
0x39f9   :  { %11421 = vmatprep.subr.bf16.mxu1 %v11420_v33  ;;  %v11432_v62 = vpack.c.bf16 %v5915_v31, %v5914_v40  ;;  %v11434_v33 = vpack.c.bf16 %v5899_v43, %v5898_v35 }
0x39fb   :  { %11463 = vmatpush3.bf16.msra.mxu0 %v11460_v36 }
0x39fc   :  { %11423 = vmatpush3.bf16.msra.mxu1 %v11422_v7  ;;  %v11464_v7 = vpack.c.bf16 %v5931_v17, %v5930_v41 }
0x39fd   :  { %11425 = vmatprep.subr.bf16.mxu1 %v11424_v13  ;;  %v11438_v13 = vpack.c.bf16 %v5901_v30, %v5900_v10 }
0x39fe   :  { %11465 = vmatprep.subr.bf16.mxu0 %v11464_v7 }
0x39ff   :  { %11467 = vmatpush3.bf16.msra.mxu0 %v11464_v7 }
0x3a00   :  { %11427 = vmatpush3.bf16.msra.mxu1 %v11426_v0  ;;  %11469 = vmatprep.subr.bf16.mxu0 %v11468_v24 }
0x3a01   :  { %11429 = vmatprep.subr.bf16.mxu1 %v11428_v45 }
0x3a03   :  { %11471 = vmatpush3.bf16.msra.mxu0 %v11468_v24 }
0x3a04   :  { %11431 = vmatpush3.bf16.msra.mxu1 %v11430_v18  ;;  %11472 = vmatprep.subr.bf16.mxu0 %v14598_v32 }
0x3a05   :  { %11433 = vmatprep.subr.bf16.mxu1 %v11432_v62 }
0x3a08   :  { %11435 = vmatpush3.bf16.msra.mxu1 %v11434_v33 }
0x3a09   :  { %11437 = vmatprep.subr.bf16.mxu1 %v11436_v23 }
0x3a0c   :  { %11439 = vmatpush3.bf16.msra.mxu1 %v11438_v13 }
0x3a0d   :  { %11475 = vmatprep.subr.bf16.mxu1 %v14598_v32 }
0x3a59   :  { %v5822_v0 = vpop.permute.xlu0 %5821 }
0x3a5a   :  { %v5824_v55 = vmul.f32 %v5822_v0, %v13902_v54 }
0x3a5c   :  { %v5829_v52 = vsub.f32 %v9033_v61, %v5824_v55 }
0x3a5e   :  { %v5857_v49 = vrot.slane %v5829_v52, %v12211_v37  ;;  %v5863_v50 = vrot.slane %v5829_v52, %v12214_v39 }
0x3a5f   :  { %v5849_v45 = vpop.permute.xlu0 %5848  ;;  %v5847_v18 = vpop.permute.xlu1 %5846 }
0x3a60   :  { %v5859_v48 = vmul.f32 %v5857_v49, %v13175_v11  ;;  %v5865_v9 = vmul.f32 %v5863_v50, %v13169_v6  ;;  %v5858_v60 = vmul.f32 %v5857_v49, %v13165_v22  ;;  %v5864_v15 = vmul.f32 %v5863_v50, %v13167_v8 }
0x3a61   :  { %v5853_v40 = vmul.f32 %v5849_v45, %v13870_v46  ;;  %v5852_v54 = vmul.f32 %v5847_v18, %v13868_v19 }
0x3a62   :  { %v5867_v36 = vadd.f32 %v5865_v9, %v5859_v48  ;;  %v5866_v31 = vadd.f32 %v5864_v15, %v5858_v60 }
0x3a63   :  { %v5950_v7 = vpop.permute.xlu1 %5949 }
0x3a64   :  { %v5869_v62 = vadd.f32 %v5867_v36, %v5853_v40  ;;  %v5868_v35 = vadd.f32 %v5866_v31, %v5852_v54  ;;  %v5952_v31 = vpop.permute.xlu0 %5951 }
0x3a66   :  { %v9035_v43 = vmul.f32 -1.442695, %v5869_v62  ;;  %v9034_v41 = vmul.f32 -1.442695, %v5868_v35 }
0x3a67   :  { %v11832_v13 = vpop.permute.xlu1 %11831 }
0x3a68   :  { %12024 = vpow2.f32 %v9035_v43  ;;  %v11834_v52 = vunpack.i.h.bf16 %v11832_v13  ;;  %v11833_v48 = vunpack.i.l.bf16 %v11832_v13  ;;  %v9036_v43 = vld [vmem:[#allocation2 + $0x9e0] ss:$0 sm:$0xff] }
0x3a69   :  { %12026 = vpow2.f32 %v9034_v41 }
0x3a72   :  { %v12025_v33 = vpop.eup %12024 }
0x3a73   :  { %v12027_v17 = vpop.eup %12026  ;;  %v5877_v5 = vadd.f32 1.0, %v12025_v33 }
0x3a74   :  { %v5876_v38 = vadd.f32 1.0, %v12027_v17 }
0x3a75   :  { %12028 = vrcp.f32 %v5877_v5 }
0x3a76   :  { %12030 = vrcp.f32 %v5876_v38 }
0x3a7f   :  { %v12029_v23 = vpop.eup %12028 }
0x3a80   :  { %v12031_v10 = vpop.eup %12030  ;;  %v5883_v30 = vmul.f32 %v12029_v23, %v5869_v62 }
0x3a81   :  { %v5882_v46 = vmul.f32 %v12031_v10, %v5868_v35 }
0x3a82   :  { %v5885_v4 = vadd.f32 %v5883_v30, %v13738_v14 }
0x3a83   :  { %v5884_v19 = vadd.f32 %v5882_v46, %v13741_v1 }
0x3a84   :  { %v5936_v42 = vrot.slane %v5885_v4, 7  ;;  %v5942_v24 = vrot.slane %v5885_v4, 1  ;;  %v13959_v40 = vsel %vm647_vm10, %v5885_v4, %v13554_v27 }
0x3a85   :  { %v5935_v61 = vrot.slane %v5884_v19, 7  ;;  %v5941_v0 = vrot.slane %v5884_v19, 1  ;;  %v13939_v55 = vsel %vm647_vm10, %v5884_v19, %v13544_v25 }
0x3a86   :  { %6035 = vmatprep.mubr.f32.mxu1 %v13939_v55 }
0x3a87   :  { %v5938_v49 = vsel %vm162_vm2, %v5936_v42, %v5935_v61  ;;  %v5943_v14 = vsel %vm223_vm3, %v5941_v0, %v5942_v24  ;;  %v5944_v1 = vsel %vm223_vm3, %v5942_v24, %v5941_v0  ;;  %v5937_v50 = vsel %vm162_vm2, %v5935_v61, %v5936_v42 }
0x3a88   :  { %v5939_v45 = vmul.f32 %v5938_v49, %v13086_v47  ;;  %v5945_v25 = vmul.f32 %v5943_v14, %v13072_v63  ;;  %v5946_v9 = vmul.f32 %v5944_v1, %v13070_v56  ;;  %v5940_v36 = vmul.f32 %v5937_v50, %v13088_v16  ;;  %v9039_v1 = vld [vmem:[#allocation2 + $0x9e8] ss:$0 sm:$0xff] }
0x3a8a   :  { %v5961_v60 = vsel %vm647_vm10, %v5939_v45, %v5950_v7  ;;  %v5965_v18 = vsel %vm647_vm10, %v5945_v25, %v11833_v48  ;;  %v5966_v15 = vsel %vm647_vm10, %v5946_v9, %v11834_v52  ;;  %v5962_v54 = vsel %vm647_vm10, %v5940_v36, %v5952_v31 }
0x3a8b   :  { %6036 = vmatmul.mubr.f32.vlgmr.msra.gmra.mrb[50].mxu1 %v5961_v60  ;;  %10354 = vmatprep.mubr.f32.mxu0 %v5965_v18 }
0x3a8c   :  { %6040 = vmatprep.mubr.f32.mxu1 %v13959_v40  ;;  %10355 = vmatmul.mubr.f32.vlgmr.msra.gmra.mrb[56].mxu0 %v5966_v15 }
0x3a8d   :  { %10361 = vmatprep.mubr.msk.f32.mxu0 %vm12144_vm9, %v14599_v44  ;;  %11477 = vmatpush3.bf16.msra.mxu1 %v12505_v53 }
0x3a8e   :  { %11478 = vmatprep.subr.bf16.mxu1 %v14598_v32 }
0x3a8f   :  { %6041 = vmatmul.mubr.f32.gmra.mrb[52].mxu1 %v5962_v54 }
0x3a90   :  { %10380 = vmatprep.mubr.msk.f32.mxu1 %vm12144_vm9, %v14599_v44 }
0x3a91   :  { %11480 = vmatpush3.bf16.msra.mxu1 %v12511_v29 }
0x3a92   :  { %11481 = vmatprep.subr.bf16.mxu1 %v14598_v32 }
0x3a95   :  { %11483 = vmatpush3.bf16.msra.mxu1 %v12517_v57 }
0x3a96   :  { %11484 = vmatprep.subr.bf16.mxu1 %v14598_v32 }
0x3a99   :  { %11486 = vmatpush3.bf16.msra.mxu1 %v12521_v51 }
0x3a9a   :  { %11511 = vmatprep.subr.bf16.mxu1 %v14598_v32 }
0x3b5e   :  { %v9465_v27 = vpop.f32.mrb[50].mxu1 }
0x3b5f   :  { %v9466_v62 = vpop.f32.mrb[51].mxu1  ;;  %v10356_v35 = vpop.f32.mrb[56].mxu0 }
0x3b60   :  { %v9467_v41 = vadd.f32 %v9466_v62, %v9465_v27  ;;  %v6112_v33 = vpop.f32.mrb[57].mxu0 }
0x3b62   :  { %v6038_v17 = vadd.f32 %v9467_v41, %v9036_v43  ;;  %v9468_v5 = vpop.f32.mrb[52].mxu1 }
0x3b63   :  { %v9469_v38 = vpop.f32.mrb[53].mxu1 }
0x3b64   :  { %v13975_v7 = vadd.f32 %v6112_v33, %v6038_v17  ;;  %v9470_v23 = vadd.f32 %v9469_v38, %v9468_v5  ;;  %v6378_v5 = vld [vmem:[#allocation2 + $0x9f8] sm:$0xff]  ;;  %v6379_v38 = vld [vmem:[#allocation2 + $0xa00] sm:$0xff] }
0x3b66   :  { %v6043_v10 = vadd.f32 %v9470_v23, %v9036_v43  ;;  %v6121_v46 = vmul.f32 %v13975_v7, %v13975_v7  ;;  %v6380_v23 = vld [vmem:[#allocation2 + $0xa08] sm:$0xff] }
0x3b68   :  { %v13977_v30 = vadd.f32 %v10356_v35, %v6043_v10  ;;  %v11487_v10 = vpack.c.bf16 %v6379_v38, %v6378_v5 }
0x3b6a   :  { %v6122_v4 = vmul.f32 %v13977_v30, %v13977_v30 }
0x3b6c   :  { %v11835_v19 = vpack.i.bf16 %v6122_v4, %v6121_v46  ;;  %v6381_v46 = vld [vmem:[#allocation2 + $0xa10] sm:$0xff] }
0x3b6d   :  { %v11491_v4 = vpack.c.bf16 %v6381_v46, %v6380_v23  ;;  %v6361_v46 = vld [vmem:[%s14567_s1 + $0x30] sm:$0x3] }
0x3b6e   :  { %11836 = vrot.lane.b32.xlu0 %v11835_v19, %s12142_s6  ;;  %v6382_v19 = vld [vmem:[#allocation2 + $0xa18] sm:$0xff] }
0x3b72   :  { %6292 = vrot.lane.b32.xlu0 %v9039_v1, %s12142_s6  ;;  %v9040_v1 = vld [vmem:[#allocation2 + $0x9f0] ss:$0 sm:$0xff] }
0x3be0   :  { %v11837_v13 = vpop.permute.xlu0 %11836 }
0x3be1   :  { %v11839_v42 = vunpack.i.h.bf16 %v11837_v13  ;;  %v11838_v24 = vunpack.i.l.bf16 %v11837_v13  ;;  %v6383_v13 = vld [vmem:[#allocation2 + $0xa20] sm:$0xff] }
0x3be3   :  { %v6132_v61 = vsel %vm434_vm7, %v13977_v30, %v11839_v42  ;;  %v6131_v0 = vsel %vm434_vm7, %v13975_v7, %v11838_v24  ;;  %v11495_v42 = vpack.c.bf16 %v6383_v13, %v6382_v19  ;;  %v6384_v24 = vld [vmem:[#allocation2 + $0xa28] sm:$0xff]  ;;  %v6365_v13 = vrot.slane %v6361_v46, %v12211_v37 }
0x3be4   :  { %v11473_v52 = vpack.c.bf16 %v6132_v61, %v6131_v0  ;;  %v6293_v15 = vpop.permute.xlu0 %6292  ;;  %v6385_v61 = vld [vmem:[#allocation2 + $0xa30] sm:$0xff] }
0x3be5   :  { %v11499_v0 = vpack.c.bf16 %v6385_v61, %v6384_v24 }
0x3be6   :  { %11474 = vmatpush3.bf16.msra.mxu0 %v11473_v52  ;;  %v6386_v52 = vld [vmem:[#allocation2 + $0xa38] sm:$0xff] }
0x3be7   :  { %11488 = vmatprep.subr.bf16.mxu0 %v11487_v10 }
0x3be9   :  { %10362 = vmatmul.mubr.msk.f32.vlgmr.msra.gmra.mrb[58].mxu0 %vm429_vm6, %v13783_v26 }
0x3bea   :  { %11490 = vmatpush3.bf16.msra.mxu0 %v11487_v10 }
0x3beb   :  { %11492 = vmatprep.subr.bf16.mxu0 %v11491_v4 }
0x3bee   :  { %11494 = vmatpush3.bf16.msra.mxu0 %v11491_v4  ;;  %v6389_v4 = vld [vmem:[#allocation2 + $0xa50] sm:$0xff] }
0x3bef   :  { %11496 = vmatprep.subr.bf16.mxu0 %v11495_v42 }
0x3bf2   :  { %11498 = vmatpush3.bf16.msra.mxu0 %v11495_v42  ;;  %v6367_v42 = vmul.f32 %v6365_v13, %v13175_v11 }
0x3bf3   :  { %11500 = vmatprep.subr.bf16.mxu0 %v11499_v0 }
0x3bf6   :  { %11502 = vmatpush3.bf16.msra.mxu0 %v11499_v0  ;;  %v6748_v0 = vld [vmem:[#allocation2 + $0xa70] sm:$0xff] }
0x3cbc   :  { %v6199_v49 = vpop.f32.mrb[58].mxu0 }
0x3cbd   :  { %10381 = vmatmul.mubr.msk.f32.vlgmr.msra.gmra.mrb[54].mxu1 %vm647_vm10, %v6199_v49  ;;  %v10363_v14 = vpop.f32.mrb[59].mxu0  ;;  %v6387_v49 = vld [vmem:[#allocation2 + $0xa40] sm:$0xff] }
0x3cbe   :  { %10414 = vmatprep.mubr.msk.f32.mxu1 %vm12144_vm9, %v14599_v44  ;;  %v11503_v14 = vpack.c.bf16 %v6387_v49, %v6386_v52  ;;  %v6749_v52 = vld [vmem:[#allocation2 + $0xa78] sm:$0xff] }
0x3cc0   :  { %11504 = vmatprep.subr.bf16.mxu0 %v11503_v14 }
0x3cc1   :  { %11506 = vmatpush3.bf16.msra.mxu0 %v11503_v14  ;;  %v6366_v14 = vmul.f32 %v6365_v13, %v13165_v22 }
0x3d90   :  { %v6272_v50 = vpop.f32.mrb[54].mxu1 }
0x3d91   :  { %v6276_v45 = vmul.f32 0.03125, %v6272_v50  ;;  %v10382_v48 = vpop.f32.mrb[55].mxu1 }
0x3d93   :  { %v6277_v25 = vmul.f32 %v6276_v45, %v6276_v45 }
0x3d95   :  { %6279 = vrot.lane.b32.xlu1 %v6277_v25, %s12142_s6 }
0x3e07   :  { %v6280_v9 = vpop.permute.xlu1 %6279 }
0x3e08   :  { %v6282_v60 = vsub.f32 %v6276_v45, %v6280_v9 }
0x3e0a   :  { %v6283_v18 = vmax.f32 %v6282_v60, 0.0 }
0x3e0c   :  { %v6284_v26 = vadd.f32 1e-05, %v6283_v18 }
0x3e0e   :  { %12032 = vrsqrt.f32 %v6284_v26 }
0x3e18   :  { %v12033_v36 = vpop.eup %12032 }
0x3e19   :  { %v6295_v31 = vmul.f32 %v12033_v36, %v6293_v15 }
0x3e1b   :  { %v6310_v54 = vrot.slane %v6295_v31, %v12211_v37  ;;  %v6316_v27 = vrot.slane %v6295_v31, %v12214_v39  ;;  %6298 = vrot.lane.b32.xlu1 %v6295_v31, %s12147_s7 }
0x3e1d   :  { %v6311_v62 = vmul.f32 %v6310_v54, %v13165_v22  ;;  %v6312_v35 = vmul.f32 %v6310_v54, %v13175_v11  ;;  %v6317_v43 = vmul.f32 %v6316_v27, %v13167_v8  ;;  %v6318_v41 = vmul.f32 %v6316_v27, %v13169_v6 }
0x3e1f   :  { %v6320_v33 = vadd.f32 %v6318_v41, %v6312_v35  ;;  %v6319_v17 = vadd.f32 %v6317_v43, %v6311_v62 }
0x3e21   :  { %6325 = vrot.lane.b32.xlu1 %v6320_v33, %s12147_s7  ;;  %6323 = vrot.lane.b32.xlu0 %v6319_v17, %s12147_s7 }
0x3e8d   :  { %v6299_v50 = vpop.permute.xlu1 %6298 }
0x3e8e   :  { %v6301_v48 = vmul.f32 %v6299_v50, %v6276_v45 }
0x3e90   :  { %v6306_v25 = vsub.f32 %v9040_v1, %v6301_v48  ;;  %v11526_v1 = vpack.c.bf16 %v6749_v52, %v6748_v0  ;;  %v6754_v52 = vld [vmem:[#allocation2 + $0xaa0] sm:$0xff] }
0x3e92   :  { %v6334_v9 = vrot.slane %v6306_v25, %v12211_v37  ;;  %v6340_v60 = vrot.slane %v6306_v25, %v12214_v39 }
0x3e93   :  { %v6326_v18 = vpop.permute.xlu1 %6325  ;;  %v6324_v31 = vpop.permute.xlu0 %6323 }
0x3e94   :  { %v6336_v26 = vmul.f32 %v6334_v9, %v13175_v11  ;;  %v6342_v15 = vmul.f32 %v6340_v60, %v13169_v6  ;;  %v6335_v36 = vmul.f32 %v6334_v9, %v13165_v22  ;;  %v6341_v54 = vmul.f32 %v6340_v60, %v13167_v8 }
0x3e95   :  { %v6330_v62 = vmul.f32 %v6326_v18, %v13977_v30  ;;  %v6329_v45 = vmul.f32 %v6324_v31, %v13975_v7  ;;  %v6388_v30 = vld [vmem:[#allocation2 + $0xa48] sm:$0xff]  ;;  %v6371_v7 = vrot.slane %v6361_v46, %v12214_v39 }
0x3e96   :  { %v6344_v27 = vadd.f32 %v6342_v15, %v6336_v26  ;;  %v6343_v35 = vadd.f32 %v6341_v54, %v6335_v36  ;;  %v11507_v19 = vpack.c.bf16 %v6389_v4, %v6388_v30 }
0x3e97   :  { %v6373_v24 = vmul.f32 %v6371_v7, %v13169_v6  ;;  %v6372_v61 = vmul.f32 %v6371_v7, %v13167_v8 }
0x3e98   :  { %v6346_v43 = vadd.f32 %v6344_v27, %v6330_v62  ;;  %v6345_v41 = vadd.f32 %v6343_v35, %v6329_v45  ;;  %11508 = vmatprep.subr.bf16.mxu0 %v11507_v19 }
0x3e99   :  { %11510 = vmatpush3.bf16.msra.mxu0 %v11507_v19  ;;  %v6375_v48 = vadd.f32 %v6373_v24, %v6367_v42  ;;  %v6374_v9 = vadd.f32 %v6372_v61, %v6366_v14  ;;  %v6752_v24 = vld [vmem:[#allocation2 + $0xa90] sm:$0xff]  ;;  %v6753_v61 = vld [vmem:[#allocation2 + $0xa98] sm:$0xff] }
0x3e9a   :  { %v9042_v33 = vmul.f32 -1.442695, %v6346_v43  ;;  %v9041_v17 = vmul.f32 -1.442695, %v6345_v41  ;;  %11527 = vmatprep.subr.bf16.mxu0 %v11526_v1  ;;  %v11534_v0 = vpack.c.bf16 %v6753_v61, %v6752_v24 }
0x3e9c   :  { %12034 = vpow2.f32 %v9042_v33 }
0x3e9d   :  { %12036 = vpow2.f32 %v9041_v17 }
0x3ea6   :  { %v12035_v5 = vpop.eup %12034 }
0x3ea7   :  { %v12037_v38 = vpop.eup %12036  ;;  %v6354_v23 = vadd.f32 1.0, %v12035_v5 }
0x3ea8   :  { %v6353_v10 = vadd.f32 1.0, %v12037_v38 }
0x3ea9   :  { %12038 = vrcp.f32 %v6354_v23  ;;  %v6750_v23 = vld [vmem:[#allocation2 + $0xa80] sm:$0xff] }
0x3eaa   :  { %12040 = vrcp.f32 %v6353_v10  ;;  %v6751_v10 = vld [vmem:[#allocation2 + $0xa88] sm:$0xff] }
0x3eab   :  { %v11530_v42 = vpack.c.bf16 %v6751_v10, %v6750_v23 }
0x3eb3   :  { %v12039_v49 = vpop.eup %12038 }
0x3eb4   :  { %v12041_v50 = vpop.eup %12040  ;;  %v6360_v25 = vmul.f32 %v12039_v49, %v6346_v43  ;;  %v6755_v49 = vld [vmem:[#allocation2 + $0xaa8] sm:$0xff] }
0x3eb5   :  { %v6359_v60 = vmul.f32 %v12041_v50, %v6345_v41  ;;  %v11538_v14 = vpack.c.bf16 %v6755_v49, %v6754_v52  ;;  %v6756_v50 = vld [vmem:[#allocation2 + $0xab0] sm:$0xff] }
0x3eb6   :  { %v6377_v18 = vadd.f32 %v6375_v48, %v6360_v25  ;;  %v6757_v48 = vld [vmem:[#allocation2 + $0xab8] sm:$0xff] }
0x3eb7   :  { %v6376_v26 = vadd.f32 %v6374_v9, %v6359_v60  ;;  %v11542_v25 = vpack.c.bf16 %v6757_v48, %v6756_v50  ;;  %v6758_v9 = vld [vmem:[#allocation2 + $0xac0] sm:$0xff]  ;;  %v6759_v60 = vld [vmem:[#allocation2 + $0xac8] sm:$0xff] }
0x3eb8   :  { %v6392_v15 = vrot.slane %v6377_v18, 7  ;;  %v6398_v36 = vrot.slane %v6377_v18, 1  ;;  %6407 = vrot.lane.b32.xlu1 %v6377_v18, %s12142_s6  ;;  %v11546_v18 = vpack.c.bf16 %v6759_v60, %v6758_v9 }
0x3eb9   :  { %v6391_v31 = vrot.slane %v6376_v26, 7  ;;  %v6397_v54 = vrot.slane %v6376_v26, 1  ;;  %6405 = vrot.lane.b32.xlu0 %v6376_v26, %s12142_s6  ;;  %v6761_v26 = vld [vmem:[#allocation2 + $0xad8] sm:$0xff] }
0x3ebb   :  { %v6400_v27 = vsel %vm223_vm3, %v6398_v36, %v6397_v54  ;;  %v6399_v62 = vsel %vm223_vm3, %v6397_v54, %v6398_v36  ;;  %v6393_v35 = vsel %vm162_vm2, %v6391_v31, %v6392_v15  ;;  %v6394_v45 = vsel %vm162_vm2, %v6392_v15, %v6391_v31  ;;  %v6762_v15 = vld [vmem:[#allocation2 + $0xae0] sm:$0xff]  ;;  %v6763_v36 = vld [vmem:[#allocation2 + $0xae8] sm:$0xff] }
0x3ebc   :  { %v6402_v43 = vmul.f32 %v6400_v27, %v13070_v56  ;;  %v6401_v41 = vmul.f32 %v6399_v62, %v13072_v63  ;;  %v6396_v5 = vmul.f32 %v6393_v35, %v13088_v16  ;;  %v6395_v38 = vmul.f32 %v6394_v45, %v13086_v47 }
0x3ebd   :  { %v11554_v31 = vpack.c.bf16 %v6763_v36, %v6762_v15 }
0x3ebe   :  { %6415 = vrot.lane.b32.xlu1 %v6402_v43, %s12148_s10  ;;  %6413 = vrot.lane.b32.xlu0 %v6401_v41, %s12148_s10 }
0x3f2a   :  { %v6408_v33 = vpop.permute.xlu1 %6407 }
0x3f2b   :  { %v6406_v17 = vpop.permute.xlu0 %6405  ;;  %v6420_v46 = vsel %vm434_vm7, %v6396_v5, %v6408_v33 }
0x3f2c   :  { %v6419_v30 = vsel %vm434_vm7, %v6395_v38, %v6406_v17 }
0x3f30   :  { %v6416_v4 = vpop.permute.xlu1 %6415  ;;  %v6414_v7 = vpop.permute.xlu0 %6413 }
0x3f31   :  { %v6422_v19 = vsel %vm647_vm10, %v6420_v46, %v6416_v4  ;;  %v6421_v13 = vsel %vm647_vm10, %v6419_v30, %v6414_v7  ;;  %v14074_v4 = vld [vmem:[#allocation2 + $0xd90] sm:$0x3] }
0x3f32   :  { %10407 = vmatprep.mubr.msk.f32.mxu0 %vm990_vm11, %v6421_v13  ;;  %v9048_v13 = vld [vmem:[#allocation2 + $0xa60] ss:$0 sm:$0xff] }
0x3f33   :  { %10408 = vmatmul.mubr.msk.f32.vlgmr.msra.gmra.mrb[60].mxu0 %vm990_vm11, %v6422_v19 }
0x3f34   :  { %11529 = vmatpush3.bf16.msra.mxu0 %v11526_v1  ;;  %10468 = vmatprep.mubr.f32.mxu0 %v13939_v55  ;;  %v6760_v1 = vld [vmem:[#allocation2 + $0xad0] sm:$0xff] }
0x3f35   :  { %11531 = vmatprep.subr.bf16.mxu0 %v11530_v42  ;;  %v11550_v55 = vpack.c.bf16 %v6761_v26, %v6760_v1 }
0x3f38   :  { %11533 = vmatpush3.bf16.msra.mxu0 %v11530_v42 }
0x3f39   :  { %11535 = vmatprep.subr.bf16.mxu0 %v11534_v0 }
0x3f3c   :  { %11537 = vmatpush3.bf16.msra.mxu0 %v11534_v0 }
0x3f3d   :  { %11539 = vmatprep.subr.bf16.mxu0 %v11538_v14 }
0x3f40   :  { %11541 = vmatpush3.bf16.msra.mxu0 %v11538_v14 }
0x3f41   :  { %11543 = vmatprep.subr.bf16.mxu0 %v11542_v25 }
0x3f44   :  { %11545 = vmatpush3.bf16.msra.mxu0 %v11542_v25 }
0x3f45   :  { %11547 = vmatprep.subr.bf16.mxu0 %v11546_v18 }
0x3f48   :  { %11549 = vmatpush3.bf16.msra.mxu0 %v11546_v18 }
0x3f49   :  { %11551 = vmatprep.subr.bf16.mxu0 %v11550_v55 }
0x3f4c   :  { %11553 = vmatpush3.bf16.msra.mxu0 %v11550_v55 }
0x3f4d   :  { %11555 = vmatprep.subr.bf16.mxu0 %v11554_v31 }
0x3f50   :  { %11557 = vmatpush3.bf16.msra.mxu0 %v11554_v31 }
0x3f51   :  { %11585 = vmatprep.subr.bf16.mxu0 %v14598_v32 }
0x3f53   :  { %10469 = vmatmul.mubr.f32.vlgmr.msra.gmra.mrb[62].mxu0 %v13959_v40  ;;  %v9043_v40 = vld [vmem:[#allocation2 + $0xa58] ss:$0 sm:$0xff] }
0x3f54   :  { %11587 = vmatpush3.bf16.msra.mxu0 %v12505_v53  ;;  %10521 = vmatprep.mubr.msk.f32.mxu0 %vm12144_vm9, %v14599_v44 }
0x3f55   :  { %11588 = vmatprep.subr.bf16.mxu0 %v14598_v32 }
0x3f58   :  { %11590 = vmatpush3.bf16.msra.mxu0 %v12511_v29 }
0x3f59   :  { %11591 = vmatprep.subr.bf16.mxu0 %v14598_v32 }
0x3f5c   :  { %11593 = vmatpush3.bf16.msra.mxu0 %v12517_v57 }
0x3f5d   :  { %11594 = vmatprep.subr.bf16.mxu0 %v14598_v32 }
0x3f60   :  { %11596 = vmatpush3.bf16.msra.mxu0 %v12521_v51 }
0x3f61   :  { %11621 = vmatprep.subr.bf16.mxu0 %v14598_v32 }
0x4006   :  { %v10409_v54 = vpop.f32.mrb[60].mxu0 }
0x4007   :  { %v14056_v27 = vadd.f32 %v10409_v54, %v9043_v40  ;;  %v6499_v62 = vpop.f32.mrb[61].mxu0  ;;  %v6847_v54 = vld [vmem:[#allocation2 + $0xb00] sm:$0xff] }
0x4008   :  { %v14058_v35 = vadd.f32 %v9043_v40, %v6499_v62  ;;  %v6846_v40 = vld [vmem:[#allocation2 + $0xaf8] sm:$0xff]  ;;  %v6848_v62 = vld [vmem:[#allocation2 + $0xb08] sm:$0xff] }
0x4009   :  { %v6509_v45 = vmul.f32 %v14056_v27, %v14056_v27 }
0x400a   :  { %v6508_v43 = vmul.f32 %v14058_v35, %v14058_v35 }
0x400c   :  { %v11840_v41 = vpack.i.bf16 %v6509_v45, %v6508_v43  ;;  %v11558_v45 = vpack.c.bf16 %v6847_v54, %v6846_v40  ;;  %v6849_v43 = vld [vmem:[#allocation2 + $0xb10] sm:$0xff] }
0x400e   :  { %11841 = vrot.lane.b32.xlu0 %v11840_v41, %s12142_s6  ;;  %v11562_v41 = vpack.c.bf16 %v6849_v43, %v6848_v62 }
0x4012   :  { %6679 = vrot.lane.b32.xlu0 %v9048_v13, %s12142_s6 }
0x4026   :  { %v14065_v33 = vpop.f32.mrb[62].mxu0 }
0x4027   :  { %v14067_v17 = vpop.f32.mrb[63].mxu0 }
0x4080   :  { %v11842_v5 = vpop.permute.xlu0 %11841 }
0x4081   :  { %v11844_v38 = vunpack.i.h.bf16 %v11842_v5  ;;  %v11843_v23 = vunpack.i.l.bf16 %v11842_v5  ;;  %v6850_v5 = vld [vmem:[#allocation2 + $0xb18] sm:$0xff] }
0x4083   :  { %v6519_v10 = vsel %vm434_vm7, %v14056_v27, %v11844_v38  ;;  %v6518_v46 = vsel %vm434_vm7, %v14058_v35, %v11843_v23  ;;  %v6851_v38 = vld [vmem:[#allocation2 + $0xb20] sm:$0xff] }
0x4084   :  { %v11512_v30 = vpack.c.bf16 %v6519_v10, %v6518_v46  ;;  %v6680_v48 = vpop.permute.xlu0 %6679  ;;  %v11566_v23 = vpack.c.bf16 %v6851_v38, %v6850_v5  ;;  %v6852_v10 = vld [vmem:[#allocation2 + $0xb28] sm:$0xff]  ;;  %v6853_v46 = vld [vmem:[#allocation2 + $0xb30] sm:$0xff] }
0x4085   :  { %v6857_v5 = vld [vmem:[#allocation2 + $0xb50] sm:$0xff] }
0x4086   :  { %11513 = vmatpush3.bf16.msra.mxu1 %v11512_v30  ;;  %v11570_v30 = vpack.c.bf16 %v6853_v46, %v6852_v10 }
0x4087   :  { %11514 = vmatprep.subr.bf16.mxu1 %v14598_v32 }
0x4089   :  { %10415 = vmatmul.mubr.msk.f32.vlgmr.msra.gmra.mrb[56].mxu1 %vm429_vm6, %v14074_v4 }
0x408a   :  { %11516 = vmatpush3.bf16.msra.mxu1 %v12505_v53  ;;  %10433 = vmatprep.mubr.msk.f32.mxu1 %vm12144_vm9, %v14599_v44 }
0x408b   :  { %11517 = vmatprep.subr.bf16.mxu1 %v14598_v32 }
0x408e   :  { %11519 = vmatpush3.bf16.msra.mxu1 %v12511_v29 }
0x408f   :  { %11520 = vmatprep.subr.bf16.mxu1 %v14598_v32 }
0x4092   :  { %11522 = vmatpush3.bf16.msra.mxu1 %v12517_v57 }
0x4093   :  { %11523 = vmatprep.subr.bf16.mxu1 %v14598_v32 }
0x4096   :  { %11525 = vmatpush3.bf16.msra.mxu1 %v12521_v51 }
0x4097   :  { %11559 = vmatprep.subr.bf16.mxu1 %v11558_v45 }
0x415c   :  { %v6586_v7 = vpop.f32.mrb[56].mxu1 }
0x415d   :  { %10434 = vmatmul.mubr.msk.f32.vlgmr.msra.gmra.mrb[58].mxu1 %vm647_vm10, %v6586_v7  ;;  %v10416_v19 = vpop.f32.mrb[57].mxu1  ;;  %v6854_v7 = vld [vmem:[#allocation2 + $0xb38] sm:$0xff] }
0x415e   :  { %11561 = vmatpush3.bf16.msra.mxu1 %v11558_v45  ;;  %v6855_v19 = vld [vmem:[#allocation2 + $0xb40] sm:$0xff] }
0x415f   :  { %11563 = vmatprep.subr.bf16.mxu1 %v11562_v41  ;;  %v11574_v13 = vpack.c.bf16 %v6855_v19, %v6854_v7 }
0x4162   :  { %11565 = vmatpush3.bf16.msra.mxu1 %v11562_v41  ;;  %v6856_v41 = vld [vmem:[#allocation2 + $0xb48] sm:$0xff] }
0x4163   :  { %11567 = vmatprep.subr.bf16.mxu1 %v11566_v23  ;;  %v11578_v38 = vpack.c.bf16 %v6857_v5, %v6856_v41 }
0x4166   :  { %11569 = vmatpush3.bf16.msra.mxu1 %v11566_v23 }
0x4167   :  { %11571 = vmatprep.subr.bf16.mxu1 %v11570_v30 }
0x416a   :  { %11573 = vmatpush3.bf16.msra.mxu1 %v11570_v30 }
0x416b   :  { %11575 = vmatprep.subr.bf16.mxu1 %v11574_v13 }
0x416e   :  { %11577 = vmatpush3.bf16.msra.mxu1 %v11574_v13 }
0x416f   :  { %11579 = vmatprep.subr.bf16.mxu1 %v11578_v38 }
0x4172   :  { %11581 = vmatpush3.bf16.msra.mxu1 %v11578_v38 }
0x4173   :  { %11582 = vmatprep.subr.bf16.mxu1 %v14598_v32 }
0x4230   :  { %v6659_v42 = vpop.f32.mrb[58].mxu1 }
0x4231   :  { %v6663_v24 = vmul.f32 0.03125, %v6659_v42  ;;  %v10435_v61 = vpop.f32.mrb[59].mxu1  ;;  %v9049_v42 = vld [vmem:[#allocation2 + $0xa68] ss:$0 sm:$0xff] }
0x4233   :  { %v6664_v0 = vmul.f32 %v6663_v24, %v6663_v24 }
0x4235   :  { %6666 = vrot.lane.b32.xlu1 %v6664_v0, %s12142_s6 }
0x42a7   :  { %v6667_v52 = vpop.permute.xlu1 %6666 }
0x42a8   :  { %v6669_v49 = vsub.f32 %v6663_v24, %v6667_v52 }
0x42aa   :  { %v6670_v14 = vmax.f32 %v6669_v49, 0.0 }
0x42ac   :  { %v6671_v50 = vadd.f32 1e-05, %v6670_v14 }
0x42ae   :  { %12042 = vrsqrt.f32 %v6671_v50 }
0x42b8   :  { %v12043_v25 = vpop.eup %12042 }
0x42b9   :  { %v6682_v9 = vmul.f32 %v12043_v25, %v6680_v48 }
0x42bb   :  { %v6697_v60 = vrot.slane %v6682_v9, %v12211_v37  ;;  %v6703_v18 = vrot.slane %v6682_v9, %v12214_v39  ;;  %6685 = vrot.lane.b32.xlu1 %v6682_v9, %s12147_s7 }
0x42bd   :  { %v6698_v1 = vmul.f32 %v6697_v60, %v13165_v22  ;;  %v6699_v26 = vmul.f32 %v6697_v60, %v13175_v11  ;;  %v6704_v55 = vmul.f32 %v6703_v18, %v13167_v8  ;;  %v6705_v15 = vmul.f32 %v6703_v18, %v13169_v6 }
0x42bf   :  { %v6707_v36 = vadd.f32 %v6705_v15, %v6699_v26  ;;  %v6706_v31 = vadd.f32 %v6704_v55, %v6698_v1 }
0x42c1   :  { %6712 = vrot.lane.b32.xlu1 %v6707_v36, %s12147_s7  ;;  %6710 = vrot.lane.b32.xlu0 %v6706_v31, %s12147_s7 }
0x432d   :  { %v6686_v61 = vpop.permute.xlu1 %6685 }
0x432e   :  { %v6688_v0 = vmul.f32 %v6686_v61, %v6663_v24 }
0x4330   :  { %v6693_v52 = vsub.f32 %v9049_v42, %v6688_v0 }
0x4332   :  { %v6721_v49 = vrot.slane %v6693_v52, %v12211_v37  ;;  %v6727_v14 = vrot.slane %v6693_v52, %v12214_v39 }
0x4333   :  { %v6713_v50 = vpop.permute.xlu1 %6712  ;;  %v6711_v60 = vpop.permute.xlu0 %6710 }
0x4334   :  { %v6723_v48 = vmul.f32 %v6721_v49, %v13175_v11  ;;  %v6729_v25 = vmul.f32 %v6727_v14, %v13169_v6  ;;  %v6722_v9 = vmul.f32 %v6721_v49, %v13165_v22  ;;  %v6728_v18 = vmul.f32 %v6727_v14, %v13167_v8 }
0x4335   :  { %v6717_v26 = vmul.f32 %v6713_v50, %v14056_v27  ;;  %v6716_v24 = vmul.f32 %v6711_v60, %v14058_v35  ;;  %v9052_v27 = vld [vmem:[#allocation2 + $0xaf0] ss:$0 sm:$0xff] }
0x4336   :  { %v6731_v1 = vadd.f32 %v6729_v25, %v6723_v48  ;;  %v6730_v55 = vadd.f32 %v6728_v18, %v6722_v9  ;;  %v6841_v10 = vadd.f32 %v14065_v33, %v9052_v27  ;;  %v6836_v30 = vadd.f32 %v9052_v27, %v14067_v17 }
0x4338   :  { %v6733_v15 = vadd.f32 %v6731_v1, %v6717_v26  ;;  %v6732_v36 = vadd.f32 %v6730_v55, %v6716_v24 }
0x433a   :  { %v9051_v31 = vmul.f32 -1.442695, %v6733_v15  ;;  %v9050_v40 = vmul.f32 -1.442695, %v6732_v36 }
0x433c   :  { %12044 = vpow2.f32 %v9051_v31  ;;  %v9053_v31 = vld [vmem:[#allocation2 + $0xb58] ss:$0 sm:$0xff] }
0x433d   :  { %12046 = vpow2.f32 %v9050_v40 }
0x4346   :  { %v12045_v54 = vpop.eup %12044 }
0x4347   :  { %v12047_v62 = vpop.eup %12046  ;;  %v6741_v45 = vadd.f32 1.0, %v12045_v54 }
0x4348   :  { %v6740_v43 = vadd.f32 1.0, %v12047_v62 }
0x4349   :  { %12048 = vrcp.f32 %v6741_v45 }
0x434a   :  { %12050 = vrcp.f32 %v6740_v43 }
0x4353   :  { %v12049_v35 = vpop.eup %12048 }
0x4354   :  { %v12051_v23 = vpop.eup %12050  ;;  %v6747_v46 = vmul.f32 %v12049_v35, %v6733_v15 }
0x4355   :  { %v6746_v7 = vmul.f32 %v12051_v23, %v6732_v36 }
0x4356   :  { %v14110_v19 = vadd.f32 %v6841_v10, %v6747_v46 }
0x4357   :  { %v14112_v13 = vadd.f32 %v6836_v30, %v6746_v7 }
0x4358   :  { %6875 = vrot.lane.b32.xlu1 %v14110_v19, %s12142_s6  ;;  %v6866_v42 = vrot.slane %v14110_v19, 1  ;;  %v6860_v14 = vrot.slane %v14110_v19, 7 }
0x4359   :  { %6873 = vrot.lane.b32.xlu0 %v14112_v13, %s12142_s6  ;;  %v6865_v61 = vrot.slane %v14112_v13, 1  ;;  %v6859_v49 = vrot.slane %v14112_v13, 7 }
0x435b   :  { %v6868_v33 = vsel %vm223_vm3, %v6866_v42, %v6865_v61  ;;  %v6867_v17 = vsel %vm223_vm3, %v6865_v61, %v6866_v42  ;;  %v6861_v48 = vsel %vm162_vm2, %v6859_v49, %v6860_v14  ;;  %v6862_v9 = vsel %vm162_vm2, %v6860_v14, %v6859_v49  ;;  %v9058_v42 = vld [vmem:[#allocation2 + $0xb60] ss:$0 sm:$0xff] }
0x435c   :  { %v6870_v0 = vmul.f32 %v6868_v33, %v13070_v56  ;;  %v6869_v52 = vmul.f32 %v6867_v17, %v13072_v63  ;;  %v6864_v60 = vmul.f32 %v6861_v48, %v13088_v16  ;;  %v6863_v18 = vmul.f32 %v6862_v9, %v13086_v47 }
0x435e   :  { %6883 = vrot.lane.b32.xlu1 %v6870_v0, %s12148_s10  ;;  %6881 = vrot.lane.b32.xlu0 %v6869_v52, %s12148_s10 }
0x43ca   :  { %v6876_v50 = vpop.permute.xlu1 %6875 }
0x43cb   :  { %v6874_v25 = vpop.permute.xlu0 %6873  ;;  %v6888_v1 = vsel %vm434_vm7, %v6864_v60, %v6876_v50 }
0x43cc   :  { %v6887_v26 = vsel %vm434_vm7, %v6863_v18, %v6874_v25 }
0x43d0   :  { %v6884_v55 = vpop.permute.xlu1 %6883  ;;  %v6882_v24 = vpop.permute.xlu0 %6881 }
0x43d1   :  { %v6890_v15 = vsel %vm647_vm10, %v6888_v1, %v6884_v55  ;;  %v6889_v36 = vsel %vm647_vm10, %v6887_v26, %v6882_v24 }
0x43d2   :  { %10495 = vmatprep.mubr.msk.f32.mxu1 %vm990_vm11, %v6889_v36 }
0x43d3   :  { %10496 = vmatmul.mubr.msk.f32.vlgmr.msra.gmra.mrb[60].mxu1 %vm990_vm11, %v6890_v15 }
0x43d4   :  { %10502 = vmatprep.mubr.msk.f32.mxu1 %vm12144_vm9, %v14599_v44 }
0x44a6   :  { %v10497_v40 = vpop.f32.mrb[60].mxu1 }
0x44a7   :  { %v14144_v54 = vadd.f32 %v10497_v40, %v9053_v31  ;;  %v6967_v62 = vpop.f32.mrb[61].mxu1  ;;  %v7234_v40 = vld [vmem:[#allocation2 + $0xb78] sm:$0xff] }
0x44a8   :  { %v14146_v45 = vadd.f32 %v9053_v31, %v6967_v62  ;;  %v7233_v31 = vld [vmem:[#allocation2 + $0xb70] sm:$0xff]  ;;  %v7235_v62 = vld [vmem:[#allocation2 + $0xb80] sm:$0xff] }
0x44a9   :  { %v6977_v43 = vmul.f32 %v14144_v54, %v14144_v54 }
0x44aa   :  { %v6976_v41 = vmul.f32 %v14146_v45, %v14146_v45 }
0x44ac   :  { %v11845_v5 = vpack.i.bf16 %v6977_v43, %v6976_v41  ;;  %v11597_v43 = vpack.c.bf16 %v7234_v40, %v7233_v31  ;;  %v7236_v41 = vld [vmem:[#allocation2 + $0xb88] sm:$0xff] }
0x44ae   :  { %11846 = vrot.lane.b32.xlu0 %v11845_v5, %s12142_s6  ;;  %v11601_v5 = vpack.c.bf16 %v7236_v41, %v7235_v62 }
0x44b2   :  { %7147 = vrot.lane.b32.xlu0 %v9058_v42, %s12142_s6 }
0x4520   :  { %v11847_v38 = vpop.permute.xlu0 %11846 }
0x4521   :  { %v11849_v27 = vunpack.i.h.bf16 %v11847_v38  ;;  %v11848_v35 = vunpack.i.l.bf16 %v11847_v38  ;;  %v7237_v38 = vld [vmem:[#allocation2 + $0xb90] sm:$0xff] }
0x4523   :  { %v6987_v23 = vsel %vm434_vm7, %v14144_v54, %v11849_v27  ;;  %v6986_v10 = vsel %vm434_vm7, %v14146_v45, %v11848_v35  ;;  %v7238_v27 = vld [vmem:[#allocation2 + $0xb98] sm:$0xff] }
0x4524   :  { %v11583_v46 = vpack.c.bf16 %v6987_v23, %v6986_v10  ;;  %v7148_v48 = vpop.permute.xlu0 %7147  ;;  %v11605_v35 = vpack.c.bf16 %v7238_v27, %v7237_v38  ;;  %v7239_v23 = vld [vmem:[#allocation2 + $0xba0] sm:$0xff]  ;;  %v7240_v10 = vld [vmem:[#allocation2 + $0xba8] sm:$0xff] }
0x4525   :  { %v7244_v38 = vld [vmem:[#allocation2 + $0xbc8] sm:$0xff] }
0x4526   :  { %11584 = vmatpush3.bf16.msra.mxu1 %v11583_v46  ;;  %v11609_v46 = vpack.c.bf16 %v7240_v10, %v7239_v23 }
0x4527   :  { %11598 = vmatprep.subr.bf16.mxu1 %v11597_v43 }
0x4529   :  { %10503 = vmatmul.mubr.msk.f32.vlgmr.msra.gmra.mrb[62].mxu1 %vm429_vm6, %v14074_v4 }
0x452a   :  { %11600 = vmatpush3.bf16.msra.mxu1 %v11597_v43 }
0x452b   :  { %11602 = vmatprep.subr.bf16.mxu1 %v11601_v5 }
0x452e   :  { %11604 = vmatpush3.bf16.msra.mxu1 %v11601_v5  ;;  %v7216_v5 = vld [vmem:[%s14567_s1 + $0x38] sm:$0x3]  ;;  %s12149_s1 = smov 112  }
0x452f   :  { %11606 = vmatprep.subr.bf16.mxu1 %v11605_v35 }
0x4532   :  { %11608 = vmatpush3.bf16.msra.mxu1 %v11605_v35  ;;  %v7220_v35 = vrot.slane %v7216_v5, %v12211_v37 }
0x4533   :  { %11610 = vmatprep.subr.bf16.mxu1 %v11609_v46 }
0x4534   :  { %v7222_v23 = vmul.f32 %v7220_v35, %v13175_v11 }
0x4536   :  { %11612 = vmatpush3.bf16.msra.mxu1 %v11609_v46 }
0x45fc   :  { %v7054_v30 = vpop.f32.mrb[62].mxu1 }
0x45fd   :  { %10522 = vmatmul.mubr.msk.f32.vlgmr.msra.gmra.mrb[64].mxu0 %vm647_vm10, %v7054_v30  ;;  %v10504_v7 = vpop.f32.mrb[63].mxu1  ;;  %v7241_v30 = vld [vmem:[#allocation2 + $0xbb0] sm:$0xff] }
0x45fe   :  { %10555 = vmatprep.mubr.msk.f32.mxu0 %vm12144_vm9, %v14599_v44  ;;  %v7242_v7 = vld [vmem:[#allocation2 + $0xbb8] sm:$0xff] }
0x45ff   :  { %v11613_v42 = vpack.c.bf16 %v7242_v7, %v7241_v30  ;;  %v7221_v7 = vmul.f32 %v7220_v35, %v13165_v22 }
0x4601   :  { %11614 = vmatprep.subr.bf16.mxu1 %v11613_v42 }
0x4602   :  { %11616 = vmatpush3.bf16.msra.mxu1 %v11613_v42 }
0x46d0   :  { %v7127_v61 = vpop.f32.mrb[64].mxu0 }
0x46d1   :  { %v7131_v33 = vmul.f32 0.03125, %v7127_v61  ;;  %v10523_v17 = vpop.f32.mrb[65].mxu0  ;;  %v9059_v61 = vld [vmem:[#allocation2 + $0xb68] ss:$0 sm:$0xff] }
0x46d3   :  { %v7132_v0 = vmul.f32 %v7131_v33, %v7131_v33 }
0x46d5   :  { %7134 = vrot.lane.b32.xlu1 %v7132_v0, %s12142_s6 }
0x4747   :  { %v7135_v52 = vpop.permute.xlu1 %7134 }
0x4748   :  { %v7137_v49 = vsub.f32 %v7131_v33, %v7135_v52 }
0x474a   :  { %v7138_v14 = vmax.f32 %v7137_v49, 0.0 }
0x474c   :  { %v7139_v50 = vadd.f32 1e-05, %v7138_v14 }
0x474e   :  { %12052 = vrsqrt.f32 %v7139_v50 }
0x4758   :  { %v12053_v25 = vpop.eup %12052 }
0x4759   :  { %v7150_v9 = vmul.f32 %v12053_v25, %v7148_v48 }
0x475b   :  { %v7165_v60 = vrot.slane %v7150_v9, %v12211_v37  ;;  %v7171_v18 = vrot.slane %v7150_v9, %v12214_v39  ;;  %7153 = vrot.lane.b32.xlu1 %v7150_v9, %s12147_s7 }
0x475d   :  { %v7166_v1 = vmul.f32 %v7165_v60, %v13165_v22  ;;  %v7167_v26 = vmul.f32 %v7165_v60, %v13175_v11  ;;  %v7172_v55 = vmul.f32 %v7171_v18, %v13167_v8  ;;  %v7173_v24 = vmul.f32 %v7171_v18, %v13169_v6 }
0x475f   :  { %v7175_v15 = vadd.f32 %v7173_v24, %v7167_v26  ;;  %v7174_v36 = vadd.f32 %v7172_v55, %v7166_v1 }
0x4761   :  { %7180 = vrot.lane.b32.xlu1 %v7175_v15, %s12147_s7  ;;  %7178 = vrot.lane.b32.xlu0 %v7174_v36, %s12147_s7 }
0x47cd   :  { %v7154_v17 = vpop.permute.xlu1 %7153 }
0x47ce   :  { %v7156_v0 = vmul.f32 %v7154_v17, %v7131_v33 }
0x47d0   :  { %v7161_v52 = vsub.f32 %v9059_v61, %v7156_v0 }
0x47d2   :  { %v7189_v49 = vrot.slane %v7161_v52, %v12211_v37  ;;  %v7195_v14 = vrot.slane %v7161_v52, %v12214_v39 }
0x47d3   :  { %v7181_v50 = vpop.permute.xlu1 %7180  ;;  %v7179_v60 = vpop.permute.xlu0 %7178 }
0x47d4   :  { %v7191_v48 = vmul.f32 %v7189_v49, %v13175_v11  ;;  %v7197_v25 = vmul.f32 %v7195_v14, %v13169_v6  ;;  %v7190_v9 = vmul.f32 %v7189_v49, %v13165_v22  ;;  %v7196_v18 = vmul.f32 %v7195_v14, %v13167_v8 }
0x47d5   :  { %v7185_v26 = vmul.f32 %v7181_v50, %v14144_v54  ;;  %v7184_v33 = vmul.f32 %v7179_v60, %v14146_v45  ;;  %v7243_v54 = vld [vmem:[#allocation2 + $0xbc0] sm:$0xff]  ;;  %v7226_v45 = vrot.slane %v7216_v5, %v12214_v39 }
0x47d6   :  { %v7199_v1 = vadd.f32 %v7197_v25, %v7191_v48  ;;  %v7198_v55 = vadd.f32 %v7196_v18, %v7190_v9  ;;  %v11617_v27 = vpack.c.bf16 %v7244_v38, %v7243_v54  ;;  %v9062_v38 = vld [vmem:[#allocation2 + $0xbd0] ss:$0 sm:$0xff] }
0x47d7   :  { %v7228_v10 = vmul.f32 %v7226_v45, %v13169_v6  ;;  %v7227_v46 = vmul.f32 %v7226_v45, %v13167_v8 }
0x47d8   :  { %v7201_v24 = vadd.f32 %v7199_v1, %v7185_v26  ;;  %v7200_v15 = vadd.f32 %v7198_v55, %v7184_v33  ;;  %11618 = vmatprep.subr.bf16.mxu1 %v11617_v27 }
0x47d9   :  { %11620 = vmatpush3.bf16.msra.mxu1 %v11617_v27  ;;  %v7230_v61 = vadd.f32 %v7228_v10, %v7222_v23  ;;  %v7229_v0 = vadd.f32 %v7227_v46, %v7221_v7 }
0x47da   :  { %v9061_v36 = vmul.f32 -1.442695, %v7201_v24  ;;  %v9060_v31 = vmul.f32 -1.442695, %v7200_v15 }
0x47dc   :  { %12054 = vpow2.f32 %v9061_v36 }
0x47dd   :  { %12056 = vpow2.f32 %v9060_v31 }
0x47e6   :  { %v12055_v40 = vpop.eup %12054 }
0x47e7   :  { %v12057_v62 = vpop.eup %12056  ;;  %v7209_v43 = vadd.f32 1.0, %v12055_v40 }
0x47e8   :  { %v7208_v41 = vadd.f32 1.0, %v12057_v62 }
0x47e9   :  { %12058 = vrcp.f32 %v7209_v43 }
0x47ea   :  { %12060 = vrcp.f32 %v7208_v41 }
0x47f3   :  { %v12059_v30 = vpop.eup %12058 }
0x47f4   :  { %v12061_v42 = vpop.eup %12060  ;;  %v7215_v17 = vmul.f32 %v12059_v30, %v7201_v24 }
0x47f5   :  { %v7214_v52 = vmul.f32 %v12061_v42, %v7200_v15 }
0x47f6   :  { %v7232_v49 = vadd.f32 %v7230_v61, %v7215_v17 }
0x47f7   :  { %v7231_v14 = vadd.f32 %v7229_v0, %v7214_v52 }
0x47f8   :  { %v7247_v50 = vrot.slane %v7232_v49, 7  ;;  %v7253_v48 = vrot.slane %v7232_v49, 1  ;;  %7262 = vrot.lane.b32.xlu1 %v7232_v49, %s12142_s6 }
0x47f9   :  { %v7246_v25 = vrot.slane %v7231_v14, 7  ;;  %v7252_v9 = vrot.slane %v7231_v14, 1  ;;  %7260 = vrot.lane.b32.xlu0 %v7231_v14, %s12142_s6 }
0x47fb   :  { %v7255_v60 = vsel %vm223_vm3, %v7253_v48, %v7252_v9  ;;  %v7254_v18 = vsel %vm223_vm3, %v7252_v9, %v7253_v48  ;;  %v7248_v1 = vsel %vm162_vm2, %v7246_v25, %v7247_v50  ;;  %v7249_v26 = vsel %vm162_vm2, %v7247_v50, %v7246_v25 }
0x47fc   :  { %v7257_v55 = vmul.f32 %v7255_v60, %v13070_v56  ;;  %v7256_v33 = vmul.f32 %v7254_v18, %v13072_v63  ;;  %v7251_v36 = vmul.f32 %v7248_v1, %v13088_v16  ;;  %v7250_v31 = vmul.f32 %v7249_v26, %v13086_v47 }
0x47fe   :  { %7270 = vrot.lane.b32.xlu1 %v7257_v55, %s12148_s10  ;;  %7268 = vrot.lane.b32.xlu0 %v7256_v33, %s12148_s10 }
0x486a   :  { %v7263_v24 = vpop.permute.xlu1 %7262 }
0x486b   :  { %v7261_v15 = vpop.permute.xlu0 %7260  ;;  %v7275_v40 = vsel %vm434_vm7, %v7251_v36, %v7263_v24 }
0x486c   :  { %v7274_v62 = vsel %vm434_vm7, %v7250_v31, %v7261_v15  ;;  %v7621_v31 = vld [vmem:[#allocation2 + $0xd38] sm:$0xff] }
0x4870   :  { %v7271_v43 = vpop.permute.xlu1 %7270  ;;  %v7269_v41 = vpop.permute.xlu0 %7268 }
0x4871   :  { %v7277_v5 = vsel %vm647_vm10, %v7275_v40, %v7271_v43  ;;  %v7276_v54 = vsel %vm647_vm10, %v7274_v62, %v7269_v41  ;;  %v7622_v40 = vld [vmem:[#allocation2 + $0xd40] sm:$0xff]  ;;  %v7623_v62 = vld [vmem:[#allocation2 + $0xd48] sm:$0xff]  ;;  %v7624_v41 = vld [vmem:[#allocation2 + $0xd50] sm:$0xff] }
0x4872   :  { %10548 = vmatprep.mubr.msk.f32.mxu1 %vm990_vm11, %v7276_v54  ;;  %v11636_v43 = vpack.c.bf16 %v7622_v40, %v7621_v31  ;;  %v7625_v54 = vld [vmem:[#allocation2 + $0xd58] sm:$0xff] }
0x4873   :  { %10549 = vmatmul.mubr.msk.f32.vlgmr.msra.gmra.mrb[64].mxu1 %vm990_vm11, %v7277_v5  ;;  %v11640_v5 = vpack.c.bf16 %v7624_v41, %v7623_v62 }
0x4874   :  { %11637 = vmatprep.subr.bf16.mxu1 %v11636_v43 }
0x4875   :  { %11639 = vmatpush3.bf16.msra.mxu1 %v11636_v43  ;;  %v7718_v43 = vld [vmem:[#allocation2 + $0xfa0] sm:$0xff] }
0x4876   :  { %11641 = vmatprep.subr.bf16.mxu1 %v11640_v5 }
0x4879   :  { %11643 = vmatpush3.bf16.msra.mxu1 %v11640_v5 }
0x4946   :  { %v10550_v45 = vpop.f32.mrb[64].mxu1 }
0x4947   :  { %v14212_v27 = vadd.f32 %v10550_v45, %v9062_v38  ;;  %v7354_v16 = vpop.f32.mrb[65].mxu1 }
0x4948   :  { %v14214_v47 = vadd.f32 %v9062_v38, %v7354_v16  ;;  %v7626_v38 = vld [vmem:[#allocation2 + $0xd60] sm:$0xff]  ;;  %v7627_v16 = vld [vmem:[#allocation2 + $0xd68] sm:$0xff] }
0x4949   :  { %v7364_v35 = vmul.f32 %v14212_v27, %v14212_v27  ;;  %v11644_v45 = vpack.c.bf16 %v7626_v38, %v7625_v54 }
0x494a   :  { %v7363_v23 = vmul.f32 %v14214_v47, %v14214_v47 }
0x494b   :  { %11645 = vmatprep.subr.bf16.mxu1 %v11644_v45 }
0x494c   :  { %v11850_v10 = vpack.i.bf16 %v7364_v35, %v7363_v23  ;;  %v7628_v35 = vld [vmem:[#allocation2 + $0xd70] sm:$0xff]  ;;  %11647 = vmatpush3.bf16.msra.mxu1 %v11644_v45 }
0x494d   :  { %v11648_v23 = vpack.c.bf16 %v7628_v35, %v7627_v16  ;;  %v7719_v35 = vld [vmem:[#allocation2 + $0xfa8] sm:$0xff] }
0x494e   :  { %11851 = vrot.lane.b32.xlu0 %v11850_v10, %s12142_s6  ;;  %v9068_v10 = vld [vmem:[#allocation2 + $0xbe0] ss:$0 sm:$0xff] }
0x494f   :  { %11649 = vmatprep.subr.bf16.mxu1 %v11648_v23 }
0x4950   :  { %11651 = vmatpush3.bf16.msra.mxu1 %v11648_v23  ;;  %v7720_v23 = vld [vmem:[#allocation2 + $0xfb0] sm:$0xff] }
0x49c0   :  { %v11852_v46 = vpop.permute.xlu0 %11851 }
0x49c1   :  { %v11854_v30 = vunpack.i.h.bf16 %v11852_v46  ;;  %v11853_v7 = vunpack.i.l.bf16 %v11852_v46 }
0x49c3   :  { %v7374_v42 = vsel %vm434_vm7, %v14212_v27, %v11854_v30  ;;  %v7373_v61 = vsel %vm434_vm7, %v14214_v47, %v11853_v7 }
0x49c4   :  { %v11622_v17 = vpack.c.bf16 %v7374_v42, %v7373_v61 }
0x49c6   :  { %11623 = vmatpush3.bf16.msra.mxu0 %v11622_v17 }
0x49c7   :  { %11624 = vmatprep.subr.bf16.mxu0 %v14598_v32 }
0x49c9   :  { %10556 = vmatmul.mubr.msk.f32.vlgmr.msra.gmra.mrb[66].mxu0 %vm429_vm6, %v14074_v4 }
0x49ca   :  { %11626 = vmatpush3.bf16.msra.mxu0 %v12505_v53  ;;  %10574 = vmatprep.mubr.msk.f32.mxu0 %vm12144_vm9, %v14599_v44  ;;  %v9067_v53 = vld [vmem:[#allocation2 + $0xbd8] ss:$0 sm:$0xff] }
0x49cb   :  { %11627 = vmatprep.subr.bf16.mxu0 %v14598_v32  ;;  %7534 = vrot.lane.b32.xlu0 %v9067_v53, %s12142_s6 }
0x49ce   :  { %11629 = vmatpush3.bf16.msra.mxu0 %v12511_v29 }
0x49cf   :  { %11630 = vmatprep.subr.bf16.mxu0 %v14598_v32 }
0x49d2   :  { %11632 = vmatpush3.bf16.msra.mxu0 %v12517_v57 }
0x49d3   :  { %11633 = vmatprep.subr.bf16.mxu0 %v14598_v32 }
0x49d6   :  { %11635 = vmatpush3.bf16.msra.mxu0 %v12521_v51 }
0x4a3d   :  { %v7535_v9 = vpop.permute.xlu0 %7534 }
0x4a9c   :  { %v7441_v0 = vpop.f32.mrb[66].mxu0 }
0x4a9d   :  { %10575 = vmatmul.mubr.msk.f32.vlgmr.msra.gmra.mrb[68].mxu0 %vm647_vm10, %v7441_v0  ;;  %v10557_v4 = vpop.f32.mrb[67].mxu0 }
0x4a9e   :  { %10604 = vmatprep.mubr.msk.f32.mxu0 %vm434_vm7, %v7718_v43 }
0x4b70   :  { %v7514_v52 = vpop.f32.mrb[68].mxu0 }
0x4b71   :  { %v7518_v49 = vmul.f32 0.03125, %v7514_v52  ;;  %v10576_v14 = vpop.f32.mrb[69].mxu0 }
0x4b73   :  { %v7519_v50 = vmul.f32 %v7518_v49, %v7518_v49 }
0x4b75   :  { %7521 = vrot.lane.b32.xlu1 %v7519_v50, %s12142_s6 }
0x4be7   :  { %v7522_v29 = vpop.permute.xlu1 %7521 }
0x4be8   :  { %v7524_v48 = vsub.f32 %v7518_v49, %v7522_v29 }
0x4bea   :  { %v7525_v57 = vmax.f32 %v7524_v48, 0.0 }
0x4bec   :  { %v7526_v25 = vadd.f32 1e-05, %v7525_v57 }
0x4bee   :  { %12062 = vrsqrt.f32 %v7526_v25 }
0x4bf8   :  { %v12063_v51 = vpop.eup %12062 }
0x4bf9   :  { %v7537_v60 = vmul.f32 %v12063_v51, %v7535_v9 }
0x4bfb   :  { %v7552_v18 = vrot.slane %v7537_v60, %v12211_v37  ;;  %v7558_v1 = vrot.slane %v7537_v60, %v12214_v39  ;;  %7540 = vrot.lane.b32.xlu1 %v7537_v60, %s12147_s7 }
0x4bfd   :  { %v7553_v26 = vmul.f32 %v7552_v18, %v13165_v22  ;;  %v7554_v55 = vmul.f32 %v7552_v18, %v13175_v11  ;;  %v7559_v33 = vmul.f32 %v7558_v1, %v13167_v8  ;;  %v7560_v24 = vmul.f32 %v7558_v1, %v13169_v6 }
0x4bff   :  { %v7562_v15 = vadd.f32 %v7560_v24, %v7554_v55  ;;  %v7561_v36 = vadd.f32 %v7559_v33, %v7553_v26 }
0x4c01   :  { %7567 = vrot.lane.b32.xlu1 %v7562_v15, %s12147_s7  ;;  %7565 = vrot.lane.b32.xlu0 %v7561_v36, %s12147_s7 }
0x4c6d   :  { %v7541_v46 = vpop.permute.xlu1 %7540 }
0x4c6e   :  { %v7543_v30 = vmul.f32 %v7541_v46, %v7518_v49  ;;  %v7824_v46 = vld [vmem:[#allocation2 + $0xbe8] sm:$0xff] }
0x4c70   :  { %v7548_v7 = vsub.f32 %v9068_v10, %v7543_v30  ;;  %v7721_v10 = vld [vmem:[#allocation2 + $0xfb8] sm:$0xff]  ;;  %v7825_v30 = vld [vmem:[#allocation2 + $0xbf0] sm:$0xff] }
0x4c72   :  { %v7576_v42 = vrot.slane %v7548_v7, %v12211_v37  ;;  %v7582_v61 = vrot.slane %v7548_v7, %v12214_v39  ;;  %v7826_v7 = vld [vmem:[#allocation2 + $0xbf8] sm:$0xff] }
0x4c73   :  { %v7568_v17 = vpop.permute.xlu1 %7567  ;;  %v7566_v52 = vpop.permute.xlu0 %7565 }
0x4c74   :  { %v7578_v0 = vmul.f32 %v7576_v42, %v13175_v11  ;;  %v7584_v4 = vmul.f32 %v7582_v61, %v13169_v6  ;;  %v7577_v53 = vmul.f32 %v7576_v42, %v13165_v22  ;;  %v7583_v14 = vmul.f32 %v7582_v61, %v13167_v8  ;;  %v7827_v61 = vld [vmem:[#allocation2 + $0xc00] sm:$0xff] }
0x4c75   :  { %v7572_v29 = vmul.f32 %v7568_v17, %v14212_v27  ;;  %v7571_v49 = vmul.f32 %v7566_v52, %v14214_v47  ;;  %v11660_v42 = vpack.c.bf16 %v7825_v30, %v7824_v46  ;;  %v11664_v17 = vpack.c.bf16 %v7827_v61, %v7826_v7  ;;  %v7830_v52 = vld [vmem:[#allocation2 + $0xc18] sm:$0xff] }
0x4c76   :  { %v7586_v50 = vadd.f32 %v7584_v4, %v7578_v0  ;;  %v7585_v48 = vadd.f32 %v7583_v14, %v7577_v53  ;;  %v7828_v0 = vld [vmem:[#allocation2 + $0xc08] sm:$0xff]  ;;  %v7829_v4 = vld [vmem:[#allocation2 + $0xc10] sm:$0xff]  ;;  %v7831_v14 = vld [vmem:[#allocation2 + $0xc20] sm:$0xff] }
0x4c77   :  { %11661 = vmatprep.subr.bf16.mxu1 %v11660_v42  ;;  %v11668_v53 = vpack.c.bf16 %v7829_v4, %v7828_v0 }
0x4c78   :  { %v7588_v57 = vadd.f32 %v7586_v50, %v7572_v29  ;;  %v7587_v25 = vadd.f32 %v7585_v48, %v7571_v49  ;;  %v11672_v50 = vpack.c.bf16 %v7831_v14, %v7830_v52  ;;  %v7832_v29 = vld [vmem:[#allocation2 + $0xc28] sm:$0xff]  ;;  %v7833_v48 = vld [vmem:[#allocation2 + $0xc30] sm:$0xff] }
0x4c79   :  { %v11676_v49 = vpack.c.bf16 %v7833_v48, %v7832_v29 }
0x4c7a   :  { %v9070_v9 = vmul.f32 -1.442695, %v7588_v57  ;;  %v9069_v51 = vmul.f32 -1.442695, %v7587_v25 }
0x4c7c   :  { %12064 = vpow2.f32 %v9070_v9 }
0x4c7d   :  { %12066 = vpow2.f32 %v9069_v51  ;;  %v9073_v51 = vld [vmem:[#allocation2 + $0xd78] ss:$0 sm:$0xff] }
0x4c86   :  { %v12065_v11 = vpop.eup %12064 }
0x4c87   :  { %v12067_v60 = vpop.eup %12066  ;;  %v7596_v6 = vadd.f32 1.0, %v12065_v11 }
0x4c88   :  { %v7595_v18 = vadd.f32 1.0, %v12067_v60 }
0x4c89   :  { %12068 = vrcp.f32 %v7596_v6 }
0x4c8a   :  { %12070 = vrcp.f32 %v7595_v18 }
0x4c93   :  { %v12069_v22 = vpop.eup %12068 }
0x4c94   :  { %v12071_v8 = vpop.eup %12070  ;;  %v7602_v1 = vmul.f32 %v12069_v22, %v7588_v57  ;;  %v7834_v57 = vld [vmem:[#allocation2 + $0xc38] sm:$0xff] }
0x4c95   :  { %v7601_v26 = vmul.f32 %v12071_v8, %v7587_v25  ;;  %v7835_v25 = vld [vmem:[#allocation2 + $0xc40] sm:$0xff] }
0x4c96   :  { %v7604_v27 = vadd.f32 %v7602_v1, %v14110_v19  ;;  %v11680_v9 = vpack.c.bf16 %v7835_v25, %v7834_v57  ;;  %v9078_v25 = vld [vmem:[#allocation2 + $0xc48] ss:$0 sm:$0xff] }
0x4c97   :  { %v7603_v47 = vadd.f32 %v7601_v26, %v14112_v13 }
0x4c98   :  { %v7606_v55 = vrot.slane %v7604_v27, 1 }
0x4c99   :  { %v7605_v33 = vrot.slane %v7603_v47, 1 }
0x4c9b   :  { %v7608_v24 = vsel %vm223_vm3, %v7606_v55, %v7605_v33  ;;  %v7607_v15 = vsel %vm223_vm3, %v7605_v33, %v7606_v55 }
0x4c9c   :  { %v7610_v36 = vmul.f32 %v7608_v24, %v13070_v56  ;;  %v7609_v31 = vmul.f32 %v7607_v15, %v13072_v63 }
0x4c9e   :  { %7615 = vrot.lane.b32.xlu1 %v7610_v36, %s12142_s6  ;;  %7613 = vrot.lane.b32.xlu0 %v7609_v31, %s12142_s6 }
0x4d10   :  { %v7616_v40 = vpop.permute.xlu1 %7615  ;;  %v7614_v19 = vpop.permute.xlu0 %7613 }
0x4d11   :  { %v7620_v13 = vsel %vm434_vm7, %v7604_v27, %v7616_v40  ;;  %v7619_v62 = vsel %vm434_vm7, %v7603_v47, %v7614_v19 }
0x4d12   :  { %10593 = vmatprep.mubr.msk.f32.mxu1 %vm647_vm10, %v7619_v62 }
0x4d13   :  { %10594 = vmatmul.mubr.msk.f32.vlgmr.msra.gmra.mrb[66].mxu1 %vm647_vm10, %v7620_v13 }
0x4d14   :  { %11663 = vmatpush3.bf16.msra.mxu1 %v11660_v42 }
0x4d15   :  { %11665 = vmatprep.subr.bf16.mxu1 %v11664_v17 }
0x4d18   :  { %11667 = vmatpush3.bf16.msra.mxu1 %v11664_v17 }
0x4d19   :  { %11669 = vmatprep.subr.bf16.mxu1 %v11668_v53 }
0x4d1c   :  { %11671 = vmatpush3.bf16.msra.mxu1 %v11668_v53 }
0x4d1d   :  { %11673 = vmatprep.subr.bf16.mxu1 %v11672_v50 }
0x4d20   :  { %11675 = vmatpush3.bf16.msra.mxu1 %v11672_v50 }
0x4d21   :  { %11677 = vmatprep.subr.bf16.mxu1 %v11676_v49 }
0x4d24   :  { %11679 = vmatpush3.bf16.msra.mxu1 %v11676_v49 }
0x4d25   :  { %11681 = vmatprep.subr.bf16.mxu1 %v11680_v9 }
0x4d28   :  { %11683 = vmatpush3.bf16.msra.mxu1 %v11680_v9 }
0x4d29   :  { %11708 = vmatprep.subr.bf16.mxu1 %v14598_v32 }
0x4de6   :  { %v10595_v56 = vpop.f32.mrb[66].mxu1 }
0x4de7   :  { %v7701_v41 = vpop.f32.mrb[67].mxu1 }
0x4de8   :  { %v11855_v63 = vpack.i.bf16 %v10595_v56, %v7701_v41  ;;  %v11652_v5 = vpack.c.bf16 %v10595_v56, %v7701_v41 }
0x4dea   :  { %11856 = vrot.lane.b32.xlu0 %v11855_v63, %s12147_s7  ;;  %11653 = vmatprep.subr.bf16.mxu0 %v11652_v5 }
0x4deb   :  { %11655 = vmatpush3.bf16.msra.mxu0 %v11652_v5 }
0x4e5c   :  { %v11857_v54 = vpop.permute.xlu0 %11856 }
0x4e5d   :  { %v11859_v38 = vunpack.i.h.bf16 %v11857_v54  ;;  %v11858_v45 = vunpack.i.l.bf16 %v11857_v54 }
0x4e5f   :  { %v11656_v16 = vpack.c.bf16 %v11859_v38, %v11858_v45 }
0x4e61   :  { %11657 = vmatprep.subr.bf16.mxu0 %v11656_v16 }
0x4e62   :  { %11659 = vmatpush3.bf16.msra.mxu0 %v11656_v16 }
0x4e63   :  { %11684 = vmatprep.subr.bf16.mxu0 %v14598_v32 }
0x4e65   :  { %10605 = vmatmul.mubr.msk.f32.vlgmr.msra.gmra.mrb[70].mxu0 %vm434_vm7, %v7719_v35 }
0x4e66   :  { %10607 = vmatprep.mubr.msk.f32.mxu0 %vm434_vm7, %v7720_v23 }
0x4e69   :  { %10608 = vmatmul.mubr.msk.f32.gmra.mrb[72].mxu0 %vm434_vm7, %v7721_v10 }
0x4e6a   :  { %10648 = vmatprep.mubr.msk.f32.mxu0 %vm12144_vm9, %v14599_v44 }
0x4f38   :  { %v10606_v11 = vpop.f32.mrb[70].mxu0 }
0x4f39   :  { %v14280_v60 = vadd.f32 %v10606_v11, %v9073_v51  ;;  %v7805_v6 = vpop.f32.mrb[71].mxu0 }
0x4f3a   :  { %v14282_v18 = vadd.f32 %v9073_v51, %v7805_v6 }
0x4f3b   :  { %v7850_v22 = vrot.slane %v14280_v60, 1  ;;  %7867 = vrot.lane.b32.xlu0 %v14280_v60, %s12142_s6  ;;  %v7838_v41 = vrot.slane %v14280_v60, 7 }
0x4f3c   :  { %v7849_v8 = vrot.slane %v14282_v18, 1  ;;  %v10609_v1 = vpop.f32.mrb[72].mxu0  ;;  %7865 = vrot.lane.b32.xlu1 %v14282_v18, %s12142_s6  ;;  %v7837_v63 = vrot.slane %v14282_v18, 7 }
0x4f3d   :  { %v14290_v26 = vadd.f32 %v10609_v1, %v9073_v51  ;;  %v7815_v27 = vpop.f32.mrb[73].mxu0 }
0x4f3e   :  { %v14292_v47 = vadd.f32 %v9073_v51, %v7815_v27  ;;  %v7855_v33 = vsel %vm223_vm3, %v7849_v8, %v7850_v22  ;;  %v7843_v45 = vsel %vm162_vm2, %v7837_v63, %v7838_v41 }
0x4f3f   :  { %v7852_v55 = vrot.slane %v14290_v26, 1  ;;  %7871 = vrot.lane.b32.xlu0 %v14290_v26, %s12142_s6  ;;  %v7857_v15 = vmul.f32 %v7855_v33, %v12317_v3  ;;  %v7840_v43 = vrot.slane %v14290_v26, 7  ;;  %v7846_v10 = vmul.f32 %v7843_v45, %v12238_v58  ;;  %v8096_v45 = vld [vmem:[#allocation2 + $0xeb0] sm:$0xff] }
0x4f40   :  { %v7851_v24 = vrot.slane %v14292_v47, 1  ;;  %7869 = vrot.lane.b32.xlu1 %v14292_v47, %s12142_s6  ;;  %v7839_v54 = vrot.slane %v14292_v47, 7 }
0x4f41   :  { %v7856_v19 = vsel %vm223_vm3, %v7852_v55, %v7849_v8  ;;  %v7844_v38 = vsel %vm162_vm2, %v7840_v43, %v7837_v63 }
0x4f42   :  { %v7854_v36 = vsel %vm223_vm3, %v7850_v22, %v7851_v24  ;;  %v7853_v40 = vsel %vm223_vm3, %v7851_v24, %v7852_v55  ;;  %v7860_v62 = vmul.f32 %v7856_v19, %v12382_v21  ;;  %v7845_v23 = vmul.f32 %v7844_v38, %v12240_v59 }
0x4f43   :  { %v7858_v31 = vmul.f32 %v7854_v36, %v12315_v2  ;;  %v7859_v13 = vmul.f32 %v7853_v40, %v12346_v20  ;;  %v7842_v46 = vsel %vm162_vm2, %v7838_v41, %v7839_v54  ;;  %v7841_v7 = vsel %vm162_vm2, %v7839_v54, %v7840_v43 }
0x4f44   :  { %7881 = vrot.lane.b32.xlu1 %v7857_v15, %s12148_s10  ;;  %v7847_v4 = vmul.f32 %v7842_v46, %v12258_v12  ;;  %v7848_v52 = vmul.f32 %v7841_v7, %v12286_v28  ;;  %v8099_v46 = vld [vmem:[#allocation2 + $0xec8] sm:$0xff] }
0x4f45   :  { %7883 = vrot.lane.b32.xlu0 %v7858_v31, %s12148_s10 }
0x4f48   :  { %7885 = vrot.lane.b32.xlu1 %v7859_v13, %s12148_s10 }
0x4f49   :  { %7887 = vrot.lane.b32.xlu0 %v7860_v62, %s12148_s10 }
0x4fad   :  { %v7868_v56 = vpop.permute.xlu0 %7867 }
0x4fae   :  { %v7866_v5 = vpop.permute.xlu1 %7865  ;;  %v7894_v61 = vsel %vm434_vm7, %v7846_v10, %v7868_v56  ;;  %v8098_v10 = vld [vmem:[#allocation2 + $0xec0] sm:$0xff] }
0x4faf   :  { %v7893_v30 = vsel %vm434_vm7, %v7845_v23, %v7866_v5  ;;  %v14381_v7 = vpack.c.bf16 %v8099_v46, %v8098_v10  ;;  %v9086_v46 = vld [vmem:[#allocation2 + $0xc58] ss:$0 sm:$0xff] }
0x4fb1   :  { %v7872_v35 = vpop.permute.xlu0 %7871 }
0x4fb2   :  { %v7870_v16 = vpop.permute.xlu1 %7869  ;;  %v7896_v29 = vsel %vm434_vm7, %v7848_v52, %v7872_v35 }
0x4fb3   :  { %v7895_v14 = vsel %vm434_vm7, %v7847_v4, %v7870_v16  ;;  %v8097_v16 = vld [vmem:[#allocation2 + $0xeb8] sm:$0xff] }
0x4fb4   :  { %v14373_v23 = vpack.c.bf16 %v8097_v16, %v8096_v45  ;;  %v8296_v16 = vld [vmem:[#allocation2 + $0xc60] sm:$0xff] }
0x4fb6   :  { %v7882_v42 = vpop.permute.xlu1 %7881 }
0x4fb7   :  { %v7897_v17 = vsel %vm647_vm10, %v7893_v30, %v7882_v42  ;;  %v7884_v0 = vpop.permute.xlu0 %7883  ;;  %v14376_v30 = vld [vmem:[#allocation2 + $0xdc8] sm:$0x3] }
0x4fb8   :  { %v7898_v53 = vsel %vm647_vm10, %v7894_v61, %v7884_v0  ;;  %10634 = vmatprep.mubr.msk.f32.mxu1 %vm990_vm11, %v7897_v17  ;;  %v9085_v17 = vld [vmem:[#allocation2 + $0xc50] ss:$0 sm:$0xff] }
0x4fb9   :  { %10635 = vmatmul.mubr.msk.f32.vlgmr.msra.gmra.mrb[68].mxu1 %vm990_vm11, %v7898_v53 }
0x4fba   :  { %v7886_v50 = vpop.permute.xlu1 %7885 }
0x4fbb   :  { %v7899_v48 = vsel %vm647_vm10, %v7895_v14, %v7886_v50  ;;  %v7888_v49 = vpop.permute.xlu0 %7887 }
0x4fbc   :  { %v7900_v57 = vsel %vm647_vm10, %v7896_v29, %v7888_v49  ;;  %10637 = vmatprep.mubr.msk.f32.mxu1 %vm990_vm11, %v7899_v48 }
0x4fbd   :  { %10638 = vmatmul.mubr.msk.f32.gmra.mrb[70].mxu1 %vm990_vm11, %v7900_v57 }
0x4fbe   :  { %10688 = vmatprep.mubr.msk.f32.mxu1 %vm12144_vm9, %v14599_v44 }
0x508c   :  { %v10636_v9 = vpop.f32.mrb[68].mxu1 }
0x508d   :  { %v14346_v51 = vadd.f32 %v10636_v9, %v9078_v25  ;;  %v7983_v11 = vpop.f32.mrb[69].mxu1 }
0x508e   :  { %v14348_v6 = vadd.f32 %v9078_v25, %v7983_v11 }
0x508f   :  { %v8003_v22 = vmul.f32 %v14346_v51, %v14346_v51 }
0x5090   :  { %v8002_v8 = vmul.f32 %v14348_v6, %v14348_v6  ;;  %v10639_v1 = vpop.f32.mrb[70].mxu1 }
0x5091   :  { %v14354_v27 = vadd.f32 %v10639_v1, %v9078_v25  ;;  %v7993_v55 = vpop.f32.mrb[71].mxu1  ;;  %v14601_v1 = vld [vmem:[#allocation9_spill] sm:$0xff] }
0x5092   :  { %v11860_v33 = vpack.i.bf16 %v8003_v22, %v8002_v8  ;;  %v14356_v24 = vadd.f32 %v9078_v25, %v7993_v55  ;;  %v14600_v22 = vld [vmem:[#allocation7_spill] sm:$0xff] }
0x5093   :  { %v8005_v15 = vmul.f32 %v14354_v27, %v14354_v27 }
0x5094   :  { %v8004_v36 = vmul.f32 %v14356_v24, %v14356_v24  ;;  %11861 = vrot.lane.b32.xlu1 %v11860_v33, %s12141_s0  ;;  %v14602_v33 = vld [vmem:[#allocation5_spill] sm:$0xff] }
0x5096   :  { %v11865_v31 = vpack.i.bf16 %v8005_v15, %v8004_v36  ;;  %v14603_v36 = vld [vmem:[#allocation6_spill] sm:$0xff] }
0x5098   :  { %11866 = vrot.lane.b32.xlu0 %v11865_v31, %s12141_s0 }
0x509c   :  { %8189 = vrot.lane.b32.xlu0 %v9085_v17, %s12141_s0 }
0x5106   :  { %v11862_v40 = vpop.permute.xlu1 %11861 }
0x5107   :  { %v11864_v19 = vunpack.i.h.bf16 %v11862_v40  ;;  %v11863_v13 = vunpack.i.l.bf16 %v11862_v40  ;;  %v14604_v40 = vld [vmem:[#allocation11_spill] sm:$0xff] }
0x5109   :  { %v8023_v62 = vsel %vm429_vm6, %v14346_v51, %v11864_v19  ;;  %v8022_v43 = vsel %vm429_vm6, %v14348_v6, %v11863_v13  ;;  %v14605_v13 = vld [vmem:[#allocation12_spill] sm:$0xff] }
0x510a   :  { %v11685_v56 = vpack.c.bf16 %v8023_v62, %v8022_v43  ;;  %v11867_v41 = vpop.permute.xlu0 %11866 }
0x510b   :  { %v11869_v63 = vunpack.i.h.bf16 %v11867_v41  ;;  %v11868_v5 = vunpack.i.l.bf16 %v11867_v41  ;;  %v14606_v41 = vld [vmem:[#allocation8_spill] sm:$0xff] }
0x510c   :  { %11686 = vmatpush3.bf16.msra.mxu0 %v11685_v56 }
0x510d   :  { %v8025_v54 = vsel %vm429_vm6, %v14354_v27, %v11869_v63  ;;  %v8024_v38 = vsel %vm429_vm6, %v14356_v24, %v11868_v5  ;;  %11687 = vmatprep.subr.bf16.mxu0 %v14598_v32  ;;  %v14607_v5 = vld [vmem:[#allocation10_spill] sm:$0xff] }
0x510e   :  { %v11688_v35 = vpack.c.bf16 %v8025_v54, %v8024_v38  ;;  %v8190_v49 = vpop.permute.xlu0 %8189 }
0x5110   :  { %11689 = vmatpush3.bf16.msra.mxu0 %v11688_v35  ;;  %v8297_v35 = vld [vmem:[#allocation2 + $0xc68] sm:$0xff] }
0x5111   :  { %11690 = vmatprep.subr.bf16.mxu0 %v14598_v32  ;;  %v11696_v10 = vpack.c.bf16 %v8297_v35, %v8296_v16 }
0x5113   :  { %10649 = vmatmul.mubr.msk.f32.vlgmr.msra.gmra.mrb[74].mxu0 %vm434_vm7, %v14376_v30 }
0x5114   :  { %11692 = vmatpush3.bf16.msra.mxu0 %v14373_v23  ;;  %10659 = vmatprep.mubr.msk.f32.mxu0 %vm12144_vm9, %v14599_v44 }
0x5115   :  { %11693 = vmatprep.subr.bf16.mxu0 %v14598_v32 }
0x5118   :  { %11695 = vmatpush3.bf16.msra.mxu0 %v14381_v7 }
0x5119   :  { %11697 = vmatprep.subr.bf16.mxu0 %v11696_v10 }
0x51e6   :  { %v8092_v42 = vpop.f32.mrb[74].mxu0 }
0x51e7   :  { %10660 = vmatmul.mubr.msk.f32.vlgmr.msra.gmra.mrb[76].mxu0 %vm434_vm7, %v8092_v42  ;;  %v10650_v61 = vpop.f32.mrb[75].mxu0 }
0x51e8   :  { %11699 = vmatpush3.bf16.msra.mxu0 %v11696_v10 }
0x52ba   :  { %v8169_v0 = vpop.f32.mrb[76].mxu0 }
0x52bb   :  { %v8173_v4 = vmul.f32 0.03125, %v8169_v0  ;;  %v10661_v53 = vpop.f32.mrb[77].mxu0 }
0x52bd   :  { %v8174_v52 = vmul.f32 %v8173_v4, %v8173_v4 }
0x52bf   :  { %8176 = vrot.lane.b32.xlu1 %v8174_v52, %s12141_s0 }
0x5331   :  { %v8177_v14 = vpop.permute.xlu1 %8176 }
0x5332   :  { %v8179_v50 = vsub.f32 %v8173_v4, %v8177_v14 }
0x5334   :  { %v8180_v29 = vmax.f32 %v8179_v50, 0.0 }
0x5336   :  { %v8181_v48 = vadd.f32 1e-05, %v8180_v29 }
0x5338   :  { %12072 = vrsqrt.f32 %v8181_v48 }
0x5342   :  { %v12073_v57 = vpop.eup %12072 }
0x5343   :  { %v8192_v25 = vmul.f32 %v12073_v57, %v8190_v49 }
0x5345   :  { %v8207_v9 = vrot.slane %v8192_v25, %v12211_v37  ;;  %v8215_v11 = vrot.slane %v8192_v25, %v12214_v39  ;;  %8195 = vrot.lane.b32.xlu1 %v8192_v25, %s12149_s1 }
0x5347   :  { %v8209_v8 = vmul.f32 %v8207_v9, %v14600_v22  ;;  %v8217_v55 = vmul.f32 %v8215_v11, %v14601_v1  ;;  %v8208_v15 = vmul.f32 %v8207_v9, %v14602_v33  ;;  %v8216_v31 = vmul.f32 %v8215_v11, %v14603_v36 }
0x5348   :  { %v8211_v19 = vmul.f32 %v8207_v9, %v14604_v40  ;;  %v8219_v62 = vmul.f32 %v8215_v11, %v14605_v13  ;;  %v8210_v63 = vmul.f32 %v8207_v9, %v14606_v41  ;;  %v8218_v54 = vmul.f32 %v8215_v11, %v14607_v5 }
0x5349   :  { %v8221_v43 = vadd.f32 %v8217_v55, %v8209_v8  ;;  %v8220_v56 = vadd.f32 %v8216_v31, %v8208_v15 }
0x534a   :  { %v8223_v38 = vadd.f32 %v8219_v62, %v8211_v19  ;;  %v8222_v45 = vadd.f32 %v8218_v54, %v8210_v63 }
0x534b   :  { %8230 = vrot.lane.b32.xlu1 %v8221_v43, %s12149_s1  ;;  %8228 = vrot.lane.b32.xlu0 %v8220_v56, %s12149_s1 }
0x534f   :  { %8234 = vrot.lane.b32.xlu1 %v8223_v38, %s12149_s1  ;;  %8232 = vrot.lane.b32.xlu0 %v8222_v45, %s12149_s1 }
0x53b7   :  { %v8196_v42 = vpop.permute.xlu1 %8195 }
0x53b8   :  { %v8198_v61 = vmul.f32 %v8196_v42, %v8173_v4 }
0x53ba   :  { %v8203_v17 = vsub.f32 %v9086_v46, %v8198_v61 }
0x53bc   :  { %v8247_v0 = vrot.slane %v8203_v17, %v12211_v37  ;;  %v8255_v53 = vrot.slane %v8203_v17, %v12214_v39 }
0x53bd   :  { %v8231_v52 = vpop.permute.xlu1 %8230  ;;  %v8229_v14 = vpop.permute.xlu0 %8228 }
0x53be   :  { %v8249_v50 = vmul.f32 %v8247_v0, %v14600_v22  ;;  %v8257_v29 = vmul.f32 %v8255_v53, %v14601_v1  ;;  %v8248_v48 = vmul.f32 %v8247_v0, %v14602_v33  ;;  %v8256_v49 = vmul.f32 %v8255_v53, %v14603_v36 }
0x53bf   :  { %v8251_v57 = vmul.f32 %v8247_v0, %v14604_v40  ;;  %v8259_v25 = vmul.f32 %v8255_v53, %v14605_v13  ;;  %v8241_v9 = vmul.f32 %v8231_v52, %v14346_v51  ;;  %v8250_v11 = vmul.f32 %v8247_v0, %v14606_v41  ;;  %v8298_v52 = vld [vmem:[#allocation2 + $0xc70] sm:$0xff] }
0x53c0   :  { %v8261_v4 = vadd.f32 %v8257_v29, %v8249_v50  ;;  %v8258_v8 = vmul.f32 %v8255_v53, %v14607_v5  ;;  %v8260_v55 = vadd.f32 %v8256_v49, %v8248_v48  ;;  %v8240_v15 = vmul.f32 %v8229_v14, %v14348_v6  ;;  %v8299_v14 = vld [vmem:[#allocation2 + $0xc78] sm:$0xff]  ;;  %v8300_v29 = vld [vmem:[#allocation2 + $0xc80] sm:$0xff]  ;;  %v8301_v48 = vld [vmem:[#allocation2 + $0xc88] sm:$0xff] }
0x53c1   :  { %v8263_v31 = vadd.f32 %v8259_v25, %v8251_v57  ;;  %v8235_v19 = vpop.permute.xlu1 %8234  ;;  %v8233_v62 = vpop.permute.xlu0 %8232  ;;  %v11700_v50 = vpack.c.bf16 %v8299_v14, %v8298_v52  ;;  %v11704_v49 = vpack.c.bf16 %v8301_v48, %v8300_v29 }
0x53c2   :  { %v8265_v43 = vadd.f32 %v8261_v4, %v8241_v9  ;;  %v8243_v56 = vmul.f32 %v8235_v19, %v14354_v27  ;;  %v8262_v63 = vadd.f32 %v8258_v8, %v8250_v11  ;;  %v8242_v54 = vmul.f32 %v8233_v62, %v14356_v24 }
0x53c3   :  { %v8264_v38 = vadd.f32 %v8260_v55, %v8240_v15  ;;  %11701 = vmatprep.subr.bf16.mxu0 %v11700_v50 }
0x53c4   :  { %v9088_v45 = vmul.f32 -1.442695, %v8265_v43  ;;  %v8267_v16 = vadd.f32 %v8263_v31, %v8243_v56  ;;  %v8266_v51 = vadd.f32 %v8262_v63, %v8242_v54  ;;  %11703 = vmatpush3.bf16.msra.mxu0 %v11700_v50 }
0x53c5   :  { %v9087_v35 = vmul.f32 -1.442695, %v8264_v38  ;;  %11705 = vmatprep.subr.bf16.mxu0 %v11704_v49 }
0x53c6   :  { %12074 = vpow2.f32 %v9088_v45  ;;  %v9090_v10 = vmul.f32 -1.442695, %v8267_v16  ;;  %v9089_v46 = vmul.f32 -1.442695, %v8266_v51 }
0x53c7   :  { %12076 = vpow2.f32 %v9087_v35 }
0x53c8   :  { %12078 = vpow2.f32 %v9090_v10  ;;  %11707 = vmatpush3.bf16.msra.mxu0 %v11704_v49 }
0x53c9   :  { %12080 = vpow2.f32 %v9089_v46  ;;  %11714 = vmatprep.subr.bf16.mxu0 %v14598_v32 }
0x53d0   :  { %v12075_v6 = vpop.eup %12074 }
0x53d1   :  { %v12077_v42 = vpop.eup %12076  ;;  %v8281_v61 = vadd.f32 1.0, %v12075_v6 }
0x53d2   :  { %v12079_v17 = vpop.eup %12078  ;;  %v8280_v0 = vadd.f32 1.0, %v12077_v42 }
0x53d3   :  { %v12081_v27 = vpop.eup %12080  ;;  %12082 = vrcp.f32 %v8281_v61  ;;  %v8283_v53 = vadd.f32 1.0, %v12079_v17 }
0x53d4   :  { %12084 = vrcp.f32 %v8280_v0  ;;  %v8282_v24 = vadd.f32 1.0, %v12081_v27 }
0x53d5   :  { %12086 = vrcp.f32 %v8283_v53 }
0x53d6   :  { %12088 = vrcp.f32 %v8282_v24 }
0x53dd   :  { %v12083_v57 = vpop.eup %12082 }
0x53de   :  { %v12085_v25 = vpop.eup %12084  ;;  %v8293_v4 = vmul.f32 %v12083_v57, %v8265_v43 }
0x53df   :  { %v12087_v9 = vpop.eup %12086  ;;  %v8292_v11 = vmul.f32 %v12085_v25, %v8264_v38 }
0x53e0   :  { %v12089_v8 = vpop.eup %12088  ;;  %v8304_v55 = vrot.slane %v8293_v4, 7  ;;  %v8316_v15 = vrot.slane %v8293_v4, 1  ;;  %v8295_v31 = vmul.f32 %v12087_v9, %v8267_v16  ;;  %8333 = vrot.lane.b32.xlu1 %v8293_v4, %s12141_s0 }
0x53e1   :  { %v8303_v19 = vrot.slane %v8292_v11, 7  ;;  %v8315_v62 = vrot.slane %v8292_v11, 1  ;;  %v8294_v56 = vmul.f32 %v12089_v8, %v8266_v51  ;;  %8331 = vrot.lane.b32.xlu0 %v8292_v11, %s12141_s0 }
0x53e2   :  { %v8306_v63 = vrot.slane %v8295_v31, 7  ;;  %v8318_v54 = vrot.slane %v8295_v31, 1 }
0x53e3   :  { %v8305_v45 = vrot.slane %v8294_v56, 7  ;;  %v8317_v35 = vrot.slane %v8294_v56, 1  ;;  %v8309_v43 = vsel %vm162_vm2, %v8303_v19, %v8304_v55  ;;  %v8321_v38 = vsel %vm223_vm3, %v8315_v62, %v8316_v15 }
0x53e4   :  { %8337 = vrot.lane.b32.xlu1 %v8295_v31, %s12141_s0  ;;  %v8310_v16 = vsel %vm162_vm2, %v8306_v63, %v8303_v19  ;;  %v8323_v42 = vmul.f32 %v8321_v38, %v12317_v3  ;;  %v8322_v61 = vsel %vm223_vm3, %v8318_v54, %v8315_v62  ;;  %v8312_v52 = vmul.f32 %v8309_v43, %v12238_v58 }
0x53e5   :  { %8335 = vrot.lane.b32.xlu0 %v8294_v56, %s12141_s0  ;;  %v8320_v51 = vsel %vm223_vm3, %v8316_v15, %v8317_v35  ;;  %v8307_v46 = vsel %vm162_vm2, %v8305_v45, %v8306_v63  ;;  %v8308_v6 = vsel %vm162_vm2, %v8304_v55, %v8305_v45  ;;  %v8319_v17 = vsel %vm223_vm3, %v8317_v35, %v8318_v54 }
0x53e6   :  { %v8324_v10 = vmul.f32 %v8320_v51, %v12315_v2  ;;  %v8326_v2 = vmul.f32 %v8322_v61, %v12382_v21  ;;  %v8325_v0 = vmul.f32 %v8319_v17, %v12346_v20  ;;  %v8311_v14 = vmul.f32 %v8310_v16, %v12240_v59 }
0x53e7   :  { %v8314_v48 = vmul.f32 %v8307_v46, %v12286_v28  ;;  %v8313_v57 = vmul.f32 %v8308_v6, %v12258_v12  ;;  %v9091_v12 = vld [vmem:[#allocation2 + $0xc90] ss:$0 sm:$0xff]  ;;  %v8758_v6 = vld [vmem:[#allocation2 + $0xca8] sm:$0xff] }
0x53e8   :  { %8349 = vrot.lane.b32.xlu1 %v8324_v10, %s12142_s6 }
0x53e9   :  { %8347 = vrot.lane.b32.xlu0 %v8323_v42, %s12142_s6  ;;  %v8759_v42 = vld [vmem:[#allocation2 + $0xcb0] sm:$0xff] }
0x53ec   :  { %8353 = vrot.lane.b32.xlu1 %v8326_v2, %s12142_s6 }
0x53ed   :  { %8351 = vrot.lane.b32.xlu0 %v8325_v0, %s12142_s6 }
0x5452   :  { %v8334_v27 = vpop.permute.xlu1 %8333 }
0x5453   :  { %v8332_v3 = vpop.permute.xlu0 %8331  ;;  %v8360_v34 = vsel %vm429_vm6, %v8312_v52, %v8334_v27  ;;  %v11720_v27 = vpack.c.bf16 %v8759_v42, %v8758_v6 }
0x5454   :  { %v8359_v29 = vsel %vm429_vm6, %v8311_v14, %v8332_v3 }
0x5456   :  { %v8338_v53 = vpop.permute.xlu1 %8337 }
0x5457   :  { %v8336_v24 = vpop.permute.xlu0 %8335  ;;  %v8362_v58 = vsel %vm429_vm6, %v8314_v48, %v8338_v53  ;;  %v8760_v53 = vld [vmem:[#allocation2 + $0xcb8] sm:$0xff] }
0x5458   :  { %v8361_v25 = vsel %vm429_vm6, %v8313_v57, %v8336_v24  ;;  %v8761_v24 = vld [vmem:[#allocation2 + $0xcc0] sm:$0xff] }
0x5459   :  { %v11724_v52 = vpack.c.bf16 %v8761_v24, %v8760_v53 }
0x545a   :  { %v8350_v50 = vpop.permute.xlu1 %8349 }
0x545b   :  { %v8364_v21 = vsel %vm434_vm7, %v8360_v34, %v8350_v50  ;;  %v8348_v20 = vpop.permute.xlu0 %8347 }
0x545c   :  { %v8363_v49 = vsel %vm434_vm7, %v8359_v29, %v8348_v20  ;;  %v9098_v29 = vld [vmem:[#allocation2 + $0xc98] ss:$0 sm:$0xff] }
0x545d   :  { %10674 = vmatprep.mubr.msk.f32.mxu0 %vm443_vm8, %v8363_v49 }
0x545e   :  { %10675 = vmatmul.mubr.msk.f32.vlgmr.msra.gmra.mrb[78].mxu0 %vm443_vm8, %v8364_v21  ;;  %v8354_v59 = vpop.permute.xlu1 %8353 }
0x545f   :  { %v8366_v4 = vsel %vm434_vm7, %v8362_v58, %v8354_v59  ;;  %v8352_v9 = vpop.permute.xlu0 %8351  ;;  %11716 = vmatpush3.bf16.msra.mxu0 %v14373_v23 }
0x5460   :  { %v8365_v28 = vsel %vm434_vm7, %v8361_v25, %v8352_v9  ;;  %11717 = vmatprep.subr.bf16.mxu0 %v14598_v32 }
0x5461   :  { %10677 = vmatprep.mubr.msk.f32.mxu0 %vm443_vm8, %v8365_v28 }
0x5462   :  { %10678 = vmatmul.mubr.msk.f32.gmra.mrb[80].mxu0 %vm443_vm8, %v8366_v4 }
0x5463   :  { %11719 = vmatpush3.bf16.msra.mxu0 %v14381_v7  ;;  %10699 = vmatprep.mubr.msk.f32.mxu0 %vm12144_vm9, %v14599_v44 }
0x5531   :  { %v10676_v11 = vpop.f32.mrb[78].mxu0 }
0x5532   :  { %v14469_v8 = vadd.f32 %v10676_v11, %v9091_v12  ;;  %v8449_v55 = vpop.f32.mrb[79].mxu0 }
0x5533   :  { %v14471_v15 = vadd.f32 %v9091_v12, %v8449_v55 }
0x5534   :  { %v8469_v23 = vmul.f32 %v14469_v8, %v14469_v8 }
0x5535   :  { %v8468_v31 = vmul.f32 %v14471_v15, %v14471_v15  ;;  %v10679_v19 = vpop.f32.mrb[80].mxu0 }
0x5536   :  { %v14477_v62 = vadd.f32 %v10679_v19, %v9091_v12  ;;  %v8459_v7 = vpop.f32.mrb[81].mxu0 }
0x5537   :  { %v11870_v56 = vpack.i.bf16 %v8469_v23, %v8468_v31  ;;  %v14479_v63 = vadd.f32 %v9091_v12, %v8459_v7 }
0x5538   :  { %v8471_v44 = vmul.f32 %v14477_v62, %v14477_v62 }
0x5539   :  { %v8470_v54 = vmul.f32 %v14479_v63, %v14479_v63  ;;  %11871 = vrot.lane.b32.xlu0 %v11870_v56, %s12141_s0 }
0x553b   :  { %v11875_v45 = vpack.i.bf16 %v8471_v44, %v8470_v54 }
0x553d   :  { %11876 = vrot.lane.b32.xlu1 %v11875_v45, %s12141_s0 }
0x5541   :  { %8651 = vrot.lane.b32.xlu1 %v9098_v29, %s12141_s0 }
0x55ab   :  { %v11872_v35 = vpop.permute.xlu0 %11871 }
0x55ac   :  { %v11874_v43 = vunpack.i.h.bf16 %v11872_v35  ;;  %v11873_v38 = vunpack.i.l.bf16 %v11872_v35  ;;  %v9099_v35 = vld [vmem:[#allocation2 + $0xca0] ss:$0 sm:$0xff] }
0x55ae   :  { %v8489_v16 = vsel %vm429_vm6, %v14469_v8, %v11874_v43  ;;  %v8488_v51 = vsel %vm429_vm6, %v14471_v15, %v11873_v38 }
0x55af   :  { %v11709_v10 = vpack.c.bf16 %v8489_v16, %v8488_v51  ;;  %v11877_v46 = vpop.permute.xlu1 %11876 }
0x55b0   :  { %v11879_v61 = vunpack.i.h.bf16 %v11877_v46  ;;  %v11878_v17 = vunpack.i.l.bf16 %v11877_v46 }
0x55b1   :  { %11710 = vmatpush3.bf16.msra.mxu1 %v11709_v10 }
0x55b2   :  { %v8491_v2 = vsel %vm429_vm6, %v14477_v62, %v11879_v61  ;;  %v8490_v0 = vsel %vm429_vm6, %v14479_v63, %v11878_v17  ;;  %11711 = vmatprep.subr.bf16.mxu1 %v14598_v32 }
0x55b3   :  { %v11712_v3 = vpack.c.bf16 %v8491_v2, %v8490_v0  ;;  %v8652_v58 = vpop.permute.xlu1 %8651 }
0x55b5   :  { %11713 = vmatpush3.bf16.msra.mxu1 %v11712_v3 }
0x55b6   :  { %11721 = vmatprep.subr.bf16.mxu1 %v11720_v27 }
0x55b8   :  { %10689 = vmatmul.mubr.msk.f32.vlgmr.msra.gmra.mrb[72].mxu1 %vm434_vm7, %v14376_v30 }
0x55b9   :  { %11723 = vmatpush3.bf16.msra.mxu1 %v11720_v27  ;;  %10710 = vmatprep.mubr.msk.f32.mxu1 %vm434_vm7, %v14282_v18 }
0x55ba   :  { %11725 = vmatprep.subr.bf16.mxu1 %v11724_v52 }
0x55bd   :  { %11727 = vmatpush3.bf16.msra.mxu1 %v11724_v52 }
0x55c0   :  { %10711 = vmatmul.mubr.msk.f32.vlgmr.msra.gmra.mrb[74].mxu1 %vm434_vm7, %v14280_v60 }
0x55c1   :  { %10713 = vmatprep.mubr.msk.f32.mxu1 %vm434_vm7, %v14292_v47 }
0x55c4   :  { %10714 = vmatmul.mubr.msk.f32.gmra.mrb[76].mxu1 %vm434_vm7, %v14290_v26 }
0x568b   :  { %v8558_v32 = vpop.f32.mrb[72].mxu1 }
0x568c   :  { %10700 = vmatmul.mubr.msk.f32.vlgmr.msra.gmra.mrb[82].mxu0 %vm434_vm7, %v8558_v32  ;;  %v10690_v14 = vpop.f32.mrb[73].mxu1 }
0x5693   :  { %v14507_v30 = vpop.f32.mrb[74].mxu1 }
0x5694   :  { %v14509_v34 = vpop.f32.mrb[75].mxu1 }
0x5697   :  { %v14511_v18 = vpop.f32.mrb[76].mxu1 }
0x5698   :  { %v14513_v50 = vpop.f32.mrb[77].mxu1 }
0x575f   :  { %v8631_v60 = vpop.f32.mrb[82].mxu0 }
0x5760   :  { %v8635_v47 = vmul.f32 0.03125, %v8631_v60  ;;  %v10701_v21 = vpop.f32.mrb[83].mxu0 }
0x5762   :  { %v8636_v20 = vmul.f32 %v8635_v47, %v8635_v47 }
0x5764   :  { %8638 = vrot.lane.b32.xlu0 %v8636_v20, %s12141_s0 }
0x57d6   :  { %v8639_v26 = vpop.permute.xlu0 %8638 }
0x57d7   :  { %v8641_v48 = vsub.f32 %v8635_v47, %v8639_v26 }
0x57d9   :  { %v8642_v49 = vmax.f32 %v8641_v48, 0.0 }
0x57db   :  { %v8643_v57 = vadd.f32 1e-05, %v8642_v49 }
0x57dd   :  { %12090 = vrsqrt.f32 %v8643_v57  ;;  %v9104_v57 = vld [vmem:[#allocation2 + $0xcc8] ss:$0 sm:$0xff] }
0x57e7   :  { %v12091_v59 = vpop.eup %12090 }
0x57e8   :  { %v8654_v25 = vmul.f32 %v12091_v59, %v8652_v58 }
0x57ea   :  { %v8669_v4 = vrot.slane %v8654_v25, %v12211_v37  ;;  %v8677_v9 = vrot.slane %v8654_v25, %v12214_v39  ;;  %8657 = vrot.lane.b32.xlu0 %v8654_v25, %s12149_s1  ;;  %v8847_v25 = vadd.f32 %v14507_v30, %v9104_v57 }
0x57ec   :  { %v8671_v28 = vmul.f32 %v8669_v4, %v14600_v22  ;;  %v8679_v12 = vmul.f32 %v8677_v9, %v14601_v1  ;;  %v8670_v11 = vmul.f32 %v8669_v4, %v14602_v33  ;;  %v8678_v55 = vmul.f32 %v8677_v9, %v14603_v36 }
0x57ed   :  { %v8673_v23 = vmul.f32 %v8669_v4, %v14604_v40  ;;  %v8681_v31 = vmul.f32 %v8677_v9, %v14605_v13  ;;  %v8672_v56 = vmul.f32 %v8669_v4, %v14606_v41  ;;  %v8680_v44 = vmul.f32 %v8677_v9, %v14607_v5 }
0x57ee   :  { %v8683_v19 = vadd.f32 %v8679_v12, %v8671_v28  ;;  %v8682_v7 = vadd.f32 %v8678_v55, %v8670_v11  ;;  %v8842_v28 = vadd.f32 %v9104_v57, %v14509_v34  ;;  %v9109_v11 = vld [vmem:[#allocation2 + $0xd80] ss:$0 sm:$0xff] }
0x57ef   :  { %v8685_v54 = vadd.f32 %v8681_v31, %v8673_v23  ;;  %v8684_v45 = vadd.f32 %v8680_v44, %v8672_v56  ;;  %v8857_v23 = vadd.f32 %v14511_v18, %v9104_v57 }
0x57f0   :  { %8692 = vrot.lane.b32.xlu0 %v8683_v19, %s12149_s1  ;;  %8690 = vrot.lane.b32.xlu1 %v8682_v7, %s12149_s1  ;;  %v8852_v7 = vadd.f32 %v9104_v57, %v14513_v50  ;;  %v9110_v50 = vld [vmem:[#allocation2 + $0xd88] ss:$0 sm:$0xff] }
0x57f4   :  { %8696 = vrot.lane.b32.xlu0 %v8685_v54, %s12149_s1  ;;  %8694 = vrot.lane.b32.xlu1 %v8684_v45, %s12149_s1 }
0x585c   :  { %v8658_v43 = vpop.permute.xlu0 %8657 }
0x585d   :  { %v8660_v38 = vmul.f32 %v8658_v43, %v8635_v47 }
0x585f   :  { %v8665_v16 = vsub.f32 %v9099_v35, %v8660_v38 }
0x5861   :  { %v8709_v51 = vrot.slane %v8665_v16, %v12211_v37  ;;  %v8717_v10 = vrot.slane %v8665_v16, %v12214_v39 }
0x5862   :  { %v8693_v46 = vpop.permute.xlu0 %8692  ;;  %v8691_v6 = vpop.permute.xlu1 %8690 }
0x5863   :  { %v8711_v42 = vmul.f32 %v8709_v51, %v14600_v22  ;;  %v8719_v61 = vmul.f32 %v8717_v10, %v14601_v1  ;;  %v8710_v17 = vmul.f32 %v8709_v51, %v14602_v33  ;;  %v8718_v2 = vmul.f32 %v8717_v10, %v14603_v36 }
0x5864   :  { %v8713_v0 = vmul.f32 %v8709_v51, %v14604_v40  ;;  %v8721_v27 = vmul.f32 %v8717_v10, %v14605_v13  ;;  %v8703_v53 = vmul.f32 %v8693_v46, %v14469_v8  ;;  %v8712_v37 = vmul.f32 %v8709_v51, %v14606_v41 }
0x5865   :  { %v8723_v3 = vadd.f32 %v8719_v61, %v8711_v42  ;;  %v8720_v39 = vmul.f32 %v8717_v10, %v14607_v5  ;;  %v8722_v24 = vadd.f32 %v8718_v2, %v8710_v17  ;;  %v8702_v22 = vmul.f32 %v8691_v6, %v14471_v15 }
0x5866   :  { %v8725_v52 = vadd.f32 %v8721_v27, %v8713_v0  ;;  %v8697_v1 = vpop.permute.xlu0 %8696  ;;  %v8695_v32 = vpop.permute.xlu1 %8694 }
0x5867   :  { %v8727_v33 = vadd.f32 %v8723_v3, %v8703_v53  ;;  %v8705_v36 = vmul.f32 %v8697_v1, %v14477_v62  ;;  %v8724_v14 = vadd.f32 %v8720_v39, %v8712_v37  ;;  %v8704_v40 = vmul.f32 %v8695_v32, %v14479_v63 }
0x5868   :  { %v8726_v13 = vadd.f32 %v8722_v24, %v8702_v22 }
0x5869   :  { %v9101_v29 = vmul.f32 -1.442695, %v8727_v33  ;;  %v8729_v60 = vadd.f32 %v8725_v52, %v8705_v36  ;;  %v8728_v8 = vadd.f32 %v8724_v14, %v8704_v40 }
0x586a   :  { %v9100_v47 = vmul.f32 -1.442695, %v8726_v13 }
0x586b   :  { %12092 = vpow2.f32 %v9101_v29  ;;  %v9103_v41 = vmul.f32 -1.442695, %v8729_v60  ;;  %v9102_v5 = vmul.f32 -1.442695, %v8728_v8 }
0x586c   :  { %12094 = vpow2.f32 %v9100_v47 }
0x586d   :  { %12096 = vpow2.f32 %v9103_v41 }
0x586e   :  { %12098 = vpow2.f32 %v9102_v5 }
0x5875   :  { %v12093_v15 = vpop.eup %12092 }
0x5876   :  { %v12095_v21 = vpop.eup %12094  ;;  %v8743_v20 = vadd.f32 1.0, %v12093_v15 }
0x5877   :  { %v12097_v26 = vpop.eup %12096  ;;  %v8742_v48 = vadd.f32 1.0, %v12095_v21 }
0x5878   :  { %v12099_v62 = vpop.eup %12098  ;;  %12100 = vrcp.f32 %v8743_v20  ;;  %v8745_v49 = vadd.f32 1.0, %v12097_v26 }
0x5879   :  { %12102 = vrcp.f32 %v8742_v48  ;;  %v8744_v63 = vadd.f32 1.0, %v12099_v62 }
0x587a   :  { %12104 = vrcp.f32 %v8745_v49 }
0x587b   :  { %12106 = vrcp.f32 %v8744_v63 }
0x5882   :  { %v12101_v58 = vpop.eup %12100 }
0x5883   :  { %v12103_v59 = vpop.eup %12102  ;;  %v8755_v4 = vmul.f32 %v12101_v58, %v8727_v33 }
0x5884   :  { %v12105_v9 = vpop.eup %12104  ;;  %v8754_v12 = vmul.f32 %v12103_v59, %v8726_v13 }
0x5885   :  { %v12107_v55 = vpop.eup %12106  ;;  %v8757_v31 = vmul.f32 %v12105_v9, %v8729_v60  ;;  %v8861_v19 = vadd.f32 %v8847_v25, %v8755_v4 }
0x5886   :  { %v8756_v56 = vmul.f32 %v12107_v55, %v8728_v8  ;;  %v8860_v44 = vadd.f32 %v8842_v28, %v8754_v12 }
0x5887   :  { %v8871_v54 = vmul.f32 %v9109_v11, %v8861_v19  ;;  %v8863_v45 = vadd.f32 %v8857_v23, %v8757_v31 }
0x5888   :  { %v8870_v35 = vmul.f32 %v9109_v11, %v8860_v44  ;;  %v8862_v43 = vadd.f32 %v8852_v7, %v8756_v56 }
0x5889   :  { %v8877_v30 = vsel %vm429_vm6, %v8871_v54, 0.0  ;;  %v8873_v16 = vmul.f32 %v9109_v11, %v8863_v45 }
0x588a   :  { %8878 = vadd.xlane.f32.xlu0 %v8877_v30  ;;  %v8874_v34 = vsel %vm429_vm6, %v8870_v35, 0.0  ;;  %v8872_v38 = vmul.f32 %v9109_v11, %v8862_v43 }
0x588b   :  { %8875 = vadd.xlane.f32.xlu1 %v8874_v34  ;;  %v8883_v51 = vsel %vm429_vm6, %v8873_v16, 0.0 }
0x588c   :  { %v8880_v18 = vsel %vm429_vm6, %v8872_v38, 0.0 }
0x588e   :  { %8881 = vadd.xlane.f32.xlu0 %v8880_v18 }
0x588f   :  { %8884 = vadd.xlane.f32.xlu1 %v8883_v51 }
0x5917   :  { %v8879_v10 = vpop.xlane.xlu0 %8878 }
0x5918   :  { %v8891_v46 = vadd.f32 %v9110_v50, %v8879_v10  ;;  %v8876_v6 = vpop.xlane.xlu1 %8875 }
0x5919   :  { %v8890_v42 = vadd.f32 %v9110_v50, %v8876_v6 }
0x591a   :  { %8896 = vst.msk [vmem:[%s14569_s3 + $0x8] sm:$0xff] %vm8894_vm12, %v8891_v46 }
0x591b   :  { %8895 = vst.msk [vmem:[%s14569_s3] sm:$0xff] %vm8894_vm12, %v8890_v42  ;;  %v8882_v61 = vpop.xlane.xlu0 %8881 }
0x591c   :  { %v8892_v17 = vadd.f32 %v9110_v50, %v8882_v61  ;;  %v8885_v2 = vpop.xlane.xlu1 %8884 }
0x591d   :  { %v8893_v0 = vadd.f32 %v9110_v50, %v8885_v2 }
0x591e   :  { %8897 = vst.msk [vmem:[%s14569_s3 + $0x10] sm:$0xff] %vm8894_vm12, %v8892_v17 }
0x591f   :  { %8898 = vst.msk [vmem:[%s14569_s3 + $0x18] sm:$0xff] %vm8894_vm12, %v8893_v0 }
0x5920   :  { %8903 = vsyncpa [#allocation3], 1 }

</bundles_post_ra>
